<compile_context>
chip_gen: v7x
topology: tpu7x:2x2x1
jax: 0.10.0
libtpu: 0.0.40
codegen_flags: <defaults>
</compile_context>

<pallas_src>
import jax
import jax.numpy as jnp
from jax.experimental import pallas as pl
from jax.experimental.pallas import tpu as pltpu

CH = 32          # channel count fixed by the module
K = 3            # conv kernel size
G = 4            # images packed onto the lane axis
GC = G * CH      # packed channel width = 128 lanes
COL0 = 8         # sublane-aligned column where the image interior starts


def resblock_kernel(x_ref, w1_ref, b1_ref, w2_ref, b2_ref, out_ref,
                    xpad_ref, mid_ref, patch_ref):
    # x_ref / out_ref : (B, H, W, GC) f32     batch-packed NHWC tile
    # w1_ref / w2_ref : (9*GC, GC)    bf16    tap-folded block-diagonal weights
    # b1_ref / b2_ref : (1, GC)       f32     group-tiled biases
    # xpad_ref/mid_ref: (B, H+2, WPAD, GC) bf16   padded input / padded relu
    # patch_ref       : (B*H*W, 9*GC) bf16   persistent im2col patch (reused)
    B, H, W, _ = out_ref.shape
    M = B * H * W

    # ---- zero only the halo slabs of the padded scratches ----------------
    # (interior rows/cols are fully rewritten below; done every step so the
    #  kernel stays correct no matter how the parallel axis is split across
    #  TensorCores, since scratch is per-core)
    zrow = jnp.zeros((B, 1, xpad_ref.shape[2], GC), jnp.bfloat16)
    zcol = jnp.zeros((B, H + 2, 1, GC), jnp.bfloat16)
    for ref in (xpad_ref, mid_ref):
        ref[:, 0:1, :, :] = zrow                        # top halo row
        ref[:, H + 1:H + 2, :, :] = zrow                # bottom halo row
        ref[:, :, COL0 - 1:COL0, :] = zcol              # left halo column
        ref[:, :, COL0 + W:COL0 + W + 1, :] = zcol      # right halo column

    def fill_patch(src_ref):
        # One lane-aligned slab store per tap into the persistent patch buffer.
        for ky in range(K):
            for kx in range(K):
                t = ky * K + kx
                c0 = COL0 - 1 + kx
                win = src_ref[:, ky:ky + H, c0:c0 + W, :]
                patch_ref[:, t * GC:(t + 1) * GC] = win.reshape(M, GC)

    # ---- conv1 + bias + relu ---------------------------------------------
    x = x_ref[...]                                                  # f32
    xpad_ref[:, 1:1 + H, COL0:COL0 + W, :] = x.astype(jnp.bfloat16)
    fill_patch(xpad_ref)
    h1 = jnp.dot(patch_ref[...], w1_ref[...],
                 preferred_element_type=jnp.float32)                # (M, GC)
    h1 = jnp.maximum(h1 + b1_ref[...], 0.0)

    # ---- conv2 + bias -----------------------------------------------------
    mid_ref[:, 1:1 + H, COL0:COL0 + W, :] = (
        h1.reshape(B, H, W, GC).astype(jnp.bfloat16))
    fill_patch(mid_ref)
    h2 = jnp.dot(patch_ref[...], w2_ref[...],
                 preferred_element_type=jnp.float32)                # (M, GC)
    h2 = h2 + b2_ref[...]

    # ---- residual add (exact f32 identity path) ---------------------------
    out_ref[...] = (h2.reshape(B, H, W, GC) + x).astype(out_ref.dtype)


def resblock(x_nchw, w1, b1, w2, b2):
    """Resblock forward. x_nchw: (N, 32, H, W); w*: (32, 32, 3, 3); b*: (32,)."""
    N, C, H, W = x_nchw.shape
    assert C == CH

    # ---- pack G=4 images onto the lane axis: (NG, H, W, 128) --------------
    n_extra = (-N) % G
    xb = x_nchw
    if n_extra:
        xb = jnp.pad(xb, ((0, n_extra), (0, 0), (0, 0), (0, 0)))
    NG = (N + n_extra) // G
    x_pk = jnp.transpose(xb, (0, 2, 3, 1))                     # (N', H, W, C)
    x_pk = x_pk.reshape(NG, G, H, W, C)
    x_pk = jnp.transpose(x_pk, (0, 2, 3, 1, 4)).reshape(NG, H, W, GC)

    # ---- images per grid step: amortize per-step overhead for small H/W,
    #      but keep >= 2 grid iterations when possible (v7x megacore balance).
    Bimg = max(1, min(8, 1024 // (H * W)))
    if NG >= 2:
        Bimg = min(Bimg, max(1, NG // 2))
    Bimg = min(Bimg, NG)
    g_extra = (-NG) % Bimg
    NG2 = NG + g_extra
    if g_extra:
        x_pk = jnp.pad(x_pk, ((0, g_extra), (0, 0), (0, 0), (0, 0)))

    # ---- fold 9 taps into the contraction dim; block-diagonal over groups --
    def prep_w(w):
        # (Cout, Cin, ky, kx) -> (tap, Cin, Cout)
        wt = jnp.transpose(w, (2, 3, 1, 0)).reshape(K * K, C, C)
        eye = jnp.eye(G, dtype=w.dtype)
        wb = jnp.einsum('tij,gh->tgihj', wt, eye)              # (tap,G,Ci,G,Co)
        return wb.reshape(K * K * GC, GC).astype(jnp.bfloat16)  # (1152, 128)

    w1r, w2r = prep_w(w1), prep_w(w2)
    b1r = jnp.tile(b1, G).reshape(1, GC).astype(jnp.float32)
    b2r = jnp.tile(b2, G).reshape(1, GC).astype(jnp.float32)

    # ---- scratch / VMEM budget ---------------------------------------------
    WPAD = W + 2 * COL0            # interior at cols [8, 8+W); halos at 7, W+8
    blk_io = Bimg * H * W * GC * 4                      # one f32 in/out block
    w_bytes = K * K * GC * GC * 2
    scratch_bytes = (2 * Bimg * (H + 2) * WPAD * GC * 2
                     + Bimg * H * W * K * K * GC * 2)
    est = 2 * 2 * blk_io + 2 * 2 * w_bytes + scratch_bytes + (2 << 20)
    vmem_limit = int(min(64 * 2**20, max(32 * 2**20, est)))

    out_pk = pl.pallas_call(
        resblock_kernel,
        out_shape=jax.ShapeDtypeStruct((NG2, H, W, GC), x_nchw.dtype),
        grid_spec=pltpu.PrefetchScalarGridSpec(
            num_scalar_prefetch=0,
            grid=(NG2 // Bimg,),
            in_specs=[
                pl.BlockSpec((Bimg, H, W, GC), lambda n: (n, 0, 0, 0)),
                pl.BlockSpec((K * K * GC, GC), lambda n: (0, 0)),
                pl.BlockSpec((1, GC), lambda n: (0, 0)),
                pl.BlockSpec((K * K * GC, GC), lambda n: (0, 0)),
                pl.BlockSpec((1, GC), lambda n: (0, 0)),
            ],
            out_specs=pl.BlockSpec((Bimg, H, W, GC), lambda n: (n, 0, 0, 0)),
            scratch_shapes=[
                pltpu.VMEM((Bimg, H + 2, WPAD, GC), jnp.bfloat16),  # padded x
                pltpu.VMEM((Bimg, H + 2, WPAD, GC), jnp.bfloat16),  # padded relu
                pltpu.VMEM((Bimg * H * W, K * K * GC), jnp.bfloat16),  # im2col
            ],
        ),
        compiler_params=pltpu.CompilerParams(
            dimension_semantics=("parallel",),
            vmem_limit_bytes=vmem_limit),
    )(x_pk, w1r, b1r, w2r, b2r)

    # ---- unpack back to NCHW ----------------------------------------------
    out = out_pk[:NG].reshape(NG, H, W, G, C)
    out = jnp.transpose(out, (0, 3, 1, 2, 4)).reshape(NG * G, H, W, C)
    out = jnp.transpose(out, (0, 3, 1, 2))[:N]
    return out


def _reference(x_nchw, w1, b1, w2, b2):
    """Pure-JAX f32 reference (lax conv) for correctness checking."""
    dn = jax.lax.conv_dimension_numbers(x_nchw.shape, w1.shape,
                                        ("NCHW", "OIHW", "NCHW"))
    c1 = jax.lax.conv_general_dilated(x_nchw, w1, (1, 1), ((1, 1), (1, 1)),
                                      dimension_numbers=dn)
    c1 = jax.nn.relu(c1 + b1[None, :, None, None])
    c2 = jax.lax.conv_general_dilated(c1, w2, (1, 1), ((1, 1), (1, 1)),
                                      dimension_numbers=dn)
    c2 = c2 + b2[None, :, None, None]
    return x_nchw + c2


if __name__ == "__main__":
    key = jax.random.PRNGKey(0)
    kx, kw1, kb1, kw2, kb2 = jax.random.split(key, 5)

    # Small test shapes (channels=32 fixed by the module; batch=6 exercises
    # both the G=4 packing and the ragged-batch padding path: 6 -> 8, NG=2).
    N, C, H, W = 6, CH, 16, 16
    x = jax.random.normal(kx, (N, C, H, W), dtype=jnp.float32)

    fan_in = C * K * K
    scale = 1.0 / jnp.sqrt(fan_in)
    w1 = jax.random.normal(kw1, (C, C, K, K), dtype=jnp.float32) * scale
    b1 = jax.random.normal(kb1, (C,), dtype=jnp.float32) * scale
    w2 = jax.random.normal(kw2, (C, C, K, K), dtype=jnp.float32) * scale
    b2 = jax.random.normal(kb2, (C,), dtype=jnp.float32) * scale

    out = resblock(x, w1, b1, w2, b2)
    out = jax.block_until_ready(out)

    ref = _reference(x, w1, b1, w2, b2)
    assert out.shape == (N, C, H, W)
    # bf16 MXU operands / bf16 inter-conv handoff with f32 accumulation:
    # loosened tolerance vs the pure-f32 reference (documented precision choice).
    assert jnp.allclose(out, ref, atol=5e-2, rtol=5e-2), "mismatch vs reference"

    print("KERNEL_OK")
</pallas_src>

<mosaic_0001>
module attributes {stable_mosaic.version = 11 : i64} {
  func.func @resblock_kernel(%arg0: i32, %arg1: memref<1x16x16x128xf32, #tpu.memory_space<vmem>>, %arg2: memref<1152x128xbf16, #tpu.memory_space<vmem>>, %arg3: memref<1x128xf32, #tpu.memory_space<vmem>>, %arg4: memref<1152x128xbf16, #tpu.memory_space<vmem>>, %arg5: memref<1x128xf32, #tpu.memory_space<vmem>>, %arg6: memref<1x16x16x128xf32, #tpu.memory_space<vmem>>, %arg7: memref<1x18x32x128xbf16, #tpu.memory_space<vmem>>, %arg8: memref<1x18x32x128xbf16, #tpu.memory_space<vmem>>, %arg9: memref<256x1152xbf16, #tpu.memory_space<vmem>>) attributes {dimension_semantics = [#tpu.dimension_semantics<parallel>], iteration_bounds = array<i64: 2>, scalar_prefetch = 0 : i64, scratch_operands = 3 : i64, tpu.core_type = #tpu.core_type<tc>, window_params = [{transform_indices = @transform_0, window_bounds = array<i64: 1, 16, 16, 128>}, {pipeline_mode = #tpu.pipeline_mode<synchronous>, transform_indices = @transform_1, window_bounds = array<i64: 1152, 128>}, {pipeline_mode = #tpu.pipeline_mode<synchronous>, transform_indices = @transform_2, window_bounds = array<i64: 1, 128>}, {pipeline_mode = #tpu.pipeline_mode<synchronous>, transform_indices = @transform_3, window_bounds = array<i64: 1152, 128>}, {pipeline_mode = #tpu.pipeline_mode<synchronous>, transform_indices = @transform_4, window_bounds = array<i64: 1, 128>}, {transform_indices = @transform_5, window_bounds = array<i64: 1, 16, 16, 128>}]} {
    %cst = arith.constant 0.000000e+00 : bf16
    %0 = vector.broadcast %cst : bf16 to vector<1x1x32x128xbf16>
    %cst_0 = arith.constant 0.000000e+00 : bf16
    %1 = vector.broadcast %cst_0 : bf16 to vector<1x18x1x128xbf16>
    %c0 = arith.constant 0 : index
    %c0_1 = arith.constant 0 : index
    %c0_2 = arith.constant 0 : index
    %c0_3 = arith.constant 0 : index
    %2 = vector.load %arg7[%c0, %c0_1, %c0_2, %c0_3] : memref<1x18x32x128xbf16, #tpu.memory_space<vmem>>, vector<1x1x32x128xbf16>
    tpu.vector_store %arg7[%c0, %c0_1, %c0_2, %c0_3], %0 {strides = array<i32>} : memref<1x18x32x128xbf16, #tpu.memory_space<vmem>>, vector<1x1x32x128xbf16>,
    %c0_4 = arith.constant 0 : index
    %c17 = arith.constant 17 : index
    %c0_5 = arith.constant 0 : index
    %c0_6 = arith.constant 0 : index
    %3 = vector.load %arg7[%c0_4, %c17, %c0_5, %c0_6] : memref<1x18x32x128xbf16, #tpu.memory_space<vmem>>, vector<1x1x32x128xbf16>
    tpu.vector_store %arg7[%c0_4, %c17, %c0_5, %c0_6], %0 {strides = array<i32>} : memref<1x18x32x128xbf16, #tpu.memory_space<vmem>>, vector<1x1x32x128xbf16>,
    %c0_7 = arith.constant 0 : index
    %c0_8 = arith.constant 0 : index
    %c7 = arith.constant 7 : index
    %c0_9 = arith.constant 0 : index
    %4 = vector.load %arg7[%c0_7, %c0_8, %c7, %c0_9] : memref<1x18x32x128xbf16, #tpu.memory_space<vmem>>, vector<1x18x1x128xbf16>
    tpu.vector_store %arg7[%c0_7, %c0_8, %c7, %c0_9], %1 {strides = array<i32>} : memref<1x18x32x128xbf16, #tpu.memory_space<vmem>>, vector<1x18x1x128xbf16>,
    %c0_10 = arith.constant 0 : index
    %c0_11 = arith.constant 0 : index
    %c24 = arith.constant 24 : index
    %c0_12 = arith.constant 0 : index
    %5 = vector.load %arg7[%c0_10, %c0_11, %c24, %c0_12] : memref<1x18x32x128xbf16, #tpu.memory_space<vmem>>, vector<1x18x1x128xbf16>
    tpu.vector_store %arg7[%c0_10, %c0_11, %c24, %c0_12], %1 {strides = array<i32>} : memref<1x18x32x128xbf16, #tpu.memory_space<vmem>>, vector<1x18x1x128xbf16>,
    %c0_13 = arith.constant 0 : index
    %c0_14 = arith.constant 0 : index
    %c0_15 = arith.constant 0 : index
    %c0_16 = arith.constant 0 : index
    %6 = vector.load %arg8[%c0_13, %c0_14, %c0_15, %c0_16] : memref<1x18x32x128xbf16, #tpu.memory_space<vmem>>, vector<1x1x32x128xbf16>
    tpu.vector_store %arg8[%c0_13, %c0_14, %c0_15, %c0_16], %0 {strides = array<i32>} : memref<1x18x32x128xbf16, #tpu.memory_space<vmem>>, vector<1x1x32x128xbf16>,
    %c0_17 = arith.constant 0 : index
    %c17_18 = arith.constant 17 : index
    %c0_19 = arith.constant 0 : index
    %c0_20 = arith.constant 0 : index
    %7 = vector.load %arg8[%c0_17, %c17_18, %c0_19, %c0_20] : memref<1x18x32x128xbf16, #tpu.memory_space<vmem>>, vector<1x1x32x128xbf16>
    tpu.vector_store %arg8[%c0_17, %c17_18, %c0_19, %c0_20], %0 {strides = array<i32>} : memref<1x18x32x128xbf16, #tpu.memory_space<vmem>>, vector<1x1x32x128xbf16>,
    %c0_21 = arith.constant 0 : index
    %c0_22 = arith.constant 0 : index
    %c7_23 = arith.constant 7 : index
    %c0_24 = arith.constant 0 : index
    %8 = vector.load %arg8[%c0_21, %c0_22, %c7_23, %c0_24] : memref<1x18x32x128xbf16, #tpu.memory_space<vmem>>, vector<1x18x1x128xbf16>
    tpu.vector_store %arg8[%c0_21, %c0_22, %c7_23, %c0_24], %1 {strides = array<i32>} : memref<1x18x32x128xbf16, #tpu.memory_space<vmem>>, vector<1x18x1x128xbf16>,
    %c0_25 = arith.constant 0 : index
    %c0_26 = arith.constant 0 : index
    %c24_27 = arith.constant 24 : index
    %c0_28 = arith.constant 0 : index
    %9 = vector.load %arg8[%c0_25, %c0_26, %c24_27, %c0_28] : memref<1x18x32x128xbf16, #tpu.memory_space<vmem>>, vector<1x18x1x128xbf16>
    tpu.vector_store %arg8[%c0_25, %c0_26, %c24_27, %c0_28], %1 {strides = array<i32>} : memref<1x18x32x128xbf16, #tpu.memory_space<vmem>>, vector<1x18x1x128xbf16>,
    %c0_29 = arith.constant 0 : index
    %c0_30 = arith.constant 0 : index
    %c0_31 = arith.constant 0 : index
    %c0_32 = arith.constant 0 : index
    %10 = vector.load %arg1[%c0_29, %c0_30, %c0_31, %c0_32] : memref<1x16x16x128xf32, #tpu.memory_space<vmem>>, vector<1x16x16x128xf32>
    %11 = arith.truncf %10 : vector<1x16x16x128xf32> to vector<1x16x16x128xbf16>
    %c0_33 = arith.constant 0 : index
    %c1 = arith.constant 1 : index
    %c8 = arith.constant 8 : index
    %c0_34 = arith.constant 0 : index
    %12 = vector.load %arg7[%c0_33, %c1, %c8, %c0_34] : memref<1x18x32x128xbf16, #tpu.memory_space<vmem>>, vector<1x16x16x128xbf16>
    tpu.vector_store %arg7[%c0_33, %c1, %c8, %c0_34], %11 {strides = array<i32>} : memref<1x18x32x128xbf16, #tpu.memory_space<vmem>>, vector<1x16x16x128xbf16>,
    %c0_35 = arith.constant 0 : index
    %c0_36 = arith.constant 0 : index
    %c7_37 = arith.constant 7 : index
    %c0_38 = arith.constant 0 : index
    %13 = vector.load %arg7[%c0_35, %c0_36, %c7_37, %c0_38] : memref<1x18x32x128xbf16, #tpu.memory_space<vmem>>, vector<1x16x16x128xbf16>
    %14 = vector.shape_cast %13 : vector<1x16x16x128xbf16> to vector<256x128xbf16>
    %c0_39 = arith.constant 0 : index
    %c0_40 = arith.constant 0 : index
    %15 = vector.load %arg9[%c0_39, %c0_40] : memref<256x1152xbf16, #tpu.memory_space<vmem>>, vector<256x128xbf16>
    tpu.vector_store %arg9[%c0_39, %c0_40], %14 {strides = array<i32>} : memref<256x1152xbf16, #tpu.memory_space<vmem>>, vector<256x128xbf16>,
    %c0_41 = arith.constant 0 : index
    %c0_42 = arith.constant 0 : index
    %c8_43 = arith.constant 8 : index
    %c0_44 = arith.constant 0 : index
    %16 = vector.load %arg7[%c0_41, %c0_42, %c8_43, %c0_44] : memref<1x18x32x128xbf16, #tpu.memory_space<vmem>>, vector<1x16x16x128xbf16>
    %17 = vector.shape_cast %16 : vector<1x16x16x128xbf16> to vector<256x128xbf16>
    %c0_45 = arith.constant 0 : index
    %c128 = arith.constant 128 : index
    %18 = vector.load %arg9[%c0_45, %c128] : memref<256x1152xbf16, #tpu.memory_space<vmem>>, vector<256x128xbf16>
    tpu.vector_store %arg9[%c0_45, %c128], %17 {strides = array<i32>} : memref<256x1152xbf16, #tpu.memory_space<vmem>>, vector<256x128xbf16>,
    %c0_46 = arith.constant 0 : index
    %c0_47 = arith.constant 0 : index
    %c9 = arith.constant 9 : index
    %c0_48 = arith.constant 0 : index
    %19 = vector.load %arg7[%c0_46, %c0_47, %c9, %c0_48] : memref<1x18x32x128xbf16, #tpu.memory_space<vmem>>, vector<1x16x16x128xbf16>
    %20 = vector.shape_cast %19 : vector<1x16x16x128xbf16> to vector<256x128xbf16>
    %c0_49 = arith.constant 0 : index
    %c256 = arith.constant 256 : index
    %21 = vector.load %arg9[%c0_49, %c256] : memref<256x1152xbf16, #tpu.memory_space<vmem>>, vector<256x128xbf16>
    tpu.vector_store %arg9[%c0_49, %c256], %20 {strides = array<i32>} : memref<256x1152xbf16, #tpu.memory_space<vmem>>, vector<256x128xbf16>,
    %c0_50 = arith.constant 0 : index
    %c1_51 = arith.constant 1 : index
    %c7_52 = arith.constant 7 : index
    %c0_53 = arith.constant 0 : index
    %22 = vector.load %arg7[%c0_50, %c1_51, %c7_52, %c0_53] : memref<1x18x32x128xbf16, #tpu.memory_space<vmem>>, vector<1x16x16x128xbf16>
    %23 = vector.shape_cast %22 : vector<1x16x16x128xbf16> to vector<256x128xbf16>
    %c0_54 = arith.constant 0 : index
    %c384 = arith.constant 384 : index
    %24 = vector.load %arg9[%c0_54, %c384] : memref<256x1152xbf16, #tpu.memory_space<vmem>>, vector<256x128xbf16>
    tpu.vector_store %arg9[%c0_54, %c384], %23 {strides = array<i32>} : memref<256x1152xbf16, #tpu.memory_space<vmem>>, vector<256x128xbf16>,
    %c0_55 = arith.constant 0 : index
    %c1_56 = arith.constant 1 : index
    %c8_57 = arith.constant 8 : index
    %c0_58 = arith.constant 0 : index
    %25 = vector.load %arg7[%c0_55, %c1_56, %c8_57, %c0_58] : memref<1x18x32x128xbf16, #tpu.memory_space<vmem>>, vector<1x16x16x128xbf16>
    %26 = vector.shape_cast %25 : vector<1x16x16x128xbf16> to vector<256x128xbf16>
    %c0_59 = arith.constant 0 : index
    %c512 = arith.constant 512 : index
    %27 = vector.load %arg9[%c0_59, %c512] : memref<256x1152xbf16, #tpu.memory_space<vmem>>, vector<256x128xbf16>
    tpu.vector_store %arg9[%c0_59, %c512], %26 {strides = array<i32>} : memref<256x1152xbf16, #tpu.memory_space<vmem>>, vector<256x128xbf16>,
    %c0_60 = arith.constant 0 : index
    %c1_61 = arith.constant 1 : index
    %c9_62 = arith.constant 9 : index
    %c0_63 = arith.constant 0 : index
    %28 = vector.load %arg7[%c0_60, %c1_61, %c9_62, %c0_63] : memref<1x18x32x128xbf16, #tpu.memory_space<vmem>>, vector<1x16x16x128xbf16>
    %29 = vector.shape_cast %28 : vector<1x16x16x128xbf16> to vector<256x128xbf16>
    %c0_64 = arith.constant 0 : index
    %c640 = arith.constant 640 : index
    %30 = vector.load %arg9[%c0_64, %c640] : memref<256x1152xbf16, #tpu.memory_space<vmem>>, vector<256x128xbf16>
    tpu.vector_store %arg9[%c0_64, %c640], %29 {strides = array<i32>} : memref<256x1152xbf16, #tpu.memory_space<vmem>>, vector<256x128xbf16>,
    %c0_65 = arith.constant 0 : index
    %c2 = arith.constant 2 : index
    %c7_66 = arith.constant 7 : index
    %c0_67 = arith.constant 0 : index
    %31 = vector.load %arg7[%c0_65, %c2, %c7_66, %c0_67] : memref<1x18x32x128xbf16, #tpu.memory_space<vmem>>, vector<1x16x16x128xbf16>
    %32 = vector.shape_cast %31 : vector<1x16x16x128xbf16> to vector<256x128xbf16>
    %c0_68 = arith.constant 0 : index
    %c768 = arith.constant 768 : index
    %33 = vector.load %arg9[%c0_68, %c768] : memref<256x1152xbf16, #tpu.memory_space<vmem>>, vector<256x128xbf16>
    tpu.vector_store %arg9[%c0_68, %c768], %32 {strides = array<i32>} : memref<256x1152xbf16, #tpu.memory_space<vmem>>, vector<256x128xbf16>,
    %c0_69 = arith.constant 0 : index
    %c2_70 = arith.constant 2 : index
    %c8_71 = arith.constant 8 : index
    %c0_72 = arith.constant 0 : index
    %34 = vector.load %arg7[%c0_69, %c2_70, %c8_71, %c0_72] : memref<1x18x32x128xbf16, #tpu.memory_space<vmem>>, vector<1x16x16x128xbf16>
    %35 = vector.shape_cast %34 : vector<1x16x16x128xbf16> to vector<256x128xbf16>
    %c0_73 = arith.constant 0 : index
    %c896 = arith.constant 896 : index
    %36 = vector.load %arg9[%c0_73, %c896] : memref<256x1152xbf16, #tpu.memory_space<vmem>>, vector<256x128xbf16>
    tpu.vector_store %arg9[%c0_73, %c896], %35 {strides = array<i32>} : memref<256x1152xbf16, #tpu.memory_space<vmem>>, vector<256x128xbf16>,
    %c0_74 = arith.constant 0 : index
    %c2_75 = arith.constant 2 : index
    %c9_76 = arith.constant 9 : index
    %c0_77 = arith.constant 0 : index
    %37 = vector.load %arg7[%c0_74, %c2_75, %c9_76, %c0_77] : memref<1x18x32x128xbf16, #tpu.memory_space<vmem>>, vector<1x16x16x128xbf16>
    %38 = vector.shape_cast %37 : vector<1x16x16x128xbf16> to vector<256x128xbf16>
    %c0_78 = arith.constant 0 : index
    %c1024 = arith.constant 1024 : index
    %39 = vector.load %arg9[%c0_78, %c1024] : memref<256x1152xbf16, #tpu.memory_space<vmem>>, vector<256x128xbf16>
    tpu.vector_store %arg9[%c0_78, %c1024], %38 {strides = array<i32>} : memref<256x1152xbf16, #tpu.memory_space<vmem>>, vector<256x128xbf16>,
    %c0_79 = arith.constant 0 : index
    %c0_80 = arith.constant 0 : index
    %40 = vector.load %arg9[%c0_79, %c0_80] : memref<256x1152xbf16, #tpu.memory_space<vmem>>, vector<256x1152xbf16>
    %c0_81 = arith.constant 0 : index
    %c0_82 = arith.constant 0 : index
    %41 = vector.load %arg2[%c0_81, %c0_82] : memref<1152x128xbf16, #tpu.memory_space<vmem>>, vector<1152x128xbf16>
    %cst_83 = arith.constant dense<0.000000e+00> : vector<256x128xf32>
    %42 = tpu.matmul %40, %41, %cst_83 {dimension_numbers = #tpu.dot_dimension_numbers<[1], [0], [0], [1], [0, 0, 1, 1], [], []>} : vector<256x1152xbf16>, vector<1152x128xbf16>, vector<256x128xf32> -> vector<256x128xf32>
    %c0_84 = arith.constant 0 : index
    %c0_85 = arith.constant 0 : index
    %43 = vector.load %arg3[%c0_84, %c0_85] : memref<1x128xf32, #tpu.memory_space<vmem>>, vector<1x128xf32>
    %44 = vector.broadcast %43 : vector<1x128xf32> to vector<256x128xf32>
    %45 = arith.addf %42, %44 : vector<256x128xf32>
    %cst_86 = arith.constant 0.000000e+00 : f32
    %46 = vector.broadcast %cst_86 : f32 to vector<256x128xf32>
    %47 = arith.maximumf %45, %46 : vector<256x128xf32>
    %48 = vector.shape_cast %47 : vector<256x128xf32> to vector<1x16x16x128xf32>
    %49 = arith.truncf %48 : vector<1x16x16x128xf32> to vector<1x16x16x128xbf16>
    %c0_87 = arith.constant 0 : index
    %c1_88 = arith.constant 1 : index
    %c8_89 = arith.constant 8 : index
    %c0_90 = arith.constant 0 : index
    %50 = vector.load %arg8[%c0_87, %c1_88, %c8_89, %c0_90] : memref<1x18x32x128xbf16, #tpu.memory_space<vmem>>, vector<1x16x16x128xbf16>
    tpu.vector_store %arg8[%c0_87, %c1_88, %c8_89, %c0_90], %49 {strides = array<i32>} : memref<1x18x32x128xbf16, #tpu.memory_space<vmem>>, vector<1x16x16x128xbf16>,
    %c0_91 = arith.constant 0 : index
    %c0_92 = arith.constant 0 : index
    %c7_93 = arith.constant 7 : index
    %c0_94 = arith.constant 0 : index
    %51 = vector.load %arg8[%c0_91, %c0_92, %c7_93, %c0_94] : memref<1x18x32x128xbf16, #tpu.memory_space<vmem>>, vector<1x16x16x128xbf16>
    %52 = vector.shape_cast %51 : vector<1x16x16x128xbf16> to vector<256x128xbf16>
    %c0_95 = arith.constant 0 : index
    %c0_96 = arith.constant 0 : index
    %53 = vector.load %arg9[%c0_95, %c0_96] : memref<256x1152xbf16, #tpu.memory_space<vmem>>, vector<256x128xbf16>
    tpu.vector_store %arg9[%c0_95, %c0_96], %52 {strides = array<i32>} : memref<256x1152xbf16, #tpu.memory_space<vmem>>, vector<256x128xbf16>,
    %c0_97 = arith.constant 0 : index
    %c0_98 = arith.constant 0 : index
    %c8_99 = arith.constant 8 : index
    %c0_100 = arith.constant 0 : index
    %54 = vector.load %arg8[%c0_97, %c0_98, %c8_99, %c0_100] : memref<1x18x32x128xbf16, #tpu.memory_space<vmem>>, vector<1x16x16x128xbf16>
    %55 = vector.shape_cast %54 : vector<1x16x16x128xbf16> to vector<256x128xbf16>
    %c0_101 = arith.constant 0 : index
    %c128_102 = arith.constant 128 : index
    %56 = vector.load %arg9[%c0_101, %c128_102] : memref<256x1152xbf16, #tpu.memory_space<vmem>>, vector<256x128xbf16>
    tpu.vector_store %arg9[%c0_101, %c128_102], %55 {strides = array<i32>} : memref<256x1152xbf16, #tpu.memory_space<vmem>>, vector<256x128xbf16>,
    %c0_103 = arith.constant 0 : index
    %c0_104 = arith.constant 0 : index
    %c9_105 = arith.constant 9 : index
    %c0_106 = arith.constant 0 : index
    %57 = vector.load %arg8[%c0_103, %c0_104, %c9_105, %c0_106] : memref<1x18x32x128xbf16, #tpu.memory_space<vmem>>, vector<1x16x16x128xbf16>
    %58 = vector.shape_cast %57 : vector<1x16x16x128xbf16> to vector<256x128xbf16>
    %c0_107 = arith.constant 0 : index
    %c256_108 = arith.constant 256 : index
    %59 = vector.load %arg9[%c0_107, %c256_108] : memref<256x1152xbf16, #tpu.memory_space<vmem>>, vector<256x128xbf16>
    tpu.vector_store %arg9[%c0_107, %c256_108], %58 {strides = array<i32>} : memref<256x1152xbf16, #tpu.memory_space<vmem>>, vector<256x128xbf16>,
    %c0_109 = arith.constant 0 : index
    %c1_110 = arith.constant 1 : index
    %c7_111 = arith.constant 7 : index
    %c0_112 = arith.constant 0 : index
    %60 = vector.load %arg8[%c0_109, %c1_110, %c7_111, %c0_112] : memref<1x18x32x128xbf16, #tpu.memory_space<vmem>>, vector<1x16x16x128xbf16>
    %61 = vector.shape_cast %60 : vector<1x16x16x128xbf16> to vector<256x128xbf16>
    %c0_113 = arith.constant 0 : index
    %c384_114 = arith.constant 384 : index
    %62 = vector.load %arg9[%c0_113, %c384_114] : memref<256x1152xbf16, #tpu.memory_space<vmem>>, vector<256x128xbf16>
    tpu.vector_store %arg9[%c0_113, %c384_114], %61 {strides = array<i32>} : memref<256x1152xbf16, #tpu.memory_space<vmem>>, vector<256x128xbf16>,
    %c0_115 = arith.constant 0 : index
    %c1_116 = arith.constant 1 : index
    %c8_117 = arith.constant 8 : index
    %c0_118 = arith.constant 0 : index
    %63 = vector.load %arg8[%c0_115, %c1_116, %c8_117, %c0_118] : memref<1x18x32x128xbf16, #tpu.memory_space<vmem>>, vector<1x16x16x128xbf16>
    %64 = vector.shape_cast %63 : vector<1x16x16x128xbf16> to vector<256x128xbf16>
    %c0_119 = arith.constant 0 : index
    %c512_120 = arith.constant 512 : index
    %65 = vector.load %arg9[%c0_119, %c512_120] : memref<256x1152xbf16, #tpu.memory_space<vmem>>, vector<256x128xbf16>
    tpu.vector_store %arg9[%c0_119, %c512_120], %64 {strides = array<i32>} : memref<256x1152xbf16, #tpu.memory_space<vmem>>, vector<256x128xbf16>,
    %c0_121 = arith.constant 0 : index
    %c1_122 = arith.constant 1 : index
    %c9_123 = arith.constant 9 : index
    %c0_124 = arith.constant 0 : index
    %66 = vector.load %arg8[%c0_121, %c1_122, %c9_123, %c0_124] : memref<1x18x32x128xbf16, #tpu.memory_space<vmem>>, vector<1x16x16x128xbf16>
    %67 = vector.shape_cast %66 : vector<1x16x16x128xbf16> to vector<256x128xbf16>
    %c0_125 = arith.constant 0 : index
    %c640_126 = arith.constant 640 : index
    %68 = vector.load %arg9[%c0_125, %c640_126] : memref<256x1152xbf16, #tpu.memory_space<vmem>>, vector<256x128xbf16>
    tpu.vector_store %arg9[%c0_125, %c640_126], %67 {strides = array<i32>} : memref<256x1152xbf16, #tpu.memory_space<vmem>>, vector<256x128xbf16>,
    %c0_127 = arith.constant 0 : index
    %c2_128 = arith.constant 2 : index
    %c7_129 = arith.constant 7 : index
    %c0_130 = arith.constant 0 : index
    %69 = vector.load %arg8[%c0_127, %c2_128, %c7_129, %c0_130] : memref<1x18x32x128xbf16, #tpu.memory_space<vmem>>, vector<1x16x16x128xbf16>
    %70 = vector.shape_cast %69 : vector<1x16x16x128xbf16> to vector<256x128xbf16>
    %c0_131 = arith.constant 0 : index
    %c768_132 = arith.constant 768 : index
    %71 = vector.load %arg9[%c0_131, %c768_132] : memref<256x1152xbf16, #tpu.memory_space<vmem>>, vector<256x128xbf16>
    tpu.vector_store %arg9[%c0_131, %c768_132], %70 {strides = array<i32>} : memref<256x1152xbf16, #tpu.memory_space<vmem>>, vector<256x128xbf16>,
    %c0_133 = arith.constant 0 : index
    %c2_134 = arith.constant 2 : index
    %c8_135 = arith.constant 8 : index
    %c0_136 = arith.constant 0 : index
    %72 = vector.load %arg8[%c0_133, %c2_134, %c8_135, %c0_136] : memref<1x18x32x128xbf16, #tpu.memory_space<vmem>>, vector<1x16x16x128xbf16>
    %73 = vector.shape_cast %72 : vector<1x16x16x128xbf16> to vector<256x128xbf16>
    %c0_137 = arith.constant 0 : index
    %c896_138 = arith.constant 896 : index
    %74 = vector.load %arg9[%c0_137, %c896_138] : memref<256x1152xbf16, #tpu.memory_space<vmem>>, vector<256x128xbf16>
    tpu.vector_store %arg9[%c0_137, %c896_138], %73 {strides = array<i32>} : memref<256x1152xbf16, #tpu.memory_space<vmem>>, vector<256x128xbf16>,
    %c0_139 = arith.constant 0 : index
    %c2_140 = arith.constant 2 : index
    %c9_141 = arith.constant 9 : index
    %c0_142 = arith.constant 0 : index
    %75 = vector.load %arg8[%c0_139, %c2_140, %c9_141, %c0_142] : memref<1x18x32x128xbf16, #tpu.memory_space<vmem>>, vector<1x16x16x128xbf16>
    %76 = vector.shape_cast %75 : vector<1x16x16x128xbf16> to vector<256x128xbf16>
    %c0_143 = arith.constant 0 : index
    %c1024_144 = arith.constant 1024 : index
    %77 = vector.load %arg9[%c0_143, %c1024_144] : memref<256x1152xbf16, #tpu.memory_space<vmem>>, vector<256x128xbf16>
    tpu.vector_store %arg9[%c0_143, %c1024_144], %76 {strides = array<i32>} : memref<256x1152xbf16, #tpu.memory_space<vmem>>, vector<256x128xbf16>,
    %c0_145 = arith.constant 0 : index
    %c0_146 = arith.constant 0 : index
    %78 = vector.load %arg9[%c0_145, %c0_146] : memref<256x1152xbf16, #tpu.memory_space<vmem>>, vector<256x1152xbf16>
    %c0_147 = arith.constant 0 : index
    %c0_148 = arith.constant 0 : index
    %79 = vector.load %arg4[%c0_147, %c0_148] : memref<1152x128xbf16, #tpu.memory_space<vmem>>, vector<1152x128xbf16>
    %cst_149 = arith.constant dense<0.000000e+00> : vector<256x128xf32>
    %80 = tpu.matmul %78, %79, %cst_149 {dimension_numbers = #tpu.dot_dimension_numbers<[1], [0], [0], [1], [0, 0, 1, 1], [], []>} : vector<256x1152xbf16>, vector<1152x128xbf16>, vector<256x128xf32> -> vector<256x128xf32>
    %c0_150 = arith.constant 0 : index
    %c0_151 = arith.constant 0 : index
    %81 = vector.load %arg5[%c0_150, %c0_151] : memref<1x128xf32, #tpu.memory_space<vmem>>, vector<1x128xf32>
    %82 = vector.broadcast %81 : vector<1x128xf32> to vector<256x128xf32>
    %83 = arith.addf %80, %82 : vector<256x128xf32>
    %84 = vector.shape_cast %83 : vector<256x128xf32> to vector<1x16x16x128xf32>
    %85 = arith.addf %84, %10 : vector<1x16x16x128xf32>
    %c0_152 = arith.constant 0 : index
    %c0_153 = arith.constant 0 : index
    %c0_154 = arith.constant 0 : index
    %c0_155 = arith.constant 0 : index
    %86 = vector.load %arg6[%c0_152, %c0_153, %c0_154, %c0_155] : memref<1x16x16x128xf32, #tpu.memory_space<vmem>>, vector<1x16x16x128xf32>
    tpu.vector_store %arg6[%c0_152, %c0_153, %c0_154, %c0_155], %85 {strides = array<i32>} : memref<1x16x16x128xf32, #tpu.memory_space<vmem>>, vector<1x16x16x128xf32>,
    return
  }
  func.func @transform_0(%arg0: i32) -> (i32, i32, i32, i32) {
    %c0_i32 = arith.constant 0 : i32
    %c0_i32_0 = arith.constant 0 : i32
    %c0_i32_1 = arith.constant 0 : i32
    %c0_i32_2 = arith.constant 0 : i32
    return %arg0, %c0_i32, %c0_i32_0, %c0_i32_1 : i32, i32, i32, i32
  }
  func.func @transform_1(%arg0: i32) -> (i32, i32) {
    %c0_i32 = arith.constant 0 : i32
    %c0_i32_0 = arith.constant 0 : i32
    %c0_i32_1 = arith.constant 0 : i32
    return %c0_i32, %c0_i32_0 : i32, i32
  }
  func.func @transform_2(%arg0: i32) -> (i32, i32) {
    %c0_i32 = arith.constant 0 : i32
    %c0_i32_0 = arith.constant 0 : i32
    %c0_i32_1 = arith.constant 0 : i32
    return %c0_i32, %c0_i32_0 : i32, i32
  }
  func.func @transform_3(%arg0: i32) -> (i32, i32) {
    %c0_i32 = arith.constant 0 : i32
    %c0_i32_0 = arith.constant 0 : i32
    %c0_i32_1 = arith.constant 0 : i32
    return %c0_i32, %c0_i32_0 : i32, i32
  }
  func.func @transform_4(%arg0: i32) -> (i32, i32) {
    %c0_i32 = arith.constant 0 : i32
    %c0_i32_0 = arith.constant 0 : i32
    %c0_i32_1 = arith.constant 0 : i32
    return %c0_i32, %c0_i32_0 : i32, i32
  }
  func.func @transform_5(%arg0: i32) -> (i32, i32, i32, i32) {
    %c0_i32 = arith.constant 0 : i32
    %c0_i32_0 = arith.constant 0 : i32
    %c0_i32_1 = arith.constant 0 : i32
    %c0_i32_2 = arith.constant 0 : i32
    return %arg0, %c0_i32, %c0_i32_0, %c0_i32_1 : i32, i32, i32, i32
  }
}

</mosaic_0001>

<bundles_post_ra>
// kernel: tpu_custom_call.1
= control target key start
LH: loop header
LB: loop body
LE: loop exit
PB: predicated region body
PF: predicated region fallthrough
CT: control target
= control target key end

     0   :  { %10 = vsyncpa [#allocation6], 0  ;;  %s12424_s0 = inlined_call_operand.hbm [shape: f32[2,16,16,128], index: 0, kind: input, shape index: {}]   ;;  %s12425_s1 = inlined_call_operand.hbm [shape: bf16[1152,128], index: 1, kind: input, shape index: {}]   ;;  %s12426_s2 = inlined_call_operand.vmem [shape: f32[1,128], index: 2, kind: input, shape index: {}]   ;;  %s12427_s3 = inlined_call_operand.hbm [shape: bf16[1152,128], index: 3, kind: input, shape index: {}]   ;;  %s12428_s4 = inlined_call_operand.vmem [shape: f32[1,128], index: 4, kind: input, shape index: {}]   ;;  %s12429_s5 = inlined_call_operand.hbm [shape: f32[2,16,16,128], index: 5, kind: output, shape index: {}]  }
   0x1   :  { %12 = vsyncpa [#allocation6 + $0x1], 0 }
   0x2   :  { %13 = vsyncpa [#allocation9], 0 }
   0x3   :  { %14 = vsyncpa [#allocation7], 0 }
   0x4   :  { %16 = vsyncpa [#allocation7 + $0x1], 0  ;;  %s10555_s18 = smov 0   ;;  %s10557_s19 = smov 0  }
   0x5   :  { %s10559_s20 = smov 0   ;;  %s10561_s21 = smov 0  }
   0x6 LB: > { %s10576_s22 = sadd.s32 4294967295, %s10512_s21   ;;  %s8897_s23 = sadd.s32 4294967294, %s10512_s21   ;;  %s10512_s21 = sphi %s10561_s21, %s12474_s21   ;;  %s10508_s20 = sphi %s10559_s20, %s12473_s20   ;;  %s10504_s19 = sphi %s10557_s19, %s12472_s19   ;;  %s10500_s18 = sphi %s10555_s18, %s12471_s18  }
   0x7   : > { %p42_p0 = scmp.ne.s32.totalorder %s10504_s19, %s10500_s18  ;;  %p12430_p1 = scmp.eq.s32.totalorder %s10576_s22, 0 }
   0x8   : > { %p156_p3 = scmp.eq.s32.totalorder %s8897_s23, 1  ;;  %p8898_p5 = scmp.ge.s32.totalorder %s10512_s21, 1 }
   0x9   : > { %p10585_p4 = por %p12430_p1, %p42_p0  ;;  %p163_p7 = scmp.lt.s32.totalorder %s10512_s21, 3 }
   0xa   : > { %p10590_p6 = por %p156_p3, %p42_p0  ;;  %s10514_s27 = smov [#allocation8]  }
   0xb   : > { %s12435_s24 = scalar_select %p10585_p4, 1, 0 }
   0xc   : > { %s12436_s25 = scalar_select %p10590_p6, 1, 0 }
   0xd   : > { %p10595_p8 = pnand %p8898_p5, %p163_p7  ;;  %s175_s28 = sshll.u32 %s10514_s27, 4  ;;  %s10599_s28 = int_to_ptr.vmem [resolvable:$true] %s175_s28 }
   0xe   : > { %s10515_s30 = smov [#allocation10]   ;;  %s10356_s9 = scalar_lea.hbm %s12425_s1, 9216 }
   0xf   : > { %p10115_p9 = pneg %p10595_p8  ;;  %s191_s6 = sshll.u32 %s10515_s30, 4  ;;  %s10610_s6 = int_to_ptr.vmem [resolvable:$true] %s191_s6 }
  0x10   : > { %p10357_p12 = scmp.ne.s32.totalorder %s12425_s1, %s10356_s9  ;;  %p10363_p5 = scmp.lt.u32.totalorder %s10356_s9, %s12425_s1 }
  0x11   : > { %p10606_p11 = pnand %p10115_p9, %p12430_p1 }
  0x13   : > { %p10358_p13 = pneg %p10606_p11 }
  0x15   : > { %p10359_p0 = pnand %p10358_p13, %p10357_p12 }
  0x17   : > { %p10360_p3 = pneg %p10359_p0 }
  0x19   : > { %p10365_p7 = pnand %p10363_p5, %p10360_p3 }
  0x1b   : > { %10368 = shalt.err (!%p10365_p7)
}
  0x1c   : > { %s10369_s14 = scalar_lea.vmem %s10599_s28, 9216  ;;  %p10377_p2 = scmp.lt.s32.totalorder %s10599_s28, %s10599_s28 }
  0x1d   : > { %p10370_p9 = scmp.ne.s32.totalorder %s10599_s28, %s10369_s14  ;;  %p10378_p12 = scmp.lt.s32.totalorder %s10369_s14, %s10369_s14 }
  0x1f   : > { %p10372_p10 = pnand %p10370_p9, %p10358_p13  ;;  %p10379_p0 = por %p10378_p12, %p10377_p2 }
  0x21   : > { %p10373_p1 = pneg %p10372_p10 }
  0x23   : > { %p10380_p6 = pnand %p10379_p0, %p10373_p1 }
  0x25   : > { %10383 = shalt.err (!%p10380_p6)
}
  0x26   : > { %s10516_s15 = smov 64   ;;  %s10517_s16 = smov 4  }
  0x27   : > { %10118 = dma.hbm_to_vmem [thread:$0]  (!%p10606_p11), %s12425_s1, 9216, %s10599_s28, [#allocation9], %s10516_s15, %s10516_s15, %s10517_s16  }
  0x28   : > { %s10384_s7 = scalar_lea.hbm %s12427_s3, 9216 }
  0x29   : > { %p10385_p2 = scmp.ne.s32.totalorder %s12427_s3, %s10384_s7  ;;  %p10391_p10 = scmp.lt.u32.totalorder %s10384_s7, %s12427_s3 }
  0x2b   : > { %p10387_p1 = pnand %p10385_p2, %p10358_p13 }
  0x2d   : > { %p10388_p6 = pneg %p10387_p1 }
  0x2f   : > { %p10393_p3 = pnand %p10391_p10, %p10388_p6 }
  0x31   : > { %10396 = shalt.err (!%p10393_p3)
}
  0x32   : > { %s10397_s28 = scalar_lea.vmem %s10610_s6, 9216  ;;  %p10405_p12 = scmp.lt.s32.totalorder %s10610_s6, %s10610_s6 }
  0x33   : > { %p10398_p5 = scmp.ne.s32.totalorder %s10610_s6, %s10397_s28  ;;  %p10406_p0 = scmp.lt.s32.totalorder %s10397_s28, %s10397_s28 }
  0x35   : > { %p10400_p7 = pnand %p10398_p5, %p10358_p13  ;;  %p10407_p2 = por %p10406_p0, %p10405_p12 }
  0x37   : > { %p10401_p9 = pneg %p10400_p7 }
  0x39   : > { %p10408_p1 = pnand %p10407_p2, %p10401_p9 }
  0x3b   : > { %10411 = shalt.err (!%p10408_p1)
}
  0x3c   : > { %10121 = dma.hbm_to_vmem [thread:$0]  (!%p10606_p11), %s12427_s3, 9216, %s10610_s6, [#allocation9], %s10516_s15, %s10516_s15, %s10517_s16  }
  0x3d   : > { %s10665_s14 = sadd.s32 1, %s10512_s21   ;;  %s29_s29 = sadd.s32 1, %s10508_s20 }
  0x3e   : > { %s26_s17 = ssub.s32 %s10512_s21, %s10665_s14  ;;  %p36_p13 = scmp.ne.s32.totalorder %s10508_s20, %s10504_s19 }
  0x3f   : > { %p27_p6 = scmp.eq.s32.totalorder %s26_s17, 0  ;;  %p37_p10 = scmp.eq.s32.totalorder %s10512_s21, 0 }
  0x40   : > { %p12439_p3 = scmp.eq.s32.totalorder %s10576_s22, 1  ;;  %p10132_p7 = scmp.lt.s32.totalorder %s10512_s21, 2 }
  0x41   : > { %s10681_s27 = scalar_select %p27_p6, %s10508_s20, %s29_s29  }
  0x42   : > { %p10675_p5 = por %p12439_p3, %p36_p13  ;;  %p38_p9 = por %p37_p10, %p36_p13 }
  0x43   : > { %s208_s30 = sand.u32 1, %s10508_s20   ;;  %s9061_s6 = sshll.u32 %s10512_s21, 12 }
  0x44   : > { %s12440_s23 = scalar_select %p10675_p5, 1, 0 }
  0x45   : > { %s8902_s7 = sshll.u32 %s208_s30, 8  ;;  %s10688_s8 = scalar_lea.hbm %s12424_s0, %s9061_s6 }
  0x46   : > { %s212_s9 = scalar_lea.vmem [#allocation5], %s8902_s7  ;;  %p10692_p11 = pnand %p10132_p7, %p38_p9 }
  0x47   : > { %s219_s10 = sshll.u32 %s212_s9, 4  ;;  %s10696_s28 = scalar_lea.sflag [#allocation6], %s208_s30  ;;  %s10690_s10 = int_to_ptr.vmem [resolvable:$true] %s219_s10 }
  0x48   : > { %s10412_s12 = scalar_lea.hbm %s10688_s8, 4096  ;;  %p10414_p0 = pneg %p10692_p11 }
  0x49   : > { %p10413_p12 = scmp.ne.s32.totalorder %s10688_s8, %s10412_s12  ;;  %s10417_s17 = scalar_lea.hbm %s12424_s0, 8192 }
  0x4a   : > { %p10418_p13 = scmp.lt.u32.totalorder %s10688_s8, %s12424_s0  ;;  %p10419_p6 = scmp.lt.u32.totalorder %s10417_s17, %s10412_s12 }
  0x4b   : > { %p10415_p2 = pnand %p10414_p0, %p10413_p12  ;;  %p10421_p3 = scmp.lt.u32.totalorder %s10412_s12, %s10688_s8 }
  0x4c   : > { %p10420_p10 = por %p10419_p6, %p10418_p13 }
  0x4d   : > { %p10416_p1 = pneg %p10415_p2 }
  0x4e   : > { %p10422_p7 = por %p10421_p3, %p10420_p10 }
  0x50   : > { %p10423_p9 = pnand %p10422_p7, %p10416_p1 }
  0x52   : > { %10426 = shalt.err (!%p10423_p9)
}
  0x53   : > { %s10427_s30 = scalar_lea.vmem %s10690_s10, 4096  ;;  %s10518_s15 = smov [#allocation5]  }
  0x54   : > { %p10428_p12 = scmp.ne.s32.totalorder %s10690_s10, %s10427_s30  ;;  %s10432_s16 = sshll.u32 %s10518_s15, 4  ;;  %s10433_s16 = int_to_ptr.vmem [resolvable:$false] %s10432_s16 }
  0x55   : > { %s10434_s9 = scalar_lea.vmem %s10433_s16, 8192  ;;  %p10435_p4 = scmp.lt.s32.totalorder %s10690_s10, %s10433_s16 }
  0x56   : > { %p10430_p2 = pnand %p10428_p12, %p10414_p0  ;;  %p10436_p13 = scmp.lt.s32.totalorder %s10434_s9, %s10427_s30 }
  0x58   : > { %p10431_p5 = pneg %p10430_p2  ;;  %p10437_p6 = por %p10436_p13, %p10435_p4 }
  0x5a   : > { %p10438_p10 = pnand %p10437_p6, %p10431_p5 }
  0x5c   : > { %10441 = shalt.err (!%p10438_p10)
}
  0x5d   : > { %s10519_s12 = smov 128   ;;  %s10520_s13 = smov 8  }
  0x5e   : > { %10125 = dma.hbm_to_vmem [thread:$0]  (!%p10692_p11), %s10688_s8, 4096, %s10690_s10, %s10696_s28, %s10519_s12, %s10519_s12, %s10520_s13  }
  0x5f   : > { %231 = sbr.rel (%p10595_p8) target bundleno = 1248 (0x4e0), region = 40 }
  0x66   : > { %s10727_s29 = sand.u32 1, %s10504_s19   ;;  %p12442_p4 = scmp.ne.s32.totalorder %s12435_s24, 0 }
  0x67   : > { %s8906_s17 = sshll.u32 %s10727_s29, 8  ;;  %s234_s7 = scalar_lea.sflag [#allocation6], %s10727_s29 }
  0x68   : > { %s10733_s6 = scalar_lea.vmem [#allocation5], %s8906_s17 }
  0x69   : > { %10487 = dma.done.wait (%p12442_p4), %s234_s7, 4096  }
  0x6a   : > { %10489 = vsyncadd (%p12442_p4), %s234_s7, 4294963200  ;;  %p12443_p5 = scmp.eq.s32.totalorder %s10576_s22, 0 }
  0x6c   : > { %10491 = dma.done.wait (%p12443_p5), [#allocation9], 18432   ;;  %p12444_p8 = pmov %p12443_p5 }
  0x6d   : > { %v10521_v0 = vmov 0   ;;  %v10177_v1 = vld [vmem:[#allocation8 + $0x40] sm:$0xff]   ;;  %v10181_v5 = vld [vmem:[#allocation8 + $0x48] sm:$0xff]   ;;  %v10185_v9 = vld [vmem:[#allocation8 + $0x50] sm:$0xff]   ;;  %vm279_vm0 = vsmask.f32 7950 }
  0x6e   : > { %10493 = vsyncadd (%p12444_p8), [#allocation9], 4294948864  ;;  %273 = vst [vmem:[#allocation2] sm:$0xff] %v10521_v0  ;;  %v10178_v2 = vld [vmem:[#allocation8] sm:$0xff]   ;;  %9063 = vmatprep.subr.bf16.mxu0 %v10177_v1  ;;  %v10182_v6 = vld [vmem:[#allocation8 + $0x8] sm:$0xff]   ;;  %vm278_vm1 = vcmask 1043459  }
  0x6f   : > { %274 = vst [vmem:[#allocation2 + $0x8] sm:$0xff] %v10521_v0  ;;  %276 = vst [vmem:[#allocation2 + $0x110] sm:$0xff] %v10521_v0  ;;  %v10179_v3 = vld [vmem:[#allocation8 + $0xc0] sm:$0xff]   ;;  %9064 = vmatpush3.bf16.msra.mxu0 %v10178_v2  ;;  %v10183_v7 = vld [vmem:[#allocation8 + $0xc8] sm:$0xff]   ;;  %v12445_v25 = vmov 0  ;;  %vm1034_vm4 = vcmask 1043456  }
  0x70   : > { %277 = vst [vmem:[#allocation2 + $0x118] sm:$0xff] %v10521_v0  ;;  %392 = vst [vmem:[#allocation3] sm:$0xff] %v10521_v0  ;;  %v10180_v4 = vld [vmem:[#allocation8 + $0x80] sm:$0xff]   ;;  %9175 = vmatprep.subr.bf16.mxu1 %v10179_v3  ;;  %9065 = vmatprep.subr.bf16.mxu0 %v10181_v5  ;;  %v10184_v8 = vld [vmem:[#allocation8 + $0x88] sm:$0xff]   ;;  %vm336_vm3 = vsmask.f32 4352 }
  0x71   : > { %393 = vst [vmem:[#allocation3 + $0x8] sm:$0xff] %v10521_v0  ;;  %395 = vst [vmem:[#allocation3 + $0x110] sm:$0xff] %v10521_v0  ;;  %9176 = vmatpush3.bf16.msra.mxu1 %v10180_v4  ;;  %v10186_v10 = vld [vmem:[#allocation8 + $0x10] sm:$0xff]   ;;  %v10189_v13 = vld [vmem:[#allocation8 + $0x58] sm:$0xff]   ;;  %vm335_vm5 = vcmask 1044484   ;;  %s12275_s16 = scalar_lea.vmem [#allocation11], %s8906_s17 }
  0x72   : > { %396 = vst [vmem:[#allocation3 + $0x118] sm:$0xff] %v10521_v0  ;;  %9177 = vmatprep.subr.bf16.mxu1 %v10183_v7  ;;  %v10187_v11 = vld [vmem:[#allocation8 + $0xd0] sm:$0xff]   ;;  %v10190_v14 = vld [vmem:[#allocation8 + $0x18] sm:$0xff]   ;;  %v10193_v17 = vld [vmem:[#allocation8 + $0x60] sm:$0xff]   ;;  %vm1147_vm7 = vsmask.f32 3328 }
  0x73   : > { %9066 = vmatpush3.bf16.msra.mxu0 %v10182_v6  ;;  %v10188_v12 = vld [vmem:[#allocation8 + $0x90] sm:$0xff]   ;;  %v10191_v15 = vld [vmem:[#allocation8 + $0xd8] sm:$0xff]   ;;  %v10194_v18 = vld [vmem:[#allocation8 + $0x20] sm:$0xff]   ;;  %s9062_s9 = sshll.u32 %s10576_s22, 12  ;;  %s8805_s12 = sshll.u32 %s12275_s16, 4  ;;  %s12376_s12 = int_to_ptr.vmem [resolvable:$true] %s8805_s12 }
  0x74   : > { %9067 = vmatprep.subr.bf16.mxu0 %v10185_v9  ;;  %v10192_v16 = vld [vmem:[#allocation8 + $0x98] sm:$0xff]   ;;  %v10195_v19 = vld [vmem:[#allocation8 + $0xe0] sm:$0xff]   ;;  %v10197_v21 = vld [vmem:[#allocation8 + $0x68] sm:$0xff]   ;;  %s12374_s22 = scalar_lea.hbm %s12429_s5, %s9062_s9  ;;  %s8792_s7 = scalar_lea.sflag [#allocation7], %s10727_s29 }
  0x75   : > { %9178 = vmatpush3.bf16.msra.mxu1 %v10184_v8  ;;  %v10196_v20 = vld [vmem:[#allocation8 + $0xa0] sm:$0xff]   ;;  %v10198_v22 = vld [vmem:[#allocation8 + $0x28] sm:$0xff]   ;;  %vm10744_vm2 = vmand %vm278_vm1, %vm279_vm0  ;;  %s10442_s24 = scalar_lea.vmem %s12376_s12, 4096  ;;  %p12468_p0 = scmp.ne.s32.totalorder %s12440_s23, 0 }
  0x76   : > { %9179 = vmatprep.subr.bf16.mxu1 %v10187_v11  ;;  %v10199_v23 = vld [vmem:[#allocation8 + $0xe8] sm:$0xff]   ;;  %v12446_v25 = vsel %vm10744_vm2, 4294967295, %v12445_v25  ;;  %v10201_v26 = vld [vmem:[#allocation8 + $0x70] sm:$0xff]   ;;  %v10205_v30 = vld [vmem:[#allocation8 + $0x78] sm:$0xff]   ;;  %p10443_p11 = scmp.ne.s32.totalorder %s12376_s12, %s10442_s24  ;;  %s10522_s26 = smov [#allocation11]  }
  0x77   : > { %9068 = vmatpush3.bf16.msra.mxu0 %v10186_v10  ;;  %v10200_v24 = vld [vmem:[#allocation8 + $0xa8] sm:$0xff]   ;;  %12447 = vst [vmem:[#allocation15_spill] sm:$0xff] %v12446_v25  ;;  %v10202_v27 = vld [vmem:[#allocation8 + $0x30] sm:$0xff]   ;;  %v10206_v31 = vld [vmem:[#allocation8 + $0x38] sm:$0xff]   ;;  %s10446_s8 = sshll.u32 %s10522_s26, 4  ;;  %s10447_s8 = int_to_ptr.vmem [resolvable:$false] %s10446_s8 }
  0x78   : > { %9069 = vmatprep.subr.bf16.mxu0 %v10189_v13  ;;  %v10203_v28 = vld [vmem:[#allocation8 + $0xf0] sm:$0xff]   ;;  %v10207_v32 = vld [vmem:[#allocation8 + $0xf8] sm:$0xff]   ;;  %v970_v33 = vld [vmem:[#allocation2] sm:$0xf0]  ;;  %p10444_p1 = pnand %p10443_p11, %p12468_p0  ;;  %s10448_s10 = scalar_lea.vmem %s10447_s8, 8192 }
  0x79   : > { %9180 = vmatpush3.bf16.msra.mxu1 %v10188_v12  ;;  %v10204_v29 = vld [vmem:[#allocation8 + $0xb0] sm:$0xff]   ;;  %v971_v34 = vld [vmem:[#allocation2 + $0x8] sm:$0xf]  ;;  %v1035_v35 = vrot.slane %v970_v33, 4  ;;  %v10208_v37 = vld [vmem:[#allocation8 + $0xb8] sm:$0xff]   ;;  %p10449_p7 = scmp.lt.s32.totalorder %s12376_s12, %s10447_s8  ;;  %p10450_p9 = scmp.lt.s32.totalorder %s10448_s10, %s10442_s24 }
  0x7a   : > { %9181 = vmatprep.subr.bf16.mxu1 %v10191_v15  ;;  %v1036_v36 = vrot.slane %v971_v34, 4  ;;  %v10209_v38 = vld [vmem:[#allocation8 + $0x140] sm:$0xff]   ;;  %v635_v40 = vld [vmem:[#allocation2 + $0x8] sm:$0xf]  ;;  %vm10754_vm6 = vmand %vm335_vm5, %vm336_vm3  ;;  %p10445_p3 = pneg %p10444_p1 }
  0x7b   : > { %9070 = vmatpush3.bf16.msra.mxu0 %v10190_v14  ;;  %v281_v39 = vld [vmem:[#allocation2] sm:$0x8]  ;;  %v675_v43 = vshrl.u32 %v635_v40, 16  ;;  %v284_v46 = vld [vmem:[#allocation2 + $0x10] sm:$0x8]  ;;  %v506_v47 = vld [vmem:[%s10733_s6 + $0x8] sm:$0xff]  ;;  %p10451_p12 = por %p10450_p9, %p10449_p7 }
  0x7c   : > { %9071 = vmatprep.subr.bf16.mxu0 %v10193_v17  ;;  %v1037_v41 = vsel %vm1034_vm4, %v1035_v35, %v1036_v36  ;;  %v282_v42 = vsel %vm10744_vm2, 0, %v281_v39  ;;  %v505_v44 = vld [vmem:[%s10733_s6] sm:$0xff]  ;;  %v678_v48 = vshll.u32 %v635_v40, 16  ;;  %v285_v49 = vsel %vm10744_vm2, 0, %v284_v46  ;;  %v338_v51 = vld [vmem:[#allocation2 + $0x8] sm:$0x10] }
  0x7d   : > { %9182 = vmatpush3.bf16.msra.mxu1 %v10192_v16  ;;  %3844 = vmatprep.mubr.bf16.mxu0 %v1037_v41  ;;  %283 = vst [vmem:[#allocation2] sm:$0x8] %v282_v42  ;;  %v537_v50 = vpack.c.bf16 %v506_v47, %v505_v44  ;;  %286 = vst [vmem:[#allocation2 + $0x10] sm:$0x8] %v285_v49  ;;  %v1115_v52 = vld [vmem:[#allocation2] sm:$0xf0]  ;;  %p10452_p2 = pnand %p10451_p12, %p10445_p3 }
  0x7e   : > { %9183 = vmatprep.subr.bf16.mxu1 %v10195_v19  ;;  %v287_v53 = vld [vmem:[#allocation2 + $0x20] sm:$0x8]  ;;  %v10761_v54 = vrot.slane %v675_v43, 3  ;;  %v339_v56 = vsel %vm10754_vm6, 0, %v338_v51  ;;  %v1149_v57 = vshrl.u32 %v1115_v52, 16  ;;  %v507_v58 = vld [vmem:[%s10733_s6 + $0x10] sm:$0xff] }
  0x7f   : > { %9072 = vmatpush3.bf16.msra.mxu0 %v10194_v18  ;;  %v569_v55 = vrot.slane %v537_v50, 4  ;;  %v508_v59 = vld [vmem:[%s10733_s6 + $0x18] sm:$0xff]  ;;  %340 = vst [vmem:[#allocation2 + $0x8] sm:$0x10] %v339_v56  ;;  %v1152_v60 = vshll.u32 %v1115_v52, 16  ;;  %v288_v61 = vsel %vm10744_vm2, 0, %v287_v53 }
  0x80   : > { %9073 = vmatprep.subr.bf16.mxu0 %v10197_v21  ;;  %v538_v62 = vpack.c.bf16 %v508_v59, %v507_v58  ;;  %v341_v63 = vld [vmem:[#allocation2 + $0x18] sm:$0x10]  ;;  %v680_v0 = vrot.slane %v678_v48, 4  ;;  %289 = vst [vmem:[#allocation2 + $0x20] sm:$0x8] %v288_v61  ;;  %v10771_v3 = vrot.slane %v1149_v57, 4 }
  0x81   : > { %9184 = vmatpush3.bf16.msra.mxu1 %v10196_v20  ;;  %602 = vst [vmem:[#allocation2 + $0x18] ss:$-4 sps:$4 sm:$0xff] %v569_v55   ;;  %v342_v1 = vsel %vm10754_vm6, 0, %v341_v63  ;;  %v290_v2 = vld [vmem:[#allocation2 + $0x30] sm:$0x8]  ;;  %v10773_v4 = vrot.slane %v1152_v60, 5 }
  0x82   : > { %9185 = vmatprep.subr.bf16.mxu1 %v10199_v23  ;;  %v570_v5 = vrot.slane %v538_v62, 4  ;;  %343 = vst [vmem:[#allocation2 + $0x18] sm:$0x10] %v342_v1  ;;  %v291_v6 = vsel %vm10744_vm2, 0, %v290_v2  ;;  %v509_v7 = vld [vmem:[%s10733_s6 + $0x20] sm:$0xff]  ;;  %v510_v8 = vld [vmem:[%s10733_s6 + $0x28] sm:$0xff] }
  0x83   : > { %9074 = vmatpush3.bf16.msra.mxu0 %v10198_v22  ;;  %292 = vst [vmem:[#allocation2 + $0x30] sm:$0x8] %v291_v6  ;;  %v539_v10 = vpack.c.bf16 %v510_v8, %v509_v7  ;;  %v344_v13 = vld [vmem:[#allocation2 + $0x28] sm:$0x10]  ;;  %v293_v14 = vld [vmem:[#allocation2 + $0x40] sm:$0x8]  ;;  %v681_v22 = vor.u32 %v680_v0, %v10761_v54 }
  0x84   : > { %9075 = vmatprep.subr.bf16.mxu0 %v10201_v26  ;;  %v634_v9 = vld [vmem:[#allocation2] sm:$0xf8]  ;;  %604 = vst [vmem:[#allocation2 + $0x28] ss:$-4 sps:$4 sm:$0xff] %v570_v5   ;;  %v345_v16 = vsel %vm10754_vm6, 0, %v344_v13  ;;  %v294_v17 = vsel %vm10744_vm2, 0, %v293_v14 }
  0x85   : > { %9186 = vmatpush3.bf16.msra.mxu1 %v10200_v24  ;;  %v667_v11 = vshrl.u32 %v634_v9, 16  ;;  %v670_v12 = vshll.u32 %v634_v9, 16  ;;  %v571_v15 = vrot.slane %v539_v10, 4  ;;  %v10784_v18 = vld [vmem:[%s10733_s6 + $0x30] sm:$0xff]  ;;  %v10787_v19 = vld [vmem:[%s10733_s6 + $0x38] sm:$0xff]  ;;  %v10210_v23 = vld [vmem:[#allocation8 + $0x100] sm:$0xff]  }
  0x86   : > { %9187 = vmatprep.subr.bf16.mxu1 %v10203_v28  ;;  %346 = vst [vmem:[#allocation2 + $0x28] sm:$0x10] %v345_v16  ;;  %295 = vst [vmem:[#allocation2 + $0x40] sm:$0x8] %v294_v17  ;;  %v347_v24 = vld [vmem:[#allocation2 + $0x38] sm:$0x10]  ;;  %v540_v35 = vpack.c.bf16 %v10787_v19, %v10784_v18 }
  0x87   : > { %9076 = vmatpush3.bf16.msra.mxu0 %v10202_v27  ;;  %v669_v20 = vrot.slane %v667_v11, 3  ;;  %v672_v21 = vrot.slane %v670_v12, 4  ;;  %v1116_v26 = vld [vmem:[#allocation2 + $0x8] sm:$0x1f]  ;;  %v1155_v27 = vor.u32 %v10773_v4, %v10771_v3  ;;  %606 = vst [vmem:[#allocation2 + $0x38] ss:$-4 sps:$4 sm:$0xff] %v571_v15  }
  0x88   : > { %9077 = vmatprep.subr.bf16.mxu0 %v10205_v30  ;;  %v10211_v28 = vld [vmem:[#allocation8 + $0x148] sm:$0xff]   ;;  %v1157_v33 = vshrl.u32 %v1116_v26, 16  ;;  %v1160_v34 = vshll.u32 %v1116_v26, 16  ;;  %v972_v40 = vld [vmem:[#allocation2 + $0x10] sm:$0xf0] }
  0x89   : > { %9188 = vmatpush3.bf16.msra.mxu1 %v10204_v29  ;;  %v348_v29 = vsel %vm10754_vm6, 0, %v347_v24  ;;  %v673_v30 = vor.u32 %v672_v21, %v669_v20  ;;  %v973_v44 = vld [vmem:[#allocation2 + $0x18] sm:$0xf]  ;;  %v1038_v46 = vrot.slane %v972_v40, 4  ;;  %v10212_v47 = vld [vmem:[#allocation8 + $0x108] sm:$0xff]   ;;  %v10213_v58 = vld [vmem:[#allocation8 + $0x150] sm:$0xff]  }
  0x8a   : > { %9189 = vmatprep.subr.bf16.mxu1 %v10207_v32  ;;  %v1453_v32 = vld [vmem:[#allocation2 + $0x18] sm:$0xf]  ;;  %349 = vst [vmem:[#allocation2 + $0x38] sm:$0x10] %v348_v29  ;;  %v1159_v42 = vrot.slane %v1157_v33, 4  ;;  %v1162_v43 = vrot.slane %v1160_v34, 5 }
  0x8b   : > { %9078 = vmatpush3.bf16.msra.mxu0 %v10206_v31  ;;  %v1452_v31 = vld [vmem:[#allocation2 + $0x10] sm:$0xf8]  ;;  %v1496_v39 = vshll.u32 %v1453_v32, 16  ;;  %v682_v41 = vsel %vm336_vm3, %v673_v30, %v681_v22  ;;  %v1039_v54 = vrot.slane %v973_v44, 4  ;;  %v637_v55 = vld [vmem:[#allocation2 + $0x18] sm:$0xf] }
  0x8c   : > { %9287 = vmatprep.subr.bf16.mxu0 %v10209_v38  ;;  %v1485_v36 = vshrl.u32 %v1452_v31, 16  ;;  %v1493_v38 = vshrl.u32 %v1453_v32, 16  ;;  %v636_v52 = vld [vmem:[#allocation2 + $0x10] sm:$0xf8]  ;;  %v1163_v53 = vor.u32 %v1162_v43, %v1159_v42  ;;  %v692_v61 = vshrl.u32 %v637_v55, 16  ;;  %v10215_v30 = vld [vmem:[#allocation8 + $0x158] sm:$0xff]  }
  0x8d   : > { %9190 = vmatpush3.bf16.msra.mxu1 %v10208_v37  ;;  %v1488_v37 = vshll.u32 %v1452_v31, 16  ;;  %v1498_v51 = vrot.slane %v1496_v39, 4  ;;  %v684_v56 = vshrl.u32 %v636_v52, 16  ;;  %v687_v57 = vshll.u32 %v636_v52, 16  ;;  %v1454_v63 = vld [vmem:[#allocation2 + $0x20] sm:$0xf8] }
  0x8e   : > { %3845 = vmatmul.mubr.bf16.vlgmr.msra.gmra.mrb[0].mxu0 %v682_v41  ;;  %v1487_v48 = vrot.slane %v1485_v36, 3  ;;  %v1495_v50 = vrot.slane %v1493_v38, 3  ;;  %v695_v62 = vshll.u32 %v637_v55, 16  ;;  %v1455_v0 = vld [vmem:[#allocation2 + $0x28] sm:$0xf]  ;;  %v1164_v1 = vsel %vm1147_vm7, %v1155_v27, %v1163_v53  ;;  %v10214_v24 = vld [vmem:[#allocation8 + $0x110] sm:$0xff]  }
  0x8f   : > { %v1490_v49 = vrot.slane %v1488_v37, 4  ;;  %9288 = vmatpush3.bf16.msra.mxu0 %v10210_v23  ;;  %v1040_v2 = vsel %vm1034_vm4, %v1038_v46, %v1039_v54  ;;  %v686_v3 = vrot.slane %v684_v56, 3  ;;  %v689_v4 = vrot.slane %v687_v57, 4  ;;  %v1117_v5 = vld [vmem:[#allocation2 + $0x10] sm:$0xf0]  ;;  %v10216_v52 = vld [vmem:[#allocation8 + $0x118] sm:$0xff]  }
  0x90   : > { %v1499_v60 = vor.u32 %v1498_v51, %v1495_v50  ;;  %9289 = vmatprep.subr.bf16.mxu0 %v10211_v28  ;;  %v1118_v6 = vld [vmem:[#allocation2 + $0x18] sm:$0x1f]  ;;  %3852 = vmatprep.mubr.bf16.mxu0 %v1040_v2  ;;  %v694_v8 = vrot.slane %v692_v61, 3  ;;  %v697_v9 = vrot.slane %v695_v62, 4  ;;  %v1502_v10 = vshrl.u32 %v1454_v63, 16 }
  0x91   : > { %v1491_v59 = vor.u32 %v1490_v49, %v1487_v48  ;;  %v974_v11 = vld [vmem:[#allocation2 + $0x20] sm:$0xf0]  ;;  %v690_v12 = vor.u32 %v689_v4, %v686_v3  ;;  %v1505_v13 = vshll.u32 %v1454_v63, 16  ;;  %v1510_v14 = vshrl.u32 %v1455_v0, 16  ;;  %v975_v16 = vld [vmem:[#allocation2 + $0x28] sm:$0xf] }
  0x92   : > { %v1513_v15 = vshll.u32 %v1455_v0, 16  ;;  %v698_v17 = vor.u32 %v697_v9, %v694_v8  ;;  %v1504_v20 = vrot.slane %v1502_v10, 3  ;;  %v1166_v21 = vshrl.u32 %v1117_v5, 16  ;;  %v638_v23 = vld [vmem:[#allocation2 + $0x20] sm:$0xf8] }
  0x93   : > { %v1500_v7 = vsel %vm336_vm3, %v1491_v59, %v1499_v60  ;;  %9290 = vmatpush3.bf16.msra.mxu0 %v10212_v47  ;;  %v1169_v22 = vshll.u32 %v1117_v5, 16  ;;  %v1507_v26 = vrot.slane %v1505_v13, 4  ;;  %v1512_v27 = vrot.slane %v1510_v14, 3  ;;  %v639_v36 = vld [vmem:[#allocation2 + $0x28] sm:$0xf] }
  0x94   : > { %4005 = vmatprep.mubr.bf16.mxu1 %v1500_v7  ;;  %9291 = vmatprep.subr.bf16.mxu0 %v10213_v58  ;;  %v1515_v28 = vrot.slane %v1513_v15, 4  ;;  %v1174_v29 = vshrl.u32 %v1118_v6, 16  ;;  %v699_v31 = vsel %vm336_vm3, %v690_v12, %v698_v17  ;;  %v1168_v32 = vrot.slane %v1166_v21, 4  ;;  %v1456_v41 = vld [vmem:[#allocation2 + $0x30] sm:$0xf8] }
  0x95   : > { %4006 = vmatmul.mubr.bf16.vlgmr.msra.gmra.mrb[0].mxu1 %v1164_v1  ;;  %v1171_v33 = vrot.slane %v1169_v22, 5  ;;  %v1177_v34 = vshll.u32 %v1118_v6, 16  ;;  %v1508_v37 = vor.u32 %v1507_v26, %v1504_v20  ;;  %v1041_v40 = vrot.slane %v974_v11, 4  ;;  %v1457_v51 = vld [vmem:[#allocation2 + $0x38] sm:$0xf] }
  0x96   : > { %3853 = vmatmul.mubr.bf16.gmra.mrb[4].mxu0 %v699_v31  ;;  %v1516_v38 = vor.u32 %v1515_v28, %v1512_v27  ;;  %v1176_v39 = vrot.slane %v1174_v29, 4  ;;  %v1042_v44 = vrot.slane %v975_v16, 4  ;;  %v701_v46 = vshrl.u32 %v638_v23, 16  ;;  %v1119_v57 = vld [vmem:[#allocation2 + $0x20] sm:$0xf0] }
  0x97   : > { %v1172_v42 = vor.u32 %v1171_v33, %v1168_v32  ;;  %v1179_v43 = vrot.slane %v1177_v34, 5  ;;  %9292 = vmatpush3.bf16.msra.mxu0 %v10214_v24  ;;  %v704_v48 = vshll.u32 %v638_v23, 16  ;;  %v709_v49 = vshrl.u32 %v639_v36, 16  ;;  %v1120_v58 = vld [vmem:[#allocation2 + $0x28] sm:$0x1f] }
  0x98   : > { %v1517_v47 = vsel %vm336_vm3, %v1508_v37, %v1516_v38  ;;  %v712_v50 = vshll.u32 %v639_v36, 16  ;;  %9293 = vmatprep.subr.bf16.mxu0 %v10215_v30  ;;  %v1043_v54 = vsel %vm1034_vm4, %v1041_v40, %v1042_v44  ;;  %v703_v55 = vrot.slane %v701_v46, 3  ;;  %v976_v63 = vld [vmem:[#allocation2 + $0x30] sm:$0xf0]  ;;  %v977_v4 = vld [vmem:[#allocation2 + $0x38] sm:$0xf] }
  0x99   : > { %4013 = vmatprep.mubr.bf16.mxu1 %v1517_v47  ;;  %v1180_v53 = vor.u32 %v1179_v43, %v1176_v39  ;;  %v1519_v56 = vshrl.u32 %v1456_v41, 16  ;;  %3860 = vmatprep.mubr.bf16.mxu0 %v1043_v54  ;;  %v706_v59 = vrot.slane %v704_v48, 4  ;;  %v711_v60 = vrot.slane %v709_v49, 3  ;;  %v640_v9 = vld [vmem:[#allocation2 + $0x30] sm:$0xf8]  ;;  %v513_v38 = vld [vmem:[%s10733_s6 + $0x40] sm:$0xff] }
  0x9a   : > { %v714_v61 = vrot.slane %v712_v50, 4  ;;  %v1522_v62 = vshll.u32 %v1456_v41, 16  ;;  %v1527_v2 = vshrl.u32 %v1457_v51, 16  ;;  %v1530_v3 = vshll.u32 %v1457_v51, 16  ;;  %v641_v10 = vld [vmem:[#allocation2 + $0x38] sm:$0xf] }
  0x9b   : > { %v1181_v0 = vsel %vm1147_vm7, %v1172_v42, %v1180_v53  ;;  %v1521_v1 = vrot.slane %v1519_v56, 3  ;;  %9294 = vmatpush3.bf16.msra.mxu0 %v10216_v52  ;;  %v707_v5 = vor.u32 %v706_v59, %v703_v55  ;;  %v1183_v8 = vshrl.u32 %v1119_v57, 16  ;;  %v1121_v21 = vld [vmem:[#allocation2 + $0x30] sm:$0xf0]  ;;  %v1122_v27 = vld [vmem:[#allocation2 + $0x38] sm:$0x1f] }
  0x9c   : > { %v715_v6 = vor.u32 %v714_v61, %v711_v60  ;;  %v1524_v7 = vrot.slane %v1522_v62, 4  ;;  %v1529_v11 = vrot.slane %v1527_v2, 3  ;;  %v1532_v12 = vrot.slane %v1530_v3, 4  ;;  %v296_v32 = vld [vmem:[#allocation2 + $0x50] sm:$0x8]  ;;  %v514_v39 = vld [vmem:[%s10733_s6 + $0x48] sm:$0xff] }
  0x9d   : > { %4014 = vmatmul.mubr.bf16.gmra.mrb[4].mxu1 %v1181_v0  ;;  %v1186_v13 = vshll.u32 %v1119_v57, 16  ;;  %v1191_v14 = vshrl.u32 %v1120_v58, 16  ;;  %v1185_v17 = vrot.slane %v1183_v8, 4  ;;  %v1194_v20 = vshll.u32 %v1120_v58, 16  ;;  %v350_v40 = vld [vmem:[#allocation2 + $0x48] sm:$0x10] }
  0x9e   : > { %v716_v15 = vsel %vm336_vm3, %v707_v5, %v715_v6  ;;  %v1525_v16 = vor.u32 %v1524_v7, %v1521_v1  ;;  %v1533_v22 = vor.u32 %v1532_v12, %v1529_v11  ;;  %v1044_v26 = vrot.slane %v976_v63, 4  ;;  %v299_v46 = vld [vmem:[#allocation2 + $0x60] sm:$0x8]  ;;  %v515_v47 = vld [vmem:[%s10733_s6 + $0x50] sm:$0xff]  ;;  %v516_v48 = vld [vmem:[%s10733_s6 + $0x58] sm:$0xff] }
  0x9f   : > { %3861 = vmatmul.mubr.bf16.gmra.mrb[8].mxu0 %v716_v15  ;;  %v1188_v23 = vrot.slane %v1186_v13, 5  ;;  %v1193_v24 = vrot.slane %v1191_v14, 4  ;;  %v1196_v28 = vrot.slane %v1194_v20, 5  ;;  %v1045_v29 = vrot.slane %v977_v4, 4  ;;  %v353_v53 = vld [vmem:[#allocation2 + $0x58] sm:$0x10] }
  0xa0   : > { %v718_v30 = vshrl.u32 %v640_v9, 16  ;;  %v721_v31 = vshll.u32 %v640_v9, 16  ;;  %v1534_v33 = vsel %vm336_vm3, %v1525_v16, %v1533_v22  ;;  %v726_v36 = vshrl.u32 %v641_v10, 16  ;;  %v302_v58 = vld [vmem:[#allocation2 + $0x70] sm:$0x8]  ;;  %v517_v59 = vld [vmem:[%s10733_s6 + $0x60] sm:$0xff] }
  0xa1   : > { %v1189_v34 = vor.u32 %v1188_v23, %v1185_v17  ;;  %v729_v37 = vshll.u32 %v641_v10, 16  ;;  %4021 = vmatprep.mubr.bf16.mxu1 %v1534_v33  ;;  %v1197_v41 = vor.u32 %v1196_v28, %v1193_v24  ;;  %v1046_v42 = vsel %vm1034_vm4, %v1044_v26, %v1045_v29  ;;  %v356_v60 = vld [vmem:[#allocation2 + $0x68] sm:$0x10]  ;;  %v305_v19 = vld [vmem:[#allocation2 + $0x80] sm:$0x8]  ;;  %v10829_v15 = vld [vmem:[%s10733_s6 + $0x70] sm:$0xff] }
  0xa2   : > { %v720_v43 = vrot.slane %v718_v30, 3  ;;  %v723_v44 = vrot.slane %v721_v31, 4  ;;  %3868 = vmatprep.mubr.bf16.mxu0 %v1046_v42  ;;  %v728_v49 = vrot.slane %v726_v36, 3  ;;  %v572_v51 = vrot.slane %v540_v35, 4  ;;  %v359_v35 = vld [vmem:[#allocation2 + $0x78] sm:$0x10] }
  0xa3   : > { %v731_v50 = vrot.slane %v729_v37, 4  ;;  %v1200_v52 = vshrl.u32 %v1121_v21, 16  ;;  %v1198_v54 = vsel %vm1147_vm7, %v1189_v34, %v1197_v41  ;;  %v1203_v56 = vshll.u32 %v1121_v21, 16  ;;  %v10217_v0 = vld [vmem:[#allocation8 + $0x160] sm:$0xff]   ;;  %v518_v5 = vld [vmem:[%s10733_s6 + $0x68] sm:$0xff]  ;;  %v10834_v22 = vld [vmem:[%s10733_s6 + $0x78] sm:$0xff] }
  0xa4   : > { %v724_v55 = vor.u32 %v723_v44, %v720_v43  ;;  %v1208_v57 = vshrl.u32 %v1122_v27, 16  ;;  %608 = vst [vmem:[#allocation2 + $0x48] ss:$-4 sps:$4 sm:$0xff] %v572_v51   ;;  %v1211_v63 = vshll.u32 %v1122_v27, 16  ;;  %v297_v18 = vsel %vm10744_vm2, 0, %v296_v32  ;;  %9295 = vmatprep.subr.bf16.mxu0 %v10217_v0  ;;  %v10218_v23 = vld [vmem:[#allocation8 + $0x120] sm:$0xff]  }
  0xa5   : > { %4022 = vmatmul.mubr.bf16.gmra.mrb[8].mxu1 %v1198_v54  ;;  %v732_v61 = vor.u32 %v731_v50, %v728_v49  ;;  %v1202_v62 = vrot.slane %v1200_v52, 4  ;;  %v1205_v1 = vrot.slane %v1203_v56, 5  ;;  %298 = vst [vmem:[#allocation2 + $0x50] sm:$0x8] %v297_v18  ;;  %v541_v3 = vpack.c.bf16 %v514_v39, %v513_v38  ;;  %v308_v10 = vld [vmem:[#allocation2 + $0x90] sm:$0x8]  ;;  %9296 = vmatpush3.bf16.msra.mxu0 %v10218_v23 }
  0xa6   : > { %v1210_v2 = vrot.slane %v1208_v57, 4  ;;  %v351_v4 = vsel %vm10754_vm6, 0, %v350_v40  ;;  %v1213_v7 = vrot.slane %v1211_v63, 5  ;;  %v300_v8 = vsel %vm10744_vm2, 0, %v299_v46  ;;  %v10843_v28 = vld [vmem:[%s10733_s6 + $0x80] sm:$0xff]  ;;  %v10846_v31 = vld [vmem:[%s10733_s6 + $0x88] sm:$0xff] }
  0xa7   : > { %v733_v6 = vsel %vm336_vm3, %v724_v55, %v732_v61  ;;  %352 = vst [vmem:[#allocation2 + $0x48] sm:$0x10] %v351_v4  ;;  %v542_v9 = vpack.c.bf16 %v516_v48, %v515_v47  ;;  %v1206_v11 = vor.u32 %v1205_v1, %v1202_v62  ;;  %v573_v12 = vrot.slane %v541_v3, 4  ;;  %301 = vst [vmem:[#allocation2 + $0x60] sm:$0x8] %v300_v8  ;;  %v10851_v33 = vld [vmem:[%s10733_s6 + $0x90] sm:$0xff] }
  0xa8   : > { %3869 = vmatmul.mubr.bf16.gmra.mrb[12].mxu0 %v733_v6  ;;  %v354_v13 = vsel %vm10754_vm6, 0, %v353_v53  ;;  %v303_v14 = vsel %vm10744_vm2, 0, %v302_v58  ;;  %v1214_v16 = vor.u32 %v1213_v7, %v1210_v2  ;;  %v543_v20 = vpack.c.bf16 %v518_v5, %v517_v59  ;;  %v362_v29 = vld [vmem:[#allocation2 + $0x88] sm:$0x10]  ;;  %v10854_v34 = vld [vmem:[%s10733_s6 + $0x98] sm:$0xff] }
  0xa9   : > { %v574_v17 = vrot.slane %v542_v9, 4  ;;  %355 = vst [vmem:[#allocation2 + $0x58] sm:$0x10] %v354_v13  ;;  %304 = vst [vmem:[#allocation2 + $0x70] sm:$0x8] %v303_v14  ;;  %v357_v21 = vsel %vm10754_vm6, 0, %v356_v60  ;;  %v544_v40 = vpack.c.bf16 %v10834_v22, %v10829_v15  ;;  %v545_v51 = vpack.c.bf16 %v10846_v31, %v10843_v28 }
  0xaa   : > { %610 = vst [vmem:[#allocation2 + $0x58] ss:$-4 sps:$4 sm:$0xff] %v573_v12   ;;  %358 = vst [vmem:[#allocation2 + $0x68] sm:$0x10] %v357_v21  ;;  %v306_v24 = vsel %vm10744_vm2, 0, %v305_v19  ;;  %v360_v26 = vsel %vm10754_vm6, 0, %v359_v35  ;;  %v1215_v38 = vsel %vm1147_vm7, %v1206_v11, %v1214_v16  ;;  %v546_v52 = vpack.c.bf16 %v10854_v34, %v10851_v33 }
  0xab   : > { %v309_v27 = vsel %vm10744_vm2, 0, %v308_v10  ;;  %612 = vst [vmem:[#allocation2 + $0x68] ss:$-4 sps:$4 sm:$0xff] %v574_v17   ;;  %v575_v30 = vrot.slane %v543_v20, 4  ;;  %307 = vst [vmem:[#allocation2 + $0x80] sm:$0x8] %v306_v24 }
  0xac   : > { %361 = vst [vmem:[#allocation2 + $0x78] sm:$0x10] %v360_v26  ;;  %310 = vst [vmem:[#allocation2 + $0x90] sm:$0x8] %v309_v27  ;;  %v363_v32 = vsel %vm10754_vm6, 0, %v362_v29  ;;  %v10219_v62 = vld [vmem:[#allocation8 + $0x168] sm:$0xff]  }
  0xad   : > { %v1458_v36 = vld [vmem:[#allocation2 + $0x40] sm:$0xf8]  ;;  %v1459_v37 = vld [vmem:[#allocation2 + $0x48] sm:$0xf]  ;;  %364 = vst [vmem:[#allocation2 + $0x88] sm:$0x10] %v363_v32  ;;  %9297 = vmatprep.subr.bf16.mxu0 %v10219_v62 }
  0xae   : > { %v978_v39 = vld [vmem:[#allocation2 + $0x40] sm:$0xf0]  ;;  %v1536_v41 = vshrl.u32 %v1458_v36, 16  ;;  %v1539_v42 = vshll.u32 %v1458_v36, 16  ;;  %v1544_v43 = vshrl.u32 %v1459_v37, 16  ;;  %v1547_v44 = vshll.u32 %v1459_v37, 16 }
  0xaf   : > { %v979_v46 = vld [vmem:[#allocation2 + $0x48] sm:$0xf]  ;;  %614 = vst [vmem:[#allocation2 + $0x78] ss:$-4 sps:$4 sm:$0xff] %v575_v30   ;;  %v1047_v47 = vrot.slane %v978_v39, 4  ;;  %v577_v22 = vrot.slane %v545_v51, 4 }
  0xb0   : > { %v1048_v48 = vrot.slane %v979_v46, 4  ;;  %v642_v49 = vld [vmem:[#allocation2 + $0x40] sm:$0xf8]  ;;  %v643_v50 = vld [vmem:[#allocation2 + $0x48] sm:$0xf]  ;;  %v1538_v53 = vrot.slane %v1536_v41, 3 }
  0xb1   : > { %v1541_v54 = vrot.slane %v1539_v42, 4  ;;  %v1546_v55 = vrot.slane %v1544_v43, 3  ;;  %v1549_v56 = vrot.slane %v1547_v44, 4  ;;  %v1123_v57 = vld [vmem:[#allocation2 + $0x40] sm:$0xf0]  ;;  %v735_v59 = vshrl.u32 %v642_v49, 16 }
  0xb2   : > { %v1049_v58 = vsel %vm1034_vm4, %v1047_v47, %v1048_v48  ;;  %v738_v60 = vshll.u32 %v642_v49, 16  ;;  %v743_v61 = vshrl.u32 %v643_v50, 16  ;;  %v746_v19 = vshll.u32 %v643_v50, 16  ;;  %v1460_v35 = vld [vmem:[#allocation2 + $0x50] sm:$0xf8]  ;;  %v10220_v27 = vld [vmem:[#allocation8 + $0x128] sm:$0xff]  }
  0xb3   : > { %v1542_v63 = vor.u32 %v1541_v54, %v1538_v53  ;;  %v1550_v18 = vor.u32 %v1549_v56, %v1546_v55  ;;  %3876 = vmatprep.mubr.bf16.mxu0 %v1049_v58  ;;  %v1461_v0 = vld [vmem:[#allocation2 + $0x58] sm:$0xf]  ;;  %v1217_v1 = vshrl.u32 %v1123_v57, 16  ;;  %v737_v2 = vrot.slane %v735_v59, 3  ;;  %v1124_v6 = vld [vmem:[#allocation2 + $0x48] sm:$0x1f]  ;;  %9298 = vmatpush3.bf16.msra.mxu0 %v10220_v27 }
  0xb4   : > { %v740_v3 = vrot.slane %v738_v60, 4  ;;  %v745_v4 = vrot.slane %v743_v61, 3  ;;  %v1553_v5 = vshrl.u32 %v1460_v35, 16  ;;  %v748_v8 = vrot.slane %v746_v19, 4  ;;  %v980_v11 = vld [vmem:[#allocation2 + $0x50] sm:$0xf0] }
  0xb5   : > { %v1551_v7 = vsel %vm336_vm3, %v1542_v63, %v1550_v18  ;;  %v1556_v9 = vshll.u32 %v1460_v35, 16  ;;  %v1561_v10 = vshrl.u32 %v1461_v0, 16  ;;  %v1564_v14 = vshll.u32 %v1461_v0, 16  ;;  %v981_v17 = vld [vmem:[#allocation2 + $0x58] sm:$0xf]  ;;  %v10227_v33 = vld [vmem:[#allocation8 + $0x1d0] sm:$0xff]  }
  0xb6   : > { %4029 = vmatprep.mubr.bf16.mxu1 %v1551_v7  ;;  %v741_v12 = vor.u32 %v740_v3, %v737_v2  ;;  %v1555_v13 = vrot.slane %v1553_v5, 3  ;;  %v1219_v16 = vrot.slane %v1217_v1, 4  ;;  %v749_v20 = vor.u32 %v748_v8, %v745_v4  ;;  %v644_v26 = vld [vmem:[#allocation2 + $0x50] sm:$0xf8]  ;;  %v645_v37 = vld [vmem:[#allocation2 + $0x58] sm:$0xf] }
  0xb7   : > { %4030 = vmatmul.mubr.bf16.gmra.mrb[12].mxu1 %v1215_v38  ;;  %v1558_v21 = vrot.slane %v1556_v9, 4  ;;  %v1563_v23 = vrot.slane %v1561_v10, 3  ;;  %v1220_v24 = vshll.u32 %v1123_v57, 16  ;;  %v1566_v29 = vrot.slane %v1564_v14, 4  ;;  %v1462_v48 = vld [vmem:[#allocation2 + $0x60] sm:$0xf8] }
  0xb8   : > { %v1225_v30 = vshrl.u32 %v1124_v6, 16  ;;  %v1228_v32 = vshll.u32 %v1124_v6, 16  ;;  %v1050_v36 = vrot.slane %v980_v11, 4  ;;  %v750_v39 = vsel %vm336_vm3, %v741_v12, %v749_v20  ;;  %v1463_v55 = vld [vmem:[#allocation2 + $0x68] sm:$0xf]  ;;  %v10221_v9 = vld [vmem:[#allocation8 + $0x170] sm:$0xff]  }
  0xb9   : > { %v1559_v41 = vor.u32 %v1558_v21, %v1555_v13  ;;  %v1222_v42 = vrot.slane %v1220_v24, 5  ;;  %v1051_v43 = vrot.slane %v981_v17, 4  ;;  %3877 = vmatmul.mubr.bf16.gmra.mrb[16].mxu0 %v750_v39  ;;  %v1567_v44 = vor.u32 %v1566_v29, %v1563_v23  ;;  %v1125_v60 = vld [vmem:[#allocation2 + $0x50] sm:$0xf0]  ;;  %v1126_v19 = vld [vmem:[#allocation2 + $0x58] sm:$0x1f]  ;;  %9299 = vmatprep.subr.bf16.mxu0 %v10221_v9 }
  0xba   : > { %v1227_v38 = vrot.slane %v1225_v30, 4  ;;  %v1230_v46 = vrot.slane %v1228_v32, 5  ;;  %v752_v47 = vshrl.u32 %v644_v26, 16  ;;  %v755_v53 = vshll.u32 %v644_v26, 16  ;;  %v982_v3 = vld [vmem:[#allocation2 + $0x60] sm:$0xf0] }
  0xbb   : > { %v1223_v49 = vor.u32 %v1222_v42, %v1219_v16  ;;  %v1052_v50 = vsel %vm1034_vm4, %v1050_v36, %v1051_v43  ;;  %v760_v54 = vshrl.u32 %v645_v37, 16  ;;  %v1568_v56 = vsel %vm336_vm3, %v1559_v41, %v1567_v44  ;;  %v983_v8 = vld [vmem:[#allocation2 + $0x68] sm:$0xf]  ;;  %v646_v14 = vld [vmem:[#allocation2 + $0x60] sm:$0xf8] }
  0xbc   : > { %v1231_v57 = vor.u32 %v1230_v46, %v1227_v38  ;;  %3884 = vmatprep.mubr.bf16.mxu0 %v1052_v50  ;;  %v754_v58 = vrot.slane %v752_v47, 3  ;;  %v763_v59 = vshll.u32 %v645_v37, 16  ;;  %4037 = vmatprep.mubr.bf16.mxu1 %v1568_v56  ;;  %v757_v61 = vrot.slane %v755_v53, 4  ;;  %v647_v23 = vld [vmem:[#allocation2 + $0x68] sm:$0xf] }
  0xbd   : > { %v762_v62 = vrot.slane %v760_v54, 3  ;;  %v1570_v63 = vshrl.u32 %v1462_v48, 16  ;;  %v1573_v18 = vshll.u32 %v1462_v48, 16  ;;  %v1578_v1 = vshrl.u32 %v1463_v55, 16  ;;  %v1464_v39 = vld [vmem:[#allocation2 + $0x70] sm:$0xf8] }
  0xbe   : > { %v1232_v35 = vsel %vm1147_vm7, %v1223_v49, %v1231_v57  ;;  %v765_v0 = vrot.slane %v763_v59, 4  ;;  %v1581_v2 = vshll.u32 %v1463_v55, 16  ;;  %v758_v4 = vor.u32 %v757_v61, %v754_v58  ;;  %v1465_v38 = vld [vmem:[#allocation2 + $0x78] sm:$0xf]  ;;  %v1127_v46 = vld [vmem:[#allocation2 + $0x60] sm:$0xf0] }
  0xbf   : > { %4038 = vmatmul.mubr.bf16.gmra.mrb[16].mxu1 %v1232_v35  ;;  %v1572_v5 = vrot.slane %v1570_v63, 3  ;;  %v1575_v6 = vrot.slane %v1573_v18, 4  ;;  %v1234_v7 = vshrl.u32 %v1125_v60, 16  ;;  %v1580_v11 = vrot.slane %v1578_v1, 3  ;;  %v1128_v53 = vld [vmem:[#allocation2 + $0x68] sm:$0x1f] }
  0xc0   : > { %v766_v10 = vor.u32 %v765_v0, %v762_v62  ;;  %v1583_v12 = vrot.slane %v1581_v2, 4  ;;  %v1237_v13 = vshll.u32 %v1125_v60, 16  ;;  %v1242_v20 = vshrl.u32 %v1126_v19, 16  ;;  %v984_v58 = vld [vmem:[#allocation2 + $0x70] sm:$0xf0]  ;;  %v10223_v2 = vld [vmem:[#allocation8 + $0x1c0] sm:$0xff]  }
  0xc1   : > { %v1576_v16 = vor.u32 %v1575_v6, %v1572_v5  ;;  %v1236_v17 = vrot.slane %v1234_v7, 4  ;;  %v1245_v21 = vshll.u32 %v1126_v19, 16  ;;  %v1053_v29 = vrot.slane %v982_v3, 4  ;;  %v985_v63 = vld [vmem:[#allocation2 + $0x78] sm:$0xf]  ;;  %v10222_v18 = vld [vmem:[#allocation8 + $0x130] sm:$0xff]   ;;  %9399 = vmatprep.subr.bf16.mxu1 %v10223_v2 }
  0xc2   : > { %v767_v24 = vsel %vm336_vm3, %v758_v4, %v766_v10  ;;  %v1584_v26 = vor.u32 %v1583_v12, %v1580_v11  ;;  %v1239_v27 = vrot.slane %v1237_v13, 5  ;;  %v1244_v30 = vrot.slane %v1242_v20, 4  ;;  %v648_v7 = vld [vmem:[#allocation2 + $0x70] sm:$0xf8]  ;;  %9300 = vmatpush3.bf16.msra.mxu0 %v10222_v18  ;;  %v649_v13 = vld [vmem:[#allocation2 + $0x78] sm:$0xf] }
  0xc3   : > { %3885 = vmatmul.mubr.bf16.gmra.mrb[20].mxu0 %v767_v24  ;;  %v1247_v32 = vrot.slane %v1245_v21, 5  ;;  %v1054_v36 = vrot.slane %v983_v8, 4  ;;  %v769_v37 = vshrl.u32 %v646_v14, 16  ;;  %v772_v43 = vshll.u32 %v646_v14, 16  ;;  %v10224_v8 = vld [vmem:[#allocation8 + $0x180] sm:$0xff]   ;;  %v10225_v14 = vld [vmem:[#allocation8 + $0x1c8] sm:$0xff]  }
  0xc4   : > { %v1585_v41 = vsel %vm336_vm3, %v1576_v16, %v1584_v26  ;;  %v1240_v42 = vor.u32 %v1239_v27, %v1236_v17  ;;  %v777_v44 = vshrl.u32 %v647_v23, 16  ;;  %v780_v50 = vshll.u32 %v647_v23, 16  ;;  %v1129_v23 = vld [vmem:[#allocation2 + $0x70] sm:$0xf0]  ;;  %9400 = vmatpush3.bf16.msra.mxu1 %v10224_v8  ;;  %618 = vst [vmem:[#allocation2 + $0x98] ss:$-4 sps:$4 sm:$0xff] %v577_v22  }
  0xc5   : > { %4045 = vmatprep.mubr.bf16.mxu1 %v1585_v41  ;;  %v1248_v47 = vor.u32 %v1247_v32, %v1244_v30  ;;  %v1055_v48 = vsel %vm1034_vm4, %v1053_v29, %v1054_v36  ;;  %v771_v49 = vrot.slane %v769_v37, 3  ;;  %v774_v54 = vrot.slane %v772_v43, 4  ;;  %9401 = vmatprep.subr.bf16.mxu1 %v10225_v14  ;;  %v311_v41 = vld [vmem:[#allocation2 + $0xa0] sm:$0x8]  ;;  %v10902_v8 = vld [vmem:[%s10733_s6 + $0xc8] sm:$0xff] }
  0xc6   : > { %3892 = vmatprep.mubr.bf16.mxu0 %v1055_v48  ;;  %v779_v55 = vrot.slane %v777_v44, 3  ;;  %v1587_v56 = vshrl.u32 %v1464_v39, 16  ;;  %v1590_v57 = vshll.u32 %v1464_v39, 16  ;;  %v782_v60 = vrot.slane %v780_v50, 4  ;;  %v1130_v39 = vld [vmem:[#allocation2 + $0x78] sm:$0x1f] }
  0xc7   : > { %v1249_v59 = vsel %vm1147_vm7, %v1240_v42, %v1248_v47  ;;  %v1595_v61 = vshrl.u32 %v1465_v38, 16  ;;  %v1598_v62 = vshll.u32 %v1465_v38, 16  ;;  %v775_v19 = vor.u32 %v774_v54, %v771_v49  ;;  %v314_v47 = vld [vmem:[#allocation2 + $0xb0] sm:$0x8]  ;;  %v525_v54 = vld [vmem:[%s10733_s6 + $0xa0] sm:$0xff] }
  0xc8   : > { %4046 = vmatmul.mubr.bf16.gmra.mrb[20].mxu1 %v1249_v59  ;;  %v1589_v35 = vrot.slane %v1587_v56, 3  ;;  %v1592_v0 = vrot.slane %v1590_v57, 4  ;;  %v1251_v1 = vshrl.u32 %v1127_v46, 16  ;;  %v783_v3 = vor.u32 %v782_v60, %v779_v55  ;;  %v526_v55 = vld [vmem:[%s10733_s6 + $0xa8] sm:$0xff]  ;;  %v323_v14 = vld [vmem:[#allocation2 + $0xe0] sm:$0x8] }
  0xc9   : > { %v1597_v4 = vrot.slane %v1595_v61, 3  ;;  %v1600_v5 = vrot.slane %v1598_v62, 4  ;;  %v1254_v6 = vshll.u32 %v1127_v46, 16  ;;  %v1259_v11 = vshrl.u32 %v1128_v53, 16  ;;  %v365_v46 = vld [vmem:[#allocation2 + $0x98] sm:$0x10] }
  0xca   : > { %v1593_v9 = vor.u32 %v1592_v0, %v1589_v35  ;;  %v1253_v10 = vrot.slane %v1251_v1, 4  ;;  %v1262_v12 = vshll.u32 %v1128_v53, 16  ;;  %v784_v16 = vsel %vm336_vm3, %v775_v19, %v783_v3  ;;  %v368_v56 = vld [vmem:[#allocation2 + $0xa8] sm:$0x10]  ;;  %v317_v61 = vld [vmem:[#allocation2 + $0xc0] sm:$0x8] }
  0xcb   : > { %v1601_v17 = vor.u32 %v1600_v5, %v1597_v4  ;;  %v1256_v20 = vrot.slane %v1254_v6, 5  ;;  %v1056_v21 = vrot.slane %v984_v58, 4  ;;  %3893 = vmatmul.mubr.bf16.gmra.mrb[24].mxu0 %v784_v16  ;;  %v1261_v24 = vrot.slane %v1259_v11, 4  ;;  %v371_v62 = vld [vmem:[#allocation2 + $0xb8] sm:$0x10] }
  0xcc   : > { %v1264_v26 = vrot.slane %v1262_v12, 5  ;;  %v1057_v27 = vrot.slane %v985_v63, 4  ;;  %v786_v29 = vshrl.u32 %v648_v7, 16  ;;  %v789_v36 = vshll.u32 %v648_v7, 16  ;;  %v10226_v63 = vld [vmem:[#allocation8 + $0x188] sm:$0xff]   ;;  %v528_v5 = vld [vmem:[%s10733_s6 + $0xb8] sm:$0xff] }
  0xcd   : > { %v1602_v30 = vsel %vm336_vm3, %v1593_v9, %v1601_v17  ;;  %v1257_v32 = vor.u32 %v1256_v20, %v1253_v10  ;;  %v794_v37 = vshrl.u32 %v649_v13, 16  ;;  %v797_v38 = vshll.u32 %v649_v13, 16  ;;  %v320_v35 = vld [vmem:[#allocation2 + $0xd0] sm:$0x8]  ;;  %v374_v0 = vld [vmem:[#allocation2 + $0xc8] sm:$0x10]  ;;  %9402 = vmatpush3.bf16.msra.mxu1 %v10226_v63 }
  0xce   : > { %4053 = vmatprep.mubr.bf16.mxu1 %v1602_v30  ;;  %v1265_v42 = vor.u32 %v1264_v26, %v1261_v24  ;;  %v1058_v43 = vsel %vm1034_vm4, %v1056_v21, %v1057_v27  ;;  %v788_v44 = vrot.slane %v786_v29, 3  ;;  %v791_v48 = vrot.slane %v789_v36, 4  ;;  %v10899_v7 = vld [vmem:[%s10733_s6 + $0xc0] sm:$0xff]  ;;  %v10920_v24 = vld [vmem:[%s10733_s6 + $0xd8] sm:$0xff]  ;;  %9403 = vmatprep.subr.bf16.mxu1 %v10227_v33  ;;  %v10228_v26 = vld [vmem:[#allocation8 + $0x190] sm:$0xff]  }
  0xcf   : > { %3900 = vmatprep.mubr.bf16.mxu0 %v1058_v43  ;;  %v796_v49 = vrot.slane %v794_v37, 3  ;;  %v576_v50 = vrot.slane %v544_v40, 4  ;;  %v1268_v53 = vshrl.u32 %v1129_v23, 16  ;;  %v799_v58 = vrot.slane %v797_v38, 4  ;;  %v527_v40 = vld [vmem:[%s10733_s6 + $0xb0] sm:$0xff]  ;;  %v10229_v63 = vld [vmem:[#allocation8 + $0x1d8] sm:$0xff]  }
  0xd0   : > { %v1266_v57 = vsel %vm1147_vm7, %v1257_v32, %v1265_v42  ;;  %v1271_v59 = vshll.u32 %v1129_v23, 16  ;;  %v1276_v60 = vshrl.u32 %v1130_v39, 16  ;;  %v792_v18 = vor.u32 %v791_v48, %v788_v44  ;;  %v10917_v23 = vld [vmem:[%s10733_s6 + $0xd0] sm:$0xff]  ;;  %v2753_v25 = vld [vmem:[#allocation2 + $0x40] sm:$0xf0] }
  0xd1   : > { %4054 = vmatmul.mubr.bf16.gmra.mrb[24].mxu1 %v1266_v57  ;;  %616 = vst [vmem:[#allocation2 + $0x88] ss:$-4 sps:$4 sm:$0xff] %v576_v50   ;;  %v10882_v19 = vrot.slane %v1268_v53, 4  ;;  %v1279_v15 = vshll.u32 %v1130_v39, 16  ;;  %v800_v1 = vor.u32 %v799_v58, %v796_v49  ;;  %v312_v4 = vsel %vm10744_vm2, 0, %v311_v41 }
  0xd2   : > { %v1273_v2 = vrot.slane %v1271_v59, 5  ;;  %v1278_v3 = vrot.slane %v1276_v60, 4  ;;  %313 = vst [vmem:[#allocation2 + $0xa0] sm:$0x8] %v312_v4  ;;  %v578_v28 = vrot.slane %v546_v52, 4  ;;  %v366_v31 = vsel %vm10754_vm6, 0, %v365_v46  ;;  %9404 = vmatpush3.bf16.msra.mxu1 %v10228_v26 }
  0xd3   : > { %v1281_v6 = vrot.slane %v1279_v15, 5  ;;  %v315_v51 = vsel %vm10744_vm2, 0, %v314_v47  ;;  %v801_v9 = vsel %vm336_vm3, %v792_v18, %v800_v1  ;;  %367 = vst [vmem:[#allocation2 + $0x98] sm:$0x10] %v366_v31  ;;  %v547_v10 = vpack.c.bf16 %v526_v55, %v525_v54  ;;  %v1468_v57 = vld [vmem:[#allocation2 + $0x90] sm:$0xf8]  ;;  %9405 = vmatprep.subr.bf16.mxu1 %v10229_v63 }
  0xd4   : > { %316 = vst [vmem:[#allocation2 + $0xb0] sm:$0x8] %v315_v51  ;;  %v369_v11 = vsel %vm10754_vm6, 0, %v368_v56  ;;  %3901 = vmatmul.mubr.bf16.gmra.mrb[28].mxu0 %v801_v9  ;;  %v1274_v34 = vor.u32 %v1273_v2, %v10882_v19  ;;  %620 = vst [vmem:[#allocation2 + $0xa8] ss:$-4 sps:$4 sm:$0xff] %v578_v28   ;;  %v318_v52 = vsel %vm10744_vm2, 0, %v317_v61  ;;  %v548_v12 = vpack.c.bf16 %v528_v5, %v527_v40 }
  0xd5   : > { %370 = vst [vmem:[#allocation2 + $0xa8] sm:$0x10] %v369_v11  ;;  %v372_v13 = vsel %vm10754_vm6, 0, %v371_v62  ;;  %v1282_v16 = vor.u32 %v1281_v6, %v1278_v3  ;;  %v579_v17 = vrot.slane %v547_v10, 4  ;;  %319 = vst [vmem:[#allocation2 + $0xc0] sm:$0x8] %v318_v52  ;;  %v549_v37 = vpack.c.bf16 %v10902_v8, %v10899_v7 }
  0xd6   : > { %373 = vst [vmem:[#allocation2 + $0xb8] sm:$0x10] %v372_v13  ;;  %v321_v20 = vsel %vm10744_vm2, 0, %v320_v35  ;;  %v375_v21 = vsel %vm10754_vm6, 0, %v374_v0  ;;  %v580_v27 = vrot.slane %v548_v12, 4  ;;  %v324_v29 = vsel %vm10744_vm2, 0, %v323_v14 }
  0xd7   : > { %322 = vst [vmem:[#allocation2 + $0xd0] sm:$0x8] %v321_v20  ;;  %376 = vst [vmem:[#allocation2 + $0xc8] sm:$0x10] %v375_v21  ;;  %v1283_v38 = vsel %vm1147_vm7, %v1274_v34, %v1282_v16  ;;  %v550_v50 = vpack.c.bf16 %v10920_v24, %v10917_v23  ;;  %v1469_v62 = vld [vmem:[#allocation2 + $0x98] sm:$0xf] }
  0xd8   : > { %v1466_v30 = vld [vmem:[#allocation2 + $0x80] sm:$0xf8]  ;;  %v1467_v32 = vld [vmem:[#allocation2 + $0x88] sm:$0xf]  ;;  %622 = vst [vmem:[#allocation2 + $0xb8] ss:$-4 sps:$4 sm:$0xff] %v579_v17  }
  0xd9   : > { %v986_v36 = vld [vmem:[#allocation2 + $0x80] sm:$0xf0]  ;;  %325 = vst [vmem:[#allocation2 + $0xe0] sm:$0x8] %v324_v29  ;;  %v1604_v39 = vshrl.u32 %v1466_v30, 16  ;;  %v1607_v41 = vshll.u32 %v1466_v30, 16 }
  0xda   : > { %v1612_v42 = vshrl.u32 %v1467_v32, 16  ;;  %v1615_v43 = vshll.u32 %v1467_v32, 16  ;;  %v987_v44 = vld [vmem:[#allocation2 + $0x88] sm:$0xf]  ;;  %624 = vst [vmem:[#allocation2 + $0xc8] ss:$-4 sps:$4 sm:$0xff] %v580_v27  }
  0xdb   : > { %v1059_v46 = vrot.slane %v986_v36, 4  ;;  %v1060_v47 = vrot.slane %v987_v44, 4  ;;  %v650_v48 = vld [vmem:[#allocation2 + $0x80] sm:$0xf8]  ;;  %v651_v49 = vld [vmem:[#allocation2 + $0x88] sm:$0xf] }
  0xdc   : > { %v1606_v53 = vrot.slane %v1604_v39, 3  ;;  %v1609_v54 = vrot.slane %v1607_v41, 4  ;;  %v1614_v55 = vrot.slane %v1612_v42, 3  ;;  %v1617_v56 = vrot.slane %v1615_v43, 4  ;;  %v1131_v40 = vld [vmem:[#allocation2 + $0x80] sm:$0xf0] }
  0xdd   : > { %v1061_v58 = vsel %vm1034_vm4, %v1059_v46, %v1060_v47  ;;  %v803_v59 = vshrl.u32 %v650_v48, 16  ;;  %v806_v60 = vshll.u32 %v650_v48, 16  ;;  %v811_v61 = vshrl.u32 %v651_v49, 16  ;;  %v1132_v3 = vld [vmem:[#allocation2 + $0x88] sm:$0x1f]  ;;  %v10230_v51 = vld [vmem:[#allocation8 + $0x198] sm:$0xff]  }
  0xde   : > { %v1610_v18 = vor.u32 %v1609_v54, %v1606_v53  ;;  %v1618_v19 = vor.u32 %v1617_v56, %v1614_v55  ;;  %3908 = vmatprep.mubr.bf16.mxu0 %v1061_v58  ;;  %v814_v15 = vshll.u32 %v651_v49, 16  ;;  %v1621_v22 = vshrl.u32 %v1468_v57, 16  ;;  %v988_v31 = vld [vmem:[#allocation2 + $0x90] sm:$0xf0]  ;;  %v989_v34 = vld [vmem:[#allocation2 + $0x98] sm:$0xf]  ;;  %9406 = vmatpush3.bf16.msra.mxu1 %v10230_v51 }
  0xdf   : > { %v805_v35 = vrot.slane %v803_v59, 3  ;;  %v808_v0 = vrot.slane %v806_v60, 4  ;;  %v813_v1 = vrot.slane %v811_v61, 3  ;;  %v1624_v2 = vshll.u32 %v1468_v57, 16  ;;  %v10231_v52 = vld [vmem:[#allocation8 + $0x178] sm:$0xff]   ;;  %v10233_v47 = vld [vmem:[#allocation8 + $0x1e0] sm:$0xff]  }
  0xe0   : > { %v1619_v4 = vsel %vm336_vm3, %v1610_v18, %v1618_v19  ;;  %v816_v5 = vrot.slane %v814_v15, 4  ;;  %v1623_v6 = vrot.slane %v1621_v22, 3  ;;  %v1629_v28 = vshrl.u32 %v1469_v62, 16  ;;  %v652_v17 = vld [vmem:[#allocation2 + $0x90] sm:$0xf8]  ;;  %9301 = vmatprep.subr.bf16.mxu0 %v10231_v52  ;;  %v10232_v41 = vld [vmem:[#allocation8 + $0x138] sm:$0xff]   ;;  %9407 = vmatprep.subr.bf16.mxu1 %v10233_v47 }
  0xe1   : > { %4061 = vmatprep.mubr.bf16.mxu1 %v1619_v4  ;;  %v809_v9 = vor.u32 %v808_v0, %v805_v35  ;;  %v1626_v10 = vrot.slane %v1624_v2, 4  ;;  %v1632_v11 = vshll.u32 %v1469_v62, 16  ;;  %v1285_v33 = vshrl.u32 %v1131_v40, 16  ;;  %v653_v29 = vld [vmem:[#allocation2 + $0x98] sm:$0xf]  ;;  %9302 = vmatpush3.bf16.msra.mxu0 %v10232_v41  ;;  %v10234_v56 = vld [vmem:[#allocation8 + $0x1a0] sm:$0xff]  }
  0xe2   : > { %4062 = vmatmul.mubr.bf16.gmra.mrb[28].mxu1 %v1283_v38  ;;  %v817_v12 = vor.u32 %v816_v5, %v813_v1  ;;  %v1631_v13 = vrot.slane %v1629_v28, 3  ;;  %v1288_v14 = vshll.u32 %v1131_v40, 16  ;;  %v1293_v16 = vshrl.u32 %v1132_v3, 16  ;;  %v1470_v46 = vld [vmem:[#allocation2 + $0xa0] sm:$0xf8]  ;;  %v10235_v62 = vld [vmem:[#allocation8 + $0x1e8] sm:$0xff]  }
  0xe3   : > { %v1627_v20 = vor.u32 %v1626_v10, %v1623_v6  ;;  %v1634_v21 = vrot.slane %v1632_v11, 4  ;;  %v1287_v26 = vrot.slane %v1285_v33, 4  ;;  %v1296_v27 = vshll.u32 %v1132_v3, 16  ;;  %v1471_v55 = vld [vmem:[#allocation2 + $0xa8] sm:$0xf]  ;;  %9408 = vmatpush3.bf16.msra.mxu1 %v10234_v56 }
  0xe4   : > { %v818_v30 = vsel %vm336_vm3, %v809_v9, %v817_v12  ;;  %v1290_v32 = vrot.slane %v1288_v14, 5  ;;  %v1295_v36 = vrot.slane %v1293_v16, 4  ;;  %v1062_v39 = vrot.slane %v988_v31, 4  ;;  %v1133_v61 = vld [vmem:[#allocation2 + $0x90] sm:$0xf0]  ;;  %v10236_v2 = vld [vmem:[#allocation8 + $0x1a8] sm:$0xff]   ;;  %9409 = vmatprep.subr.bf16.mxu1 %v10235_v62 }
  0xe5   : > { %3909 = vmatmul.mubr.bf16.gmra.mrb[32].mxu0 %v818_v30  ;;  %v1635_v42 = vor.u32 %v1634_v21, %v1631_v13  ;;  %v1298_v43 = vrot.slane %v1296_v27, 5  ;;  %v1063_v44 = vrot.slane %v989_v34, 4  ;;  %v820_v38 = vshrl.u32 %v652_v17, 16  ;;  %v1134_v1 = vld [vmem:[#allocation2 + $0x98] sm:$0x1f] }
  0xe6   : > { %v1291_v48 = vor.u32 %v1290_v32, %v1287_v26  ;;  %v823_v49 = vshll.u32 %v652_v17, 16  ;;  %v828_v53 = vshrl.u32 %v653_v29, 16  ;;  %v831_v54 = vshll.u32 %v653_v29, 16  ;;  %v990_v28 = vld [vmem:[#allocation2 + $0xa0] sm:$0xf0] }
  0xe7   : > { %v1636_v57 = vsel %vm336_vm3, %v1627_v20, %v1635_v42  ;;  %v1299_v58 = vor.u32 %v1298_v43, %v1295_v36  ;;  %v1064_v59 = vsel %vm1034_vm4, %v1062_v39, %v1063_v44  ;;  %v822_v60 = vrot.slane %v820_v38, 3  ;;  %v991_v31 = vld [vmem:[#allocation2 + $0xa8] sm:$0xf]  ;;  %v654_v33 = vld [vmem:[#allocation2 + $0xa0] sm:$0xf8]  ;;  %9410 = vmatpush3.bf16.msra.mxu1 %v10236_v2 }
  0xe8   : > { %4069 = vmatprep.mubr.bf16.mxu1 %v1636_v57  ;;  %3916 = vmatprep.mubr.bf16.mxu0 %v1064_v59  ;;  %v825_v63 = vrot.slane %v823_v49, 4  ;;  %v830_v18 = vrot.slane %v828_v53, 3  ;;  %v833_v19 = vrot.slane %v831_v54, 4  ;;  %v1638_v15 = vshrl.u32 %v1470_v46, 16  ;;  %v655_v14 = vld [vmem:[#allocation2 + $0xa8] sm:$0xf] }
  0xe9   : > { %v1300_v22 = vsel %vm1147_vm7, %v1291_v48, %v1299_v58  ;;  %v1641_v40 = vshll.u32 %v1470_v46, 16  ;;  %v1646_v35 = vshrl.u32 %v1471_v55, 16  ;;  %v1649_v0 = vshll.u32 %v1471_v55, 16  ;;  %v1472_v32 = vld [vmem:[#allocation2 + $0xb0] sm:$0xf8] }
  0xea   : > { %4070 = vmatmul.mubr.bf16.gmra.mrb[32].mxu1 %v1300_v22  ;;  %v826_v3 = vor.u32 %v825_v63, %v822_v60  ;;  %v834_v4 = vor.u32 %v833_v19, %v830_v18  ;;  %v1640_v5 = vrot.slane %v1638_v15, 3  ;;  %v1302_v6 = vshrl.u32 %v1133_v61, 16  ;;  %v1473_v43 = vld [vmem:[#allocation2 + $0xb8] sm:$0xf]  ;;  %v1135_v48 = vld [vmem:[#allocation2 + $0xa0] sm:$0xf0] }
  0xeb   : > { %v1643_v51 = vrot.slane %v1641_v40, 4  ;;  %v1648_v9 = vrot.slane %v1646_v35, 3  ;;  %v1651_v10 = vrot.slane %v1649_v0, 4  ;;  %v1305_v11 = vshll.u32 %v1133_v61, 16  ;;  %v1136_v56 = vld [vmem:[#allocation2 + $0xa8] sm:$0x1f] }
  0xec   : > { %v835_v34 = vsel %vm336_vm3, %v826_v3, %v834_v4  ;;  %v1304_v52 = vrot.slane %v1302_v6, 4  ;;  %v1310_v12 = vshrl.u32 %v1134_v1, 16  ;;  %v1313_v13 = vshll.u32 %v1134_v1, 16  ;;  %v992_v61 = vld [vmem:[#allocation2 + $0xb0] sm:$0xf0] }
  0xed   : > { %3917 = vmatmul.mubr.bf16.gmra.mrb[36].mxu0 %v835_v34  ;;  %v1644_v16 = vor.u32 %v1643_v51, %v1640_v5  ;;  %v1652_v17 = vor.u32 %v1651_v10, %v1648_v9  ;;  %v1307_v20 = vrot.slane %v1305_v11, 5  ;;  %v1065_v21 = vrot.slane %v990_v28, 4  ;;  %v993_v15 = vld [vmem:[#allocation2 + $0xb8] sm:$0xf]  ;;  %v10237_v22 = vld [vmem:[#allocation8 + $0x1f0] sm:$0xff]  }
  0xee   : > { %v1312_v26 = vrot.slane %v1310_v12, 4  ;;  %v1315_v27 = vrot.slane %v1313_v13, 5  ;;  %v1066_v29 = vrot.slane %v991_v31, 4  ;;  %v837_v30 = vshrl.u32 %v654_v33, 16  ;;  %v656_v2 = vld [vmem:[#allocation2 + $0xb0] sm:$0xf8]  ;;  %9411 = vmatprep.subr.bf16.mxu1 %v10237_v22 }
  0xef   : > { %v1653_v36 = vsel %vm336_vm3, %v1644_v16, %v1652_v17  ;;  %v1308_v39 = vor.u32 %v1307_v20, %v1304_v52  ;;  %v840_v41 = vshll.u32 %v654_v33, 16  ;;  %v845_v42 = vshrl.u32 %v655_v14, 16  ;;  %v10238_v3 = vld [vmem:[#allocation8 + $0x1b0] sm:$0xff]   ;;  %v657_v31 = vld [vmem:[#allocation2 + $0xb8] sm:$0xf] }
  0xf0   : > { %4077 = vmatprep.mubr.bf16.mxu1 %v1653_v36  ;;  %v1316_v44 = vor.u32 %v1315_v27, %v1312_v26  ;;  %v1067_v38 = vsel %vm1034_vm4, %v1065_v21, %v1066_v29  ;;  %v839_v46 = vrot.slane %v837_v30, 3  ;;  %v848_v47 = vshll.u32 %v655_v14, 16  ;;  %v10239_v51 = vld [vmem:[#allocation8 + $0x1f8] sm:$0xff]   ;;  %v1474_v34 = vld [vmem:[#allocation2 + $0xc0] sm:$0xf8]  ;;  %9412 = vmatpush3.bf16.msra.mxu1 %v10238_v3 }
  0xf1   : > { %3924 = vmatprep.mubr.bf16.mxu0 %v1067_v38  ;;  %v842_v49 = vrot.slane %v840_v41, 4  ;;  %v847_v53 = vrot.slane %v845_v42, 3  ;;  %v1655_v54 = vshrl.u32 %v1472_v32, 16  ;;  %v1658_v55 = vshll.u32 %v1472_v32, 16  ;;  %v1475_v52 = vld [vmem:[#allocation2 + $0xc8] sm:$0xf]  ;;  %9413 = vmatprep.subr.bf16.mxu1 %v10239_v51 }
  0xf2   : > { %v1317_v57 = vsel %vm1147_vm7, %v1308_v39, %v1316_v44  ;;  %v850_v58 = vrot.slane %v848_v47, 4  ;;  %v1663_v59 = vshrl.u32 %v1473_v43, 16  ;;  %v1666_v60 = vshll.u32 %v1473_v43, 16  ;;  %v1137_v17 = vld [vmem:[#allocation2 + $0xb0] sm:$0xf0] }
  0xf3   : > { %4078 = vmatmul.mubr.bf16.gmra.mrb[36].mxu1 %v1317_v57  ;;  %v843_v62 = vor.u32 %v842_v49, %v839_v46  ;;  %v1657_v63 = vrot.slane %v1655_v54, 3  ;;  %v1660_v18 = vrot.slane %v1658_v55, 4  ;;  %v1319_v19 = vshrl.u32 %v1135_v48, 16  ;;  %v1138_v39 = vld [vmem:[#allocation2 + $0xb8] sm:$0x1f] }
  0xf4   : > { %v851_v40 = vor.u32 %v850_v58, %v847_v53  ;;  %v1665_v35 = vrot.slane %v1663_v59, 3  ;;  %v1668_v0 = vrot.slane %v1666_v60, 4  ;;  %v1322_v1 = vshll.u32 %v1135_v48, 16  ;;  %v994_v38 = vld [vmem:[#allocation2 + $0xc0] sm:$0xf0]  ;;  %v10240_v55 = vld [vmem:[#allocation8 + $0x1b8] sm:$0xff]  }
  0xf5   : > { %v1661_v4 = vor.u32 %v1660_v18, %v1657_v63  ;;  %v1321_v5 = vrot.slane %v1319_v19, 4  ;;  %v1327_v6 = vshrl.u32 %v1136_v56, 16  ;;  %v1330_v28 = vshll.u32 %v1136_v56, 16  ;;  %v995_v53 = vld [vmem:[#allocation2 + $0xc8] sm:$0xf]  ;;  %v10943_v60 = vld [vmem:[#allocation8 + $0x200] sm:$0xff]   ;;  %9414 = vmatpush3.bf16.msra.mxu1 %v10240_v55 }
  0xf6   : > { %v852_v9 = vsel %vm336_vm3, %v843_v62, %v851_v40  ;;  %v1669_v10 = vor.u32 %v1668_v0, %v1665_v35  ;;  %v1324_v11 = vrot.slane %v1322_v1, 5  ;;  %v1068_v33 = vrot.slane %v992_v61, 4  ;;  %v658_v54 = vld [vmem:[#allocation2 + $0xc0] sm:$0xf8]  ;;  %v659_v19 = vld [vmem:[#allocation2 + $0xc8] sm:$0xf]  ;;  %10007 = vmatprep.subr.bf16.mxu0 %v10943_v60 }
  0xf7   : > { %3925 = vmatmul.mubr.bf16.gmra.mrb[40].mxu0 %v852_v9  ;;  %v1329_v12 = vrot.slane %v1327_v6, 4  ;;  %v1332_v13 = vrot.slane %v1330_v28, 5  ;;  %v1069_v14 = vrot.slane %v993_v15, 4  ;;  %v854_v16 = vshrl.u32 %v656_v2, 16  ;;  %v1139_v0 = vld [vmem:[#allocation2 + $0xc0] sm:$0xf0] }
  0xf8   : > { %v1670_v20 = vsel %vm336_vm3, %v1661_v4, %v1669_v10  ;;  %v1325_v21 = vor.u32 %v1324_v11, %v1321_v5  ;;  %v857_v26 = vshll.u32 %v656_v2, 16  ;;  %v862_v27 = vshrl.u32 %v657_v31, 16  ;;  %v1140_v5 = vld [vmem:[#allocation2 + $0xc8] sm:$0x1f]  ;;  %v383_v23 = vld [vmem:[#allocation2 + $0xf8] sm:$0x10] }
  0xf9   : > { %4085 = vmatprep.mubr.bf16.mxu1 %v1670_v20  ;;  %v1333_v29 = vor.u32 %v1332_v13, %v1329_v12  ;;  %v1070_v30 = vsel %vm1034_vm4, %v1068_v33, %v1069_v14  ;;  %v856_v32 = vrot.slane %v854_v16, 3  ;;  %v865_v36 = vshll.u32 %v657_v31, 16  ;;  %v326_v16 = vld [vmem:[#allocation2 + $0xf0] sm:$0x8]  ;;  %v534_v20 = vld [vmem:[%s10733_s6 + $0xe8] sm:$0xff] }
  0xfa   : > { %3932 = vmatprep.mubr.bf16.mxu0 %v1070_v30  ;;  %v859_v41 = vrot.slane %v857_v26, 4  ;;  %v864_v42 = vrot.slane %v862_v27, 3  ;;  %v1672_v43 = vshrl.u32 %v1474_v34, 16  ;;  %v1675_v44 = vshll.u32 %v1474_v34, 16  ;;  %v377_v34 = vld [vmem:[#allocation2 + $0xd8] sm:$0x10] }
  0xfb   : > { %v1334_v46 = vsel %vm1147_vm7, %v1325_v21, %v1333_v29  ;;  %v867_v47 = vrot.slane %v865_v36, 4  ;;  %v1680_v48 = vshrl.u32 %v1475_v52, 16  ;;  %v1683_v49 = vshll.u32 %v1475_v52, 16  ;;  %v380_v21 = vld [vmem:[#allocation2 + $0xe8] sm:$0x10] }
  0xfc   : > { %4086 = vmatmul.mubr.bf16.gmra.mrb[40].mxu1 %v1334_v46  ;;  %v860_v56 = vor.u32 %v859_v41, %v856_v32  ;;  %v1674_v57 = vrot.slane %v1672_v43, 3  ;;  %v1677_v58 = vrot.slane %v1675_v44, 4  ;;  %v1336_v59 = vshrl.u32 %v1137_v17, 16 }
  0xfd   : > { %v868_v61 = vor.u32 %v867_v47, %v864_v42  ;;  %v1682_v62 = vrot.slane %v1680_v48, 3  ;;  %v1685_v63 = vrot.slane %v1683_v49, 4  ;;  %v1339_v18 = vshll.u32 %v1137_v17, 16  ;;  %v533_v17 = vld [vmem:[%s10733_s6 + $0xe0] sm:$0xff]  ;;  %v535_v42 = vld [vmem:[%s10733_s6 + $0xf0] sm:$0xff]  ;;  %v536_v47 = vld [vmem:[%s10733_s6 + $0xf8] sm:$0xff] }
  0xfe   : > { %v1678_v15 = vor.u32 %v1677_v58, %v1674_v57  ;;  %v1338_v22 = vrot.slane %v1336_v59, 4  ;;  %v1344_v40 = vshrl.u32 %v1138_v39, 16  ;;  %v1347_v35 = vshll.u32 %v1138_v39, 16  ;;  %v329_v49 = vld [vmem:[#allocation2 + $0x100] sm:$0x8] }
  0xff   : > { %v869_v1 = vsel %vm336_vm3, %v860_v56, %v868_v61  ;;  %v1686_v2 = vor.u32 %v1685_v63, %v1682_v62  ;;  %v1341_v3 = vrot.slane %v1339_v18, 5  ;;  %v1071_v4 = vrot.slane %v994_v38, 4 }
 0x100   : > { %3933 = vmatmul.mubr.bf16.gmra.mrb[44].mxu0 %v869_v1  ;;  %v1346_v6 = vrot.slane %v1344_v40, 4  ;;  %v1349_v28 = vrot.slane %v1347_v35, 5  ;;  %v1072_v31 = vrot.slane %v995_v53, 4  ;;  %v871_v51 = vshrl.u32 %v658_v54, 16 }
 0x101   : > { %v1687_v9 = vsel %vm336_vm3, %v1678_v15, %v1686_v2  ;;  %v1342_v10 = vor.u32 %v1341_v3, %v1338_v22  ;;  %v874_v11 = vshll.u32 %v658_v54, 16  ;;  %v879_v33 = vshrl.u32 %v659_v19, 16 }
 0x102   : > { %4093 = vmatprep.mubr.bf16.mxu1 %v1687_v9  ;;  %v1350_v52 = vor.u32 %v1349_v28, %v1346_v6  ;;  %v1073_v12 = vsel %vm1034_vm4, %v1071_v4, %v1072_v31  ;;  %v873_v13 = vrot.slane %v871_v51, 3  ;;  %v882_v14 = vshll.u32 %v659_v19, 16 }
 0x103   : > { %3940 = vmatprep.mubr.bf16.mxu0 %v1073_v12  ;;  %v876_v26 = vrot.slane %v874_v11, 4  ;;  %v881_v27 = vrot.slane %v879_v33, 3  ;;  %v581_v29 = vrot.slane %v549_v37, 4  ;;  %v1353_v30 = vshrl.u32 %v1139_v0, 16 }
 0x104   : > { %v1351_v32 = vsel %vm1147_vm7, %v1342_v10, %v1350_v52  ;;  %v884_v36 = vrot.slane %v882_v14, 4  ;;  %v1356_v39 = vshll.u32 %v1139_v0, 16  ;;  %v1361_v41 = vshrl.u32 %v1140_v5, 16 }
 0x105   : > { %4094 = vmatmul.mubr.bf16.gmra.mrb[44].mxu1 %v1351_v32  ;;  %v877_v43 = vor.u32 %v876_v26, %v873_v13  ;;  %626 = vst [vmem:[#allocation2 + $0xd8] ss:$-4 sps:$4 sm:$0xff] %v581_v29   ;;  %v1355_v44 = vrot.slane %v1353_v30, 4  ;;  %v1364_v38 = vshll.u32 %v1140_v5, 16  ;;  %v582_v46 = vrot.slane %v550_v50, 4 }
 0x106   : > { %v885_v48 = vor.u32 %v884_v36, %v881_v27  ;;  %v1358_v7 = vrot.slane %v1356_v39, 5  ;;  %v1363_v8 = vrot.slane %v1361_v41, 4  ;;  %v378_v37 = vsel %vm10754_vm6, 0, %v377_v34 }
 0x107   : > { %v1366_v53 = vrot.slane %v1364_v38, 5  ;;  %628 = vst [vmem:[#allocation2 + $0xe8] ss:$-4 sps:$4 sm:$0xff] %v582_v46   ;;  %379 = vst [vmem:[#allocation2 + $0xd8] sm:$0x10] %v378_v37  ;;  %v327_v54 = vsel %vm10744_vm2, 0, %v326_v16  ;;  %v551_v55 = vpack.c.bf16 %v534_v20, %v533_v17  ;;  %v552_v57 = vpack.c.bf16 %v536_v47, %v535_v42 }
 0x108   : > { %v381_v56 = vsel %vm10754_vm6, 0, %v380_v21  ;;  %v886_v24 = vsel %vm336_vm3, %v877_v43, %v885_v48  ;;  %328 = vst [vmem:[#allocation2 + $0xf0] sm:$0x8] %v327_v54  ;;  %v330_v50 = vsel %vm10744_vm2, 0, %v329_v49  ;;  %v384_v59 = vsel %vm10754_vm6, 0, %v383_v23 }
 0x109   : > { %382 = vst [vmem:[#allocation2 + $0xe8] sm:$0x10] %v381_v56  ;;  %3941 = vmatmul.mubr.bf16.gmra.mrb[48].mxu0 %v886_v24  ;;  %v583_v58 = vrot.slane %v551_v55, 4  ;;  %331 = vst [vmem:[#allocation2 + $0x100] sm:$0x8] %v330_v50  ;;  %v1359_v61 = vor.u32 %v1358_v7, %v1355_v44  ;;  %v1367_v62 = vor.u32 %v1366_v53, %v1363_v8  ;;  %v584_v63 = vrot.slane %v552_v57, 4 }
 0x10a   : > { %385 = vst [vmem:[#allocation2 + $0xf8] sm:$0x10] %v384_v59 }
 0x10b   : > { %630 = vst [vmem:[#allocation2 + $0xf8] ss:$-4 sps:$4 sm:$0xff] %v583_v58   ;;  %632 = vst [vmem:[#allocation2 + $0x108] ss:$-4 sps:$4 sm:$0xff] %v584_v63   ;;  %v1368_v2 = vsel %vm1147_vm7, %v1359_v61, %v1367_v62 }
 0x10c   : > { %v1476_v18 = vld [vmem:[#allocation2 + $0xd0] sm:$0xf8]  ;;  %v1477_v19 = vld [vmem:[#allocation2 + $0xd8] sm:$0xf] }
 0x10d   : > { %v996_v15 = vld [vmem:[#allocation2 + $0xd0] sm:$0xf0]  ;;  %v1689_v22 = vshrl.u32 %v1476_v18, 16  ;;  %v1692_v40 = vshll.u32 %v1476_v18, 16  ;;  %v1697_v35 = vshrl.u32 %v1477_v19, 16  ;;  %v1700_v0 = vshll.u32 %v1477_v19, 16 }
 0x10e   : > { %v997_v1 = vld [vmem:[#allocation2 + $0xd8] sm:$0xf]  ;;  %v1074_v3 = vrot.slane %v996_v15, 4  ;;  %v660_v5 = vld [vmem:[#allocation2 + $0xd0] sm:$0xf8] }
 0x10f   : > { %v1075_v4 = vrot.slane %v997_v1, 4  ;;  %v661_v6 = vld [vmem:[#allocation2 + $0xd8] sm:$0xf]  ;;  %v1691_v28 = vrot.slane %v1689_v22, 3  ;;  %v1694_v31 = vrot.slane %v1692_v40, 4  ;;  %v1699_v51 = vrot.slane %v1697_v35, 3 }
 0x110   : > { %v1702_v9 = vrot.slane %v1700_v0, 4  ;;  %v1478_v10 = vld [vmem:[#allocation2 + $0xe0] sm:$0xf8]  ;;  %v888_v33 = vshrl.u32 %v660_v5, 16  ;;  %v891_v34 = vshll.u32 %v660_v5, 16  ;;  %v896_v52 = vshrl.u32 %v661_v6, 16 }
 0x111   : > { %v1076_v11 = vsel %vm1034_vm4, %v1074_v3, %v1075_v4  ;;  %v1479_v12 = vld [vmem:[#allocation2 + $0xe8] sm:$0xf]  ;;  %v1695_v13 = vor.u32 %v1694_v31, %v1691_v28  ;;  %v899_v16 = vshll.u32 %v661_v6, 16  ;;  %v1706_v17 = vshrl.u32 %v1478_v10, 16  ;;  %v1141_v20 = vld [vmem:[#allocation2 + $0xd0] sm:$0xf0] }
 0x112   : > { %v1703_v14 = vor.u32 %v1702_v9, %v1699_v51  ;;  %3948 = vmatprep.mubr.bf16.mxu0 %v1076_v11  ;;  %v890_v21 = vrot.slane %v888_v33, 3  ;;  %v893_v26 = vrot.slane %v891_v34, 4  ;;  %v898_v27 = vrot.slane %v896_v52, 3  ;;  %v1142_v30 = vld [vmem:[#allocation2 + $0xd8] sm:$0x1f] }
 0x113   : > { %v1709_v29 = vshll.u32 %v1478_v10, 16  ;;  %v901_v36 = vrot.slane %v899_v16, 4  ;;  %v1708_v39 = vrot.slane %v1706_v17, 3  ;;  %v1714_v41 = vshrl.u32 %v1479_v12, 16  ;;  %v998_v42 = vld [vmem:[#allocation2 + $0xe0] sm:$0xf0] }
 0x114   : > { %v1704_v32 = vsel %vm336_vm3, %v1695_v13, %v1703_v14  ;;  %v894_v43 = vor.u32 %v893_v26, %v890_v21  ;;  %v1717_v38 = vshll.u32 %v1479_v12, 16  ;;  %v1370_v46 = vshrl.u32 %v1141_v20, 16  ;;  %v999_v47 = vld [vmem:[#allocation2 + $0xe8] sm:$0xf]  ;;  %v662_v49 = vld [vmem:[#allocation2 + $0xe0] sm:$0xf8] }
 0x115   : > { %4101 = vmatprep.mubr.bf16.mxu1 %v1704_v32  ;;  %v1711_v44 = vrot.slane %v1709_v29, 4  ;;  %v902_v48 = vor.u32 %v901_v36, %v898_v27  ;;  %v1716_v7 = vrot.slane %v1714_v41, 3  ;;  %v1373_v8 = vshll.u32 %v1141_v20, 16  ;;  %v663_v23 = vld [vmem:[#allocation2 + $0xe8] sm:$0xf] }
 0x116   : > { %4102 = vmatmul.mubr.bf16.gmra.mrb[48].mxu1 %v1368_v2  ;;  %v1378_v37 = vshrl.u32 %v1142_v30, 16  ;;  %v1719_v54 = vrot.slane %v1717_v38, 4  ;;  %v1372_v55 = vrot.slane %v1370_v46, 4  ;;  %v1381_v56 = vshll.u32 %v1142_v30, 16  ;;  %v1480_v18 = vld [vmem:[#allocation2 + $0xf0] sm:$0xf8] }
 0x117   : > { %v1712_v53 = vor.u32 %v1711_v44, %v1708_v39  ;;  %v903_v24 = vsel %vm336_vm3, %v894_v43, %v902_v48  ;;  %v1375_v50 = vrot.slane %v1373_v8, 5  ;;  %v1077_v58 = vrot.slane %v998_v42, 4  ;;  %v1481_v35 = vld [vmem:[#allocation2 + $0xf8] sm:$0xf]  ;;  %v1143_v4 = vld [vmem:[#allocation2 + $0xe0] sm:$0xf0] }
 0x118   : > { %v1380_v57 = vrot.slane %v1378_v37, 4  ;;  %3949 = vmatmul.mubr.bf16.gmra.mrb[52].mxu0 %v903_v24  ;;  %v1720_v59 = vor.u32 %v1719_v54, %v1716_v7  ;;  %v1383_v61 = vrot.slane %v1381_v56, 5  ;;  %v1078_v62 = vrot.slane %v999_v47, 4  ;;  %v1144_v33 = vld [vmem:[#allocation2 + $0xe8] sm:$0x1f] }
 0x119   : > { %v905_v63 = vshrl.u32 %v662_v49, 16  ;;  %v1376_v19 = vor.u32 %v1375_v50, %v1372_v55  ;;  %v908_v15 = vshll.u32 %v662_v49, 16  ;;  %v913_v22 = vshrl.u32 %v663_v23, 16  ;;  %v1000_v14 = vld [vmem:[#allocation2 + $0xf0] sm:$0xf0] }
 0x11a   : > { %v916_v40 = vshll.u32 %v663_v23, 16  ;;  %v1721_v0 = vsel %vm336_vm3, %v1712_v53, %v1720_v59  ;;  %v1384_v1 = vor.u32 %v1383_v61, %v1380_v57  ;;  %v1079_v2 = vsel %vm1034_vm4, %v1077_v58, %v1078_v62  ;;  %v1001_v16 = vld [vmem:[#allocation2 + $0xf8] sm:$0xf]  ;;  %v664_v27 = vld [vmem:[#allocation2 + $0xf0] sm:$0xf8] }
 0x11b   : > { %v907_v3 = vrot.slane %v905_v63, 3  ;;  %4109 = vmatprep.mubr.bf16.mxu1 %v1721_v0  ;;  %3956 = vmatprep.mubr.bf16.mxu0 %v1079_v2  ;;  %v910_v5 = vrot.slane %v908_v15, 4  ;;  %v915_v6 = vrot.slane %v913_v22, 3  ;;  %v1723_v31 = vshrl.u32 %v1480_v18, 16  ;;  %v665_v39 = vld [vmem:[#allocation2 + $0xf8] sm:$0xf] }
 0x11c   : > { %v918_v28 = vrot.slane %v916_v40, 4  ;;  %v1385_v51 = vsel %vm1147_vm7, %v1376_v19, %v1384_v1  ;;  %v1726_v9 = vshll.u32 %v1480_v18, 16  ;;  %v1731_v10 = vshrl.u32 %v1481_v35, 16  ;;  %v1482_v38 = vld [vmem:[#allocation2 + $0x100] sm:$0xf8] }
 0x11d   : > { %v1734_v11 = vshll.u32 %v1481_v35, 16  ;;  %v911_v34 = vor.u32 %v910_v5, %v907_v3  ;;  %v1725_v12 = vrot.slane %v1723_v31, 3  ;;  %v1387_v13 = vshrl.u32 %v1143_v4, 16  ;;  %v1483_v8 = vld [vmem:[#allocation2 + $0x108] sm:$0xf] }
 0x11e   : > { %4110 = vmatmul.mubr.bf16.gmra.mrb[52].mxu1 %v1385_v51  ;;  %v919_v52 = vor.u32 %v918_v28, %v915_v6  ;;  %v1728_v17 = vrot.slane %v1726_v9, 4  ;;  %v1733_v20 = vrot.slane %v1731_v10, 3  ;;  %v1390_v26 = vshll.u32 %v1143_v4, 16  ;;  %v1145_v50 = vld [vmem:[#allocation2 + $0xf0] sm:$0xf0] }
 0x11f   : > { %v1736_v21 = vrot.slane %v1734_v11, 4  ;;  %v1389_v30 = vrot.slane %v1387_v13, 4  ;;  %v1395_v32 = vshrl.u32 %v1144_v33, 16  ;;  %v1398_v36 = vshll.u32 %v1144_v33, 16  ;;  %v1146_v15 = vld [vmem:[#allocation2 + $0xf8] sm:$0x1f] }
 0x120   : > { %v920_v29 = vsel %vm336_vm3, %v911_v34, %v919_v52  ;;  %v1729_v41 = vor.u32 %v1728_v17, %v1725_v12  ;;  %v1392_v43 = vrot.slane %v1390_v26, 5  ;;  %v1080_v44 = vrot.slane %v1000_v14, 4  ;;  %v1932_v1 = vld [vmem:[#allocation2 + $0x10] sm:$0xf0]  ;;  %v1933_v6 = vld [vmem:[#allocation2 + $0x18] sm:$0x1f] }
 0x121   : > { %3957 = vmatmul.mubr.bf16.gmra.mrb[56].mxu0 %v920_v29  ;;  %v1737_v42 = vor.u32 %v1736_v21, %v1733_v20  ;;  %v1397_v46 = vrot.slane %v1395_v32, 4  ;;  %v1400_v47 = vrot.slane %v1398_v36, 5  ;;  %v1081_v48 = vrot.slane %v1001_v16, 4  ;;  %v1788_v10 = vld [vmem:[#allocation2 + $0x10] sm:$0xf0] }
 0x122   : > { %v922_v7 = vshrl.u32 %v664_v27, 16  ;;  %v1393_v49 = vor.u32 %v1392_v43, %v1389_v30  ;;  %v925_v53 = vshll.u32 %v664_v27, 16  ;;  %v930_v54 = vshrl.u32 %v665_v39, 16  ;;  %v1789_v12 = vld [vmem:[#allocation2 + $0x18] sm:$0xf] }
 0x123   : > { %v1738_v37 = vsel %vm336_vm3, %v1729_v41, %v1737_v42  ;;  %v1401_v55 = vor.u32 %v1400_v47, %v1397_v46  ;;  %v1082_v56 = vsel %vm1034_vm4, %v1080_v44, %v1081_v48  ;;  %v933_v24 = vshll.u32 %v665_v39, 16  ;;  %v2605_v13 = vld [vmem:[#allocation2 + $0x20] sm:$0xf0]  ;;  %v2606_v21 = vld [vmem:[#allocation2 + $0x28] sm:$0xf] }
 0x124   : > { %4117 = vmatprep.mubr.bf16.mxu1 %v1738_v37  ;;  %v924_v23 = vrot.slane %v922_v7, 3  ;;  %3964 = vmatprep.mubr.bf16.mxu0 %v1082_v56  ;;  %v927_v57 = vrot.slane %v925_v53, 4  ;;  %v932_v58 = vrot.slane %v930_v54, 3  ;;  %v1740_v59 = vshrl.u32 %v1482_v38, 16  ;;  %v2269_v32 = vld [vmem:[#allocation2 + $0x20] sm:$0xf8] }
 0x125   : > { %v1743_v61 = vshll.u32 %v1482_v38, 16  ;;  %v1402_v62 = vsel %vm1147_vm7, %v1393_v49, %v1401_v55  ;;  %v935_v63 = vrot.slane %v933_v24, 4  ;;  %v1748_v18 = vshrl.u32 %v1483_v8, 16  ;;  %v2270_v36 = vld [vmem:[#allocation2 + $0x28] sm:$0xf] }
 0x126   : > { %v1751_v19 = vshll.u32 %v1483_v8, 16  ;;  %4118 = vmatmul.mubr.bf16.gmra.mrb[56].mxu1 %v1402_v62  ;;  %v928_v22 = vor.u32 %v927_v57, %v924_v23  ;;  %v1742_v40 = vrot.slane %v1740_v59, 3  ;;  %v1404_v0 = vshrl.u32 %v1145_v50, 16  ;;  %v1934_v44 = vld [vmem:[#allocation2 + $0x20] sm:$0xf0] }
 0x127   : > { %v1745_v35 = vrot.slane %v1743_v61, 4  ;;  %v936_v2 = vor.u32 %v935_v63, %v932_v58  ;;  %v1750_v3 = vrot.slane %v1748_v18, 3  ;;  %v1407_v5 = vshll.u32 %v1145_v50, 16  ;;  %v1935_v7 = vld [vmem:[#allocation2 + $0x28] sm:$0x1f] }
 0x128   : > { %v1753_v4 = vrot.slane %v1751_v19, 4  ;;  %v1406_v31 = vrot.slane %v1404_v0, 4  ;;  %v1412_v51 = vshrl.u32 %v1146_v15, 16  ;;  %v1415_v9 = vshll.u32 %v1146_v15, 16  ;;  %v1790_v54 = vld [vmem:[#allocation2 + $0x20] sm:$0xf0] }
 0x129   : > { %v1746_v28 = vor.u32 %v1745_v35, %v1742_v40  ;;  %v937_v11 = vsel %vm336_vm3, %v928_v22, %v936_v2  ;;  %v1409_v34 = vrot.slane %v1407_v5, 5  ;;  %v1965_v52 = vshrl.u32 %v1932_v1, 16  ;;  %v1791_v55 = vld [vmem:[#allocation2 + $0x28] sm:$0xf]  ;;  %v2607_v62 = vld [vmem:[#allocation2 + $0x30] sm:$0xf0] }
 0x12a   : > { %v1754_v33 = vor.u32 %v1753_v4, %v1750_v3  ;;  %3965 = vmatmul.mubr.bf16.gmra.mrb[60].mxu0 %v937_v11  ;;  %v1414_v14 = vrot.slane %v1412_v51, 4  ;;  %v1417_v16 = vrot.slane %v1415_v9, 5  ;;  %v1968_v17 = vshll.u32 %v1932_v1, 16  ;;  %v2608_v22 = vld [vmem:[#allocation2 + $0x38] sm:$0xf]  ;;  %v10242_v40 = vld [vmem:[#allocation8 + $0x208] sm:$0xff]  }
 0x12b   : > { %v1973_v20 = vshrl.u32 %v1933_v6, 16  ;;  %v1410_v27 = vor.u32 %v1409_v34, %v1406_v31  ;;  %v1967_v29 = vrot.slane %v1965_v52, 4  ;;  %v1976_v30 = vshll.u32 %v1933_v6, 16  ;;  %v2271_v3 = vld [vmem:[#allocation2 + $0x30] sm:$0xf8] }
 0x12c   : > { %v1755_v26 = vsel %vm336_vm3, %v1746_v28, %v1754_v33  ;;  %v1418_v39 = vor.u32 %v1417_v16, %v1414_v14  ;;  %v1970_v41 = vrot.slane %v1968_v17, 5  ;;  %v1852_v43 = vrot.slane %v1788_v10, 4  ;;  %v2272_v31 = vld [vmem:[#allocation2 + $0x38] sm:$0xf]  ;;  %v1936_v33 = vld [vmem:[#allocation2 + $0x30] sm:$0xf0] }
 0x12d   : > { %4125 = vmatprep.mubr.bf16.mxu1 %v1755_v26  ;;  %v1975_v42 = vrot.slane %v1973_v20, 4  ;;  %v1978_v38 = vrot.slane %v1976_v30, 5  ;;  %v1853_v46 = vrot.slane %v1789_v12, 4  ;;  %v2669_v47 = vrot.slane %v2605_v13, 4  ;;  %v1937_v14 = vld [vmem:[#allocation2 + $0x38] sm:$0x1f] }
 0x12e   : > { %v2670_v48 = vrot.slane %v2606_v21, 4  ;;  %v1419_v8 = vsel %vm1147_vm7, %v1410_v27, %v1418_v39  ;;  %v1971_v37 = vor.u32 %v1970_v41, %v1967_v29  ;;  %v2302_v49 = vshrl.u32 %v2269_v32, 16  ;;  %v10243_v16 = vld [vmem:[#allocation8 + $0x210] sm:$0xff]   ;;  %v1793_v27 = vld [vmem:[#allocation2 + $0x38] sm:$0xf] }
 0x12f   : > { %v2305_v53 = vshll.u32 %v2269_v32, 16  ;;  %4126 = vmatmul.mubr.bf16.gmra.mrb[60].mxu1 %v1419_v8  ;;  %v1979_v56 = vor.u32 %v1978_v38, %v1975_v42  ;;  %v1854_v23 = vsel %vm1034_vm4, %v1852_v43, %v1853_v46  ;;  %v2310_v50 = vshrl.u32 %v2270_v36, 16  ;;  %v2609_v39 = vld [vmem:[#allocation2 + $0x40] sm:$0xf0]  ;;  %v2610_v38 = vld [vmem:[#allocation2 + $0x48] sm:$0xf] }
 0x130   : > { %v2671_v24 = vsel %vm1034_vm4, %v2669_v47, %v2670_v48  ;;  %v2304_v57 = vrot.slane %v2302_v49, 3  ;;  %v2313_v59 = vshll.u32 %v2270_v36, 16  ;;  %v1982_v61 = vshrl.u32 %v1934_v44, 16  ;;  %v2273_v8 = vld [vmem:[#allocation2 + $0x40] sm:$0xf8] }
 0x131   : > { %4327 = vmatprep.mubr.bf16.mxu1 %v2671_v24  ;;  %v2307_v58 = vrot.slane %v2305_v53, 4  ;;  %v1980_v63 = vsel %vm1147_vm7, %v1971_v37, %v1979_v56  ;;  %v2312_v18 = vrot.slane %v2310_v50, 3  ;;  %v1985_v19 = vshll.u32 %v1934_v44, 16  ;;  %v10244_v37 = vld [vmem:[#allocation8 + $0x218] sm:$0xff]   ;;  %v2274_v56 = vld [vmem:[#allocation2 + $0x48] sm:$0xf] }
 0x132   : > { %v1990_v15 = vshrl.u32 %v1935_v7, 16  ;;  %4166 = vmatprep.mubr.bf16.mxu0 %v1980_v63  ;;  %v2315_v0 = vrot.slane %v2313_v59, 4  ;;  %v1984_v1 = vrot.slane %v1982_v61, 4  ;;  %v1993_v2 = vshll.u32 %v1935_v7, 16 }
 0x133   : > { %v2308_v35 = vor.u32 %v2307_v58, %v2304_v57  ;;  %4167 = vmatmul.mubr.bf16.vlgmr.msra.gmra.mrb[64].mxu0 %v1854_v23  ;;  %v1987_v4 = vrot.slane %v1985_v19, 5  ;;  %v1855_v6 = vrot.slane %v1790_v54, 4  ;;  %v1856_v28 = vrot.slane %v1791_v55, 4  ;;  %v1938_v58 = vld [vmem:[#allocation2 + $0x40] sm:$0xf0] }
 0x134   : > { %v1992_v5 = vrot.slane %v1990_v15, 4  ;;  %10008 = vmatpush3.bf16.msra.mxu0 %v10943_v60  ;;  %v2316_v51 = vor.u32 %v2315_v0, %v2312_v18  ;;  %v1995_v9 = vrot.slane %v1993_v2, 5  ;;  %v2672_v10 = vrot.slane %v2607_v62, 4  ;;  %v1792_v60 = vld [vmem:[#allocation2 + $0x30] sm:$0xf0]  ;;  %v10245_v0 = vld [vmem:[#allocation8 + $0x220] sm:$0xff]  }
 0x135   : > { %v2673_v11 = vrot.slane %v2608_v22, 4  ;;  %v1988_v34 = vor.u32 %v1987_v4, %v1984_v1  ;;  %v1857_v52 = vsel %vm1034_vm4, %v1855_v6, %v1856_v28  ;;  %v2319_v12 = vshrl.u32 %v2271_v3, 16  ;;  %10009 = vmatprep.subr.bf16.mxu0 %v10242_v40  ;;  %v1939_v18 = vld [vmem:[#allocation2 + $0x48] sm:$0x1f]  ;;  %v10994_v19 = vld [vmem:[#allocation2 + $0x40] sm:$0xf0] }
 0x136   : > { %v2322_v13 = vshll.u32 %v2271_v3, 16  ;;  %v2317_v17 = vsel %vm336_vm3, %v2308_v35, %v2316_v51  ;;  %v1996_v20 = vor.u32 %v1995_v9, %v1992_v5  ;;  %v2327_v26 = vshrl.u32 %v2272_v31, 16  ;;  %v1795_v5 = vld [vmem:[#allocation2 + $0x48] sm:$0xf]  ;;  %v2611_v6 = vld [vmem:[#allocation2 + $0x50] sm:$0xf0] }
 0x137   : > { %v2674_v21 = vsel %vm1034_vm4, %v2672_v10, %v2673_v11  ;;  %4328 = vmatmul.mubr.bf16.vlgmr.msra.gmra.mrb[64].mxu1 %v2317_v17  ;;  %v2321_v29 = vrot.slane %v2319_v12, 3  ;;  %v2330_v32 = vshll.u32 %v2272_v31, 16  ;;  %v1999_v36 = vshrl.u32 %v1936_v33, 16  ;;  %v2612_v10 = vld [vmem:[#allocation2 + $0x58] sm:$0xf] }
 0x138   : > { %v2324_v30 = vrot.slane %v2322_v13, 4  ;;  %v1997_v41 = vsel %vm1147_vm7, %v1988_v34, %v1996_v20  ;;  %4335 = vmatprep.mubr.bf16.mxu1 %v2674_v21  ;;  %v2329_v42 = vrot.slane %v2327_v26, 3  ;;  %v2002_v43 = vshll.u32 %v1936_v33, 16  ;;  %10010 = vmatpush3.bf16.msra.mxu0 %v10242_v40  ;;  %v2275_v12 = vld [vmem:[#allocation2 + $0x50] sm:$0xf8] }
 0x139   : > { %v2007_v44 = vshrl.u32 %v1937_v14, 16  ;;  %4174 = vmatprep.mubr.bf16.mxu0 %v1997_v41  ;;  %v2332_v47 = vrot.slane %v2330_v32, 4  ;;  %v2001_v48 = vrot.slane %v1999_v36, 4  ;;  %v2010_v7 = vshll.u32 %v1937_v14, 16  ;;  %10011 = vmatprep.subr.bf16.mxu0 %v10243_v16  ;;  %v2276_v17 = vld [vmem:[#allocation2 + $0x58] sm:$0xf] }
 0x13a   : > { %v2325_v46 = vor.u32 %v2324_v30, %v2321_v29  ;;  %v2004_v49 = vrot.slane %v2002_v43, 5  ;;  %v1858_v54 = vrot.slane %v1792_v60, 4  ;;  %v1859_v55 = vrot.slane %v1793_v27, 4  ;;  %v1940_v27 = vld [vmem:[#allocation2 + $0x50] sm:$0xf0]  ;;  %v10246_v29 = vld [vmem:[#allocation8 + $0x228] sm:$0xff]  }
 0x13b   : > { %v2009_v53 = vrot.slane %v2007_v44, 4  ;;  %4175 = vmatmul.mubr.bf16.gmra.mrb[68].mxu0 %v1857_v52  ;;  %v2333_v23 = vor.u32 %v2332_v47, %v2329_v42  ;;  %v2012_v24 = vrot.slane %v2010_v7, 5  ;;  %v2675_v50 = vrot.slane %v2609_v39, 4  ;;  %v1941_v41 = vld [vmem:[#allocation2 + $0x58] sm:$0x1f] }
 0x13c   : > { %v2676_v57 = vrot.slane %v2610_v38, 4  ;;  %v2005_v59 = vor.u32 %v2004_v49, %v2001_v48  ;;  %v1860_v61 = vsel %vm1034_vm4, %v1858_v54, %v1859_v55  ;;  %v2336_v62 = vshrl.u32 %v2273_v8, 16  ;;  %10012 = vmatpush3.bf16.msra.mxu0 %v10243_v16  ;;  %v2613_v47 = vld [vmem:[#allocation2 + $0x60] sm:$0xf0]  ;;  %v11004_v49 = vld [vmem:[#allocation2 + $0x58] sm:$0xf] }
 0x13d   : > { %v2339_v63 = vshll.u32 %v2273_v8, 16  ;;  %v2334_v15 = vsel %vm336_vm3, %v2325_v46, %v2333_v23  ;;  %v2013_v22 = vor.u32 %v2012_v24, %v2009_v53  ;;  %v2344_v35 = vshrl.u32 %v2274_v56, 16  ;;  %10013 = vmatprep.subr.bf16.mxu0 %v10244_v37  ;;  %v11002_v46 = vld [vmem:[#allocation2 + $0x50] sm:$0xf0]  ;;  %v2614_v53 = vld [vmem:[#allocation2 + $0x68] sm:$0xf] }
 0x13e   : > { %v2677_v40 = vsel %vm1034_vm4, %v2675_v50, %v2676_v57  ;;  %v2338_v1 = vrot.slane %v2336_v62, 3  ;;  %v2347_v3 = vshll.u32 %v2274_v56, 16  ;;  %v2016_v4 = vshrl.u32 %v1938_v58, 16  ;;  %v2277_v24 = vld [vmem:[#allocation2 + $0x60] sm:$0xf8]  ;;  %v10247_v50 = vld [vmem:[#allocation8 + $0x230] sm:$0xff]  }
 0x13f   : > { %v2341_v2 = vrot.slane %v2339_v63, 4  ;;  %4336 = vmatmul.mubr.bf16.gmra.mrb[68].mxu1 %v2334_v15  ;;  %v2014_v28 = vsel %vm1147_vm7, %v2005_v59, %v2013_v22  ;;  %v2346_v31 = vrot.slane %v2344_v35, 3  ;;  %v2019_v51 = vshll.u32 %v1938_v58, 16  ;;  %v2278_v62 = vld [vmem:[#allocation2 + $0x68] sm:$0xf] }
 0x140   : > { %v2024_v9 = vshrl.u32 %v1939_v18, 16  ;;  %4182 = vmatprep.mubr.bf16.mxu0 %v2014_v28  ;;  %4343 = vmatprep.mubr.bf16.mxu1 %v2677_v40  ;;  %v2349_v33 = vrot.slane %v2347_v3, 4  ;;  %v2018_v34 = vrot.slane %v2016_v4, 4  ;;  %v2027_v52 = vshll.u32 %v1939_v18, 16  ;;  %v1942_v22 = vld [vmem:[#allocation2 + $0x60] sm:$0xf0] }
 0x141   : > { %v2342_v11 = vor.u32 %v2341_v2, %v2338_v1  ;;  %v2021_v13 = vrot.slane %v2019_v51, 5  ;;  %v1861_v16 = vrot.slane %v10994_v19, 4  ;;  %10014 = vmatpush3.bf16.msra.mxu0 %v10244_v37  ;;  %v2678_v26 = vrot.slane %v2611_v6, 4  ;;  %v1943_v2 = vld [vmem:[#allocation2 + $0x68] sm:$0x1f] }
 0x142   : > { %v2026_v14 = vrot.slane %v2024_v9, 4  ;;  %v2350_v20 = vor.u32 %v2349_v33, %v2346_v31  ;;  %v2029_v21 = vrot.slane %v2027_v52, 5  ;;  %v2679_v60 = vrot.slane %v2612_v10, 4  ;;  %10015 = vmatprep.subr.bf16.mxu0 %v10245_v0  ;;  %v11010_v28 = vld [vmem:[#allocation2 + $0x60] sm:$0xf0]  ;;  %v10248_v31 = vld [vmem:[#allocation8 + $0x238] sm:$0xff]  }
 0x143   : > { %4183 = vmatmul.mubr.bf16.gmra.mrb[72].mxu0 %v1860_v61  ;;  %v2022_v30 = vor.u32 %v2021_v13, %v2018_v34  ;;  %v1862_v32 = vrot.slane %v1795_v5, 4  ;;  %v2353_v36 = vshrl.u32 %v2275_v12, 16  ;;  %v2356_v39 = vshll.u32 %v2275_v12, 16  ;;  %v1799_v13 = vld [vmem:[#allocation2 + $0x68] sm:$0xf] }
 0x144   : > { %v2351_v42 = vsel %vm336_vm3, %v2342_v11, %v2350_v20  ;;  %v2030_v43 = vor.u32 %v2029_v21, %v2026_v14  ;;  %v2680_v44 = vsel %vm1034_vm4, %v2678_v26, %v2679_v60  ;;  %v2361_v38 = vshrl.u32 %v2276_v17, 16  ;;  %v2615_v14 = vld [vmem:[#allocation2 + $0x70] sm:$0xf0]  ;;  %v2616_v26 = vld [vmem:[#allocation2 + $0x78] sm:$0xf] }
 0x145   : > { %v2355_v48 = vrot.slane %v2353_v36, 3  ;;  %v2358_v7 = vrot.slane %v2356_v39, 4  ;;  %v2364_v8 = vshll.u32 %v2276_v17, 16  ;;  %v2033_v37 = vshrl.u32 %v1940_v27, 16  ;;  %10016 = vmatpush3.bf16.msra.mxu0 %v10245_v0 }
 0x146   : > { %v2031_v54 = vsel %vm1147_vm7, %v2022_v30, %v2030_v43  ;;  %v2363_v55 = vrot.slane %v2361_v38, 3  ;;  %v2036_v56 = vshll.u32 %v1940_v27, 16  ;;  %v2041_v23 = vshrl.u32 %v1941_v41, 16  ;;  %10017 = vmatprep.subr.bf16.mxu0 %v10246_v29  ;;  %v2280_v43 = vld [vmem:[#allocation2 + $0x78] sm:$0xf] }
 0x147   : > { %4344 = vmatmul.mubr.bf16.gmra.mrb[72].mxu1 %v2351_v42  ;;  %4190 = vmatprep.mubr.bf16.mxu0 %v2031_v54  ;;  %v2359_v57 = vor.u32 %v2358_v7, %v2355_v48  ;;  %v2366_v58 = vrot.slane %v2364_v8, 4  ;;  %v2035_v59 = vrot.slane %v2033_v37, 4  ;;  %v2044_v61 = vshll.u32 %v1941_v41, 16  ;;  %v1944_v48 = vld [vmem:[#allocation2 + $0x70] sm:$0xf0] }
 0x148   : > { %v1863_v63 = vsel %vm1034_vm4, %v1861_v16, %v1862_v32  ;;  %4351 = vmatprep.mubr.bf16.mxu1 %v2680_v44  ;;  %v2038_v18 = vrot.slane %v2036_v56, 5  ;;  %v2043_v19 = vrot.slane %v2041_v23, 4  ;;  %v1864_v15 = vrot.slane %v11002_v46, 4  ;;  %v2279_v32 = vld [vmem:[#allocation2 + $0x70] sm:$0xf8] }
 0x149   : > { %v2367_v40 = vor.u32 %v2366_v58, %v2363_v55  ;;  %v2046_v35 = vrot.slane %v2044_v61, 5  ;;  %v2681_v0 = vrot.slane %v2613_v47, 4  ;;  %v2682_v1 = vrot.slane %v2614_v53, 4  ;;  %10018 = vmatpush3.bf16.msra.mxu0 %v10246_v29  ;;  %v1945_v53 = vld [vmem:[#allocation2 + $0x78] sm:$0x1f] }
 0x14a   : > { %v2039_v3 = vor.u32 %v2038_v18, %v2035_v59  ;;  %v1865_v4 = vrot.slane %v11004_v49, 4  ;;  %v2370_v5 = vshrl.u32 %v2277_v24, 16  ;;  %v2373_v6 = vshll.u32 %v2277_v24, 16  ;;  %10019 = vmatprep.subr.bf16.mxu0 %v10247_v50  ;;  %v11019_v24 = vld [vmem:[#allocation2 + $0x70] sm:$0xf0] }
 0x14b   : > { %4191 = vmatmul.mubr.bf16.gmra.mrb[76].mxu0 %v1863_v63  ;;  %v2368_v51 = vsel %vm336_vm3, %v2359_v57, %v2367_v40  ;;  %v2047_v9 = vor.u32 %v2046_v35, %v2043_v19  ;;  %v2683_v10 = vsel %vm1034_vm4, %v2681_v0, %v2682_v1  ;;  %v2378_v11 = vshrl.u32 %v2278_v62, 16  ;;  %v2617_v61 = vld [vmem:[#allocation2 + $0x80] sm:$0xf0] }
 0x14c   : > { %v2372_v33 = vrot.slane %v2370_v5, 3  ;;  %v2375_v34 = vrot.slane %v2373_v6, 4  ;;  %v2381_v52 = vshll.u32 %v2278_v62, 16  ;;  %v2050_v12 = vshrl.u32 %v1942_v22, 16  ;;  %v2282_v6 = vld [vmem:[#allocation2 + $0x88] sm:$0xf] }
 0x14d   : > { %v2048_v16 = vsel %vm1147_vm7, %v2039_v3, %v2047_v9  ;;  %v2380_v17 = vrot.slane %v2378_v11, 3  ;;  %v2053_v20 = vshll.u32 %v1942_v22, 16  ;;  %v2058_v21 = vshrl.u32 %v1943_v2, 16  ;;  %10020 = vmatpush3.bf16.msra.mxu0 %v10247_v50  ;;  %v2618_v22 = vld [vmem:[#allocation2 + $0x88] sm:$0xf] }
 0x14e   : > { %4198 = vmatprep.mubr.bf16.mxu0 %v2048_v16  ;;  %v2376_v60 = vor.u32 %v2375_v34, %v2372_v33  ;;  %v2383_v27 = vrot.slane %v2381_v52, 4  ;;  %v2052_v29 = vrot.slane %v2050_v12, 4  ;;  %v2061_v30 = vshll.u32 %v1943_v2, 16  ;;  %10021 = vmatprep.subr.bf16.mxu0 %v10248_v31  ;;  %v2281_v2 = vld [vmem:[#allocation2 + $0x80] sm:$0xf8] }
 0x14f   : > { %4352 = vmatmul.mubr.bf16.gmra.mrb[76].mxu1 %v2368_v51  ;;  %v1866_v36 = vsel %vm1034_vm4, %v1864_v15, %v1865_v4  ;;  %v2055_v39 = vrot.slane %v2053_v20, 5  ;;  %v2060_v41 = vrot.slane %v2058_v21, 4  ;;  %v1867_v42 = vrot.slane %v11010_v28, 4  ;;  %v1801_v15 = vld [vmem:[#allocation2 + $0x78] sm:$0xf] }
 0x150   : > { %4359 = vmatprep.mubr.bf16.mxu1 %v2683_v10  ;;  %v2384_v44 = vor.u32 %v2383_v27, %v2380_v17  ;;  %v2063_v38 = vrot.slane %v2061_v30, 5  ;;  %v2684_v46 = vrot.slane %v2615_v14, 4  ;;  %v2685_v47 = vrot.slane %v2616_v26, 4  ;;  %v1946_v28 = vld [vmem:[#allocation2 + $0x80] sm:$0xf0] }
 0x151   : > { %v2056_v7 = vor.u32 %v2055_v39, %v2052_v29  ;;  %v1868_v8 = vrot.slane %v1799_v13, 4  ;;  %v2387_v37 = vshrl.u32 %v2279_v32, 16  ;;  %v2390_v49 = vshll.u32 %v2279_v32, 16  ;;  %10022 = vmatpush3.bf16.msra.mxu0 %v10248_v31  ;;  %v1947_v11 = vld [vmem:[#allocation2 + $0x88] sm:$0x1f] }
 0x152   : > { %v2385_v54 = vsel %vm336_vm3, %v2376_v60, %v2384_v44  ;;  %v2064_v55 = vor.u32 %v2063_v38, %v2060_v41  ;;  %v2686_v56 = vsel %vm1034_vm4, %v2684_v46, %v2685_v47  ;;  %v2395_v23 = vshrl.u32 %v2280_v43, 16  ;;  %v1802_v13 = vld [vmem:[#allocation2 + $0x80] sm:$0xf0]  ;;  %v1803_v29 = vld [vmem:[#allocation2 + $0x88] sm:$0xf] }
 0x153   : > { %4199 = vmatmul.mubr.bf16.gmra.mrb[80].mxu0 %v1866_v36  ;;  %v2389_v50 = vrot.slane %v2387_v37, 3  ;;  %v2392_v57 = vrot.slane %v2390_v49, 4  ;;  %v2398_v58 = vshll.u32 %v2280_v43, 16  ;;  %v2067_v59 = vshrl.u32 %v1944_v48, 16  ;;  %v2619_v41 = vld [vmem:[#allocation2 + $0x90] sm:$0xf0] }
 0x154   : > { %v2065_v62 = vsel %vm1147_vm7, %v2056_v7, %v2064_v55  ;;  %v2397_v63 = vrot.slane %v2395_v23, 3  ;;  %v2070_v18 = vshll.u32 %v1944_v48, 16  ;;  %v2075_v19 = vshrl.u32 %v1945_v53, 16  ;;  %v2283_v47 = vld [vmem:[#allocation2 + $0x90] sm:$0xf8] }
 0x155   : > { %4206 = vmatprep.mubr.bf16.mxu0 %v2065_v62  ;;  %v2393_v40 = vor.u32 %v2392_v57, %v2389_v50  ;;  %v2400_v35 = vrot.slane %v2398_v58, 4  ;;  %v2069_v0 = vrot.slane %v2067_v59, 4  ;;  %v2078_v1 = vshll.u32 %v1945_v53, 16  ;;  %v2284_v49 = vld [vmem:[#allocation2 + $0x98] sm:$0xf] }
 0x156   : > { %v1869_v3 = vsel %vm1034_vm4, %v1867_v42, %v1868_v8  ;;  %v2072_v4 = vrot.slane %v2070_v18, 5  ;;  %v2077_v5 = vrot.slane %v2075_v19, 4  ;;  %v1870_v9 = vrot.slane %v11019_v24, 4  ;;  %v2620_v42 = vld [vmem:[#allocation2 + $0x98] sm:$0xf] }
 0x157   : > { %4360 = vmatmul.mubr.bf16.gmra.mrb[80].mxu1 %v2385_v54  ;;  %v2401_v31 = vor.u32 %v2400_v35, %v2397_v63  ;;  %v2080_v51 = vrot.slane %v2078_v1, 5  ;;  %v2687_v10 = vrot.slane %v2617_v61, 4  ;;  %v2688_v34 = vrot.slane %v2618_v22, 4  ;;  %v1949_v58 = vld [vmem:[#allocation2 + $0x98] sm:$0x1f] }
 0x158   : > { %4367 = vmatprep.mubr.bf16.mxu1 %v2686_v56  ;;  %v2073_v33 = vor.u32 %v2072_v4, %v2069_v0  ;;  %v2404_v52 = vshrl.u32 %v2281_v2, 16  ;;  %v2407_v12 = vshll.u32 %v2281_v2, 16  ;;  %v1871_v17 = vrot.slane %v1801_v15, 4  ;;  %v1948_v56 = vld [vmem:[#allocation2 + $0x90] sm:$0xf0] }
 0x159   : > { %v2402_v14 = vsel %vm336_vm3, %v2393_v40, %v2401_v31  ;;  %v2081_v16 = vor.u32 %v2080_v51, %v2077_v5  ;;  %v2412_v20 = vshrl.u32 %v2282_v6, 16  ;;  %v2415_v60 = vshll.u32 %v2282_v6, 16  ;;  %v11028_v18 = vld [vmem:[#allocation2 + $0x90] sm:$0xf0]  ;;  %v1805_v19 = vld [vmem:[#allocation2 + $0x98] sm:$0xf] }
 0x15a   : > { %v2406_v21 = vrot.slane %v2404_v52, 3  ;;  %v2409_v26 = vrot.slane %v2407_v12, 4  ;;  %v2084_v27 = vshrl.u32 %v1946_v28, 16  ;;  %v2087_v36 = vshll.u32 %v1946_v28, 16  ;;  %v11030_v15 = vld [vmem:[#allocation2 + $0xa0] sm:$0xf0] }
 0x15b   : > { %4207 = vmatmul.mubr.bf16.gmra.mrb[84].mxu0 %v1869_v3  ;;  %v2082_v30 = vsel %vm1147_vm7, %v2073_v33, %v2081_v16  ;;  %v2414_v32 = vrot.slane %v2412_v20, 3  ;;  %v2092_v39 = vshrl.u32 %v1947_v11, 16  ;;  %v2689_v43 = vsel %vm1034_vm4, %v2687_v10, %v2688_v34  ;;  %v11033_v1 = vld [vmem:[#allocation2 + $0xa8] sm:$0xf]  ;;  %v2285_v6 = vld [vmem:[#allocation2 + $0xa0] sm:$0xf8] }
 0x15c   : > { %4214 = vmatprep.mubr.bf16.mxu0 %v2082_v30  ;;  %v2417_v44 = vrot.slane %v2415_v60, 4  ;;  %v2086_v38 = vrot.slane %v2084_v27, 4  ;;  %v2095_v46 = vshll.u32 %v1947_v11, 16  ;;  %v2089_v48 = vrot.slane %v2087_v36, 5  ;;  %v2286_v12 = vld [vmem:[#allocation2 + $0xa8] sm:$0xf] }
 0x15d   : > { %v2094_v7 = vrot.slane %v2092_v39, 4  ;;  %v1873_v8 = vrot.slane %v1802_v13, 4  ;;  %v1874_v37 = vrot.slane %v1803_v29, 4  ;;  %v1872_v53 = vsel %vm1034_vm4, %v1870_v9, %v1871_v17  ;;  %v1950_v13 = vld [vmem:[#allocation2 + $0xa0] sm:$0xf0] }
 0x15e   : > { %v2410_v54 = vor.u32 %v2409_v26, %v2406_v21  ;;  %v2097_v55 = vrot.slane %v2095_v46, 5  ;;  %v2418_v23 = vor.u32 %v2417_v44, %v2414_v32  ;;  %v2090_v24 = vor.u32 %v2089_v48, %v2086_v38  ;;  %v1951_v30 = vld [vmem:[#allocation2 + $0xa8] sm:$0x1f] }
 0x15f   : > { %4368 = vmatmul.mubr.bf16.gmra.mrb[84].mxu1 %v2402_v14  ;;  %v2421_v50 = vshrl.u32 %v2283_v47, 16  ;;  %v2424_v57 = vshll.u32 %v2283_v47, 16  ;;  %v2690_v61 = vrot.slane %v2619_v41, 4  ;;  %v2691_v62 = vrot.slane %v2620_v42, 4  ;;  %v11051_v47 = vld [vmem:[#allocation2 + $0xa0] sm:$0xf0] }
 0x160   : > { %4375 = vmatprep.mubr.bf16.mxu1 %v2689_v43  ;;  %v2098_v59 = vor.u32 %v2097_v55, %v2094_v7  ;;  %v2429_v63 = vshrl.u32 %v2284_v49, 16  ;;  %v1875_v22 = vsel %vm1034_vm4, %v1873_v8, %v1874_v37  ;;  %v2432_v35 = vshll.u32 %v2284_v49, 16  ;;  %v2623_v49 = vld [vmem:[#allocation2 + $0xb0] sm:$0xf0] }
 0x161   : > { %v2423_v40 = vrot.slane %v2421_v50, 3  ;;  %v2101_v0 = vshrl.u32 %v1948_v56, 16  ;;  %v2426_v3 = vrot.slane %v2424_v57, 4  ;;  %v2104_v4 = vshll.u32 %v1948_v56, 16  ;;  %v11036_v10 = vpop.f32.mrb[0].mxu0 }
 0x162   : > { %v2099_v2 = vsel %vm1147_vm7, %v2090_v24, %v2098_v59  ;;  %v2109_v5 = vshrl.u32 %v1949_v58, 16  ;;  %v2431_v28 = vrot.slane %v2429_v63, 3  ;;  %v2434_v31 = vrot.slane %v2432_v35, 4  ;;  %v11042_v21 = vpop.f32.mrb[1].mxu0  ;;  %v2288_v63 = vld [vmem:[#allocation2 + $0xb8] sm:$0xf] }
 0x163   : > { %4215 = vmatmul.mubr.bf16.gmra.mrb[88].mxu0 %v1872_v53  ;;  %v2103_v51 = vrot.slane %v2101_v0, 4  ;;  %v2112_v9 = vshll.u32 %v1949_v58, 16  ;;  %v2419_v11 = vsel %vm336_vm3, %v2410_v54, %v2418_v23  ;;  %v2692_v33 = vsel %vm1034_vm4, %v2690_v61, %v2691_v62  ;;  %v11045_v42 = vpop.f32.mrb[2].mxu0  ;;  %v2287_v23 = vld [vmem:[#allocation2 + $0xb0] sm:$0xf8] }
 0x164   : > { %4222 = vmatprep.mubr.bf16.mxu0 %v2099_v2  ;;  %v2106_v34 = vrot.slane %v2104_v4, 5  ;;  %v2111_v52 = vrot.slane %v2109_v5, 4  ;;  %v1876_v16 = vrot.slane %v11028_v18, 4  ;;  %v1877_v17 = vrot.slane %v1805_v19, 4  ;;  %v11056_v24 = vpop.f32.mrb[3].mxu0 }
 0x165   : > { %v2114_v14 = vrot.slane %v2112_v9, 5  ;;  %v2693_v20 = vrot.slane %v11030_v15, 4  ;;  %v2694_v60 = vrot.slane %v11033_v1, 4  ;;  %v2438_v27 = vshrl.u32 %v2285_v6, 16  ;;  %v11060_v61 = vld [vmem:[#allocation2 + $0xa8] sm:$0xf] }
 0x166   : > { %v2107_v26 = vor.u32 %v2106_v34, %v2103_v51  ;;  %v2441_v29 = vshll.u32 %v2285_v6, 16  ;;  %v2427_v32 = vor.u32 %v2426_v3, %v2423_v40  ;;  %v2435_v36 = vor.u32 %v2434_v31, %v2431_v28  ;;  %v2624_v62 = vld [vmem:[#allocation2 + $0xb8] sm:$0xf] }
 0x167   : > { %4376 = vmatmul.mubr.bf16.gmra.mrb[88].mxu1 %v2419_v11  ;;  %v2115_v39 = vor.u32 %v2114_v14, %v2111_v52  ;;  %v2446_v41 = vshrl.u32 %v2286_v12, 16  ;;  %v11047_v43 = vrot.slane %v2438_v27, 3  ;;  %v2449_v38 = vshll.u32 %v2286_v12, 16  ;;  %v1953_v4 = vld [vmem:[#allocation2 + $0xb8] sm:$0x1f] }
 0x168   : > { %4383 = vmatprep.mubr.bf16.mxu1 %v2692_v33  ;;  %v11049_v44 = vrot.slane %v2441_v29, 4  ;;  %v2118_v46 = vshrl.u32 %v1950_v13, 16  ;;  %v2121_v8 = vshll.u32 %v1950_v13, 16  ;;  %v2126_v37 = vshrl.u32 %v1951_v30, 16  ;;  %v11054_v53 = vpop.f32.mrb[0].mxu1 }
 0x169   : > { %v2116_v48 = vsel %vm1147_vm7, %v2107_v26, %v2115_v39  ;;  %v2448_v7 = vrot.slane %v2446_v41, 3  ;;  %v2451_v54 = vrot.slane %v2449_v38, 4  ;;  %v2129_v56 = vshll.u32 %v1951_v30, 16  ;;  %v11066_v35 = vpop.f32.mrb[1].mxu1  ;;  %v11070_v6 = vpop.f32.mrb[4].mxu0 }
 0x16a   : > { %v2120_v55 = vrot.slane %v2118_v46, 4  ;;  %v2436_v50 = vsel %vm336_vm3, %v2427_v32, %v2435_v36  ;;  %v1878_v57 = vsel %vm1034_vm4, %v1876_v16, %v1877_v17  ;;  %v2123_v58 = vrot.slane %v2121_v8, 5  ;;  %v11068_v5 = vpop.f32.mrb[2].mxu1  ;;  %v1808_v11 = vld [vmem:[#allocation2 + $0xb0] sm:$0xf0]  ;;  %v11077_v27 = vpop.f32.mrb[5].mxu0 }
 0x16b   : > { %4223 = vmatmul.mubr.bf16.gmra.mrb[92].mxu0 %v1875_v22  ;;  %v2128_v59 = vrot.slane %v2126_v37, 4  ;;  %v2695_v18 = vsel %vm1034_vm4, %v2693_v20, %v2694_v60  ;;  %v2444_v19 = vor.u32 %v11049_v44, %v11047_v43  ;;  %v2131_v15 = vrot.slane %v2129_v56, 5  ;;  %v1952_v22 = vld [vmem:[#allocation2 + $0xb0] sm:$0xf0]  ;;  %v1809_v33 = vld [vmem:[#allocation2 + $0xb8] sm:$0xf] }
 0x16c   : > { %4230 = vmatprep.mubr.bf16.mxu0 %v2116_v48  ;;  %v1879_v40 = vrot.slane %v11051_v47, 4  ;;  %v2452_v0 = vor.u32 %v2451_v54, %v2448_v7  ;;  %v2124_v1 = vor.u32 %v2123_v58, %v2120_v55  ;;  %v2455_v2 = vshrl.u32 %v2287_v23, 16  ;;  %v11072_v34 = vpop.f32.mrb[3].mxu1  ;;  %v11074_v16 = vld [vmem:[#allocation2 + $0xc0] sm:$0xf0]  ;;  %v11080_v41 = vpop.f32.mrb[6].mxu0 }
 0x16d   : > { %v2458_v3 = vshll.u32 %v2287_v23, 16  ;;  %v2132_v28 = vor.u32 %v2131_v15, %v2128_v59  ;;  %v2696_v31 = vrot.slane %v2623_v49, 4  ;;  %v2697_v51 = vrot.slane %v2624_v62, 4  ;;  %v2289_v39 = vld [vmem:[#allocation2 + $0xc0] sm:$0xf8]  ;;  %v11087_v59 = vpop.f32.mrb[7].mxu0 }
 0x16e   : > { %v2463_v9 = vshrl.u32 %v2288_v63, 16  ;;  %v2457_v52 = vrot.slane %v2455_v2, 3  ;;  %v2466_v13 = vshll.u32 %v2288_v63, 16  ;;  %v2135_v14 = vshrl.u32 %v1952_v22, 16  ;;  %v2626_v48 = vld [vmem:[#allocation2 + $0xc8] sm:$0xf] }
 0x16f   : > { %4384 = vmatmul.mubr.bf16.gmra.mrb[92].mxu1 %v2436_v50  ;;  %v2460_v12 = vrot.slane %v2458_v3, 4  ;;  %v1880_v17 = vrot.slane %v11060_v61, 4  ;;  %v2138_v26 = vshll.u32 %v1952_v22, 16  ;;  %v2143_v60 = vshrl.u32 %v1953_v4, 16  ;;  %v2290_v7 = vld [vmem:[#allocation2 + $0xc8] sm:$0xf] }
 0x170   : > { %4391 = vmatprep.mubr.bf16.mxu1 %v2695_v18  ;;  %v2465_v20 = vrot.slane %v2463_v9, 3  ;;  %v2133_v29 = vsel %vm1147_vm7, %v2124_v1, %v2132_v28  ;;  %v2468_v30 = vrot.slane %v2466_v13, 4  ;;  %v2137_v32 = vrot.slane %v2135_v14, 4  ;;  %v11084_v55 = vpop.f32.mrb[4].mxu1  ;;  %v11100_v2 = vld [vmem:[%s12426_s2] ss:$0 sm:$0xff] }
 0x171   : > { %v2146_v36 = vshll.u32 %v1953_v4, 16  ;;  %v2453_v43 = vsel %vm336_vm3, %v2444_v19, %v2452_v0  ;;  %v2698_v44 = vsel %vm1034_vm4, %v2696_v31, %v2697_v51  ;;  %v2140_v38 = vrot.slane %v2138_v26, 5  ;;  %v11089_v61 = vpop.f32.mrb[5].mxu1  ;;  %v1954_v19 = vld [vmem:[#allocation2 + $0xc0] sm:$0xf0] }
 0x172   : > { %v2145_v46 = vrot.slane %v2143_v60, 4  ;;  %v2461_v8 = vor.u32 %v2460_v12, %v2457_v52  ;;  %v1882_v49 = vrot.slane %v1808_v11, 4  ;;  %v1883_v54 = vrot.slane %v1809_v33, 4  ;;  %v11091_v15 = vpop.f32.mrb[6].mxu1  ;;  %v1955_v4 = vld [vmem:[#allocation2 + $0xc8] sm:$0x1f] }
 0x173   : > { %4231 = vmatmul.mubr.bf16.gmra.mrb[96].mxu0 %v1878_v57  ;;  %v2148_v37 = vrot.slane %v2146_v36, 5  ;;  %v2469_v56 = vor.u32 %v2468_v30, %v2465_v20  ;;  %v2699_v23 = vrot.slane %v11074_v16, 4  ;;  %v2472_v50 = vshrl.u32 %v2289_v39, 16  ;;  %v11104_v28 = vpop.f32.mrb[7].mxu1  ;;  %v1810_v33 = vld [vmem:[#allocation2 + $0xc0] sm:$0xf0] }
 0x174   : > { %4238 = vmatprep.mubr.bf16.mxu0 %v2133_v29  ;;  %v2475_v58 = vshll.u32 %v2289_v39, 16  ;;  %v2141_v62 = vor.u32 %v2140_v38, %v2137_v32  ;;  %v2700_v18 = vrot.slane %v2626_v48, 4  ;;  %v2480_v57 = vshrl.u32 %v2290_v7, 16  ;;  %v2628_v29 = vld [vmem:[#allocation2 + $0xd8] sm:$0xf] }
 0x175   : > { %v2149_v63 = vor.u32 %v2148_v37, %v2145_v46  ;;  %v11093_v22 = vrot.slane %v2472_v50, 3  ;;  %v2483_v1 = vshll.u32 %v2290_v7, 16  ;;  %v9081_v3 = vadd.f32 %v11042_v21, %v11036_v10  ;;  %v11118_v10 = vpop.f32.mrb[8].mxu0  ;;  %v2292_v30 = vld [vmem:[#allocation2 + $0xd8] sm:$0xf] }
 0x176   : > { %v11095_v0 = vrot.slane %v2475_v58, 4  ;;  %v1881_v31 = vsel %vm1034_vm4, %v1879_v40, %v1880_v17  ;;  %v11110_v51 = vsel %vm1034_vm4, %v1882_v49, %v1883_v54  ;;  %v9084_v9 = vadd.f32 %v11056_v24, %v11045_v42  ;;  %v1811_v40 = vld [vmem:[#allocation2 + $0xc8] sm:$0xf]  ;;  %v2627_v42 = vld [vmem:[#allocation2 + $0xd0] sm:$0xf0]  ;;  %v11122_v20 = vpop.f32.mrb[9].mxu0 }
 0x177   : > { %4392 = vmatmul.mubr.bf16.gmra.mrb[96].mxu1 %v2453_v43  ;;  %v11116_v11 = vadd.f32 %v11066_v35, %v11054_v53  ;;  %v2470_v21 = vsel %vm336_vm3, %v2461_v8, %v2469_v56  ;;  %v2482_v52 = vrot.slane %v2480_v57, 3  ;;  %v2485_v47 = vrot.slane %v2483_v1, 4  ;;  %v2291_v24 = vld [vmem:[#allocation2 + $0xd0] sm:$0xf8]  ;;  %v11131_v32 = vpop.f32.mrb[10].mxu0 }
 0x178   : > { %4399 = vmatprep.mubr.bf16.mxu1 %v2698_v44  ;;  %v2152_v12 = vshrl.u32 %v1954_v19, 16  ;;  %v2150_v13 = vsel %vm1147_vm7, %v2141_v62, %v2149_v63  ;;  %v2155_v14 = vshll.u32 %v1954_v19, 16  ;;  %v2160_v16 = vshrl.u32 %v1955_v4, 16  ;;  %v11136_v38 = vpop.f32.mrb[8].mxu1  ;;  %v11138_v46 = vpop.f32.mrb[11].mxu0 }
 0x179   : > { %v2163_v17 = vshll.u32 %v1955_v4, 16  ;;  %v2701_v53 = vsel %vm1034_vm4, %v2699_v23, %v2700_v18  ;;  %v2478_v35 = vor.u32 %v11095_v0, %v11093_v22  ;;  %v11129_v60 = vadd.f32 %v11072_v34, %v11068_v5  ;;  %v11140_v8 = vpop.f32.mrb[9].mxu1  ;;  %v1956_v23 = vld [vmem:[#allocation2 + $0xd0] sm:$0xf0]  ;;  %v1957_v50 = vld [vmem:[#allocation2 + $0xd8] sm:$0x1f] }
 0x17a   : > { %v2154_v26 = vrot.slane %v2152_v12, 4  ;;  %v11134_v36 = vadd.f32 %v9081_v3, %v11100_v2  ;;  %v2157_v39 = vrot.slane %v2155_v14, 5  ;;  %v2162_v43 = vrot.slane %v2160_v16, 4  ;;  %v11145_v58 = vpop.f32.mrb[10].mxu1  ;;  %v1812_v4 = vld [vmem:[#allocation2 + $0xd0] sm:$0xf0] }
 0x17b   : > { %4239 = vmatmul.mubr.bf16.gmra.mrb[100].mxu0 %v1881_v31  ;;  %v2165_v44 = vrot.slane %v2163_v17, 5  ;;  %v2486_v48 = vor.u32 %v2485_v47, %v2482_v52  ;;  %v1885_v7 = vrot.slane %v1810_v33, 4  ;;  %v1886_v5 = vrot.slane %v1811_v40, 4  ;;  %v11147_v19 = vpop.f32.mrb[11].mxu1  ;;  %v11153_v31 = vpop.f32.mrb[12].mxu0 }
 0x17c   : > { %4246 = vmatprep.mubr.bf16.mxu0 %v2150_v13  ;;  %v2489_v34 = vshrl.u32 %v2291_v24, 16  ;;  %v11143_v37 = vadd.f32 %v9084_v9, %v11100_v2  ;;  %v2158_v49 = vor.u32 %v2157_v39, %v2154_v26  ;;  %v2492_v56 = vshll.u32 %v2291_v24, 16  ;;  %v1813_v47 = vld [vmem:[#allocation2 + $0xd8] sm:$0xf]  ;;  %v2629_v12 = vld [vmem:[#allocation2 + $0xe0] sm:$0xf0] }
 0x17d   : > { %v2166_v54 = vor.u32 %v2165_v44, %v2162_v43  ;;  %v2702_v62 = vrot.slane %v2627_v42, 4  ;;  %v2703_v63 = vrot.slane %v2628_v29, 4  ;;  %v2497_v18 = vshrl.u32 %v2292_v30, 16  ;;  %v11161_v40 = vpop.f32.mrb[13].mxu0  ;;  %v2630_v13 = vld [vmem:[#allocation2 + $0xe8] sm:$0xf] }
 0x17e   : > { %v2500_v57 = vshll.u32 %v2292_v30, 16  ;;  %v2491_v22 = vrot.slane %v2489_v34, 3  ;;  %v2494_v0 = vrot.slane %v2492_v56, 4  ;;  %v9087_v1 = vadd.f32 %v11077_v27, %v11070_v6  ;;  %v11164_v14 = vpop.f32.mrb[14].mxu0  ;;  %v2294_v30 = vld [vmem:[#allocation2 + $0xe8] sm:$0xf] }
 0x17f   : > { %4400 = vmatmul.mubr.bf16.gmra.mrb[100].mxu1 %v2470_v21  ;;  %v9090_v3 = vadd.f32 %v11087_v59, %v11080_v41  ;;  %v2487_v9 = vsel %vm336_vm3, %v2478_v35, %v2486_v48  ;;  %v1887_v33 = vsel %vm1034_vm4, %v1885_v7, %v1886_v5  ;;  %v11159_v52 = vadd.f32 %v11089_v61, %v11084_v55  ;;  %v2293_v55 = vld [vmem:[#allocation2 + $0xe0] sm:$0xf8]  ;;  %v11167_v61 = vpop.f32.mrb[15].mxu0 }
 0x180   : > { %4407 = vmatprep.mubr.bf16.mxu1 %v2701_v53  ;;  %v2169_v21 = vshrl.u32 %v1956_v23, 16  ;;  %v2167_v6 = vsel %vm1147_vm7, %v2158_v49, %v2166_v54  ;;  %v2499_v27 = vrot.slane %v2497_v18, 3  ;;  %v2502_v41 = vrot.slane %v2500_v57, 4  ;;  %v1959_v18 = vld [vmem:[#allocation2 + $0xe8] sm:$0x1f] }
 0x181   : > { %v2172_v59 = vshll.u32 %v1956_v23, 16  ;;  %v2704_v16 = vsel %vm1034_vm4, %v2702_v62, %v2703_v63  ;;  %v2177_v42 = vshrl.u32 %v1957_v50, 16  ;;  %v2180_v24 = vshll.u32 %v1957_v50, 16  ;;  %v1958_v50 = vld [vmem:[#allocation2 + $0xe0] sm:$0xf0] }
 0x182   : > { %v2171_v17 = vrot.slane %v2169_v21, 4  ;;  %v2495_v53 = vor.u32 %v2494_v0, %v2491_v22  ;;  %v11172_v26 = vadd.f32 %v11104_v28, %v11091_v15  ;;  %v1888_v29 = vrot.slane %v1812_v4, 4 }
 0x183   : > { %4247 = vmatmul.mubr.bf16.gmra.mrb[104].mxu0 %v11110_v51  ;;  %v2174_v35 = vrot.slane %v2172_v59, 5  ;;  %v2179_v39 = vrot.slane %v2177_v42, 4  ;;  %v2182_v43 = vrot.slane %v2180_v24, 5  ;;  %v1889_v44 = vrot.slane %v1813_v47, 4  ;;  %v2631_v47 = vld [vmem:[#allocation2 + $0xf0] sm:$0xf0] }
 0x184   : > { %4254 = vmatprep.mubr.bf16.mxu0 %v2167_v6  ;;  %v2705_v48 = vrot.slane %v2629_v12, 4  ;;  %v2503_v7 = vor.u32 %v2502_v41, %v2499_v27  ;;  %v2706_v34 = vrot.slane %v2630_v13, 4  ;;  %v2506_v49 = vshrl.u32 %v2293_v55, 16  ;;  %v2632_v27 = vld [vmem:[#allocation2 + $0xf8] sm:$0xf] }
 0x185   : > { %v2175_v5 = vor.u32 %v2174_v35, %v2171_v17  ;;  %v2183_v54 = vor.u32 %v2182_v43, %v2179_v39  ;;  %v2509_v56 = vshll.u32 %v2293_v55, 16  ;;  %v2514_v51 = vshrl.u32 %v2294_v30, 16  ;;  %v2295_v41 = vld [vmem:[#allocation2 + $0xf0] sm:$0xf8] }
 0x186   : > { %v2517_v23 = vshll.u32 %v2294_v30, 16  ;;  %v11175_v15 = vadd.f32 %v9087_v1, %v11100_v2  ;;  %v11178_v28 = vadd.f32 %v9090_v3, %v11100_v2  ;;  %v9093_v62 = vadd.f32 %v11122_v20, %v11118_v10  ;;  %v1815_v20 = vld [vmem:[#allocation2 + $0xe8] sm:$0xf] }
 0x187   : > { %4408 = vmatmul.mubr.bf16.gmra.mrb[104].mxu1 %v2487_v9  ;;  %v11184_v63 = vadd.f32 %v11138_v46, %v11131_v32  ;;  %v2508_v57 = vrot.slane %v2506_v49, 3  ;;  %v2511_v22 = vrot.slane %v2509_v56, 4  ;;  %v2516_v0 = vrot.slane %v2514_v51, 3  ;;  %v1814_v9 = vld [vmem:[#allocation2 + $0xe0] sm:$0xf0] }
 0x188   : > { %4415 = vmatprep.mubr.bf16.mxu1 %v2704_v16  ;;  %v2519_v4 = vrot.slane %v2517_v23, 4  ;;  %v2504_v1 = vsel %vm336_vm3, %v2495_v53, %v2503_v7  ;;  %v2184_v21 = vsel %vm1147_vm7, %v2175_v5, %v2183_v54  ;;  %v11190_v3 = vadd.f32 %v11140_v8, %v11136_v38  ;;  %v2296_v8 = vld [vmem:[#allocation2 + $0xf8] sm:$0xf] }
 0x189   : > { %v2186_v10 = vshrl.u32 %v1958_v50, 16  ;;  %v1890_v32 = vsel %vm1034_vm4, %v1888_v29, %v1889_v44  ;;  %v2707_v46 = vsel %vm1034_vm4, %v2705_v48, %v2706_v34  ;;  %v2189_v12 = vshll.u32 %v1958_v50, 16  ;;  %v1960_v29 = vld [vmem:[#allocation2 + $0xf0] sm:$0xf0] }
 0x18a   : > { %v2194_v6 = vshrl.u32 %v1959_v18, 16  ;;  %v11195_v59 = vadd.f32 %v9093_v62, %v11100_v2  ;;  %v2197_v16 = vshll.u32 %v1959_v18, 16  ;;  %v11199_v38 = vadd.f32 %v11147_v19, %v11145_v58  ;;  %v9209_v17 = vpop.f32.mrb[12].mxu1 }
 0x18b   : > { %4255 = vmatmul.mubr.bf16.gmra.mrb[108].mxu0 %v1887_v33  ;;  %v2188_v13 = vrot.slane %v2186_v10, 4  ;;  %v2512_v42 = vor.u32 %v2511_v22, %v2508_v57  ;;  %v2520_v24 = vor.u32 %v2519_v4, %v2516_v0  ;;  %v2191_v55 = vrot.slane %v2189_v12, 5  ;;  %v9210_v35 = vpop.f32.mrb[13].mxu1  ;;  %v1961_v22 = vld [vmem:[#allocation2 + $0xf8] sm:$0x1f] }
 0x18c   : > { %4262 = vmatprep.mubr.bf16.mxu0 %v2184_v21  ;;  %v2196_v53 = vrot.slane %v2194_v6, 4  ;;  %v2199_v30 = vrot.slane %v2197_v16, 5  ;;  %v1891_v33 = vrot.slane %v1814_v9, 4  ;;  %v1892_v39 = vrot.slane %v1815_v20, 4  ;;  %v9212_v44 = vpop.f32.mrb[14].mxu1  ;;  %v11201_v19 = vpop.f32.mrb[16].mxu0 }
 0x18d   : > { %v2523_v43 = vshrl.u32 %v2295_v41, 16  ;;  %v2192_v48 = vor.u32 %v2191_v55, %v2188_v13  ;;  %v2708_v7 = vrot.slane %v2631_v47, 4  ;;  %v2526_v5 = vshll.u32 %v2295_v41, 16  ;;  %v9213_v58 = vpop.f32.mrb[15].mxu1  ;;  %v9104_v23 = vpop.f32.mrb[17].mxu0 }
 0x18e   : > { %v2531_v34 = vshrl.u32 %v2296_v8, 16  ;;  %v2200_v49 = vor.u32 %v2199_v30, %v2196_v53  ;;  %v2709_v54 = vrot.slane %v2632_v27, 4  ;;  %v2534_v51 = vshll.u32 %v2296_v8, 16  ;;  %v9106_v0 = vpop.f32.mrb[18].mxu0  ;;  %v2297_v41 = vld [vmem:[#allocation2 + $0x100] sm:$0xf8] }
 0x18f   : > { %4416 = vmatmul.mubr.bf16.gmra.mrb[108].mxu1 %v2504_v1  ;;  %v11203_v56 = vrot.slane %v2523_v43, 3  ;;  %v11205_v50 = vrot.slane %v2526_v5, 4  ;;  %v9099_v18 = vadd.f32 %v11161_v40, %v11153_v31  ;;  %v9102_v57 = vadd.f32 %v11167_v61, %v11164_v14  ;;  %v9107_v10 = vpop.f32.mrb[19].mxu0  ;;  %v11224_v14 = vld [vmem:[#allocation2 + $0x100] sm:$0xf0] }
 0x190   : > { %4423 = vmatprep.mubr.bf16.mxu1 %v2707_v46  ;;  %v11207_v62 = vrot.slane %v2531_v34, 3  ;;  %v2201_v4 = vsel %vm1147_vm7, %v2192_v48, %v2200_v49  ;;  %v2536_v9 = vrot.slane %v2534_v51, 4  ;;  %v11214_v1 = vadd.f32 %v9210_v35, %v9209_v17  ;;  %v11222_v46 = vld [vmem:[#allocation2 + $0xf0] sm:$0xf0]  ;;  %v1817_v30 = vld [vmem:[#allocation2 + $0xf8] sm:$0xf] }
 0x191   : > { %v2203_v21 = vshrl.u32 %v1960_v29, 16  ;;  %v2521_v20 = vsel %vm336_vm3, %v2512_v42, %v2520_v24  ;;  %v11219_v47 = vadd.f32 %v11184_v63, %v11100_v2  ;;  %v1893_v31 = vsel %vm1034_vm4, %v1891_v33, %v1892_v39  ;;  %v2634_v42 = vld [vmem:[#allocation2 + $0x108] sm:$0xf]  ;;  %v386_v39 = vld [vmem:[#allocation2 + $0x108] sm:$0x10] }
 0x192   : > { %v2206_v40 = vshll.u32 %v1960_v29, 16  ;;  %v2710_v61 = vsel %vm1034_vm4, %v2708_v7, %v2709_v54  ;;  %v2211_v6 = vshrl.u32 %v1961_v22, 16  ;;  %v2214_v27 = vshll.u32 %v1961_v22, 16  ;;  %v9215_v13 = vpop.f32.mrb[16].mxu1  ;;  %v2298_v24 = vld [vmem:[#allocation2 + $0x108] sm:$0xf] }
 0x193   : > { %4263 = vmatmul.mubr.bf16.gmra.mrb[112].mxu0 %v1890_v32  ;;  %v2205_v12 = vrot.slane %v2203_v21, 4  ;;  %v2529_v63 = vor.u32 %v11205_v50, %v11203_v56  ;;  %v11230_v16 = vadd.f32 %v9099_v18, %v11100_v2  ;;  %v11232_v17 = vadd.f32 %v9213_v58, %v9212_v44  ;;  %v9216_v32 = vpop.f32.mrb[17].mxu1  ;;  %v1962_v5 = vld [vmem:[#allocation2 + $0x100] sm:$0xf0] }
 0x194   : > { %4270 = vmatprep.mubr.bf16.mxu0 %v2201_v4  ;;  %v2208_v8 = vrot.slane %v2206_v40, 5  ;;  %v2537_v55 = vor.u32 %v2536_v9, %v11207_v62  ;;  %v11236_v53 = vadd.f32 %v9102_v57, %v11100_v2  ;;  %v2213_v35 = vrot.slane %v2211_v6, 4  ;;  %v9218_v33 = vpop.f32.mrb[18].mxu1  ;;  %v1818_v51 = vld [vmem:[#allocation2 + $0x100] sm:$0xf0] }
 0x195   : > { %v2216_v29 = vrot.slane %v2214_v27, 5  ;;  %v1894_v48 = vrot.slane %v11222_v46, 4  ;;  %v2711_v7 = vrot.slane %v11224_v14, 4  ;;  %v2540_v44 = vshrl.u32 %v2297_v41, 16  ;;  %v9219_v34 = vpop.f32.mrb[19].mxu1 }
 0x196   : > { %v2209_v43 = vor.u32 %v2208_v8, %v2205_v12  ;;  %v2543_v49 = vshll.u32 %v2297_v41, 16  ;;  %v2548_v54 = vshrl.u32 %v2298_v24, 16  ;;  %v2551_v56 = vshll.u32 %v2298_v24, 16  ;;  %v9109_v50 = vpop.f32.mrb[20].mxu0  ;;  %v1819_v4 = vld [vmem:[#allocation2 + $0x108] sm:$0xf] }
 0x197   : > { %4424 = vmatmul.mubr.bf16.gmra.mrb[112].mxu1 %v2521_v20  ;;  %v2217_v58 = vor.u32 %v2216_v29, %v2213_v35  ;;  %v2712_v62 = vrot.slane %v2634_v42, 4  ;;  %v2542_v18 = vrot.slane %v2540_v44, 3  ;;  %v11241_v57 = vadd.f32 %v9104_v23, %v11201_v19  ;;  %v9110_v9 = vpop.f32.mrb[21].mxu0  ;;  %v2635_v14 = vld [vmem:[#allocation2 + $0x110] sm:$0xf0] }
 0x198   : > { %4431 = vmatprep.mubr.bf16.mxu1 %v2710_v61  ;;  %v11243_v22 = vadd.f32 %v9107_v10, %v9106_v0  ;;  %v2545_v40 = vrot.slane %v2543_v49, 4  ;;  %v2550_v20 = vrot.slane %v2548_v54, 3  ;;  %v2553_v46 = vrot.slane %v2551_v56, 4  ;;  %v9112_v12 = vpop.f32.mrb[22].mxu0  ;;  %v2636_v23 = vld [vmem:[#allocation2 + $0x118] sm:$0xf] }
 0x199   : > { %v2218_v21 = vsel %vm1147_vm7, %v2209_v43, %v2217_v58  ;;  %v2538_v6 = vsel %vm336_vm3, %v2529_v63, %v2537_v55  ;;  %v1895_v27 = vrot.slane %v1817_v30, 4  ;;  %v11247_v61 = vadd.f32 %v9216_v32, %v9215_v13  ;;  %v9113_v0 = vpop.f32.mrb[23].mxu0  ;;  %v332_v24 = vld [vmem:[#allocation2 + $0x110] sm:$0x8]  ;;  %v2300_v35 = vld [vmem:[#allocation2 + $0x118] sm:$0xf] }
 0x19a   : > { %v387_v19 = vsel %vm10754_vm6, 0, %v386_v39  ;;  %v2546_v10 = vor.u32 %v2545_v40, %v2542_v18  ;;  %v2554_v41 = vor.u32 %v2553_v46, %v2550_v20  ;;  %v2220_v8 = vshrl.u32 %v1962_v5, 16  ;;  %v2749_v30 = vld [vmem:[#allocation2 + $0x20] sm:$0xf0] }
 0x19b   : > { %4271 = vmatmul.mubr.bf16.gmra.mrb[116].mxu0 %v1893_v31  ;;  %388 = vst [vmem:[#allocation2 + $0x108] sm:$0x10] %v387_v19  ;;  %v2223_v42 = vshll.u32 %v1962_v5, 16  ;;  %v2713_v29 = vsel %vm1034_vm4, %v2711_v7, %v2712_v62  ;;  %v11252_v63 = vadd.f32 %v9219_v34, %v9218_v33  ;;  %v1897_v13 = vrot.slane %v1818_v51, 4  ;;  %v9221_v55 = vpop.f32.mrb[20].mxu1 }
 0x19c   : > { %4278 = vmatprep.mubr.bf16.mxu0 %v2218_v21  ;;  %v1898_v32 = vrot.slane %v1819_v4, 4  ;;  %v11254_v39 = vrot.slane %v2220_v8, 4  ;;  %v2714_v31 = vrot.slane %v2635_v14, 4  ;;  %v2715_v44 = vrot.slane %v2636_v23, 4  ;;  %v9222_v58 = vpop.f32.mrb[21].mxu1 }
 0x19d   : > { %v11256_v43 = vrot.slane %v2223_v42, 5  ;;  %v1896_v5 = vsel %vm1034_vm4, %v1894_v48, %v1895_v27  ;;  %v333_v49 = vsel %vm10744_vm2, 0, %v332_v24  ;;  %v2565_v54 = vshrl.u32 %v2300_v35, 16  ;;  %v9224_v33 = vpop.f32.mrb[22].mxu1  ;;  %v2750_v34 = vld [vmem:[#allocation2 + $0x28] sm:$0x1f] }
 0x19e   : > { %v2568_v7 = vshll.u32 %v2300_v35, 16  ;;  %v2555_v56 = vsel %vm336_vm3, %v2546_v10, %v2554_v41  ;;  %v11263_v51 = vsel %vm1034_vm4, %v1897_v13, %v1898_v32  ;;  %334 = vst [vmem:[#allocation2 + $0x110] sm:$0x8] %v333_v49  ;;  %v11265_v62 = vadd.f32 %v9110_v9, %v9109_v50  ;;  %v9225_v4 = vpop.f32.mrb[23].mxu1  ;;  %v10249_v48 = vld [vmem:[#allocation10 + $0x40] sm:$0xff]  }
 0x19f   : > { %4432 = vmatmul.mubr.bf16.gmra.mrb[116].mxu1 %v2538_v6  ;;  %v11267_v18 = vadd.f32 %v9113_v0, %v9112_v12  ;;  %v11269_v21 = vrot.slane %v2565_v54, 3  ;;  %v11273_v20 = vadd.f32 %v9222_v58, %v9221_v55  ;;  %v2782_v46 = vshrl.u32 %v2749_v30, 16  ;;  %v2751_v14 = vld [vmem:[#allocation2 + $0x30] sm:$0xf0]  ;;  %v9115_v6 = vpop.f32.mrb[24].mxu0  ;;  %9535 = vmatprep.subr.bf16.mxu1 %v10249_v48  ;;  %v10250_v0 = vld [vmem:[#allocation10] sm:$0xff]  }
 0x1a0   : > { %4439 = vmatprep.mubr.bf16.mxu1 %v2713_v29  ;;  %v11271_v40 = vrot.slane %v2568_v7, 4  ;;  %v2226_v27 = vor.u32 %v11256_v43, %v11254_v39  ;;  %v2716_v50 = vsel %vm1034_vm4, %v2714_v31, %v2715_v44  ;;  %v2785_v9 = vshll.u32 %v2749_v30, 16  ;;  %v2752_v19 = vld [vmem:[#allocation2 + $0x38] sm:$0x1f]  ;;  %v9116_v23 = vpop.f32.mrb[25].mxu0  ;;  %9536 = vmatpush3.bf16.msra.mxu1 %v10250_v0 }
 0x1a1   : > { %v2790_v12 = vshrl.u32 %v2750_v34, 16  ;;  %v2784_v8 = vrot.slane %v2782_v46, 4  ;;  %v2793_v42 = vshll.u32 %v2750_v34, 16  ;;  %v11280_v24 = vadd.f32 %v9225_v4, %v9224_v33  ;;  %v9118_v35 = vpop.f32.mrb[26].mxu0 }
 0x1a2   : > { %v1963_v10 = vld [vmem:[#allocation2 + $0x108] sm:$0x1f]  ;;  %v2787_v32 = vrot.slane %v2785_v9, 5  ;;  %v9119_v30 = vpop.f32.mrb[27].mxu0  ;;  %v2799_v43 = vshrl.u32 %v2751_v14, 16  ;;  %v2802_v31 = vshll.u32 %v2751_v14, 16 }
 0x1a3   : > { %4279 = vmatmul.mubr.bf16.gmra.mrb[120].mxu0 %v1896_v5  ;;  %v2228_v29 = vshrl.u32 %v1963_v10, 16  ;;  %v2231_v13 = vshll.u32 %v1963_v10, 16  ;;  %v2792_v55 = vrot.slane %v2790_v12, 4  ;;  %v2795_v39 = vrot.slane %v2793_v42, 5 }
 0x1a4   : > { %v2807_v44 = vshrl.u32 %v2752_v19, 16  ;;  %v2788_v54 = vor.u32 %v2787_v32, %v2784_v8  ;;  %v2810_v7 = vshll.u32 %v2752_v19, 16  ;;  %v9227_v48 = vpop.f32.mrb[24].mxu1  ;;  %v2801_v4 = vrot.slane %v2799_v43, 4 }
 0x1a5   : > { %v2230_v58 = vrot.slane %v2228_v29, 4  ;;  %v2233_v49 = vrot.slane %v2231_v13, 5  ;;  %v2299_v34 = vld [vmem:[#allocation2 + $0x110] sm:$0xf8]  ;;  %v2796_v33 = vor.u32 %v2795_v39, %v2792_v55  ;;  %v2804_v46 = vrot.slane %v2802_v31, 5  ;;  %v9228_v41 = vpop.f32.mrb[25].mxu1 }
 0x1a6   : > { %v2809_v5 = vrot.slane %v2807_v44, 4  ;;  %v2557_v12 = vshrl.u32 %v2299_v34, 16  ;;  %v2560_v10 = vshll.u32 %v2299_v34, 16  ;;  %v2812_v0 = vrot.slane %v2810_v7, 5  ;;  %v9230_v42 = vpop.f32.mrb[26].mxu1 }
 0x1a7   : > { %4440 = vmatmul.mubr.bf16.gmra.mrb[120].mxu1 %v2555_v56  ;;  %v2234_v9 = vor.u32 %v2233_v49, %v2230_v58  ;;  %v2797_v14 = vsel %vm1147_vm7, %v2788_v54, %v2796_v33  ;;  %v2805_v29 = vor.u32 %v2804_v46, %v2801_v4  ;;  %v11283_v8 = vadd.f32 %v9116_v23, %v9115_v6  ;;  %v2754_v13 = vld [vmem:[#allocation2 + $0x48] sm:$0x1f]  ;;  %v9231_v32 = vpop.f32.mrb[27].mxu1  ;;  %v2755_v31 = vld [vmem:[#allocation2 + $0x50] sm:$0xf0]  ;;  %v9121_v44 = vpop.f32.mrb[28].mxu0 }
 0x1a8   : > { %4447 = vmatprep.mubr.bf16.mxu1 %v2716_v50  ;;  %v11285_v19 = vadd.f32 %v9119_v30, %v9118_v35  ;;  %v2559_v39 = vrot.slane %v2557_v12, 3  ;;  %v2562_v56 = vrot.slane %v2560_v10, 4  ;;  %v2813_v43 = vor.u32 %v2812_v0, %v2809_v5  ;;  %v2756_v35 = vld [vmem:[#allocation2 + $0x58] sm:$0x1f]  ;;  %v9122_v30 = vpop.f32.mrb[29].mxu0 }
 0x1a9   : > { %v2235_v55 = vsel %vm1147_vm7, %v2226_v27, %v2234_v9  ;;  %v11290_v58 = vadd.f32 %v11241_v57, %v11100_v2  ;;  %v11294_v50 = vadd.f32 %v11243_v22, %v11100_v2  ;;  %v11296_v6 = vadd.f32 %v9228_v41, %v9227_v48  ;;  %v9124_v34 = vpop.f32.mrb[30].mxu0  ;;  %v2757_v57 = vld [vmem:[#allocation2 + $0x60] sm:$0xf0]  ;;  %v2758_v10 = vld [vmem:[#allocation2 + $0x68] sm:$0x1f] }
 0x1aa   : > { %4286 = vmatprep.mubr.bf16.mxu0 %v2235_v55  ;;  %v2816_v23 = vshrl.u32 %v2753_v25, 16  ;;  %v2563_v27 = vor.u32 %v2562_v56, %v2559_v39  ;;  %v2814_v49 = vsel %vm1147_vm7, %v2805_v29, %v2813_v43  ;;  %v2819_v54 = vshll.u32 %v2753_v25, 16  ;;  %v9125_v41 = vpop.f32.mrb[31].mxu0  ;;  %v10251_v25 = vld [vmem:[#allocation10 + $0x48] sm:$0xff]   ;;  %v2759_v39 = vld [vmem:[#allocation2 + $0x70] sm:$0xf0] }
 0x1ab   : > { %12450 = vst [vmem:[#allocation16_spill] sm:$0xff] %v11296_v6  ;;  %4287 = vmatmul.mubr.bf16.gmra.mrb[124].mxu0 %v11263_v51  ;;  %v2824_v7 = vshrl.u32 %v2754_v13, 16  ;;  %v2827_v4 = vshll.u32 %v2754_v13, 16  ;;  %v11300_v22 = vadd.f32 %v9231_v32, %v9230_v42  ;;  %v2833_v46 = vshrl.u32 %v2755_v31, 16  ;;  %9537 = vmatprep.subr.bf16.mxu1 %v10251_v25  ;;  %v2763_v25 = vld [vmem:[#allocation2 + $0x90] sm:$0xf0] }
 0x1ac   : > { %10023 = vmatprep.mubr.bf16.mxu0 %v2797_v14  ;;  %v2818_v33 = vrot.slane %v2816_v23, 4  ;;  %v12452_v48 = vor.u32 %v11271_v40, %v11269_v21  ;;  %v2821_v51 = vrot.slane %v2819_v54, 5  ;;  %v2836_v12 = vshll.u32 %v2755_v31, 16  ;;  %v2760_v21 = vld [vmem:[#allocation2 + $0x78] sm:$0x1f]  ;;  %v10252_v40 = vld [vmem:[#allocation10 + $0x8] sm:$0xff]  }
 0x1ad   : > { %12451 = vst [vmem:[#allocation17_spill] sm:$0xff] %v11300_v22  ;;  %v2826_v9 = vrot.slane %v2824_v7, 4  ;;  %v2829_v0 = vrot.slane %v2827_v4, 5  ;;  %v2835_v29 = vrot.slane %v2833_v46, 4  ;;  %v2841_v55 = vshrl.u32 %v2756_v35, 16  ;;  %9538 = vmatpush3.bf16.msra.mxu1 %v10252_v40 }
 0x1ae   : > { %v2572_v5 = vsel %vm336_vm3, %v2563_v27, %v12452_v48  ;;  %v2844_v14 = vshll.u32 %v2756_v35, 16  ;;  %v2822_v42 = vor.u32 %v2821_v51, %v2818_v33  ;;  %v2838_v13 = vrot.slane %v2836_v12, 5 }
 0x1af   : > { %4448 = vmatmul.mubr.bf16.gmra.mrb[124].mxu1 %v2572_v5  ;;  %v11306_v32 = vadd.f32 %v9122_v30, %v9121_v44  ;;  %v11308_v56 = vadd.f32 %v9125_v41, %v9124_v34  ;;  %v2830_v43 = vor.u32 %v2829_v0, %v2826_v9  ;;  %v2843_v23 = vrot.slane %v2841_v55, 4  ;;  %v2761_v30 = vld [vmem:[#allocation2 + $0x80] sm:$0xf0]  ;;  %v2762_v41 = vld [vmem:[#allocation2 + $0x88] sm:$0x1f] }
 0x1b0   : > { %v2846_v31 = vrot.slane %v2844_v14, 5  ;;  %v2850_v27 = vshrl.u32 %v2757_v57, 16  ;;  %v11312_v54 = vadd.f32 %v11265_v62, %v11100_v2  ;;  %v11316_v35 = vadd.f32 %v11267_v18, %v11100_v2 }
 0x1b1   : > { %v2839_v7 = vor.u32 %v2838_v13, %v2835_v29  ;;  %v2853_v44 = vshll.u32 %v2757_v57, 16  ;;  %v2831_v34 = vsel %vm1147_vm7, %v2822_v42, %v2830_v43  ;;  %v2858_v46 = vshrl.u32 %v2758_v10, 16 }
 0x1b2   : > { %v2847_v33 = vor.u32 %v2846_v31, %v2843_v23  ;;  %v2852_v4 = vrot.slane %v2850_v27, 4  ;;  %v2861_v5 = vshll.u32 %v2758_v10, 16  ;;  %v2867_v51 = vshrl.u32 %v2759_v39, 16 }
 0x1b3   : > { %10024 = vmatmul.mubr.bf16.vlgmr.msra.gmra.mrb[128].mxu0 %v2814_v49  ;;  %v2855_v48 = vrot.slane %v2853_v44, 5  ;;  %v2870_v62 = vshll.u32 %v2759_v39, 16  ;;  %v11321_v9 = vadd.f32 %v11283_v8, %v11100_v2  ;;  %v2860_v18 = vrot.slane %v2858_v46, 4  ;;  %v2764_v39 = vld [vmem:[#allocation2 + $0x98] sm:$0x1f] }
 0x1b4   : > { %10027 = vmatprep.mubr.bf16.mxu0 %v2831_v34  ;;  %v2875_v57 = vshrl.u32 %v2760_v21, 16  ;;  %v2878_v12 = vshll.u32 %v2760_v21, 16  ;;  %v2863_v55 = vrot.slane %v2861_v5, 5  ;;  %v2869_v14 = vrot.slane %v2867_v51, 4  ;;  %v2765_v21 = vld [vmem:[#allocation2 + $0xa0] sm:$0xf0] }
 0x1b5   : > { %12453 = vst [vmem:[#allocation18_spill] sm:$0xff] %v11321_v9  ;;  %v9233_v0 = vpop.f32.mrb[28].mxu1  ;;  %v2856_v29 = vor.u32 %v2855_v48, %v2852_v4  ;;  %v2872_v42 = vrot.slane %v2870_v62, 5  ;;  %v2884_v10 = vshrl.u32 %v2761_v30, 16  ;;  %v2887_v43 = vshll.u32 %v2761_v30, 16 }
 0x1b6   : > { %v9234_v13 = vpop.f32.mrb[29].mxu1  ;;  %v2877_v49 = vrot.slane %v2875_v57, 4  ;;  %v2880_v40 = vrot.slane %v2878_v12, 5  ;;  %v2848_v23 = vsel %vm1147_vm7, %v2839_v7, %v2847_v33  ;;  %v2864_v27 = vor.u32 %v2863_v55, %v2860_v18  ;;  %v2766_v7 = vld [vmem:[#allocation2 + $0xa8] sm:$0x1f] }
 0x1b7   : > { %v11324_v8 = vadd.f32 %v9234_v13, %v9233_v0  ;;  %v9236_v31 = vpop.f32.mrb[30].mxu1  ;;  %v2892_v44 = vshrl.u32 %v2762_v41, 16  ;;  %v2873_v46 = vor.u32 %v2872_v42, %v2869_v14  ;;  %v2886_v48 = vrot.slane %v2884_v10, 4 }
 0x1b8   : > { %v9237_v34 = vpop.f32.mrb[31].mxu1  ;;  %v9127_v4 = vpop.f32.mrb[32].mxu0  ;;  %v2889_v5 = vrot.slane %v2887_v43, 5  ;;  %v2895_v51 = vshll.u32 %v2762_v41, 16  ;;  %v2865_v62 = vsel %vm1147_vm7, %v2856_v29, %v2864_v27  ;;  %v2901_v22 = vshrl.u32 %v2763_v25, 16 }
 0x1b9   : > { %12454 = vst [vmem:[#allocation19_spill] sm:$0xff] %v11324_v8  ;;  %v11327_v57 = vadd.f32 %v9237_v34, %v9236_v31  ;;  %v9128_v30 = vpop.f32.mrb[33].mxu0  ;;  %v2894_v12 = vrot.slane %v2892_v44, 4  ;;  %v2881_v33 = vor.u32 %v2880_v40, %v2877_v49  ;;  %v2904_v42 = vshll.u32 %v2763_v25, 16  ;;  %v2767_v41 = vld [vmem:[#allocation2 + $0xb0] sm:$0xf0] }
 0x1ba   : > { %v9129_v0 = vadd.f32 %v9128_v30, %v9127_v4  ;;  %v9130_v13 = vpop.f32.mrb[34].mxu0  ;;  %v2890_v18 = vor.u32 %v2889_v5, %v2886_v48  ;;  %v2897_v55 = vrot.slane %v2895_v51, 5  ;;  %v2903_v14 = vrot.slane %v2901_v22, 4  ;;  %v10253_v34 = vld [vmem:[#allocation10 + $0x50] sm:$0xff]   ;;  %v2769_v30 = vld [vmem:[#allocation2 + $0xc0] sm:$0xf0] }
 0x1bb   : > { %12455 = vst [vmem:[#allocation20_spill] sm:$0xff] %v11327_v57  ;;  %10028 = vmatmul.mubr.bf16.gmra.mrb[132].mxu0 %v2848_v23  ;;  %v9131_v8 = vpop.f32.mrb[35].mxu0  ;;  %v2909_v10 = vshrl.u32 %v2764_v39, 16  ;;  %v2912_v43 = vshll.u32 %v2764_v39, 16  ;;  %v2918_v44 = vshrl.u32 %v2765_v21, 16  ;;  %v10254_v57 = vld [vmem:[#allocation10 + $0x10] sm:$0xff]   ;;  %v2882_v23 = vsel %vm1147_vm7, %v2873_v46, %v2881_v33  ;;  %9539 = vmatprep.subr.bf16.mxu1 %v10253_v34 }
 0x1bc   : > { %10031 = vmatprep.mubr.bf16.mxu0 %v2865_v62  ;;  %v3911_v29 = vadd.f32 %v9129_v0, %v11100_v2  ;;  %v9132_v31 = vadd.f32 %v9131_v8, %v9130_v13  ;;  %v2898_v27 = vor.u32 %v2897_v55, %v2894_v12  ;;  %v2906_v40 = vrot.slane %v2904_v42, 5  ;;  %v2768_v62 = vld [vmem:[#allocation2 + $0xb8] sm:$0x1f]  ;;  %9540 = vmatpush3.bf16.msra.mxu1 %v10254_v57 }
 0x1bd   : > { %v9239_v49 = vpop.f32.mrb[32].mxu1  ;;  %v2911_v4 = vrot.slane %v2909_v10, 4  ;;  %v2914_v48 = vrot.slane %v2912_v43, 5  ;;  %v2921_v5 = vshll.u32 %v2765_v21, 16  ;;  %v11332_v39 = vrot.slane %v2918_v44, 4 }
 0x1be   : > { %v3914_v22 = vadd.f32 %v9132_v31, %v11100_v2  ;;  %v9240_v25 = vpop.f32.mrb[33].mxu1  ;;  %v2926_v51 = vshrl.u32 %v2766_v7, 16  ;;  %v2907_v0 = vor.u32 %v2906_v40, %v2903_v14  ;;  %v2929_v43 = vshll.u32 %v2766_v7, 16 }
 0x1bf   : > { %v9241_v8 = vadd.f32 %v9240_v25, %v9239_v49  ;;  %v9242_v12 = vpop.f32.mrb[34].mxu1  ;;  %v2915_v13 = vor.u32 %v2914_v48, %v2911_v4  ;;  %v2923_v55 = vrot.slane %v2921_v5, 5  ;;  %v2935_v46 = vshrl.u32 %v2767_v41, 16  ;;  %v2770_v49 = vld [vmem:[#allocation2 + $0xc8] sm:$0x1f] }
 0x1c0   : > { %v9243_v42 = vpop.f32.mrb[35].mxu1  ;;  %v9133_v10 = vpop.f32.mrb[36].mxu0  ;;  %v2928_v21 = vrot.slane %v2926_v51, 4  ;;  %v2938_v33 = vshll.u32 %v2767_v41, 16  ;;  %v2899_v31 = vsel %vm1147_vm7, %v2890_v18, %v2898_v27  ;;  %v2931_v40 = vrot.slane %v2929_v43, 5 }
 0x1c1   : > { %v11334_v2 = vadd.f32 %v9241_v8, %v3911_v29  ;;  %v9244_v44 = vadd.f32 %v9243_v42, %v9242_v12  ;;  %v2916_v6 = vsel %vm1147_vm7, %v2907_v0, %v2915_v13  ;;  %v9134_v34 = vpop.f32.mrb[37].mxu0  ;;  %v2937_v4 = vrot.slane %v2935_v46, 4  ;;  %v2771_v48 = vld [vmem:[#allocation2 + $0xd0] sm:$0xf0]  ;;  %v2772_v8 = vld [vmem:[#allocation2 + $0xd8] sm:$0x1f] }
 0x1c2   : > { %v9135_v25 = vadd.f32 %v9134_v34, %v9133_v10  ;;  %v9136_v14 = vpop.f32.mrb[38].mxu0  ;;  %v2940_v57 = vrot.slane %v2938_v33, 5  ;;  %v2943_v41 = vshrl.u32 %v2768_v62, 16  ;;  %v2946_v29 = vshll.u32 %v2768_v62, 16  ;;  %v11343_v18 = vld [vmem:[%s12426_s2] ss:$0 sm:$0xff] }
 0x1c3   : > { %12456 = vst [vmem:[#allocation21_spill] sm:$0xff] %v11334_v2  ;;  %10032 = vmatmul.mubr.bf16.gmra.mrb[136].mxu0 %v2882_v23  ;;  %v11338_v5 = vadd.f32 %v9244_v44, %v3914_v22  ;;  %v9137_v7 = vpop.f32.mrb[39].mxu0  ;;  %v2952_v51 = vshrl.u32 %v2769_v30, 16  ;;  %v2924_v0 = vor.u32 %v2923_v55, %v11332_v39  ;;  %v2932_v13 = vor.u32 %v2931_v40, %v2928_v21  ;;  %v2773_v44 = vld [vmem:[#allocation2 + $0xe0] sm:$0xf0] }
 0x1c4   : > { %10035 = vmatprep.mubr.bf16.mxu0 %v2899_v31  ;;  %v3919_v27 = vadd.f32 %v11343_v18, %v9135_v25  ;;  %v9138_v12 = vadd.f32 %v9137_v7, %v9136_v14  ;;  %v2941_v23 = vor.u32 %v2940_v57, %v2937_v4  ;;  %v2945_v22 = vrot.slane %v2943_v41, 4  ;;  %v2774_v14 = vld [vmem:[#allocation2 + $0xe8] sm:$0x1f] }
 0x1c5   : > { %12457 = vst [vmem:[#allocation22_spill] sm:$0xff] %v11338_v5  ;;  %v2948_v42 = vrot.slane %v2946_v29, 5  ;;  %v2955_v10 = vshll.u32 %v2769_v30, 16  ;;  %v2954_v46 = vrot.slane %v2952_v51, 4  ;;  %v2960_v33 = vshrl.u32 %v2770_v49, 16 }
 0x1c6   : > { %v9245_v43 = vpop.f32.mrb[36].mxu1  ;;  %v3922_v62 = vadd.f32 %v11343_v18, %v9138_v12  ;;  %v2963_v31 = vshll.u32 %v2770_v49, 16  ;;  %v2969_v9 = vshrl.u32 %v2771_v48, 16  ;;  %v2972_v25 = vshll.u32 %v2771_v48, 16  ;;  %v2775_v29 = vld [vmem:[#allocation2 + $0xf0] sm:$0xf0] }
 0x1c7   : > { %v9246_v34 = vpop.f32.mrb[37].mxu1  ;;  %v2949_v5 = vor.u32 %v2948_v42, %v2945_v22  ;;  %v2957_v2 = vrot.slane %v2955_v10, 5  ;;  %v2962_v55 = vrot.slane %v2960_v33, 4  ;;  %v2977_v40 = vshrl.u32 %v2772_v8, 16 }
 0x1c8   : > { %v9247_v7 = vadd.f32 %v9246_v34, %v9245_v43  ;;  %v9248_v39 = vpop.f32.mrb[38].mxu1  ;;  %v2965_v21 = vrot.slane %v2963_v31, 5  ;;  %v11350_v30 = vadd.f32 %v11343_v18, %v11285_v19  ;;  %v2933_v4 = vsel %vm1147_vm7, %v2924_v0, %v2932_v13  ;;  %v2776_v0 = vld [vmem:[#allocation2 + $0xf8] sm:$0x1f] }
 0x1c9   : > { %v9249_v57 = vpop.f32.mrb[39].mxu1  ;;  %v11353_v49 = vrot.slane %v2969_v9, 4  ;;  %v11355_v41 = vrot.slane %v2972_v25, 5  ;;  %v2958_v22 = vor.u32 %v2957_v2, %v2954_v46  ;;  %v11359_v42 = vrot.slane %v2977_v40, 4 }
 0x1ca   : > { %v11357_v51 = vadd.f32 %v9247_v7, %v3919_v27  ;;  %v9250_v48 = vadd.f32 %v9249_v57, %v9248_v39  ;;  %v9139_v12 = vpop.f32.mrb[40].mxu0  ;;  %v2966_v43 = vor.u32 %v2965_v21, %v2962_v55  ;;  %v2980_v19 = vshll.u32 %v2772_v8, 16  ;;  %v10255_v7 = vld [vmem:[#allocation10 + $0x58] sm:$0xff]   ;;  %v2777_v55 = vld [vmem:[#allocation2 + $0x100] sm:$0xf0] }
 0x1cb   : > { %10036 = vmatmul.mubr.bf16.gmra.mrb[140].mxu0 %v2916_v6  ;;  %v9140_v10 = vpop.f32.mrb[41].mxu0  ;;  %v2986_v33 = vshrl.u32 %v2773_v44, 16  ;;  %v2989_v31 = vshll.u32 %v2773_v44, 16  ;;  %v2950_v13 = vsel %vm1147_vm7, %v2941_v23, %v2949_v5  ;;  %v2994_v25 = vshrl.u32 %v2774_v14, 16  ;;  %v10256_v39 = vld [vmem:[#allocation10 + $0x18] sm:$0xff]   ;;  %9541 = vmatprep.subr.bf16.mxu1 %v10255_v7 }
 0x1cc   : > { %10039 = vmatprep.mubr.bf16.mxu0 %v2933_v4  ;;  %v11361_v9 = vadd.f32 %v9250_v48, %v3922_v62  ;;  %v9141_v34 = vadd.f32 %v9140_v10, %v9139_v12  ;;  %v9142_v27 = vpop.f32.mrb[42].mxu0  ;;  %v2982_v46 = vrot.slane %v2980_v19, 5  ;;  %v2997_v57 = vshll.u32 %v2774_v14, 16  ;;  %v2778_v10 = vld [vmem:[#allocation2 + $0x108] sm:$0x1f]  ;;  %9542 = vmatpush3.bf16.msra.mxu1 %v10256_v39 }
 0x1cd   : > { %v9143_v2 = vpop.f32.mrb[43].mxu0  ;;  %v2988_v40 = vrot.slane %v2986_v33, 4  ;;  %v2991_v6 = vrot.slane %v2989_v31, 5  ;;  %v2975_v44 = vor.u32 %v11355_v41, %v11353_v49  ;;  %v2996_v21 = vrot.slane %v2994_v25, 4 }
 0x1ce   : > { %12458 = vst [vmem:[#allocation23_spill] sm:$0xff] %v11361_v9  ;;  %v9144_v8 = vadd.f32 %v9143_v2, %v9142_v27  ;;  %v3003_v62 = vshrl.u32 %v2775_v29, 16  ;;  %v3927_v5 = vadd.f32 %v11343_v18, %v9141_v34  ;;  %v2967_v4 = vsel %vm1147_vm7, %v2958_v22, %v2966_v43  ;;  %v389_v2 = vld [vmem:[#allocation2 + $0x118] sm:$0x10] }
 0x1cf   : > { %v9251_v23 = vpop.f32.mrb[40].mxu1  ;;  %v2999_v48 = vrot.slane %v2997_v57, 5  ;;  %v3006_v12 = vshll.u32 %v2775_v29, 16  ;;  %v2983_v14 = vor.u32 %v2982_v46, %v11359_v42  ;;  %v2992_v33 = vor.u32 %v2991_v6, %v2988_v40  ;;  %v11376_v57 = vld [vmem:[#allocation2 + $0x110] sm:$0xf0] }
 0x1d0   : > { %v9252_v19 = vpop.f32.mrb[41].mxu1  ;;  %v3011_v31 = vshrl.u32 %v2776_v0, 16  ;;  %v3014_v27 = vshll.u32 %v2776_v0, 16  ;;  %v3930_v49 = vadd.f32 %v11343_v18, %v9144_v8  ;;  %v11370_v34 = vrot.slane %v3003_v62, 4 }
 0x1d1   : > { %v9253_v41 = vadd.f32 %v9252_v19, %v9251_v23  ;;  %v9254_v25 = vpop.f32.mrb[42].mxu1  ;;  %v3000_v7 = vor.u32 %v2999_v48, %v2996_v21  ;;  %v11372_v22 = vrot.slane %v3006_v12, 5  ;;  %v3020_v43 = vshrl.u32 %v2777_v55, 16 }
 0x1d2   : > { %v9255_v9 = vpop.f32.mrb[43].mxu1  ;;  %v11374_v29 = vrot.slane %v3011_v31, 4  ;;  %v3023_v39 = vshll.u32 %v2777_v55, 16  ;;  %v3903_v42 = vadd.f32 %v11343_v18, %v11306_v32  ;;  %v11382_v6 = vrot.slane %v3014_v27, 5 }
 0x1d3   : > { %10040 = vmatmul.mubr.bf16.gmra.mrb[144].mxu0 %v2950_v13  ;;  %v11380_v0 = vadd.f32 %v9253_v41, %v3927_v5  ;;  %v9256_v46 = vadd.f32 %v9255_v9, %v9254_v25  ;;  %v9145_v40 = vpop.f32.mrb[44].mxu0  ;;  %v11386_v8 = vadd.f32 %v11343_v18, %v11308_v56  ;;  %v11388_v62 = vrot.slane %v3020_v43, 4 }
 0x1d4   : > { %10043 = vmatprep.mubr.bf16.mxu0 %v2967_v4  ;;  %v9146_v21 = vpop.f32.mrb[45].mxu0  ;;  %v11390_v55 = vrot.slane %v3023_v39, 5  ;;  %v3028_v23 = vshrl.u32 %v2778_v10, 16  ;;  %v3031_v5 = vshll.u32 %v2778_v10, 16  ;;  %v390_v9 = vsel %vm10754_vm6, 0, %v389_v2 }
 0x1d5   : > { %v11392_v48 = vadd.f32 %v9256_v46, %v3930_v49  ;;  %v9147_v32 = vadd.f32 %v9146_v21, %v9145_v40  ;;  %v9148_v13 = vpop.f32.mrb[46].mxu0  ;;  %v2984_v12 = vsel %vm1147_vm7, %v2975_v44, %v2983_v14  ;;  %v3001_v56 = vsel %vm1147_vm7, %v2992_v33, %v3000_v7  ;;  %391 = vst [vmem:[#allocation2 + $0x118] sm:$0x10] %v390_v9  ;;  %v12460_v40 = vld [vmem:[#allocation16_spill] sm:$0xff]  ;;  %v12461_v21 = vld [vmem:[#allocation17_spill] sm:$0xff] }
 0x1d6   : > { %v9149_v19 = vpop.f32.mrb[47].mxu0  ;;  %v3009_v4 = vor.u32 %v11372_v22, %v11370_v34  ;;  %v3030_v31 = vrot.slane %v3028_v23, 4  ;;  %v3017_v49 = vor.u32 %v11382_v6, %v11374_v29  ;;  %v3033_v41 = vrot.slane %v3031_v5, 5 }
 0x1d7   : > { %v9150_v27 = vadd.f32 %v9149_v19, %v9148_v13  ;;  %v3037_v10 = vshrl.u32 %v11376_v57, 16  ;;  %v3935_v25 = vadd.f32 %v11343_v18, %v9147_v32  ;;  %v11406_v44 = vadd.f32 %v11116_v11, %v11134_v36  ;;  %v12463_v13 = vld [vmem:[#allocation20_spill] sm:$0xff] }
 0x1d8   : > { %v9257_v2 = vpop.f32.mrb[44].mxu1  ;;  %v11410_v14 = vadd.f32 %v11129_v60, %v11143_v37  ;;  %v11414_v33 = vadd.f32 %v11159_v52, %v11175_v15  ;;  %v3026_v22 = vor.u32 %v11390_v55, %v11388_v62  ;;  %v3040_v29 = vshll.u32 %v11376_v57, 16 }
 0x1d9   : > { %v3938_v7 = vadd.f32 %v11343_v18, %v9150_v27  ;;  %v9258_v34 = vpop.f32.mrb[45].mxu1  ;;  %v11422_v11 = vadd.f32 %v11172_v26, %v11178_v28  ;;  %v11426_v60 = vadd.f32 %v11190_v3, %v11195_v59  ;;  %v11430_v37 = vadd.f32 %v11199_v38, %v11219_v47 }
 0x1da   : > { %v9259_v36 = vadd.f32 %v9258_v34, %v9257_v2  ;;  %v9260_v43 = vpop.f32.mrb[46].mxu1  ;;  %v11434_v52 = vadd.f32 %v11214_v1, %v11230_v16  ;;  %v3034_v39 = vor.u32 %v3033_v41, %v3030_v31  ;;  %v3039_v57 = vrot.slane %v3037_v10, 4  ;;  %v10257_v16 = vld [vmem:[#allocation10 + $0x60] sm:$0xff]  }
 0x1db   : > { %10044 = vmatmul.mubr.bf16.gmra.mrb[148].mxu0 %v2984_v12  ;;  %v9261_v15 = vpop.f32.mrb[47].mxu1  ;;  %v11438_v26 = vadd.f32 %v11232_v17, %v11236_v53  ;;  %v11442_v28 = vadd.f32 %v11247_v61, %v11290_v58  ;;  %v11448_v1 = vadd.f32 %v11252_v63, %v11294_v50  ;;  %v11452_v47 = vadd.f32 %v11273_v20, %v11312_v54  ;;  %v10258_v17 = vld [vmem:[#allocation10 + $0x20] sm:$0xff]   ;;  %v12459_v58 = vld [vmem:[#allocation18_spill] sm:$0xff] }
 0x1dc   : > { %v11444_v3 = vadd.f32 %v9259_v36, %v3935_v25  ;;  %10047 = vmatprep.mubr.bf16.mxu0 %v3001_v56  ;;  %v9262_v59 = vadd.f32 %v9261_v15, %v9260_v43  ;;  %v9151_v38 = vpop.f32.mrb[48].mxu0  ;;  %v2780_v46 = vld [vmem:[#allocation2 + $0x118] sm:$0x1f]  ;;  %v11456_v61 = vadd.f32 %v11280_v24, %v11316_v35  ;;  %v11460_v6 = vadd.f32 %v12460_v40, %v12459_v58  ;;  %v12462_v50 = vld [vmem:[#allocation19_spill] sm:$0xff]  ;;  %v10259_v36 = vld [vmem:[#allocation10 + $0x68] sm:$0xff]  }
 0x1dd   : > { %v9152_v53 = vpop.f32.mrb[49].mxu0  ;;  %v11464_v63 = vadd.f32 %v12461_v21, %v11350_v30  ;;  %v11467_v62 = vadd.f32 %v12462_v50, %v3903_v42  ;;  %v3045_v23 = vshrl.u32 %v2780_v46, 16  ;;  %v3048_v32 = vshll.u32 %v2780_v46, 16  ;;  %9543 = vmatprep.subr.bf16.mxu1 %v10257_v16  ;;  %v10260_v43 = vld [vmem:[#allocation10 + $0x28] sm:$0xff]  }
 0x1de   : > { %v11469_v20 = vadd.f32 %v9262_v59, %v3938_v7  ;;  %v9153_v54 = vadd.f32 %v9152_v53, %v9151_v38  ;;  %v9154_v55 = vpop.f32.mrb[50].mxu0  ;;  %v3042_v35 = vrot.slane %v3040_v29, 5  ;;  %v11473_v5 = vadd.f32 %v12463_v13, %v11386_v8  ;;  %9544 = vmatpush3.bf16.msra.mxu1 %v10258_v17 }
 0x1df   : > { %v9155_v24 = vpop.f32.mrb[51].mxu0  ;;  %v3018_v30 = vsel %vm1147_vm7, %v3009_v4, %v3017_v49  ;;  %v3047_v12 = vrot.slane %v3045_v23, 4  ;;  %v3050_v42 = vrot.slane %v3048_v32, 5  ;;  %v3035_v19 = vsel %vm1147_vm7, %v3026_v22, %v3034_v39  ;;  %9545 = vmatprep.subr.bf16.mxu1 %v10259_v36 }
 0x1e0   : > { %v9156_v9 = vadd.f32 %v9155_v24, %v9154_v55  ;;  %v3043_v56 = vor.u32 %v3042_v35, %v3039_v57  ;;  %v3943_v27 = vadd.f32 %v11343_v18, %v9153_v54 }
 0x1e1   : > { %v3051_v31 = vor.u32 %v3050_v42, %v3047_v12 }
 0x1e2   : > { %v3946_v8 = vadd.f32 %v11343_v18, %v9156_v9  ;;  %9546 = vmatpush3.bf16.msra.mxu1 %v10260_v43 }
 0x1e3   : > { %10048 = vmatmul.mubr.bf16.gmra.mrb[152].mxu0 %v3018_v30  ;;  %v3052_v10 = vsel %vm1147_vm7, %v3043_v56, %v3051_v31 }
 0x1e4   : > { %10051 = vmatprep.mubr.bf16.mxu0 %v3035_v19 }
 0x1e9   : > { %v9263_v41 = vpop.f32.mrb[48].mxu1 }
 0x1ea   : > { %v9264_v25 = vpop.f32.mrb[49].mxu1 }
 0x1eb   : > { %v9265_v2 = vadd.f32 %v9264_v25, %v9263_v41  ;;  %v9266_v7 = vpop.f32.mrb[50].mxu1  ;;  %10052 = vmatmul.mubr.bf16.gmra.mrb[156].mxu0 %v3052_v10  ;;  %v9157_v49 = vpop.f32.mrb[52].mxu0  ;;  %v10261_v41 = vld [vmem:[#allocation10 + $0x70] sm:$0xff]  }
 0x1ec   : > { %v9267_v4 = vpop.f32.mrb[51].mxu1  ;;  %v9158_v29 = vpop.f32.mrb[53].mxu0  ;;  %v10262_v10 = vld [vmem:[#allocation10 + $0x30] sm:$0xff]   ;;  %9547 = vmatprep.subr.bf16.mxu1 %v10261_v41 }
 0x1ed   : > { %v11480_v34 = vadd.f32 %v9265_v2, %v3943_v27  ;;  %v9268_v22 = vadd.f32 %v9267_v4, %v9266_v7  ;;  %v9159_v15 = vadd.f32 %v9158_v29, %v9157_v49  ;;  %v9160_v39 = vpop.f32.mrb[54].mxu0  ;;  %9548 = vmatpush3.bf16.msra.mxu1 %v10262_v10 }
 0x1ee   : > { %v9161_v59 = vpop.f32.mrb[55].mxu0 }
 0x1ef   : > { %v11482_v57 = vadd.f32 %v9268_v22, %v3946_v8  ;;  %v9162_v38 = vadd.f32 %v9161_v59, %v9160_v39  ;;  %v3951_v16 = vadd.f32 %v11343_v18, %v9159_v15 }
 0x1f1   : > { %v9269_v17 = vpop.f32.mrb[52].mxu1  ;;  %v3954_v46 = vadd.f32 %v11343_v18, %v9162_v38 }
 0x1f2   : > { %v9270_v53 = vpop.f32.mrb[53].mxu1 }
 0x1f3   : > { %v9271_v58 = vadd.f32 %v9270_v53, %v9269_v17  ;;  %v9272_v40 = vpop.f32.mrb[54].mxu1  ;;  %v10263_v17 = vld [vmem:[#allocation10 + $0xc0] sm:$0xff]  }
 0x1f4   : > { %v9273_v21 = vpop.f32.mrb[55].mxu1  ;;  %v9163_v50 = vpop.f32.mrb[56].mxu0  ;;  %9647 = vmatprep.subr.bf16.mxu0 %v10263_v17 }
 0x1f5   : > { %v11486_v54 = vadd.f32 %v9271_v58, %v3951_v16  ;;  %v9274_v55 = vadd.f32 %v9273_v21, %v9272_v40  ;;  %v9164_v23 = vpop.f32.mrb[57].mxu0  ;;  %v10264_v21 = vld [vmem:[#allocation10 + $0x80] sm:$0xff]  }
 0x1f6   : > { %v9165_v32 = vadd.f32 %v9164_v23, %v9163_v50  ;;  %v9166_v24 = vpop.f32.mrb[58].mxu0  ;;  %9648 = vmatpush3.bf16.msra.mxu0 %v10264_v21  ;;  %v10272_v21 = vld [vmem:[#allocation10 + $0x98] sm:$0xff]  }
 0x1f7   : > { %v11488_v35 = vadd.f32 %v9274_v55, %v3954_v46  ;;  %v9167_v13 = vpop.f32.mrb[59].mxu0 }
 0x1f8   : > { %v9168_v30 = vadd.f32 %v9167_v13, %v9166_v24  ;;  %v3959_v9 = vadd.f32 %v11343_v18, %v9165_v32  ;;  %v10265_v13 = vld [vmem:[#allocation10 + $0xc8] sm:$0xff]  }
 0x1f9   : > { %v9275_v12 = vpop.f32.mrb[56].mxu1  ;;  %9649 = vmatprep.subr.bf16.mxu0 %v10265_v13 }
 0x1fa   : > { %v9276_v42 = vpop.f32.mrb[57].mxu1  ;;  %v3962_v19 = vadd.f32 %v11343_v18, %v9168_v30 }
 0x1fb   : > { %v9277_v56 = vadd.f32 %v9276_v42, %v9275_v12  ;;  %v9278_v31 = vpop.f32.mrb[58].mxu1  ;;  %v10266_v12 = vld [vmem:[#allocation10 + $0x88] sm:$0xff]  }
 0x1fc   : > { %v9279_v27 = vpop.f32.mrb[59].mxu1  ;;  %9650 = vmatpush3.bf16.msra.mxu0 %v10266_v12 }
 0x1fd   : > { %v11492_v25 = vadd.f32 %v9277_v56, %v3959_v9  ;;  %v9280_v8 = vadd.f32 %v9279_v27, %v9278_v31  ;;  %v9169_v2 = vpop.f32.mrb[60].mxu0 }
 0x1fe   : > { %v9170_v7 = vpop.f32.mrb[61].mxu0 }
 0x1ff   : > { %v11494_v4 = vadd.f32 %v9280_v8, %v3962_v19  ;;  %v9171_v49 = vadd.f32 %v9170_v7, %v9169_v2  ;;  %v9172_v22 = vpop.f32.mrb[62].mxu0 }
 0x200   : > { %v9173_v29 = vpop.f32.mrb[63].mxu0 }
 0x201   : > { %v9174_v36 = vadd.f32 %v9173_v29, %v9172_v22  ;;  %v3967_v43 = vadd.f32 %v11343_v18, %v9171_v49 }
 0x202   : > { %v9281_v15 = vpop.f32.mrb[60].mxu1 }
 0x203   : > { %v9282_v39 = vpop.f32.mrb[61].mxu1  ;;  %v3970_v59 = vadd.f32 %v11343_v18, %v9174_v36 }
 0x204   : > { %v9283_v38 = vadd.f32 %v9282_v39, %v9281_v15  ;;  %v9284_v16 = vpop.f32.mrb[62].mxu1  ;;  %v10267_v15 = vld [vmem:[#allocation10 + $0x78] sm:$0xff]   ;;  %v10269_v39 = vld [vmem:[#allocation10 + $0xd0] sm:$0xff]  }
 0x205   : > { %v9285_v53 = vpop.f32.mrb[63].mxu1  ;;  %9549 = vmatprep.subr.bf16.mxu1 %v10267_v15  ;;  %9651 = vmatprep.subr.bf16.mxu0 %v10269_v39  ;;  %v4747_v39 = vld [vmem:[#allocation3 + $0x8] sm:$0xf] }
 0x206   : > { %v11498_v46 = vadd.f32 %v9283_v38, %v3967_v43  ;;  %v9286_v58 = vadd.f32 %v9285_v53, %v9284_v16  ;;  %v9303_v40 = vpop.f32.mrb[64].mxu0  ;;  %v10270_v38 = vld [vmem:[#allocation10 + $0x90] sm:$0xff]   ;;  %v10271_v16 = vld [vmem:[#allocation10 + $0xd8] sm:$0xff]  }
 0x207   : > { %v9304_v50 = vpop.f32.mrb[65].mxu0  ;;  %9652 = vmatpush3.bf16.msra.mxu0 %v10270_v38 }
 0x208   : > { %v11500_v55 = vadd.f32 %v9286_v58, %v3970_v59  ;;  %v9305_v23 = vadd.f32 %v9304_v50, %v9303_v40  ;;  %v9306_v32 = vpop.f32.mrb[66].mxu0  ;;  %9653 = vmatprep.subr.bf16.mxu0 %v10271_v16 }
 0x209   : > { %v9307_v24 = vpop.f32.mrb[67].mxu0 }
 0x20a   : > { %v4169_v18 = vadd.f32 %v9305_v23, %v11406_v44  ;;  %v9415_v30 = vpop.f32.mrb[64].mxu1  ;;  %v9308_v9 = vadd.f32 %v9307_v24, %v9306_v32 }
 0x20b   : > { %v9416_v42 = vpop.f32.mrb[65].mxu1  ;;  %9654 = vmatpush3.bf16.msra.mxu0 %v10272_v21 }
 0x20c   : > { %v4172_v19 = vadd.f32 %v9308_v9, %v11410_v14  ;;  %v9417_v56 = vadd.f32 %v9416_v42, %v9415_v30  ;;  %v9418_v31 = vpop.f32.mrb[66].mxu1  ;;  %v10268_v14 = vld [vmem:[#allocation10 + $0x38] sm:$0xff]   ;;  %v10273_v42 = vld [vmem:[#allocation10 + $0xe0] sm:$0xff]  }
 0x20d   : > { %v9419_v27 = vpop.f32.mrb[67].mxu1  ;;  %9550 = vmatpush3.bf16.msra.mxu1 %v10268_v14  ;;  %9655 = vmatprep.subr.bf16.mxu0 %v10273_v42  ;;  %v10278_v42 = vld [vmem:[#allocation10 + $0xf0] sm:$0xff]  }
 0x20e   : > { %v9420_v41 = vadd.f32 %v9419_v27, %v9418_v31  ;;  %v9309_v10 = vpop.f32.mrb[68].mxu0  ;;  %v11504_v8 = vadd.f32 %v9417_v56, %v4169_v18  ;;  %v397_v56 = vld [vmem:[#allocation3] sm:$0x8] }
 0x20f   : > { %v9310_v2 = vpop.f32.mrb[69].mxu0 }
 0x210   : > { %v9311_v7 = vadd.f32 %v9310_v2, %v9309_v10  ;;  %v9312_v49 = vpop.f32.mrb[70].mxu0  ;;  %v11506_v22 = vadd.f32 %v9420_v41, %v4172_v19  ;;  %v10274_v19 = vld [vmem:[#allocation10 + $0xa0] sm:$0xff]   ;;  %v398_v41 = vsel %vm10744_vm2, 0, %v397_v56  ;;  %v451_v10 = vld [vmem:[#allocation3 + $0x8] sm:$0x10] }
 0x211   : > { %v9313_v44 = vpop.f32.mrb[71].mxu0  ;;  %v5082_v2 = vld [vmem:[#allocation3] sm:$0xf0]  ;;  %399 = vst [vmem:[#allocation3] sm:$0x8] %v398_v41  ;;  %9656 = vmatpush3.bf16.msra.mxu0 %v10274_v19  ;;  %v10281_v41 = vld [vmem:[#allocation10 + $0xf8] sm:$0xff]  }
 0x212   : > { %v4177_v29 = vadd.f32 %v9311_v7, %v11414_v33  ;;  %v9421_v36 = vpop.f32.mrb[68].mxu1  ;;  %v9314_v43 = vadd.f32 %v9313_v44, %v9312_v49 }
 0x213   : > { %v9422_v59 = vpop.f32.mrb[69].mxu1 }
 0x214   : > { %v4180_v17 = vadd.f32 %v9314_v43, %v11422_v11  ;;  %v9423_v53 = vadd.f32 %v9422_v59, %v9421_v36  ;;  %v9424_v58 = vpop.f32.mrb[70].mxu1  ;;  %v5146_v36 = vrot.slane %v5082_v2, 4  ;;  %v10275_v43 = vld [vmem:[#allocation10 + $0xe8] sm:$0xff]  }
 0x215   : > { %v9425_v40 = vpop.f32.mrb[71].mxu1  ;;  %v10276_v59 = vld [vmem:[#allocation10 + $0xa8] sm:$0xff]   ;;  %9657 = vmatprep.subr.bf16.mxu0 %v10275_v43 }
 0x216   : > { %v9426_v50 = vadd.f32 %v9425_v40, %v9424_v58  ;;  %v9315_v33 = vpop.f32.mrb[72].mxu0  ;;  %v11510_v23 = vadd.f32 %v9423_v53, %v4177_v29  ;;  %v5083_v29 = vld [vmem:[#allocation3 + $0x8] sm:$0xf]  ;;  %v4790_v53 = vshll.u32 %v4747_v39, 16  ;;  %9658 = vmatpush3.bf16.msra.mxu0 %v10276_v59 }
 0x217   : > { %v9316_v32 = vpop.f32.mrb[73].mxu0  ;;  %v5147_v14 = vrot.slane %v5083_v29, 4  ;;  %9659 = vmatprep.subr.bf16.mxu0 %v10278_v42  ;;  %v403_v42 = vld [vmem:[#allocation3 + $0x20] sm:$0x8] }
 0x218   : > { %v9317_v24 = vadd.f32 %v9316_v32, %v9315_v33  ;;  %v9318_v13 = vpop.f32.mrb[74].mxu0  ;;  %v11512_v18 = vadd.f32 %v9426_v50, %v4180_v17  ;;  %v4746_v56 = vld [vmem:[#allocation3] sm:$0xf8] }
 0x219   : > { %v9319_v30 = vpop.f32.mrb[75].mxu0  ;;  %v5148_v40 = vsel %vm1034_vm4, %v5146_v36, %v5147_v14 }
 0x21a   : > { %v4185_v11 = vadd.f32 %v9317_v24, %v11426_v60  ;;  %v9427_v9 = vpop.f32.mrb[72].mxu1  ;;  %v9320_v12 = vadd.f32 %v9319_v30, %v9318_v13  ;;  %v452_v60 = vsel %vm10754_vm6, 0, %v451_v10  ;;  %7954 = vmatprep.mubr.bf16.mxu1 %v5148_v40  ;;  %v4792_v13 = vrot.slane %v4790_v53, 4  ;;  %v10279_v53 = vld [vmem:[#allocation10 + $0x100] sm:$0xff]  }
 0x21b   : > { %v9428_v31 = vpop.f32.mrb[73].mxu1  ;;  %453 = vst [vmem:[#allocation3 + $0x8] sm:$0x10] %v452_v60 }
 0x21c   : > { %v4188_v7 = vadd.f32 %v9320_v12, %v11430_v37  ;;  %v9429_v49 = vadd.f32 %v9428_v31, %v9427_v9  ;;  %v9430_v44 = vpop.f32.mrb[74].mxu1  ;;  %v4787_v37 = vshrl.u32 %v4747_v39, 16  ;;  %v10277_v12 = vld [vmem:[#allocation10 + $0x140] sm:$0xff]   ;;  %v10280_v31 = vld [vmem:[#allocation10 + $0xb0] sm:$0xff]  }
 0x21d   : > { %v9431_v15 = vpop.f32.mrb[75].mxu1  ;;  %9759 = vmatprep.subr.bf16.mxu1 %v10277_v12  ;;  %9660 = vmatpush3.bf16.msra.mxu0 %v10280_v31 }
 0x21e   : > { %v9432_v38 = vadd.f32 %v9431_v15, %v9430_v44  ;;  %v9321_v16 = vpop.f32.mrb[76].mxu0  ;;  %v11520_v17 = vadd.f32 %v9429_v49, %v4185_v11  ;;  %v4789_v24 = vrot.slane %v4787_v37, 3  ;;  %v4779_v49 = vshrl.u32 %v4746_v56, 16  ;;  %9661 = vmatprep.subr.bf16.mxu0 %v10281_v41 }
 0x21f   : > { %v9322_v58 = vpop.f32.mrb[77].mxu0  ;;  %v4782_v44 = vshll.u32 %v4746_v56, 16 }
 0x220   : > { %v9323_v21 = vadd.f32 %v9322_v58, %v9321_v16  ;;  %v9324_v50 = vpop.f32.mrb[78].mxu0  ;;  %v11523_v33 = vadd.f32 %v9432_v38, %v4188_v7  ;;  %v4793_v29 = vor.u32 %v4792_v13, %v4789_v24  ;;  %v4781_v14 = vrot.slane %v4779_v49, 3  ;;  %v400_v24 = vld [vmem:[#allocation3 + $0x10] sm:$0x8] }
 0x221   : > { %v9325_v32 = vpop.f32.mrb[79].mxu0  ;;  %v4784_v39 = vrot.slane %v4782_v44, 4 }
 0x222   : > { %v4193_v30 = vadd.f32 %v9323_v21, %v11434_v52  ;;  %v9433_v9 = vpop.f32.mrb[76].mxu1  ;;  %v9326_v11 = vadd.f32 %v9325_v32, %v9324_v50  ;;  %v10282_v52 = vld [vmem:[#allocation10 + $0xb8] sm:$0xff]  }
 0x223   : > { %v9434_v19 = vpop.f32.mrb[77].mxu1  ;;  %v4785_v37 = vor.u32 %v4784_v39, %v4781_v14  ;;  %9662 = vmatpush3.bf16.msra.mxu0 %v10282_v52  ;;  %v10283_v52 = vld [vmem:[#allocation10 + $0x148] sm:$0xff]  }
 0x224   : > { %v4196_v10 = vadd.f32 %v9326_v11, %v11438_v26  ;;  %v9435_v2 = vadd.f32 %v9434_v19, %v9433_v9  ;;  %v9436_v7 = vpop.f32.mrb[78].mxu1 }
 0x225   : > { %v9437_v60 = vpop.f32.mrb[79].mxu1  ;;  %v4794_v32 = vsel %vm336_vm3, %v4785_v37, %v4793_v29 }
 0x226   : > { %v9438_v36 = vadd.f32 %v9437_v60, %v9436_v7  ;;  %v9327_v43 = vpop.f32.mrb[80].mxu0  ;;  %v11527_v15 = vadd.f32 %v9435_v2, %v4193_v30  ;;  %7955 = vmatmul.mubr.bf16.vlgmr.msra.gmra.mrb[128].mxu1 %v4794_v32  ;;  %v401_v30 = vsel %vm10744_vm2, 0, %v400_v24 }
 0x227   : > { %v9328_v59 = vpop.f32.mrb[81].mxu0  ;;  %9760 = vmatpush3.bf16.msra.mxu1 %v10279_v53  ;;  %402 = vst [vmem:[#allocation3 + $0x10] sm:$0x8] %v401_v30 }
 0x228   : > { %v9329_v38 = vadd.f32 %v9328_v59, %v9327_v43  ;;  %v9330_v26 = vpop.f32.mrb[82].mxu0  ;;  %v11529_v16 = vadd.f32 %v9438_v36, %v4196_v10  ;;  %v454_v43 = vld [vmem:[#allocation3 + $0x18] sm:$0x10]  ;;  %9761 = vmatprep.subr.bf16.mxu1 %v10283_v52 }
 0x229   : > { %v9331_v58 = vpop.f32.mrb[83].mxu0 }
 0x22a   : > { %v4201_v40 = vadd.f32 %v9329_v38, %v11442_v28  ;;  %v9439_v21 = vpop.f32.mrb[80].mxu1  ;;  %v9332_v50 = vadd.f32 %v9331_v58, %v9330_v26  ;;  %v404_v28 = vsel %vm10744_vm2, 0, %v403_v42  ;;  %v455_v38 = vsel %vm10754_vm6, 0, %v454_v43 }
 0x22b   : > { %v9440_v13 = vpop.f32.mrb[81].mxu1  ;;  %405 = vst [vmem:[#allocation3 + $0x20] sm:$0x8] %v404_v28  ;;  %456 = vst [vmem:[#allocation3 + $0x18] sm:$0x10] %v455_v38 }
 0x22c   : > { %v4204_v9 = vadd.f32 %v9332_v50, %v11448_v1  ;;  %v9441_v11 = vadd.f32 %v9440_v13, %v9439_v21  ;;  %v9442_v12 = vpop.f32.mrb[82].mxu1 }
 0x22d   : > { %v9443_v19 = vpop.f32.mrb[83].mxu1 }
 0x22e   : > { %v9444_v56 = vadd.f32 %v9443_v19, %v9442_v12  ;;  %v9333_v31 = vpop.f32.mrb[84].mxu0  ;;  %v11538_v41 = vadd.f32 %v9441_v11, %v4201_v40  ;;  %v406_v40 = vld [vmem:[#allocation3 + $0x30] sm:$0x8] }
 0x22f   : > { %v9334_v10 = vpop.f32.mrb[85].mxu0  ;;  %v407_v50 = vsel %vm10744_vm2, 0, %v406_v40 }
 0x230   : > { %v9335_v2 = vadd.f32 %v9334_v10, %v9333_v31  ;;  %v9336_v7 = vpop.f32.mrb[86].mxu0  ;;  %v11540_v49 = vadd.f32 %v9444_v56, %v4204_v9  ;;  %408 = vst [vmem:[#allocation3 + $0x30] sm:$0x8] %v407_v50 }
 0x231   : > { %v9337_v1 = vpop.f32.mrb[87].mxu0 }
 0x232   : > { %v4209_v44 = vadd.f32 %v9335_v2, %v11452_v47  ;;  %v9445_v60 = vpop.f32.mrb[84].mxu1  ;;  %v9338_v29 = vadd.f32 %v9337_v1, %v9336_v7  ;;  %v10284_v47 = vld [vmem:[#allocation10 + $0x108] sm:$0xff]  }
 0x233   : > { %v9446_v36 = vpop.f32.mrb[85].mxu1  ;;  %9762 = vmatpush3.bf16.msra.mxu1 %v10284_v47  ;;  %v457_v1 = vld [vmem:[#allocation3 + $0x28] sm:$0x10] }
 0x234   : > { %v4212_v14 = vadd.f32 %v9338_v29, %v11456_v61  ;;  %v9447_v39 = vadd.f32 %v9446_v36, %v9445_v60  ;;  %v9448_v59 = vpop.f32.mrb[86].mxu1 }
 0x235   : > { %v9449_v26 = vpop.f32.mrb[87].mxu1 }
 0x236   : > { %v9450_v37 = vadd.f32 %v9449_v26, %v9448_v59  ;;  %v9339_v53 = vpop.f32.mrb[88].mxu0  ;;  %v11546_v58 = vadd.f32 %v9447_v39, %v4209_v44  ;;  %v409_v39 = vld [vmem:[#allocation3 + $0x40] sm:$0x8] }
 0x237   : > { %v9340_v21 = vpop.f32.mrb[89].mxu0 }
 0x238   : > { %v9341_v32 = vadd.f32 %v9340_v21, %v9339_v53  ;;  %v9342_v61 = vpop.f32.mrb[90].mxu0  ;;  %v11550_v24 = vadd.f32 %v9450_v37, %v4212_v14  ;;  %v410_v37 = vsel %vm10744_vm2, 0, %v409_v39 }
 0x239   : > { %v9343_v13 = vpop.f32.mrb[91].mxu0  ;;  %411 = vst [vmem:[#allocation3 + $0x40] sm:$0x8] %v410_v37 }
 0x23a   : > { %v4217_v30 = vadd.f32 %v9341_v32, %v11460_v6  ;;  %v9451_v9 = vpop.f32.mrb[88].mxu1  ;;  %v9344_v11 = vadd.f32 %v9343_v13, %v9342_v61  ;;  %v458_v6 = vsel %vm10754_vm6, 0, %v457_v1 }
 0x23b   : > { %v9452_v12 = vpop.f32.mrb[89].mxu1  ;;  %459 = vst [vmem:[#allocation3 + $0x28] sm:$0x10] %v458_v6 }
 0x23c   : > { %v4220_v42 = vadd.f32 %v9344_v11, %v11464_v63  ;;  %v9453_v19 = vadd.f32 %v9452_v12, %v9451_v9  ;;  %v9454_v28 = vpop.f32.mrb[90].mxu1  ;;  %v10285_v12 = vld [vmem:[#allocation10 + $0x150] sm:$0xff]  }
 0x23d   : > { %v9455_v56 = vpop.f32.mrb[91].mxu1  ;;  %9763 = vmatprep.subr.bf16.mxu1 %v10285_v12  ;;  %v463_v12 = vld [vmem:[#allocation3 + $0x48] sm:$0x10] }
 0x23e   : > { %v9456_v31 = vadd.f32 %v9455_v56, %v9454_v28  ;;  %v9345_v10 = vpop.f32.mrb[92].mxu0  ;;  %v11554_v2 = vadd.f32 %v9453_v19, %v4217_v30  ;;  %v12465_v30 = vld [vmem:[#allocation21_spill] sm:$0xff]  ;;  %v460_v19 = vld [vmem:[#allocation3 + $0x38] sm:$0x10] }
 0x23f   : > { %v9346_v7 = vpop.f32.mrb[93].mxu0  ;;  %v12466_v28 = vld [vmem:[#allocation22_spill] sm:$0xff] }
 0x240   : > { %v9347_v44 = vadd.f32 %v9346_v7, %v9345_v10  ;;  %v9348_v60 = vpop.f32.mrb[94].mxu0  ;;  %v11556_v29 = vadd.f32 %v9456_v31, %v4220_v42  ;;  %v461_v7 = vsel %vm10754_vm6, 0, %v460_v19 }
 0x241   : > { %v9349_v52 = vpop.f32.mrb[95].mxu0  ;;  %462 = vst [vmem:[#allocation3 + $0x38] sm:$0x10] %v461_v7 }
 0x242   : > { %v4225_v63 = vadd.f32 %v9347_v44, %v11467_v62  ;;  %v9457_v36 = vpop.f32.mrb[92].mxu1  ;;  %v9350_v43 = vadd.f32 %v9349_v52, %v9348_v60 }
 0x243   : > { %v9458_v14 = vpop.f32.mrb[93].mxu1 }
 0x244   : > { %v4228_v59 = vadd.f32 %v9350_v43, %v11473_v5  ;;  %v9459_v38 = vadd.f32 %v9458_v14, %v9457_v36  ;;  %v9460_v26 = vpop.f32.mrb[94].mxu1  ;;  %v412_v36 = vld [vmem:[#allocation3 + $0x50] sm:$0x8] }
 0x245   : > { %v9461_v53 = vpop.f32.mrb[95].mxu1 }
 0x246   : > { %v9462_v47 = vadd.f32 %v9461_v53, %v9460_v26  ;;  %v9351_v40 = vpop.f32.mrb[96].mxu0  ;;  %v11564_v21 = vadd.f32 %v9459_v38, %v4225_v63  ;;  %v10286_v63 = vld [vmem:[#allocation10 + $0x110] sm:$0xff]  }
 0x247   : > { %v9352_v50 = vpop.f32.mrb[97].mxu0  ;;  %9764 = vmatpush3.bf16.msra.mxu1 %v10286_v63 }
 0x248   : > { %v9353_v32 = vadd.f32 %v9352_v50, %v9351_v40  ;;  %v9354_v62 = vpop.f32.mrb[98].mxu0  ;;  %v11566_v61 = vadd.f32 %v9462_v47, %v4228_v59  ;;  %v413_v59 = vsel %vm10744_vm2, 0, %v412_v36  ;;  %v12467_v40 = vld [vmem:[#allocation23_spill] sm:$0xff] }
 0x249   : > { %v9355_v13 = vpop.f32.mrb[99].mxu0  ;;  %414 = vst [vmem:[#allocation3 + $0x50] sm:$0x8] %v413_v59 }
 0x24a   : > { %v4233_v9 = vadd.f32 %v9353_v32, %v12465_v30  ;;  %v9463_v5 = vpop.f32.mrb[96].mxu1  ;;  %v9356_v11 = vadd.f32 %v9355_v13, %v9354_v62 }
 0x24b   : > { %v9464_v42 = vpop.f32.mrb[97].mxu1 }
 0x24c   : > { %v4236_v56 = vadd.f32 %v9356_v11, %v12466_v28  ;;  %v9465_v31 = vadd.f32 %v9464_v42, %v9463_v5  ;;  %v9466_v10 = vpop.f32.mrb[98].mxu1 }
 0x24d   : > { %v9467_v1 = vpop.f32.mrb[99].mxu1 }
 0x24e   : > { %v9468_v44 = vadd.f32 %v9467_v1, %v9466_v10  ;;  %v9357_v60 = vpop.f32.mrb[100].mxu0  ;;  %v11572_v6 = vadd.f32 %v9465_v31, %v4233_v9 }
 0x24f   : > { %v9358_v52 = vpop.f32.mrb[101].mxu0 }
 0x250   : > { %v9359_v43 = vadd.f32 %v9358_v52, %v9357_v60  ;;  %v9360_v14 = vpop.f32.mrb[102].mxu0  ;;  %v11574_v39 = vadd.f32 %v9468_v44, %v4236_v56  ;;  %v415_v44 = vld [vmem:[#allocation3 + $0x60] sm:$0x8] }
 0x251   : > { %v9361_v38 = vpop.f32.mrb[103].mxu0  ;;  %v416_v36 = vsel %vm10744_vm2, 0, %v415_v44 }
 0x252   : > { %v4241_v26 = vadd.f32 %v9359_v43, %v11357_v51  ;;  %v9469_v37 = vpop.f32.mrb[100].mxu1  ;;  %v9362_v53 = vadd.f32 %v9361_v38, %v9360_v14  ;;  %v464_v51 = vsel %vm10754_vm6, 0, %v463_v12  ;;  %417 = vst [vmem:[#allocation3 + $0x60] sm:$0x8] %v416_v36 }
 0x253   : > { %v9470_v47 = vpop.f32.mrb[101].mxu1  ;;  %465 = vst [vmem:[#allocation3 + $0x48] sm:$0x10] %v464_v51 }
 0x254   : > { %v4244_v50 = vadd.f32 %v9362_v53, %v12467_v40  ;;  %v9471_v32 = vadd.f32 %v9470_v47, %v9469_v37  ;;  %v9472_v62 = vpop.f32.mrb[102].mxu1  ;;  %v10287_v37 = vld [vmem:[#allocation10 + $0x158] sm:$0xff]  }
 0x255   : > { %v9473_v13 = vpop.f32.mrb[103].mxu1  ;;  %v466_v40 = vld [vmem:[#allocation3 + $0x58] sm:$0x10]  ;;  %9765 = vmatprep.subr.bf16.mxu1 %v10287_v37 }
 0x256   : > { %v9474_v30 = vadd.f32 %v9473_v13, %v9472_v62  ;;  %v9363_v9 = vpop.f32.mrb[104].mxu0  ;;  %v11580_v5 = vadd.f32 %v9471_v32, %v4241_v26 }
 0x257   : > { %v9364_v11 = vpop.f32.mrb[105].mxu0 }
 0x258   : > { %v9365_v42 = vadd.f32 %v9364_v11, %v9363_v9  ;;  %v9366_v19 = vpop.f32.mrb[106].mxu0  ;;  %v11582_v28 = vadd.f32 %v9474_v30, %v4244_v50  ;;  %v10288_v9 = vld [vmem:[#allocation10 + $0x118] sm:$0xff]   ;;  %v418_v11 = vld [vmem:[#allocation3 + $0x70] sm:$0x8] }
 0x259   : > { %v9367_v56 = vpop.f32.mrb[107].mxu0  ;;  %v419_v51 = vsel %vm10744_vm2, 0, %v418_v11  ;;  %9766 = vmatpush3.bf16.msra.mxu1 %v10288_v9 }
 0x25a   : > { %v4249_v31 = vadd.f32 %v9365_v42, %v11380_v0  ;;  %v9475_v10 = vpop.f32.mrb[104].mxu1  ;;  %v9368_v7 = vadd.f32 %v9367_v56, %v9366_v19  ;;  %420 = vst [vmem:[#allocation3 + $0x70] sm:$0x8] %v419_v51 }
 0x25b   : > { %v9476_v1 = vpop.f32.mrb[105].mxu1 }
 0x25c   : > { %v4252_v60 = vadd.f32 %v9368_v7, %v11392_v48  ;;  %v9477_v52 = vadd.f32 %v9476_v1, %v9475_v10  ;;  %v9478_v63 = vpop.f32.mrb[106].mxu1  ;;  %v467_v48 = vsel %vm10754_vm6, 0, %v466_v40 }
 0x25d   : > { %v9479_v43 = vpop.f32.mrb[107].mxu1  ;;  %468 = vst [vmem:[#allocation3 + $0x58] sm:$0x10] %v467_v48 }
 0x25e   : > { %v9480_v14 = vadd.f32 %v9479_v43, %v9478_v63  ;;  %v9369_v59 = vpop.f32.mrb[108].mxu0  ;;  %v11590_v38 = vadd.f32 %v9477_v52, %v4249_v31  ;;  %v469_v63 = vld [vmem:[#allocation3 + $0x68] sm:$0x10] }
 0x25f   : > { %v9370_v26 = vpop.f32.mrb[109].mxu0 }
 0x260   : > { %v9371_v0 = vadd.f32 %v9370_v26, %v9369_v59  ;;  %v9372_v53 = vpop.f32.mrb[110].mxu0  ;;  %v11592_v47 = vadd.f32 %v9480_v14, %v4252_v60  ;;  %v470_v14 = vsel %vm10754_vm6, 0, %v469_v63 }
 0x261   : > { %v9373_v50 = vpop.f32.mrb[111].mxu0  ;;  %471 = vst [vmem:[#allocation3 + $0x68] sm:$0x10] %v470_v14 }
 0x262   : > { %v4257_v32 = vadd.f32 %v9371_v0, %v11444_v3  ;;  %v9481_v62 = vpop.f32.mrb[108].mxu1  ;;  %v9374_v13 = vadd.f32 %v9373_v50, %v9372_v53  ;;  %v421_v53 = vld [vmem:[#allocation3 + $0x80] sm:$0x8] }
 0x263   : > { %v9482_v30 = vpop.f32.mrb[109].mxu1  ;;  %v422_v50 = vsel %vm10744_vm2, 0, %v421_v53 }
 0x264   : > { %v4260_v12 = vadd.f32 %v9374_v13, %v11469_v20  ;;  %v9483_v42 = vadd.f32 %v9482_v30, %v9481_v62  ;;  %v9484_v19 = vpop.f32.mrb[110].mxu1  ;;  %423 = vst [vmem:[#allocation3 + $0x80] sm:$0x8] %v422_v50  ;;  %v10289_v13 = vld [vmem:[#allocation10 + $0x1c0] sm:$0xff]  }
 0x265   : > { %v9485_v56 = vpop.f32.mrb[111].mxu1  ;;  %9871 = vmatprep.subr.bf16.mxu0 %v10289_v13  ;;  %v427_v13 = vld [vmem:[#allocation3 + $0xa0] sm:$0x8] }
 0x266   : > { %v9486_v31 = vadd.f32 %v9485_v56, %v9484_v19  ;;  %v9375_v10 = vpop.f32.mrb[112].mxu0  ;;  %v11600_v7 = vadd.f32 %v9483_v42, %v4257_v32  ;;  %v472_v56 = vld [vmem:[#allocation3 + $0x78] sm:$0x10] }
 0x267   : > { %v9376_v3 = vpop.f32.mrb[113].mxu0 }
 0x268   : > { %v9377_v1 = vadd.f32 %v9376_v3, %v9375_v10  ;;  %v9378_v44 = vpop.f32.mrb[114].mxu0  ;;  %v11602_v60 = vadd.f32 %v9486_v31, %v4260_v12  ;;  %v473_v10 = vsel %vm10754_vm6, 0, %v472_v56  ;;  %v475_v3 = vld [vmem:[#allocation3 + $0x88] sm:$0x10] }
 0x269   : > { %v9379_v52 = vpop.f32.mrb[115].mxu0  ;;  %474 = vst [vmem:[#allocation3 + $0x78] sm:$0x10] %v473_v10  ;;  %v476_v63 = vsel %vm10754_vm6, 0, %v475_v3 }
 0x26a   : > { %v4265_v20 = vadd.f32 %v9377_v1, %v11480_v34  ;;  %v9487_v36 = vpop.f32.mrb[112].mxu1  ;;  %v9380_v43 = vadd.f32 %v9379_v52, %v9378_v44  ;;  %477 = vst [vmem:[#allocation3 + $0x88] sm:$0x10] %v476_v63 }
 0x26b   : > { %v9488_v59 = vpop.f32.mrb[113].mxu1 }
 0x26c   : > { %v4268_v26 = vadd.f32 %v9380_v43, %v11482_v57  ;;  %v9489_v37 = vadd.f32 %v9488_v59, %v9487_v36  ;;  %v9490_v0 = vpop.f32.mrb[114].mxu1  ;;  %v10291_v57 = vld [vmem:[#allocation10 + $0x160] sm:$0xff]  }
 0x26d   : > { %v9491_v40 = vpop.f32.mrb[115].mxu1  ;;  %9767 = vmatprep.subr.bf16.mxu1 %v10291_v57  ;;  %v10292_v36 = vld [vmem:[#allocation10 + $0x120] sm:$0xff]  }
 0x26e   : > { %v9492_v48 = vadd.f32 %v9491_v40, %v9490_v0  ;;  %v9381_v32 = vpop.f32.mrb[116].mxu0  ;;  %v11610_v62 = vadd.f32 %v9489_v37, %v4265_v20  ;;  %9768 = vmatpush3.bf16.msra.mxu1 %v10292_v36 }
 0x26f   : > { %v9382_v34 = vpop.f32.mrb[117].mxu0 }
 0x270   : > { %v9383_v30 = vadd.f32 %v9382_v34, %v9381_v32  ;;  %v9384_v9 = vpop.f32.mrb[118].mxu0  ;;  %v11612_v11 = vadd.f32 %v9492_v48, %v4268_v26 }
 0x271   : > { %v9385_v12 = vpop.f32.mrb[119].mxu0 }
 0x272   : > { %v4273_v42 = vadd.f32 %v9383_v30, %v11486_v54  ;;  %v9493_v19 = vpop.f32.mrb[116].mxu1  ;;  %v9386_v51 = vadd.f32 %v9385_v12, %v9384_v9  ;;  %v424_v54 = vld [vmem:[#allocation3 + $0x90] sm:$0x8]  ;;  %v481_v30 = vld [vmem:[#allocation3 + $0xa8] sm:$0x10] }
 0x273   : > { %v9494_v31 = vpop.f32.mrb[117].mxu1  ;;  %v425_v26 = vsel %vm10744_vm2, 0, %v424_v54 }
 0x274   : > { %v4276_v1 = vadd.f32 %v9386_v51, %v11488_v35  ;;  %v9495_v44 = vadd.f32 %v9494_v31, %v9493_v19  ;;  %v9496_v52 = vpop.f32.mrb[118].mxu1  ;;  %426 = vst [vmem:[#allocation3 + $0x90] sm:$0x8] %v425_v26  ;;  %v478_v19 = vld [vmem:[#allocation3 + $0x98] sm:$0x10]  ;;  %v482_v51 = vsel %vm10754_vm6, 0, %v481_v30 }
 0x275   : > { %v9497_v20 = vpop.f32.mrb[119].mxu1  ;;  %483 = vst [vmem:[#allocation3 + $0xa8] sm:$0x10] %v482_v51  ;;  %v10296_v30 = vld [vmem:[#allocation10 + $0x128] sm:$0xff]   ;;  %v484_v51 = vld [vmem:[#allocation3 + $0xb8] sm:$0x10] }
 0x276   : > { %v9498_v43 = vadd.f32 %v9497_v20, %v9496_v52  ;;  %v9387_v14 = vpop.f32.mrb[120].mxu0  ;;  %v11620_v59 = vadd.f32 %v9495_v44, %v4273_v42  ;;  %v428_v42 = vsel %vm10744_vm2, 0, %v427_v13 }
 0x277   : > { %v9388_v37 = vpop.f32.mrb[121].mxu0  ;;  %429 = vst [vmem:[#allocation3 + $0xa0] sm:$0x8] %v428_v42 }
 0x278   : > { %v9389_v35 = vadd.f32 %v9388_v37, %v9387_v14  ;;  %v9390_v0 = vpop.f32.mrb[122].mxu0  ;;  %v11624_v53 = vadd.f32 %v9498_v43, %v4276_v1  ;;  %v10295_v14 = vld [vmem:[#allocation10 + $0x168] sm:$0xff]  }
 0x279   : > { %v9391_v40 = vpop.f32.mrb[123].mxu0  ;;  %9769 = vmatprep.subr.bf16.mxu1 %v10295_v14 }
 0x27a   : > { %v4281_v50 = vadd.f32 %v9389_v35, %v11492_v25  ;;  %v9499_v48 = vpop.f32.mrb[120].mxu1  ;;  %v9392_v32 = vadd.f32 %v9391_v40, %v9390_v0  ;;  %v479_v25 = vsel %vm10754_vm6, 0, %v478_v19  ;;  %v430_v0 = vld [vmem:[#allocation3 + $0xb0] sm:$0x8]  ;;  %9770 = vmatpush3.bf16.msra.mxu1 %v10296_v30 }
 0x27b   : > { %v9500_v34 = vpop.f32.mrb[121].mxu1  ;;  %480 = vst [vmem:[#allocation3 + $0x98] sm:$0x10] %v479_v25 }
 0x27c   : > { %v4284_v9 = vadd.f32 %v9392_v32, %v11494_v4  ;;  %v9501_v12 = vadd.f32 %v9500_v34, %v9499_v48  ;;  %v9502_v57 = vpop.f32.mrb[122].mxu1 }
 0x27d   : > { %v9503_v56 = vpop.f32.mrb[123].mxu1 }
 0x27e   : > { %v9504_v31 = vadd.f32 %v9503_v56, %v9502_v57  ;;  %v9393_v10 = vpop.f32.mrb[124].mxu0  ;;  %v11634_v3 = vadd.f32 %v9501_v12, %v4281_v50  ;;  %v431_v50 = vsel %vm10744_vm2, 0, %v430_v0  ;;  %v487_v12 = vld [vmem:[#allocation3 + $0xc8] sm:$0x10] }
 0x27f   : > { %v9394_v4 = vpop.f32.mrb[125].mxu0  ;;  %432 = vst [vmem:[#allocation3 + $0xb0] sm:$0x8] %v431_v50  ;;  %v488_v56 = vsel %vm10754_vm6, 0, %v487_v12 }
 0x280   : > { %v9395_v1 = vadd.f32 %v9394_v4, %v9393_v10  ;;  %v9396_v44 = vpop.f32.mrb[126].mxu0  ;;  %v11636_v52 = vadd.f32 %v9504_v31, %v4284_v9  ;;  %v433_v9 = vld [vmem:[#allocation3 + $0xc0] sm:$0x8]  ;;  %v485_v10 = vsel %vm10754_vm6, 0, %v484_v51  ;;  %489 = vst [vmem:[#allocation3 + $0xc8] sm:$0x10] %v488_v56 }
 0x281   : > { %v9397_v63 = vpop.f32.mrb[127].mxu0  ;;  %v434_v19 = vsel %vm10744_vm2, 0, %v433_v9  ;;  %v5227_v4 = vld [vmem:[#allocation3 + $0x8] sm:$0x1f]  ;;  %486 = vst [vmem:[#allocation3 + $0xb8] sm:$0x10] %v485_v10 }
 0x282   : > { %v4289_v20 = vadd.f32 %v9395_v1, %v11498_v46  ;;  %v9505_v36 = vpop.f32.mrb[124].mxu1  ;;  %v9398_v54 = vadd.f32 %v9397_v63, %v9396_v44  ;;  %435 = vst [vmem:[#allocation3 + $0xc0] sm:$0x8] %v434_v19  ;;  %v5270_v14 = vshll.u32 %v5227_v4, 16  ;;  %v10299_v10 = vld [vmem:[#allocation10 + $0x170] sm:$0xff]  }
 0x283   : > { %v9506_v43 = vpop.f32.mrb[125].mxu1  ;;  %9771 = vmatprep.subr.bf16.mxu1 %v10299_v10 }
 0x284   : > { %v4292_v26 = vadd.f32 %v9398_v54, %v11500_v55  ;;  %v9507_v37 = vadd.f32 %v9506_v43, %v9505_v36  ;;  %v9508_v35 = vpop.f32.mrb[126].mxu1 }
 0x285   : > { %v9509_v40 = vpop.f32.mrb[127].mxu1 }
 0x286   : > { %v9510_v48 = vadd.f32 %v9509_v40, %v9508_v35  ;;  %v10025_v32 = vpop.f32.mrb[128].mxu0  ;;  %v11642_v34 = vadd.f32 %v9507_v37, %v4289_v20 }
 0x287   : > { %v4499_v46 = vadd.f32 %v10025_v32, %v11510_v23  ;;  %v4490_v13 = vpop.f32.mrb[129].mxu0  ;;  %v5226_v23 = vld [vmem:[#allocation3] sm:$0xf0] }
 0x288   : > { %v4491_v55 = vadd.f32 %v4490_v13, %v11504_v8  ;;  %v10026_v57 = vpop.f32.mrb[130].mxu0  ;;  %v11646_v42 = vadd.f32 %v9510_v48, %v4292_v26  ;;  %v5259_v36 = vshrl.u32 %v5226_v23, 16  ;;  %v5262_v54 = vshll.u32 %v5226_v23, 16  ;;  %v436_v13 = vld [vmem:[#allocation3 + $0xd0] sm:$0x8] }
 0x289   : > { %v4502_v25 = vadd.f32 %v10026_v57, %v11512_v18  ;;  %v4493_v31 = vpop.f32.mrb[131].mxu0  ;;  %v4619_v1 = vmax.f32 %v4499_v46, 0.0  ;;  %v5267_v18 = vshrl.u32 %v5227_v4, 16  ;;  %v437_v57 = vsel %vm10744_vm2, 0, %v436_v13 }
 0x28a   : > { %v4494_v8 = vadd.f32 %v4493_v31, %v11506_v22  ;;  %v4617_v63 = vmax.f32 %v4491_v55, 0.0  ;;  %v5261_v32 = vrot.slane %v5259_v36, 4  ;;  %v5264_v46 = vrot.slane %v5262_v54, 5  ;;  %438 = vst [vmem:[#allocation3 + $0xd0] sm:$0x8] %v437_v57 }
 0x28b   : > { %v4620_v44 = vmax.f32 %v4502_v25, 0.0  ;;  %v5269_v12 = vrot.slane %v5267_v18, 4  ;;  %v5272_v55 = vrot.slane %v5270_v14, 5 }
 0x28c   : > { %v4618_v20 = vmax.f32 %v4494_v8, 0.0  ;;  %v5265_v31 = vor.u32 %v5264_v46, %v5261_v32 }
 0x28d   : > { %v4650_v43 = vpack.c.bf16 %v4620_v44, %v4619_v1  ;;  %v5273_v23 = vor.u32 %v5272_v55, %v5269_v12 }
 0x28e   : > { %v4649_v26 = vpack.c.bf16 %v4618_v20, %v4617_v63  ;;  %v10029_v37 = vpop.f32.mrb[132].mxu0 }
 0x28f   : > { %v4682_v35 = vrot.slane %v4650_v43, 4  ;;  %v4515_v0 = vadd.f32 %v10029_v37, %v11527_v15  ;;  %v4506_v40 = vpop.f32.mrb[133].mxu0  ;;  %v11668_v37 = vsel %vm1147_vm7, %v5265_v31, %v5273_v23 }
 0x290   : > { %v4681_v50 = vrot.slane %v4649_v26, 4  ;;  %v4507_v22 = vadd.f32 %v4506_v40, %v11520_v17  ;;  %v10030_v48 = vpop.f32.mrb[134].mxu0 }
 0x291   : > { %4716 = vst [vmem:[#allocation3 + $0x28] ss:$-4 sps:$4 sm:$0xff] %v4682_v35   ;;  %v4518_v30 = vadd.f32 %v10030_v48, %v11529_v16  ;;  %v4509_v9 = vpop.f32.mrb[135].mxu0  ;;  %v4623_v19 = vmax.f32 %v4515_v0, 0.0 }
 0x292   : > { %4714 = vst [vmem:[#allocation3 + $0x18] ss:$-4 sps:$4 sm:$0xff] %v4681_v50   ;;  %v4510_v15 = vadd.f32 %v4509_v9, %v11523_v33  ;;  %v4621_v17 = vmax.f32 %v4507_v22, 0.0  ;;  %v10300_v50 = vld [vmem:[#allocation10 + $0x130] sm:$0xff]  }
 0x293   : > { %v4624_v51 = vmax.f32 %v4518_v30, 0.0  ;;  %9772 = vmatpush3.bf16.msra.mxu1 %v10300_v50 }
 0x294   : > { %v4622_v56 = vmax.f32 %v4510_v15, 0.0 }
 0x295   : > { %v4652_v25 = vpack.c.bf16 %v4624_v51, %v4623_v19 }
 0x296   : > { %v4651_v8 = vpack.c.bf16 %v4622_v56, %v4621_v17  ;;  %v10033_v16 = vpop.f32.mrb[136].mxu0 }
 0x297   : > { %v4684_v4 = vrot.slane %v4652_v25, 4  ;;  %v4531_v1 = vadd.f32 %v10033_v16, %v11546_v58  ;;  %v4522_v44 = vpop.f32.mrb[137].mxu0 }
 0x298   : > { %v4683_v63 = vrot.slane %v4651_v8, 4  ;;  %v4523_v20 = vadd.f32 %v4522_v44, %v11538_v41  ;;  %v10034_v33 = vpop.f32.mrb[138].mxu0  ;;  %v11664_v36 = vld [vmem:[#allocation3 + $0x20] sm:$0xf0]  ;;  %v5087_v44 = vld [vmem:[#allocation3 + $0x28] sm:$0xf] }
 0x299   : > { %4720 = vst [vmem:[#allocation3 + $0x48] ss:$-4 sps:$4 sm:$0xff] %v4684_v4   ;;  %v4627_v54 = vmax.f32 %v4531_v1, 0.0  ;;  %v4534_v43 = vadd.f32 %v10034_v33, %v11550_v24  ;;  %v4525_v18 = vpop.f32.mrb[139].mxu0  ;;  %v5084_v14 = vld [vmem:[#allocation3 + $0x10] sm:$0xf0] }
 0x29a   : > { %v5085_v26 = vld [vmem:[#allocation3 + $0x18] sm:$0xf]  ;;  %4718 = vst [vmem:[#allocation3 + $0x38] ss:$-4 sps:$4 sm:$0xff] %v4683_v63   ;;  %v4625_v58 = vmax.f32 %v4523_v20, 0.0  ;;  %v4526_v35 = vadd.f32 %v4525_v18, %v11540_v49  ;;  %v5149_v0 = vrot.slane %v5084_v14, 4 }
 0x29b   : > { %v5150_v40 = vrot.slane %v5085_v26, 4  ;;  %v4748_v41 = vld [vmem:[#allocation3 + $0x10] sm:$0xf8]  ;;  %v4628_v22 = vmax.f32 %v4534_v43, 0.0  ;;  %v4749_v48 = vld [vmem:[#allocation3 + $0x18] sm:$0xf] }
 0x29c   : > { %v4796_v32 = vshrl.u32 %v4748_v41, 16  ;;  %v4799_v46 = vshll.u32 %v4748_v41, 16  ;;  %v5152_v24 = vrot.slane %v11664_v36, 4  ;;  %v4626_v13 = vmax.f32 %v4526_v35, 0.0  ;;  %v5562_v55 = vld [vmem:[#allocation3 + $0x10] sm:$0xf8] }
 0x29d   : > { %v5151_v30 = vsel %vm1034_vm4, %v5149_v0, %v5150_v40  ;;  %v4804_v9 = vshrl.u32 %v4749_v48, 16  ;;  %v4807_v12 = vshll.u32 %v4749_v48, 16  ;;  %v4654_v57 = vpack.c.bf16 %v4628_v22, %v4627_v54  ;;  %v5563_v31 = vld [vmem:[#allocation3 + $0x18] sm:$0xf]  ;;  %v5564_v43 = vld [vmem:[#allocation3 + $0x20] sm:$0xf8] }
 0x29e   : > { %7962 = vmatprep.mubr.bf16.mxu1 %v5151_v30  ;;  %v4798_v49 = vrot.slane %v4796_v32, 3  ;;  %v4801_v15 = vrot.slane %v4799_v46, 4  ;;  %v5595_v19 = vshrl.u32 %v5562_v55, 16  ;;  %v4653_v51 = vpack.c.bf16 %v4626_v13, %v4625_v58  ;;  %v10037_v17 = vpop.f32.mrb[140].mxu0  ;;  %v5565_v0 = vld [vmem:[#allocation3 + $0x28] sm:$0xf] }
 0x29f   : > { %v4806_v56 = vrot.slane %v4804_v9, 3  ;;  %v4809_v25 = vrot.slane %v4807_v12, 4  ;;  %v5598_v23 = vshll.u32 %v5562_v55, 16  ;;  %v4686_v10 = vrot.slane %v4654_v57, 4  ;;  %v4538_v16 = vpop.f32.mrb[141].mxu0 }
 0x2a0   : > { %v4547_v8 = vadd.f32 %v10037_v17, %v11564_v21  ;;  %v4802_v4 = vor.u32 %v4801_v15, %v4798_v49  ;;  %v5597_v1 = vrot.slane %v5595_v19, 3  ;;  %v4685_v63 = vrot.slane %v4653_v51, 4  ;;  %v10038_v33 = vpop.f32.mrb[142].mxu0  ;;  %v4750_v49 = vld [vmem:[#allocation3 + $0x20] sm:$0xf8] }
 0x2a1   : > { %v4539_v20 = vadd.f32 %v4538_v16, %v11554_v2  ;;  %v4810_v36 = vor.u32 %v4809_v25, %v4806_v56  ;;  %v5600_v54 = vrot.slane %v5598_v23, 4  ;;  %4724 = vst [vmem:[#allocation3 + $0x68] ss:$-4 sps:$4 sm:$0xff] %v4686_v10   ;;  %v4550_v14 = vadd.f32 %v10038_v33, %v11566_v61  ;;  %v4541_v26 = vpop.f32.mrb[143].mxu0  ;;  %v10290_v56 = vld [vmem:[#allocation10 + $0x180] sm:$0xff]  }
 0x2a2   : > { %v4631_v18 = vmax.f32 %v4547_v8, 0.0  ;;  %v5603_v58 = vshrl.u32 %v5563_v31, 16  ;;  %v5606_v35 = vshll.u32 %v5563_v31, 16  ;;  %4722 = vst [vmem:[#allocation3 + $0x58] ss:$-4 sps:$4 sm:$0xff] %v4685_v63   ;;  %v4542_v40 = vadd.f32 %v4541_v26, %v11556_v29 }
 0x2a3   : > { %v4629_v21 = vmax.f32 %v4539_v20, 0.0  ;;  %v4811_v41 = vsel %vm336_vm3, %v4802_v4, %v4810_v36  ;;  %v5601_v50 = vor.u32 %v5600_v54, %v5597_v1  ;;  %v4632_v2 = vmax.f32 %v4550_v14, 0.0  ;;  %v4751_v16 = vld [vmem:[#allocation3 + $0x28] sm:$0xf]  ;;  %v5088_v33 = vld [vmem:[#allocation3 + $0x30] sm:$0xf0] }
 0x2a4   : > { %7963 = vmatmul.mubr.bf16.gmra.mrb[132].mxu1 %v4811_v41  ;;  %v5605_v22 = vrot.slane %v5603_v58, 3  ;;  %v5608_v48 = vrot.slane %v5606_v35, 4  ;;  %v5153_v32 = vrot.slane %v5087_v44, 4  ;;  %v4630_v46 = vmax.f32 %v4542_v40, 0.0  ;;  %v10293_v4 = vld [vmem:[#allocation10 + $0x1c8] sm:$0xff]  }
 0x2a5   : > { %v5612_v13 = vshrl.u32 %v5564_v43, 16  ;;  %v5615_v30 = vshll.u32 %v5564_v43, 16  ;;  %v5620_v61 = vshrl.u32 %v5565_v0, 16  ;;  %v4656_v9 = vpack.c.bf16 %v4632_v2, %v4631_v18  ;;  %v5089_v14 = vld [vmem:[#allocation3 + $0x38] sm:$0xf] }
 0x2a6   : > { %v5609_v12 = vor.u32 %v5608_v48, %v5605_v22  ;;  %v5154_v55 = vsel %vm1034_vm4, %v5152_v24, %v5153_v32  ;;  %v5623_v57 = vshll.u32 %v5565_v0, 16  ;;  %v4655_v15 = vpack.c.bf16 %v4630_v46, %v4629_v21  ;;  %v10041_v17 = vpop.f32.mrb[144].mxu0  ;;  %v10294_v21 = vld [vmem:[#allocation10 + $0x188] sm:$0xff]   ;;  %v5229_v2 = vld [vmem:[#allocation3 + $0x18] sm:$0x1f] }
 0x2a7   : > { %7970 = vmatprep.mubr.bf16.mxu1 %v5154_v55  ;;  %v5614_v29 = vrot.slane %v5612_v13, 3  ;;  %v5617_v19 = vrot.slane %v5615_v30, 4  ;;  %v5622_v51 = vrot.slane %v5620_v61, 3  ;;  %v4688_v25 = vrot.slane %v4656_v9, 4  ;;  %v4554_v8 = vpop.f32.mrb[145].mxu0 }
 0x2a8   : > { %v5610_v31 = vsel %vm336_vm3, %v5601_v50, %v5609_v12  ;;  %v5625_v23 = vrot.slane %v5623_v57, 4  ;;  %v4563_v10 = vadd.f32 %v10041_v17, %v11580_v5  ;;  %v4687_v1 = vrot.slane %v4655_v15, 4  ;;  %v10042_v63 = vpop.f32.mrb[146].mxu0  ;;  %v5566_v9 = vld [vmem:[#allocation3 + $0x30] sm:$0xf8] }
 0x2a9   : > { %8115 = vmatprep.mubr.bf16.mxu0 %v5610_v31  ;;  %v5618_v24 = vor.u32 %v5617_v19, %v5614_v29  ;;  %v4555_v44 = vadd.f32 %v4554_v8, %v11572_v6  ;;  %v4813_v20 = vshrl.u32 %v4750_v49, 16  ;;  %4728 = vst [vmem:[#allocation3 + $0x88] ss:$-4 sps:$4 sm:$0xff] %v4688_v25   ;;  %v4566_v43 = vadd.f32 %v10042_v63, %v11582_v28  ;;  %v4557_v18 = vpop.f32.mrb[147].mxu0  ;;  %v5228_v6 = vld [vmem:[#allocation3 + $0x10] sm:$0xf0] }
 0x2aa   : > { %8116 = vmatmul.mubr.bf16.vlgmr.msra.gmra.mrb[160].mxu0 %v11668_v37  ;;  %v5626_v36 = vor.u32 %v5625_v23, %v5622_v51  ;;  %v4635_v54 = vmax.f32 %v4563_v10, 0.0  ;;  %v4816_v5 = vshll.u32 %v4750_v49, 16  ;;  %4726 = vst [vmem:[#allocation3 + $0x78] ss:$-4 sps:$4 sm:$0xff] %v4687_v1   ;;  %v4558_v58 = vadd.f32 %v4557_v18, %v11574_v39  ;;  %v10297_v28 = vld [vmem:[#allocation10 + $0x1d0] sm:$0xff]   ;;  %v10301_v23 = vld [vmem:[#allocation10 + $0x1d8] sm:$0xff]  }
 0x2ab   : > { %v4633_v26 = vmax.f32 %v4555_v44, 0.0  ;;  %v4815_v35 = vrot.slane %v4813_v20, 3  ;;  %v4821_v0 = vshrl.u32 %v4751_v16, 16  ;;  %9872 = vmatpush3.bf16.msra.mxu0 %v10290_v56  ;;  %v4636_v41 = vmax.f32 %v4566_v43, 0.0  ;;  %v5567_v15 = vld [vmem:[#allocation3 + $0x38] sm:$0xf] }
 0x2ac   : > { %v5627_v40 = vsel %vm336_vm3, %v5618_v24, %v5626_v36  ;;  %v4818_v37 = vrot.slane %v4816_v5, 4  ;;  %v4824_v50 = vshll.u32 %v4751_v16, 16  ;;  %9873 = vmatprep.subr.bf16.mxu0 %v10293_v4  ;;  %v4634_v22 = vmax.f32 %v4558_v58, 0.0  ;;  %v10298_v19 = vld [vmem:[#allocation10 + $0x190] sm:$0xff]  }
 0x2ad   : > { %8123 = vmatprep.mubr.bf16.mxu0 %v5627_v40  ;;  %v4823_v48 = vrot.slane %v4821_v0, 3  ;;  %v5155_v32 = vrot.slane %v5088_v33, 4  ;;  %v5156_v46 = vrot.slane %v5089_v14, 4  ;;  %v4658_v13 = vpack.c.bf16 %v4636_v41, %v4635_v54  ;;  %v4752_v5 = vld [vmem:[#allocation3 + $0x30] sm:$0xf8]  ;;  %v10302_v0 = vld [vmem:[#allocation10 + $0x198] sm:$0xff]  }
 0x2ae   : > { %v4819_v39 = vor.u32 %v4818_v37, %v4815_v35  ;;  %v4826_v30 = vrot.slane %v4824_v50, 4  ;;  %v5276_v61 = vshrl.u32 %v5228_v6, 16  ;;  %v4657_v12 = vpack.c.bf16 %v4634_v22, %v4633_v26  ;;  %v10045_v29 = vpop.f32.mrb[148].mxu0  ;;  %v4753_v37 = vld [vmem:[#allocation3 + $0x38] sm:$0xf] }
 0x2af   : > { %v5157_v55 = vsel %vm1034_vm4, %v5155_v32, %v5156_v46  ;;  %v5279_v57 = vshll.u32 %v5228_v6, 16  ;;  %v5284_v49 = vshrl.u32 %v5229_v2, 16  ;;  %9874 = vmatpush3.bf16.msra.mxu0 %v10294_v21  ;;  %v4690_v51 = vrot.slane %v4658_v13, 4  ;;  %v4570_v31 = vpop.f32.mrb[149].mxu0  ;;  %v5090_v50 = vld [vmem:[#allocation3 + $0x40] sm:$0xf0] }
 0x2b0   : > { %v4827_v17 = vor.u32 %v4826_v30, %v4823_v48  ;;  %v5278_v56 = vrot.slane %v5276_v61, 4  ;;  %v5287_v25 = vshll.u32 %v5229_v2, 16  ;;  %9875 = vmatprep.subr.bf16.mxu0 %v10297_v28  ;;  %v4689_v10 = vrot.slane %v4657_v12, 4  ;;  %v10046_v1 = vpop.f32.mrb[150].mxu0  ;;  %v5091_v48 = vld [vmem:[#allocation3 + $0x48] sm:$0xf] }
 0x2b1   : > { %v5281_v8 = vrot.slane %v5279_v57, 5  ;;  %v5286_v16 = vrot.slane %v5284_v49, 4  ;;  %v5629_v4 = vshrl.u32 %v5566_v9, 16  ;;  %4732 = vst [vmem:[#allocation3 + $0xa8] ss:$-4 sps:$4 sm:$0xff] %v4690_v51   ;;  %v5632_v63 = vshll.u32 %v5566_v9, 16 }
 0x2b2   : > { %v4828_v24 = vsel %vm336_vm3, %v4819_v39, %v4827_v17  ;;  %v5289_v44 = vrot.slane %v5287_v25, 5  ;;  %v5637_v20 = vshrl.u32 %v5567_v15, 16  ;;  %v4573_v33 = vpop.f32.mrb[151].mxu0  ;;  %4730 = vst [vmem:[#allocation3 + $0x98] ss:$-4 sps:$4 sm:$0xff] %v4689_v10   ;;  %v5640_v43 = vshll.u32 %v5567_v15, 16 }
 0x2b3   : > { %7971 = vmatmul.mubr.bf16.gmra.mrb[136].mxu1 %v4828_v24  ;;  %v5282_v36 = vor.u32 %v5281_v8, %v5278_v56  ;;  %v5631_v54 = vrot.slane %v5629_v4, 3  ;;  %v4579_v18 = vadd.f32 %v10045_v29, %v11600_v7  ;;  %9876 = vmatpush3.bf16.msra.mxu0 %v10298_v19  ;;  %v5634_v26 = vrot.slane %v5632_v63, 4  ;;  %v5230_v39 = vld [vmem:[#allocation3 + $0x20] sm:$0xf0]  ;;  %v5231_v19 = vld [vmem:[#allocation3 + $0x28] sm:$0x1f] }
 0x2b4   : > { %7978 = vmatprep.mubr.bf16.mxu1 %v5157_v55  ;;  %v5290_v14 = vor.u32 %v5289_v44, %v5286_v16  ;;  %v5639_v58 = vrot.slane %v5637_v20, 3  ;;  %v4571_v35 = vadd.f32 %v4570_v31, %v11590_v38  ;;  %9877 = vmatprep.subr.bf16.mxu0 %v10301_v23  ;;  %v5642_v6 = vrot.slane %v5640_v43, 4  ;;  %v10303_v55 = vld [vmem:[#allocation10 + $0x178] sm:$0xff]   ;;  %v5568_v51 = vld [vmem:[#allocation3 + $0x40] sm:$0xf8] }
 0x2b5   : > { %v4639_v21 = vmax.f32 %v4579_v18, 0.0  ;;  %v4582_v40 = vadd.f32 %v10046_v1, %v11602_v60  ;;  %v4574_v41 = vadd.f32 %v4573_v33, %v11592_v47  ;;  %v5635_v2 = vor.u32 %v5634_v26, %v5631_v54  ;;  %9773 = vmatprep.subr.bf16.mxu1 %v10303_v55  ;;  %v10304_v8 = vld [vmem:[#allocation10 + $0x138] sm:$0xff]   ;;  %v5569_v44 = vld [vmem:[#allocation3 + $0x48] sm:$0xf]  ;;  %v10305_v63 = vld [vmem:[#allocation10 + $0x1e0] sm:$0xff]  }
 0x2b6   : > { %v5291_v7 = vsel %vm1147_vm7, %v5282_v36, %v5290_v14  ;;  %v4637_v28 = vmax.f32 %v4571_v35, 0.0  ;;  %v4830_v22 = vshrl.u32 %v4752_v5, 16  ;;  %v5643_v32 = vor.u32 %v5642_v6, %v5639_v58  ;;  %v10049_v30 = vpop.f32.mrb[152].mxu0  ;;  %9774 = vmatpush3.bf16.msra.mxu1 %v10304_v8  ;;  %v5233_v8 = vld [vmem:[#allocation3 + $0x38] sm:$0x1f] }
 0x2b7   : > { %8124 = vmatmul.mubr.bf16.gmra.mrb[164].mxu0 %v5291_v7  ;;  %v4640_v46 = vmax.f32 %v4582_v40, 0.0  ;;  %v4638_v38 = vmax.f32 %v4574_v41, 0.0  ;;  %v4833_v13 = vshll.u32 %v4752_v5, 16  ;;  %v4838_v9 = vshrl.u32 %v4753_v37, 16  ;;  %v4586_v47 = vpop.f32.mrb[153].mxu0 }
 0x2b8   : > { %v4832_v61 = vrot.slane %v4830_v22, 3  ;;  %v4841_v60 = vshll.u32 %v4753_v37, 16  ;;  %v5158_v12 = vrot.slane %v5090_v50, 4  ;;  %9878 = vmatpush3.bf16.msra.mxu0 %v10302_v0  ;;  %v5644_v57 = vsel %vm336_vm3, %v5635_v2, %v5643_v32  ;;  %v10050_v17 = vpop.f32.mrb[154].mxu0  ;;  %v4754_v37 = vld [vmem:[#allocation3 + $0x40] sm:$0xf8] }
 0x2b9   : > { %v4660_v49 = vpack.c.bf16 %v4640_v46, %v4639_v21  ;;  %v4659_v15 = vpack.c.bf16 %v4638_v38, %v4637_v28  ;;  %v4835_v29 = vrot.slane %v4833_v13, 4  ;;  %8131 = vmatprep.mubr.bf16.mxu0 %v5644_v57  ;;  %v4840_v56 = vrot.slane %v4838_v9, 3  ;;  %v4589_v10 = vpop.f32.mrb[155].mxu0  ;;  %9879 = vmatprep.subr.bf16.mxu0 %v10305_v63 }
 0x2ba   : > { %v4843_v25 = vrot.slane %v4841_v60, 4  ;;  %v5159_v31 = vrot.slane %v5091_v48, 4  ;;  %v5293_v23 = vshrl.u32 %v5230_v39, 16  ;;  %v5296_v24 = vshll.u32 %v5230_v39, 16  ;;  %v4755_v39 = vld [vmem:[#allocation3 + $0x48] sm:$0xf] }
 0x2bb   : > { %v4692_v16 = vrot.slane %v4660_v49, 4  ;;  %v4691_v4 = vrot.slane %v4659_v15, 4  ;;  %v4836_v1 = vor.u32 %v4835_v29, %v4832_v61  ;;  %v5301_v54 = vshrl.u32 %v5231_v19, 16  ;;  %v5092_v61 = vld [vmem:[#allocation3 + $0x50] sm:$0xf0] }
 0x2bc   : > { %v4844_v20 = vor.u32 %v4843_v25, %v4840_v56  ;;  %v5160_v33 = vsel %vm1034_vm4, %v5158_v12, %v5159_v31  ;;  %v5295_v36 = vrot.slane %v5293_v23, 4  ;;  %v5298_v43 = vrot.slane %v5296_v24, 5  ;;  %v5093_v49 = vld [vmem:[#allocation3 + $0x58] sm:$0xf]  ;;  %v5232_v29 = vld [vmem:[#allocation3 + $0x30] sm:$0xf0] }
 0x2bd   : > { %4736 = vst [vmem:[#allocation3 + $0xc8] ss:$-4 sps:$4 sm:$0xff] %v4692_v16   ;;  %4734 = vst [vmem:[#allocation3 + $0xb8] ss:$-4 sps:$4 sm:$0xff] %v4691_v4   ;;  %v5304_v18 = vshll.u32 %v5231_v19, 16  ;;  %v5646_v5 = vshrl.u32 %v5568_v51, 16  ;;  %v4595_v28 = vadd.f32 %v10049_v30, %v11620_v59  ;;  %v4587_v22 = vadd.f32 %v4586_v47, %v11610_v62 }
 0x2be   : > { %v5649_v14 = vshll.u32 %v5568_v51, 16  ;;  %v4845_v26 = vsel %vm336_vm3, %v4836_v1, %v4844_v20  ;;  %v5303_v58 = vrot.slane %v5301_v54, 4  ;;  %v5654_v35 = vshrl.u32 %v5569_v44, 16  ;;  %v11696_v50 = vpop.f32.mrb[156].mxu0  ;;  %v10307_v56 = vld [vmem:[#allocation10 + $0x1e8] sm:$0xff]  }
 0x2bf   : > { %v5657_v0 = vshll.u32 %v5569_v44, 16  ;;  %7979 = vmatmul.mubr.bf16.gmra.mrb[140].mxu1 %v4845_v26  ;;  %v5299_v6 = vor.u32 %v5298_v43, %v5295_v36  ;;  %v5306_v21 = vrot.slane %v5304_v18, 5  ;;  %v5648_v40 = vrot.slane %v5646_v5, 3  ;;  %v11700_v48 = vpop.f32.mrb[157].mxu0  ;;  %v5570_v44 = vld [vmem:[#allocation3 + $0x50] sm:$0xf8] }
 0x2c0   : > { %v5651_v41 = vrot.slane %v5649_v14, 4  ;;  %7986 = vmatprep.mubr.bf16.mxu1 %v5160_v33  ;;  %v5656_v7 = vrot.slane %v5654_v35, 3  ;;  %v4598_v38 = vadd.f32 %v10050_v17, %v11624_v53  ;;  %v4590_v13 = vadd.f32 %v4589_v10, %v11612_v11  ;;  %v11704_v9 = vpop.f32.mrb[158].mxu0  ;;  %v10306_v53 = vld [vmem:[#allocation10 + $0x1a0] sm:$0xff]   ;;  %v5571_v54 = vld [vmem:[#allocation3 + $0x58] sm:$0xf] }
 0x2c1   : > { %v5659_v2 = vrot.slane %v5657_v0, 4  ;;  %v5307_v32 = vor.u32 %v5306_v21, %v5303_v58  ;;  %v4643_v12 = vmax.f32 %v4595_v28, 0.0  ;;  %v4641_v55 = vmax.f32 %v4587_v22, 0.0  ;;  %v11706_v59 = vpop.f32.mrb[159].mxu0  ;;  %9880 = vmatpush3.bf16.msra.mxu0 %v10306_v53  ;;  %v10308_v43 = vld [vmem:[#allocation10 + $0x1a8] sm:$0xff]  }
 0x2c2   : > { %v5652_v46 = vor.u32 %v5651_v41, %v5648_v40  ;;  %v4847_v57 = vshrl.u32 %v4754_v37, 16  ;;  %v4644_v30 = vmax.f32 %v4598_v38, 0.0  ;;  %v4642_v47 = vmax.f32 %v4590_v13, 0.0  ;;  %9881 = vmatprep.subr.bf16.mxu0 %v10307_v56  ;;  %v10310_v38 = vld [vmem:[#allocation10 + $0x1f0] sm:$0xff]  }
 0x2c3   : > { %v5660_v60 = vor.u32 %v5659_v2, %v5656_v7  ;;  %v5308_v62 = vsel %vm1147_vm7, %v5299_v6, %v5307_v32  ;;  %v4850_v15 = vshll.u32 %v4754_v37, 16  ;;  %v4855_v51 = vshrl.u32 %v4755_v39, 16  ;;  %v10309_v7 = vld [vmem:[#allocation10 + $0x200] sm:$0xff]  }
 0x2c4   : > { %8132 = vmatmul.mubr.bf16.gmra.mrb[168].mxu0 %v5308_v62  ;;  %v4849_v19 = vrot.slane %v4847_v57, 3  ;;  %v4858_v17 = vshll.u32 %v4755_v39, 16  ;;  %v4662_v25 = vpack.c.bf16 %v4644_v30, %v4643_v12  ;;  %v4661_v31 = vpack.c.bf16 %v4642_v47, %v4641_v55  ;;  %10055 = vmatprep.subr.bf16.mxu1 %v10309_v7  ;;  %v4757_v62 = vld [vmem:[#allocation3 + $0x58] sm:$0xf]  ;;  %v5094_v30 = vld [vmem:[#allocation3 + $0x60] sm:$0xf0] }
 0x2c5   : > { %v5661_v11 = vsel %vm336_vm3, %v5652_v46, %v5660_v60  ;;  %v4852_v23 = vrot.slane %v4850_v15, 4  ;;  %v5161_v10 = vrot.slane %v5092_v61, 4  ;;  %v4857_v16 = vrot.slane %v4855_v51, 3  ;;  %9882 = vmatpush3.bf16.msra.mxu0 %v10308_v43  ;;  %v4756_v46 = vld [vmem:[#allocation3 + $0x50] sm:$0xf8] }
 0x2c6   : > { %8139 = vmatprep.mubr.bf16.mxu0 %v5661_v11  ;;  %v4860_v4 = vrot.slane %v4858_v17, 4  ;;  %v5162_v1 = vrot.slane %v5093_v49, 4  ;;  %v5310_v24 = vshrl.u32 %v5232_v29, 16  ;;  %v4694_v63 = vrot.slane %v4662_v25, 4  ;;  %9883 = vmatprep.subr.bf16.mxu0 %v10310_v38  ;;  %v5234_v51 = vld [vmem:[#allocation3 + $0x40] sm:$0xf0] }
 0x2c7   : > { %v4693_v20 = vrot.slane %v4661_v31, 4  ;;  %v4853_v33 = vor.u32 %v4852_v23, %v4849_v19  ;;  %v5313_v36 = vshll.u32 %v5232_v29, 16  ;;  %v5318_v26 = vshrl.u32 %v5233_v8, 16  ;;  %v10312_v17 = vld [vmem:[#allocation10 + $0x1f8] sm:$0xff]   ;;  %v4759_v7 = vld [vmem:[#allocation3 + $0x68] sm:$0xf] }
 0x2c8   : > { %v4861_v18 = vor.u32 %v4860_v4, %v4857_v16  ;;  %v5163_v5 = vsel %vm1034_vm4, %v5161_v10, %v5162_v1  ;;  %v5312_v14 = vrot.slane %v5310_v24, 4  ;;  %4740 = vst [vmem:[#allocation3 + $0xe8] ss:$-4 sps:$4 sm:$0xff] %v4694_v63   ;;  %v5321_v35 = vshll.u32 %v5233_v8, 16  ;;  %v5235_v10 = vld [vmem:[#allocation3 + $0x48] sm:$0x1f] }
 0x2c9   : > { %4738 = vst [vmem:[#allocation3 + $0xd8] ss:$-4 sps:$4 sm:$0xff] %v4693_v20   ;;  %v5315_v58 = vrot.slane %v5313_v36, 5  ;;  %v5663_v0 = vshrl.u32 %v5570_v44, 16  ;;  %v5666_v6 = vshll.u32 %v5570_v44, 16  ;;  %v5320_v40 = vrot.slane %v5318_v26, 4 }
 0x2ca   : > { %v4862_v21 = vsel %vm336_vm3, %v4853_v33, %v4861_v18  ;;  %v5671_v41 = vshrl.u32 %v5571_v54, 16  ;;  %v5674_v37 = vshll.u32 %v5571_v54, 16  ;;  %v5323_v28 = vrot.slane %v5321_v35, 5  ;;  %v10313_v8 = vld [vmem:[#allocation10 + $0x1b8] sm:$0xff]   ;;  %v5572_v44 = vld [vmem:[#allocation3 + $0x60] sm:$0xf8] }
 0x2cb   : > { %7987 = vmatmul.mubr.bf16.gmra.mrb[144].mxu1 %v4862_v21  ;;  %v5316_v2 = vor.u32 %v5315_v58, %v5312_v14  ;;  %v5665_v22 = vrot.slane %v5663_v0, 3  ;;  %v5668_v32 = vrot.slane %v5666_v6, 4  ;;  %v4611_v61 = vadd.f32 %v11696_v50, %v11642_v34  ;;  %v5095_v34 = vld [vmem:[#allocation3 + $0x68] sm:$0xf]  ;;  %v10311_v50 = vld [vmem:[#allocation10 + $0x1b0] sm:$0xff]  }
 0x2cc   : > { %7994 = vmatprep.mubr.bf16.mxu1 %v5163_v5  ;;  %v5673_v13 = vrot.slane %v5671_v41, 3  ;;  %v5676_v39 = vrot.slane %v5674_v37, 4  ;;  %v4603_v60 = vadd.f32 %v11700_v48, %v11634_v3  ;;  %v5324_v12 = vor.u32 %v5323_v28, %v5320_v40  ;;  %9884 = vmatpush3.bf16.msra.mxu0 %v10311_v50  ;;  %v5573_v54 = vld [vmem:[#allocation3 + $0x68] sm:$0xf]  ;;  %v4758_v6 = vld [vmem:[#allocation3 + $0x60] sm:$0xf8] }
 0x2cd   : > { %v5669_v55 = vor.u32 %v5668_v32, %v5665_v22  ;;  %v4614_v57 = vadd.f32 %v11704_v9, %v11646_v42  ;;  %v4606_v49 = vadd.f32 %v11706_v59, %v11636_v52  ;;  %v4647_v15 = vmax.f32 %v4611_v61, 0.0  ;;  %9885 = vmatprep.subr.bf16.mxu0 %v10312_v17 }
 0x2ce   : > { %v5677_v47 = vor.u32 %v5676_v39, %v5673_v13  ;;  %v4645_v29 = vmax.f32 %v4603_v60, 0.0  ;;  %v4864_v53 = vshrl.u32 %v4756_v46, 16  ;;  %v5325_v3 = vsel %vm1147_vm7, %v5316_v2, %v5324_v12  ;;  %v5097_v60 = vld [vmem:[#allocation3 + $0x78] sm:$0xf] }
 0x2cf   : > { %v4648_v48 = vmax.f32 %v4614_v57, 0.0  ;;  %v4646_v11 = vmax.f32 %v4606_v49, 0.0  ;;  %v4867_v19 = vshll.u32 %v4756_v46, 16  ;;  %8140 = vmatmul.mubr.bf16.gmra.mrb[172].mxu0 %v5325_v3  ;;  %v4872_v9 = vshrl.u32 %v4757_v62, 16  ;;  %v5096_v46 = vld [vmem:[#allocation3 + $0x70] sm:$0xf0] }
 0x2d0   : > { %v5678_v42 = vsel %vm336_vm3, %v5669_v55, %v5677_v47  ;;  %v4866_v52 = vrot.slane %v4864_v53, 3  ;;  %v4875_v59 = vshll.u32 %v4757_v62, 16  ;;  %v5164_v23 = vrot.slane %v5094_v30, 4  ;;  %9886 = vmatpush3.bf16.msra.mxu0 %v10313_v8  ;;  %v5236_v62 = vld [vmem:[#allocation3 + $0x50] sm:$0xf0] }
 0x2d1   : > { %8147 = vmatprep.mubr.bf16.mxu0 %v5678_v42  ;;  %v4664_v56 = vpack.c.bf16 %v4648_v48, %v4647_v15  ;;  %v4663_v25 = vpack.c.bf16 %v4646_v11, %v4645_v29  ;;  %v4869_v31 = vrot.slane %v4867_v19, 4  ;;  %v4874_v16 = vrot.slane %v4872_v9, 3  ;;  %v5237_v53 = vld [vmem:[#allocation3 + $0x58] sm:$0x1f]  ;;  %v5574_v11 = vld [vmem:[#allocation3 + $0x70] sm:$0xf8] }
 0x2d2   : > { %v4877_v4 = vrot.slane %v4875_v59, 4  ;;  %v5165_v1 = vrot.slane %v5095_v34, 4  ;;  %v5327_v24 = vshrl.u32 %v5234_v51, 16  ;;  %v5330_v36 = vshll.u32 %v5234_v51, 16 }
 0x2d3   : > { %v4696_v63 = vrot.slane %v4664_v56, 4  ;;  %v4695_v20 = vrot.slane %v4663_v25, 4  ;;  %v4870_v33 = vor.u32 %v4869_v31, %v4866_v52  ;;  %v5335_v14 = vshrl.u32 %v5235_v10, 16  ;;  %v5575_v52 = vld [vmem:[#allocation3 + $0x78] sm:$0xf] }
 0x2d4   : > { %v4878_v43 = vor.u32 %v4877_v4, %v4874_v16  ;;  %v5166_v18 = vsel %vm1034_vm4, %v5164_v23, %v5165_v1  ;;  %v5329_v5 = vrot.slane %v5327_v24, 4  ;;  %v5332_v26 = vrot.slane %v5330_v36, 5  ;;  %v4760_v31 = vld [vmem:[#allocation3 + $0x70] sm:$0xf8]  ;;  %v4761_v4 = vld [vmem:[#allocation3 + $0x78] sm:$0xf] }
 0x2d5   : > { %4744 = vst [vmem:[#allocation3 + $0x108] ss:$-4 sps:$4 sm:$0xff] %v4696_v63   ;;  %4742 = vst [vmem:[#allocation3 + $0xf8] ss:$-4 sps:$4 sm:$0xff] %v4695_v20   ;;  %v5338_v58 = vshll.u32 %v5235_v10, 16  ;;  %v5680_v35 = vshrl.u32 %v5572_v44, 16 }
 0x2d6   : > { %v5683_v0 = vshll.u32 %v5572_v44, 16  ;;  %v4879_v21 = vsel %vm336_vm3, %v4870_v33, %v4878_v43  ;;  %v5337_v40 = vrot.slane %v5335_v14, 4  ;;  %v5688_v41 = vshrl.u32 %v5573_v54, 16  ;;  %v5098_v20 = vld [vmem:[#allocation3 + $0x80] sm:$0xf0] }
 0x2d7   : > { %v5691_v37 = vshll.u32 %v5573_v54, 16  ;;  %7995 = vmatmul.mubr.bf16.gmra.mrb[148].mxu1 %v4879_v21  ;;  %v5333_v2 = vor.u32 %v5332_v26, %v5329_v5  ;;  %v5340_v28 = vrot.slane %v5338_v58, 5  ;;  %v5682_v22 = vrot.slane %v5680_v35, 3  ;;  %v5238_v35 = vld [vmem:[#allocation3 + $0x60] sm:$0xf0] }
 0x2d8   : > { %v5685_v32 = vrot.slane %v5683_v0, 4  ;;  %8002 = vmatprep.mubr.bf16.mxu1 %v5166_v18  ;;  %v5690_v38 = vrot.slane %v5688_v41, 3  ;;  %v4881_v39 = vshrl.u32 %v4758_v6, 16  ;;  %v4884_v61 = vshll.u32 %v4758_v6, 16  ;;  %v5099_v18 = vld [vmem:[#allocation3 + $0x88] sm:$0xf] }
 0x2d9   : > { %v5693_v13 = vrot.slane %v5691_v37, 4  ;;  %v5341_v12 = vor.u32 %v5340_v28, %v5337_v40  ;;  %v4889_v57 = vshrl.u32 %v4759_v7, 16  ;;  %v4892_v49 = vshll.u32 %v4759_v7, 16  ;;  %v5239_v41 = vld [vmem:[#allocation3 + $0x68] sm:$0x1f] }
 0x2da   : > { %v5686_v55 = vor.u32 %v5685_v32, %v5682_v22  ;;  %v4883_v47 = vrot.slane %v4881_v39, 3  ;;  %v4886_v15 = vrot.slane %v4884_v61, 4  ;;  %v5167_v29 = vrot.slane %v5096_v46, 4 }
 0x2db   : > { %v5694_v30 = vor.u32 %v5693_v13, %v5690_v38  ;;  %v5342_v34 = vsel %vm1147_vm7, %v5333_v2, %v5341_v12  ;;  %v4891_v50 = vrot.slane %v4889_v57, 3  ;;  %v4894_v3 = vrot.slane %v4892_v49, 4  ;;  %v5576_v13 = vld [vmem:[#allocation3 + $0x80] sm:$0xf8] }
 0x2dc   : > { %v5168_v48 = vrot.slane %v5097_v60, 4  ;;  %8148 = vmatmul.mubr.bf16.gmra.mrb[176].mxu0 %v5342_v34  ;;  %v4887_v51 = vor.u32 %v4886_v15, %v4883_v47  ;;  %v5344_v17 = vshrl.u32 %v5236_v62, 16  ;;  %v5347_v42 = vshll.u32 %v5236_v62, 16  ;;  %v4762_v47 = vld [vmem:[#allocation3 + $0x80] sm:$0xf8] }
 0x2dd   : > { %v5695_v19 = vsel %vm336_vm3, %v5686_v55, %v5694_v30  ;;  %v4895_v9 = vor.u32 %v4894_v3, %v4891_v50  ;;  %v5352_v56 = vshrl.u32 %v5237_v53, 16  ;;  %v5355_v25 = vshll.u32 %v5237_v53, 16  ;;  %v5577_v55 = vld [vmem:[#allocation3 + $0x88] sm:$0xf] }
 0x2de   : > { %8155 = vmatprep.mubr.bf16.mxu0 %v5695_v19  ;;  %v5169_v59 = vsel %vm1034_vm4, %v5167_v29, %v5168_v48  ;;  %v5346_v23 = vrot.slane %v5344_v17, 4  ;;  %v5349_v10 = vrot.slane %v5347_v42, 5  ;;  %v5697_v8 = vshrl.u32 %v5574_v11, 16  ;;  %v4763_v50 = vld [vmem:[#allocation3 + $0x88] sm:$0xf] }
 0x2df   : > { %v5700_v16 = vshll.u32 %v5574_v11, 16  ;;  %v4896_v1 = vsel %vm336_vm3, %v4887_v51, %v4895_v9  ;;  %v5354_v24 = vrot.slane %v5352_v56, 4  ;;  %v5357_v44 = vrot.slane %v5355_v25, 5  ;;  %v5100_v51 = vld [vmem:[#allocation3 + $0x90] sm:$0xf0] }
 0x2e0   : > { %v5705_v63 = vshrl.u32 %v5575_v52, 16  ;;  %8003 = vmatmul.mubr.bf16.gmra.mrb[152].mxu1 %v4896_v1  ;;  %v5350_v33 = vor.u32 %v5349_v10, %v5346_v23  ;;  %v5699_v36 = vrot.slane %v5697_v8, 3  ;;  %v5708_v43 = vshll.u32 %v5575_v52, 16  ;;  %v5240_v10 = vld [vmem:[#allocation3 + $0x70] sm:$0xf0] }
 0x2e1   : > { %v5702_v54 = vrot.slane %v5700_v16, 4  ;;  %8010 = vmatprep.mubr.bf16.mxu1 %v5169_v59  ;;  %v5358_v5 = vor.u32 %v5357_v44, %v5354_v24  ;;  %v4898_v26 = vshrl.u32 %v4760_v31, 16  ;;  %v4901_v58 = vshll.u32 %v4760_v31, 16  ;;  %v5101_v59 = vld [vmem:[#allocation3 + $0x98] sm:$0xf] }
 0x2e2   : > { %v5707_v14 = vrot.slane %v5705_v63, 3  ;;  %v5710_v6 = vrot.slane %v5708_v43, 4  ;;  %v4906_v21 = vshrl.u32 %v4761_v4, 16  ;;  %v4909_v40 = vshll.u32 %v4761_v4, 16  ;;  %v5241_v24 = vld [vmem:[#allocation3 + $0x78] sm:$0x1f] }
 0x2e3   : > { %v5703_v0 = vor.u32 %v5702_v54, %v5699_v36  ;;  %v5359_v37 = vsel %vm1147_vm7, %v5350_v33, %v5358_v5  ;;  %v4900_v7 = vrot.slane %v4898_v26, 3  ;;  %v4903_v2 = vrot.slane %v4901_v58, 4  ;;  %v5578_v5 = vld [vmem:[#allocation3 + $0x90] sm:$0xf8] }
 0x2e4   : > { %v5170_v28 = vrot.slane %v5098_v20, 4  ;;  %8156 = vmatmul.mubr.bf16.gmra.mrb[180].mxu0 %v5359_v37  ;;  %v5711_v22 = vor.u32 %v5710_v6, %v5707_v14  ;;  %v4908_v32 = vrot.slane %v4906_v21, 3  ;;  %v4911_v46 = vrot.slane %v4909_v40, 4  ;;  %v4764_v37 = vld [vmem:[#allocation3 + $0x90] sm:$0xf8] }
 0x2e5   : > { %v5171_v38 = vrot.slane %v5099_v18, 4  ;;  %v4904_v39 = vor.u32 %v4903_v2, %v4900_v7  ;;  %v5361_v61 = vshrl.u32 %v5238_v35, 16  ;;  %v5364_v60 = vshll.u32 %v5238_v35, 16 }
 0x2e6   : > { %v5369_v12 = vshrl.u32 %v5239_v41, 16  ;;  %v5712_v57 = vsel %vm336_vm3, %v5703_v0, %v5711_v22  ;;  %v4912_v49 = vor.u32 %v4911_v46, %v4908_v32  ;;  %v5372_v30 = vshll.u32 %v5239_v41, 16  ;;  %v5579_v0 = vld [vmem:[#allocation3 + $0x98] sm:$0xf] }
 0x2e7   : > { %v5172_v62 = vsel %vm1034_vm4, %v5170_v28, %v5171_v38  ;;  %8163 = vmatprep.mubr.bf16.mxu0 %v5712_v57  ;;  %v5363_v15 = vrot.slane %v5361_v61, 4  ;;  %v5366_v29 = vrot.slane %v5364_v60, 5  ;;  %v5714_v34 = vshrl.u32 %v5576_v13, 16  ;;  %v4765_v32 = vld [vmem:[#allocation3 + $0x98] sm:$0xf] }
 0x2e8   : > { %v5371_v53 = vrot.slane %v5369_v12, 4  ;;  %v4913_v3 = vsel %vm336_vm3, %v4904_v39, %v4912_v49  ;;  %v5374_v48 = vrot.slane %v5372_v30, 5  ;;  %v5717_v11 = vshll.u32 %v5576_v13, 16  ;;  %v5102_v61 = vld [vmem:[#allocation3 + $0xa0] sm:$0xf0] }
 0x2e9   : > { %v5722_v19 = vshrl.u32 %v5577_v55, 16  ;;  %8011 = vmatmul.mubr.bf16.gmra.mrb[156].mxu1 %v4913_v3  ;;  %v5367_v17 = vor.u32 %v5366_v29, %v5363_v15  ;;  %v5716_v42 = vrot.slane %v5714_v34, 3  ;;  %v5725_v52 = vshll.u32 %v5577_v55, 16  ;;  %v5103_v49 = vld [vmem:[#allocation3 + $0xa8] sm:$0xf] }
 0x2ea   : > { %v4915_v9 = vshrl.u32 %v4762_v47, 16  ;;  %8018 = vmatprep.mubr.bf16.mxu1 %v5172_v62  ;;  %v5375_v56 = vor.u32 %v5374_v48, %v5371_v53  ;;  %v5719_v25 = vrot.slane %v5717_v11, 4  ;;  %v4918_v23 = vshll.u32 %v4762_v47, 16  ;;  %v5242_v29 = vld [vmem:[#allocation3 + $0x80] sm:$0xf0] }
 0x2eb   : > { %v5724_v31 = vrot.slane %v5722_v19, 3  ;;  %v5727_v8 = vrot.slane %v5725_v52, 4  ;;  %v4923_v4 = vshrl.u32 %v4763_v50, 16  ;;  %v4926_v1 = vshll.u32 %v4763_v50, 16  ;;  %v5243_v48 = vld [vmem:[#allocation3 + $0x88] sm:$0x1f] }
 0x2ec   : > { %v4917_v16 = vrot.slane %v4915_v9, 3  ;;  %v5376_v44 = vsel %vm1147_vm7, %v5367_v17, %v5375_v56  ;;  %v5720_v63 = vor.u32 %v5719_v25, %v5716_v42  ;;  %v4920_v20 = vrot.slane %v4918_v23, 4  ;;  %v5580_v56 = vld [vmem:[#allocation3 + $0xa0] sm:$0xf8] }
 0x2ed   : > { %v5173_v33 = vrot.slane %v5100_v51, 4  ;;  %8164 = vmatmul.mubr.bf16.gmra.mrb[184].mxu0 %v5376_v44  ;;  %v5728_v36 = vor.u32 %v5727_v8, %v5724_v31  ;;  %v4925_v54 = vrot.slane %v4923_v4, 3  ;;  %v4928_v43 = vrot.slane %v4926_v1, 4  ;;  %v5581_v8 = vld [vmem:[#allocation3 + $0xa8] sm:$0xf] }
 0x2ee   : > { %v5174_v18 = vrot.slane %v5101_v59, 4  ;;  %v4921_v14 = vor.u32 %v4920_v20, %v4917_v16  ;;  %v5378_v26 = vshrl.u32 %v5240_v10, 16  ;;  %v5381_v58 = vshll.u32 %v5240_v10, 16  ;;  %v4766_v44 = vld [vmem:[#allocation3 + $0xa0] sm:$0xf8] }
 0x2ef   : > { %v5386_v35 = vshrl.u32 %v5241_v24, 16  ;;  %v5729_v6 = vsel %vm336_vm3, %v5720_v63, %v5728_v36  ;;  %v4929_v21 = vor.u32 %v4928_v43, %v4925_v54  ;;  %v5389_v41 = vshll.u32 %v5241_v24, 16  ;;  %v4767_v54 = vld [vmem:[#allocation3 + $0xa8] sm:$0xf] }
 0x2f0   : > { %v5175_v40 = vsel %vm1034_vm4, %v5173_v33, %v5174_v18  ;;  %8171 = vmatprep.mubr.bf16.mxu0 %v5729_v6  ;;  %v5380_v7 = vrot.slane %v5378_v26, 4  ;;  %v5383_v2 = vrot.slane %v5381_v58, 5  ;;  %v5731_v22 = vshrl.u32 %v5578_v5, 16  ;;  %v5104_v26 = vld [vmem:[#allocation3 + $0xb0] sm:$0xf0] }
 0x2f1   : > { %v5388_v28 = vrot.slane %v5386_v35, 4  ;;  %v4930_v46 = vsel %vm336_vm3, %v4921_v14, %v4929_v21  ;;  %v5391_v38 = vrot.slane %v5389_v41, 5  ;;  %v5734_v13 = vshll.u32 %v5578_v5, 16  ;;  %v5105_v21 = vld [vmem:[#allocation3 + $0xb8] sm:$0xf] }
 0x2f2   : > { %v5739_v39 = vshrl.u32 %v5579_v0, 16  ;;  %8019 = vmatmul.mubr.bf16.gmra.mrb[160].mxu1 %v4930_v46  ;;  %v5384_v60 = vor.u32 %v5383_v2, %v5380_v7  ;;  %v5733_v12 = vrot.slane %v5731_v22, 3  ;;  %v5742_v55 = vshll.u32 %v5579_v0, 16  ;;  %v5244_v2 = vld [vmem:[#allocation3 + $0x90] sm:$0xf0] }
 0x2f3   : > { %v4932_v57 = vshrl.u32 %v4764_v37, 16  ;;  %8026 = vmatprep.mubr.bf16.mxu1 %v5175_v40  ;;  %v5392_v62 = vor.u32 %v5391_v38, %v5388_v28  ;;  %v5736_v30 = vrot.slane %v5734_v13, 4  ;;  %v4935_v15 = vshll.u32 %v4764_v37, 16  ;;  %v5245_v38 = vld [vmem:[#allocation3 + $0x98] sm:$0x1f] }
 0x2f4   : > { %v5741_v47 = vrot.slane %v5739_v39, 3  ;;  %v5744_v53 = vrot.slane %v5742_v55, 4  ;;  %v4940_v50 = vshrl.u32 %v4765_v32, 16  ;;  %v4943_v3 = vshll.u32 %v4765_v32, 16 }
 0x2f5   : > { %v4934_v34 = vrot.slane %v4932_v57, 3  ;;  %v5393_v11 = vsel %vm1147_vm7, %v5384_v60, %v5392_v62  ;;  %v5737_v19 = vor.u32 %v5736_v30, %v5733_v12  ;;  %v4937_v51 = vrot.slane %v4935_v15, 4  ;;  %v5582_v62 = vld [vmem:[#allocation3 + $0xb0] sm:$0xf8] }
 0x2f6   : > { %v5176_v17 = vrot.slane %v5102_v61, 4  ;;  %8172 = vmatmul.mubr.bf16.gmra.mrb[188].mxu0 %v5393_v11  ;;  %v5745_v42 = vor.u32 %v5744_v53, %v5741_v47  ;;  %v4942_v52 = vrot.slane %v4940_v50, 3  ;;  %v4945_v9 = vrot.slane %v4943_v3, 4  ;;  %v5583_v53 = vld [vmem:[#allocation3 + $0xb8] sm:$0xf] }
 0x2f7   : > { %v5177_v59 = vrot.slane %v5103_v49, 4  ;;  %v4938_v25 = vor.u32 %v4937_v51, %v4934_v34  ;;  %v5395_v31 = vshrl.u32 %v5242_v29, 16  ;;  %v5398_v23 = vshll.u32 %v5242_v29, 16  ;;  %v4768_v11 = vld [vmem:[#allocation3 + $0xb0] sm:$0xf8] }
 0x2f8   : > { %v5403_v10 = vshrl.u32 %v5243_v48, 16  ;;  %v5746_v16 = vsel %vm336_vm3, %v5737_v19, %v5745_v42  ;;  %v4946_v4 = vor.u32 %v4945_v9, %v4942_v52  ;;  %v5406_v24 = vshll.u32 %v5243_v48, 16  ;;  %v4769_v52 = vld [vmem:[#allocation3 + $0xb8] sm:$0xf] }
 0x2f9   : > { %v5178_v1 = vsel %vm1034_vm4, %v5176_v17, %v5177_v59  ;;  %8179 = vmatprep.mubr.bf16.mxu0 %v5746_v16  ;;  %v5397_v63 = vrot.slane %v5395_v31, 4  ;;  %v5400_v20 = vrot.slane %v5398_v23, 5  ;;  %v5748_v36 = vshrl.u32 %v5580_v56, 16  ;;  %v5106_v31 = vld [vmem:[#allocation3 + $0xc0] sm:$0xf0] }
 0x2fa   : > { %v5405_v33 = vrot.slane %v5403_v10, 4  ;;  %v4947_v43 = vsel %vm336_vm3, %v4938_v25, %v4946_v4  ;;  %v5408_v18 = vrot.slane %v5406_v24, 5  ;;  %v5751_v5 = vshll.u32 %v5580_v56, 16  ;;  %v5107_v4 = vld [vmem:[#allocation3 + $0xc8] sm:$0xf] }
 0x2fb   : > { %v5756_v14 = vshrl.u32 %v5581_v8, 16  ;;  %8027 = vmatmul.mubr.bf16.gmra.mrb[164].mxu1 %v4947_v43  ;;  %v5401_v58 = vor.u32 %v5400_v20, %v5397_v63  ;;  %v5750_v35 = vrot.slane %v5748_v36, 3  ;;  %v5759_v0 = vshll.u32 %v5581_v8, 16  ;;  %v5246_v20 = vld [vmem:[#allocation3 + $0xa0] sm:$0xf0] }
 0x2fc   : > { %v4949_v6 = vshrl.u32 %v4766_v44, 16  ;;  %8034 = vmatprep.mubr.bf16.mxu1 %v5178_v1  ;;  %v5409_v40 = vor.u32 %v5408_v18, %v5405_v33  ;;  %v5753_v41 = vrot.slane %v5751_v5, 4  ;;  %v4952_v7 = vshll.u32 %v4766_v44, 16  ;;  %v5247_v18 = vld [vmem:[#allocation3 + $0xa8] sm:$0x1f] }
 0x2fd   : > { %v5758_v37 = vrot.slane %v5756_v14, 3  ;;  %v5761_v28 = vrot.slane %v5759_v0, 4  ;;  %v4957_v32 = vshrl.u32 %v4767_v54, 16  ;;  %v4960_v46 = vshll.u32 %v4767_v54, 16 }
 0x2fe   : > { %v4951_v22 = vrot.slane %v4949_v6, 3  ;;  %v5410_v13 = vsel %vm1147_vm7, %v5401_v58, %v5409_v40  ;;  %v5754_v39 = vor.u32 %v5753_v41, %v5750_v35  ;;  %v4954_v61 = vrot.slane %v4952_v7, 4  ;;  %v5584_v40 = vld [vmem:[#allocation3 + $0xc0] sm:$0xf8] }
 0x2ff   : > { %v5179_v60 = vrot.slane %v5104_v26, 4  ;;  %8180 = vmatmul.mubr.bf16.gmra.mrb[192].mxu0 %v5410_v13  ;;  %v5762_v12 = vor.u32 %v5761_v28, %v5758_v37  ;;  %v4959_v55 = vrot.slane %v4957_v32, 3  ;;  %v4962_v57 = vrot.slane %v4960_v46, 4  ;;  %v5585_v28 = vld [vmem:[#allocation3 + $0xc8] sm:$0xf] }
 0x300   : > { %v5180_v49 = vrot.slane %v5105_v21, 4  ;;  %v4955_v30 = vor.u32 %v4954_v61, %v4951_v22  ;;  %v5412_v47 = vshrl.u32 %v5244_v2, 16  ;;  %v5415_v15 = vshll.u32 %v5244_v2, 16  ;;  %v4770_v13 = vld [vmem:[#allocation3 + $0xc0] sm:$0xf8] }
 0x301   : > { %v5420_v29 = vshrl.u32 %v5245_v38, 16  ;;  %v5763_v34 = vsel %vm336_vm3, %v5754_v39, %v5762_v12  ;;  %v4963_v50 = vor.u32 %v4962_v57, %v4959_v55  ;;  %v5423_v48 = vshll.u32 %v5245_v38, 16  ;;  %v4771_v55 = vld [vmem:[#allocation3 + $0xc8] sm:$0xf] }
 0x302   : > { %v5181_v3 = vsel %vm1034_vm4, %v5179_v60, %v5180_v49  ;;  %8187 = vmatprep.mubr.bf16.mxu0 %v5763_v34  ;;  %v5414_v19 = vrot.slane %v5412_v47, 4  ;;  %v5417_v51 = vrot.slane %v5415_v15, 5  ;;  %v5765_v42 = vshrl.u32 %v5582_v62, 16  ;;  %v5108_v47 = vld [vmem:[#allocation3 + $0xd0] sm:$0xf0] }
 0x303   : > { %v5422_v17 = vrot.slane %v5420_v29, 4  ;;  %v4964_v9 = vsel %vm336_vm3, %v4955_v30, %v4963_v50  ;;  %v5425_v59 = vrot.slane %v5423_v48, 5  ;;  %v5768_v56 = vshll.u32 %v5582_v62, 16  ;;  %v5109_v50 = vld [vmem:[#allocation3 + $0xd8] sm:$0xf] }
 0x304   : > { %v5773_v25 = vshrl.u32 %v5583_v53, 16  ;;  %8035 = vmatmul.mubr.bf16.gmra.mrb[168].mxu1 %v4964_v9  ;;  %v5418_v23 = vor.u32 %v5417_v51, %v5414_v19  ;;  %v5767_v10 = vrot.slane %v5765_v42, 3  ;;  %v5776_v8 = vshll.u32 %v5583_v53, 16  ;;  %v5248_v51 = vld [vmem:[#allocation3 + $0xb0] sm:$0xf0] }
 0x305   : > { %v4966_v16 = vshrl.u32 %v4768_v11, 16  ;;  %8042 = vmatprep.mubr.bf16.mxu1 %v5181_v3  ;;  %v5426_v1 = vor.u32 %v5425_v59, %v5422_v17  ;;  %v5770_v24 = vrot.slane %v5768_v56, 4  ;;  %v4969_v63 = vshll.u32 %v4768_v11, 16  ;;  %v5249_v59 = vld [vmem:[#allocation3 + $0xb8] sm:$0x1f] }
 0x306   : > { %v5775_v44 = vrot.slane %v5773_v25, 3  ;;  %v5778_v33 = vrot.slane %v5776_v8, 4  ;;  %v4974_v54 = vshrl.u32 %v4769_v52, 16  ;;  %v4977_v43 = vshll.u32 %v4769_v52, 16 }
 0x307   : > { %v4968_v36 = vrot.slane %v4966_v16, 3  ;;  %v5427_v5 = vsel %vm1147_vm7, %v5418_v23, %v5426_v1  ;;  %v5771_v14 = vor.u32 %v5770_v24, %v5767_v10  ;;  %v4971_v26 = vrot.slane %v4969_v63, 4  ;;  %v5586_v1 = vld [vmem:[#allocation3 + $0xd0] sm:$0xf8]  ;;  %v11749_v24 = vpop.f32.mrb[128].mxu1 }
 0x308   : > { %v5182_v58 = vrot.slane %v5106_v31, 4  ;;  %8188 = vmatmul.mubr.bf16.gmra.mrb[196].mxu0 %v5427_v5  ;;  %v5779_v35 = vor.u32 %v5778_v33, %v5775_v44  ;;  %v4976_v0 = vrot.slane %v4974_v54, 3  ;;  %v4979_v6 = vrot.slane %v4977_v43, 4 }
 0x309   : > { %v5183_v21 = vrot.slane %v5107_v4, 4  ;;  %v4972_v41 = vor.u32 %v4971_v26, %v4968_v36  ;;  %v5429_v37 = vshrl.u32 %v5246_v20, 16  ;;  %v5432_v7 = vshll.u32 %v5246_v20, 16  ;;  %v5587_v36 = vld [vmem:[#allocation3 + $0xd8] sm:$0xf] }
 0x30a   : > { %v5437_v2 = vshrl.u32 %v5247_v18, 16  ;;  %v5780_v22 = vsel %vm336_vm3, %v5771_v14, %v5779_v35  ;;  %v4980_v32 = vor.u32 %v4979_v6, %v4976_v0  ;;  %v5440_v38 = vshll.u32 %v5247_v18, 16  ;;  %v4772_v14 = vld [vmem:[#allocation3 + $0xd0] sm:$0xf8]  ;;  %v4773_v6 = vld [vmem:[#allocation3 + $0xd8] sm:$0xf] }
 0x30b   : > { %v5184_v46 = vsel %vm1034_vm4, %v5182_v58, %v5183_v21  ;;  %8195 = vmatprep.mubr.bf16.mxu0 %v5780_v22  ;;  %v5431_v39 = vrot.slane %v5429_v37, 4  ;;  %v5434_v61 = vrot.slane %v5432_v7, 5  ;;  %v5782_v12 = vshrl.u32 %v5584_v40, 16  ;;  %v5110_v7 = vld [vmem:[#allocation3 + $0xe0] sm:$0xf0] }
 0x30c   : > { %v5439_v60 = vrot.slane %v5437_v2, 4  ;;  %v4981_v57 = vsel %vm336_vm3, %v4972_v41, %v4980_v32  ;;  %v5442_v49 = vrot.slane %v5440_v38, 5  ;;  %v5785_v62 = vshll.u32 %v5584_v40, 16  ;;  %v11754_v2 = vpop.f32.mrb[129].mxu1  ;;  %v5111_v38 = vld [vmem:[#allocation3 + $0xe8] sm:$0xf] }
 0x30d   : > { %v5790_v30 = vshrl.u32 %v5585_v28, 16  ;;  %8043 = vmatmul.mubr.bf16.gmra.mrb[172].mxu1 %v4981_v57  ;;  %v5435_v15 = vor.u32 %v5434_v61, %v5431_v39  ;;  %v5784_v29 = vrot.slane %v5782_v12, 3  ;;  %v5793_v53 = vshll.u32 %v5585_v28, 16 }
 0x30e   : > { %v4983_v34 = vshrl.u32 %v4770_v13, 16  ;;  %8050 = vmatprep.mubr.bf16.mxu1 %v5184_v46  ;;  %v5443_v3 = vor.u32 %v5442_v49, %v5439_v60  ;;  %v5787_v48 = vrot.slane %v5785_v62, 4  ;;  %v4986_v19 = vshll.u32 %v4770_v13, 16  ;;  %v11756_v13 = vpop.f32.mrb[130].mxu1 }
 0x30f   : > { %v5792_v11 = vrot.slane %v5790_v30, 3  ;;  %v5795_v17 = vrot.slane %v5793_v53, 4  ;;  %v4991_v52 = vshrl.u32 %v4771_v55, 16  ;;  %v4994_v9 = vshll.u32 %v4771_v55, 16  ;;  %v5250_v55 = vld [vmem:[#allocation3 + $0xc0] sm:$0xf0] }
 0x310   : > { %v4985_v42 = vrot.slane %v4983_v34, 3  ;;  %v5444_v56 = vsel %vm1147_vm7, %v5435_v15, %v5443_v3  ;;  %v5788_v25 = vor.u32 %v5787_v48, %v5784_v29  ;;  %v4988_v31 = vrot.slane %v4986_v19, 4  ;;  %v11758_v57 = vpop.f32.mrb[131].mxu1  ;;  %v5251_v15 = vld [vmem:[#allocation3 + $0xc8] sm:$0x1f] }
 0x311   : > { %v5185_v23 = vrot.slane %v5108_v47, 4  ;;  %8196 = vmatmul.mubr.bf16.gmra.mrb[200].mxu0 %v5444_v56  ;;  %v5796_v10 = vor.u32 %v5795_v17, %v5792_v11  ;;  %v4993_v8 = vrot.slane %v4991_v52, 3  ;;  %v4996_v16 = vrot.slane %v4994_v9, 4 }
 0x312   : > { %v5186_v4 = vrot.slane %v5109_v50, 4  ;;  %v4989_v44 = vor.u32 %v4988_v31, %v4985_v42  ;;  %v5446_v63 = vshrl.u32 %v5248_v51, 16  ;;  %v5449_v20 = vshll.u32 %v5248_v51, 16  ;;  %v439_v51 = vld [vmem:[#allocation3 + $0xe0] sm:$0x8] }
 0x313   : > { %v5454_v33 = vshrl.u32 %v5249_v59, 16  ;;  %v5797_v54 = vsel %vm336_vm3, %v5788_v25, %v5796_v10  ;;  %v4997_v43 = vor.u32 %v4996_v16, %v4993_v8  ;;  %v5457_v5 = vshll.u32 %v5249_v59, 16  ;;  %v5589_v59 = vld [vmem:[#allocation3 + $0xe8] sm:$0xf] }
 0x314   : > { %v5187_v18 = vsel %vm1034_vm4, %v5185_v23, %v5186_v4  ;;  %8203 = vmatprep.mubr.bf16.mxu0 %v5797_v54  ;;  %v5448_v26 = vrot.slane %v5446_v63, 4  ;;  %v5451_v58 = vrot.slane %v5449_v20, 5  ;;  %v5799_v0 = vshrl.u32 %v5586_v1, 16  ;;  %v4775_v23 = vld [vmem:[#allocation3 + $0xe8] sm:$0xf] }
 0x315   : > { %v5456_v35 = vrot.slane %v5454_v33, 4  ;;  %v4998_v21 = vsel %vm336_vm3, %v4989_v44, %v4997_v43  ;;  %v5459_v40 = vrot.slane %v5457_v5, 5  ;;  %v5802_v41 = vshll.u32 %v5586_v1, 16  ;;  %v490_v1 = vld [vmem:[#allocation3 + $0xd8] sm:$0x10] }
 0x316   : > { %v5807_v37 = vshrl.u32 %v5587_v36, 16  ;;  %8051 = vmatmul.mubr.bf16.gmra.mrb[176].mxu1 %v4998_v21  ;;  %v5452_v28 = vor.u32 %v5451_v58, %v5448_v26  ;;  %v5801_v22 = vrot.slane %v5799_v0, 3  ;;  %v5810_v32 = vshll.u32 %v5587_v36, 16  ;;  %v5252_v36 = vld [vmem:[#allocation3 + $0xd0] sm:$0xf0] }
 0x317   : > { %v5000_v46 = vshrl.u32 %v4772_v14, 16  ;;  %8058 = vmatprep.mubr.bf16.mxu1 %v5187_v18  ;;  %v5460_v39 = vor.u32 %v5459_v40, %v5456_v35  ;;  %v5804_v61 = vrot.slane %v5802_v41, 4  ;;  %v5003_v12 = vshll.u32 %v4772_v14, 16  ;;  %v5112_v14 = vld [vmem:[#allocation3 + $0xf0] sm:$0xf0] }
 0x318   : > { %v5809_v60 = vrot.slane %v5807_v37, 3  ;;  %v5812_v49 = vrot.slane %v5810_v32, 4  ;;  %v5008_v30 = vshrl.u32 %v4773_v6, 16  ;;  %v5011_v47 = vshll.u32 %v4773_v6, 16  ;;  %v5113_v26 = vld [vmem:[#allocation3 + $0xf8] sm:$0xf] }
 0x319   : > { %v5002_v62 = vrot.slane %v5000_v46, 3  ;;  %v5461_v29 = vsel %vm1147_vm7, %v5452_v28, %v5460_v39  ;;  %v5805_v53 = vor.u32 %v5804_v61, %v5801_v22  ;;  %v5005_v34 = vrot.slane %v5003_v12, 4  ;;  %v442_v6 = vld [vmem:[#allocation3 + $0xf0] sm:$0x8]  ;;  %v5591_v21 = vld [vmem:[#allocation3 + $0xf8] sm:$0xf] }
 0x31a   : > { %v5188_v50 = vrot.slane %v5110_v7, 4  ;;  %8204 = vmatmul.mubr.bf16.gmra.mrb[204].mxu0 %v5461_v29  ;;  %v5813_v3 = vor.u32 %v5812_v49, %v5809_v60  ;;  %v5010_v48 = vrot.slane %v5008_v30, 3  ;;  %v5013_v11 = vrot.slane %v5011_v47, 4  ;;  %v4777_v28 = vld [vmem:[#allocation3 + $0xf8] sm:$0xf] }
 0x31b   : > { %v5189_v19 = vrot.slane %v5111_v38, 4  ;;  %v5006_v17 = vor.u32 %v5005_v34, %v5002_v62  ;;  %v5463_v42 = vshrl.u32 %v5250_v55, 16  ;;  %v5466_v52 = vshll.u32 %v5250_v55, 16  ;;  %v493_v39 = vld [vmem:[#allocation3 + $0xe8] sm:$0x10] }
 0x31c   : > { %v5471_v9 = vshrl.u32 %v5251_v15, 16  ;;  %v5814_v56 = vsel %vm336_vm3, %v5805_v53, %v5813_v3  ;;  %v5014_v25 = vor.u32 %v5013_v11, %v5010_v48  ;;  %v5474_v31 = vshll.u32 %v5251_v15, 16 }
 0x31d   : > { %8211 = vmatprep.mubr.bf16.mxu0 %v5814_v56  ;;  %v5465_v10 = vrot.slane %v5463_v42, 4  ;;  %v5468_v8 = vrot.slane %v5466_v52, 5  ;;  %v440_v4 = vsel %vm10744_vm2, 0, %v439_v51  ;;  %v5824_v20 = vshrl.u32 %v5589_v59, 16 }
 0x31e   : > { %v5473_v16 = vrot.slane %v5471_v9, 4  ;;  %v5015_v44 = vsel %vm336_vm3, %v5006_v17, %v5014_v25  ;;  %v5476_v63 = vrot.slane %v5474_v31, 5  ;;  %441 = vst [vmem:[#allocation3 + $0xe0] sm:$0x8] %v440_v4  ;;  %v5827_v33 = vshll.u32 %v5589_v59, 16 }
 0x31f   : > { %8059 = vmatmul.mubr.bf16.gmra.mrb[180].mxu1 %v5015_v44  ;;  %v5190_v54 = vsel %vm1034_vm4, %v5188_v50, %v5189_v19  ;;  %v5469_v43 = vor.u32 %v5468_v8, %v5465_v10  ;;  %v5025_v18 = vshrl.u32 %v4775_v23, 16  ;;  %v5028_v5 = vshll.u32 %v4775_v23, 16  ;;  %v5254_v17 = vld [vmem:[#allocation3 + $0xe0] sm:$0xf0] }
 0x320   : > { %8066 = vmatprep.mubr.bf16.mxu1 %v5190_v54  ;;  %v5477_v58 = vor.u32 %v5476_v63, %v5473_v16  ;;  %v5826_v35 = vrot.slane %v5824_v20, 3  ;;  %v5829_v0 = vrot.slane %v5827_v33, 4  ;;  %v491_v37 = vsel %vm10754_vm6, 0, %v490_v1 }
 0x321   : > { %v5027_v40 = vrot.slane %v5025_v18, 3  ;;  %v5030_v41 = vrot.slane %v5028_v5, 4  ;;  %v5480_v7 = vshrl.u32 %v5252_v36, 16  ;;  %v5191_v32 = vrot.slane %v5112_v14, 4  ;;  %492 = vst [vmem:[#allocation3 + $0xd8] sm:$0x10] %v491_v37 }
 0x322   : > { %v5478_v22 = vsel %vm1147_vm7, %v5469_v43, %v5477_v58  ;;  %v5192_v46 = vrot.slane %v5113_v26, 4  ;;  %v5483_v38 = vshll.u32 %v5252_v36, 16  ;;  %v5830_v61 = vor.u32 %v5829_v0, %v5826_v35  ;;  %v6042_v26 = vld [vmem:[#allocation3 + $0x10] sm:$0xf0] }
 0x323   : > { %8212 = vmatmul.mubr.bf16.gmra.mrb[208].mxu0 %v5478_v22  ;;  %v5031_v60 = vor.u32 %v5030_v41, %v5027_v40  ;;  %v443_v12 = vsel %vm10744_vm2, 0, %v442_v6  ;;  %v5841_v55 = vshrl.u32 %v5591_v21, 16  ;;  %v11771_v49 = vrot.slane %v5480_v7, 4 }
 0x324   : > { %444 = vst [vmem:[#allocation3 + $0xf0] sm:$0x8] %v443_v12  ;;  %v5844_v62 = vshll.u32 %v5591_v21, 16  ;;  %v5042_v30 = vshrl.u32 %v4777_v28, 16  ;;  %v5045_v47 = vshll.u32 %v4777_v28, 16  ;;  %v5485_v53 = vrot.slane %v5483_v38, 5 }
 0x325   : > { %v5588_v15 = vld [vmem:[#allocation3 + $0xe0] sm:$0xf8]  ;;  %v494_v34 = vsel %vm10754_vm6, 0, %v493_v39  ;;  %v11777_v50 = vadd.f32 %v11754_v2, %v11749_v24  ;;  %v11781_v3 = vadd.f32 %v11758_v57, %v11756_v13  ;;  %v11783_v42 = vrot.slane %v5841_v55, 3  ;;  %v6043_v28 = vld [vmem:[#allocation3 + $0x18] sm:$0x1f] }
 0x326   : > { %v4774_v29 = vld [vmem:[#allocation3 + $0xe0] sm:$0xf8]  ;;  %v5816_v48 = vshrl.u32 %v5588_v15, 16  ;;  %v5819_v11 = vshll.u32 %v5588_v15, 16  ;;  %495 = vst [vmem:[#allocation3 + $0xe8] sm:$0x10] %v494_v34  ;;  %v5193_v13 = vsel %vm1034_vm4, %v5191_v32, %v5192_v46  ;;  %v5486_v31 = vor.u32 %v5485_v53, %v11771_v49 }
 0x327   : > { %v5017_v19 = vshrl.u32 %v4774_v29, 16  ;;  %v5020_v51 = vshll.u32 %v4774_v29, 16  ;;  %v11785_v52 = vrot.slane %v5844_v62, 4  ;;  %v11787_v9 = vrot.slane %v5042_v30, 3  ;;  %v445_v39 = vld [vmem:[#allocation3 + $0x100] sm:$0x8] }
 0x328   : > { %v11789_v59 = vrot.slane %v5045_v47, 4  ;;  %v5818_v24 = vrot.slane %v5816_v48, 3  ;;  %v5821_v2 = vrot.slane %v5819_v11, 4  ;;  %v5253_v57 = vld [vmem:[#allocation3 + $0xd8] sm:$0x1f]  ;;  %v5497_v23 = vshrl.u32 %v5254_v17, 16 }
 0x329   : > { %v5019_v56 = vrot.slane %v5017_v19, 3  ;;  %v5022_v25 = vrot.slane %v5020_v51, 4  ;;  %v5500_v10 = vshll.u32 %v5254_v17, 16  ;;  %v5488_v4 = vshrl.u32 %v5253_v57, 16  ;;  %v5593_v49 = vld [vmem:[#allocation3 + $0x108] sm:$0xf] }
 0x32a   : > { %v5822_v8 = vor.u32 %v5821_v2, %v5818_v24  ;;  %v5491_v1 = vshll.u32 %v5253_v57, 16  ;;  %v5847_v63 = vor.u32 %v11785_v52, %v11783_v42  ;;  %v5048_v33 = vor.u32 %v11789_v59, %v11787_v9  ;;  %v5898_v29 = vld [vmem:[#allocation3 + $0x10] sm:$0xf0]  ;;  %v5899_v53 = vld [vmem:[#allocation3 + $0x18] sm:$0xf] }
 0x32b   : > { %v5023_v16 = vor.u32 %v5022_v25, %v5019_v56  ;;  %v5590_v44 = vld [vmem:[#allocation3 + $0xf0] sm:$0xf8]  ;;  %v5499_v36 = vrot.slane %v5497_v23, 4  ;;  %v5502_v54 = vrot.slane %v5500_v10, 5  ;;  %v5490_v5 = vrot.slane %v5488_v4, 4 }
 0x32c   : > { %v4776_v20 = vld [vmem:[#allocation3 + $0xf0] sm:$0xf8]  ;;  %v5831_v43 = vsel %vm336_vm3, %v5822_v8, %v5830_v61  ;;  %v5493_v14 = vrot.slane %v5491_v1, 5  ;;  %v5833_v58 = vshrl.u32 %v5590_v44, 16  ;;  %v5836_v35 = vshll.u32 %v5590_v44, 16 }
 0x32d   : > { %v5032_v18 = vsel %vm336_vm3, %v5023_v16, %v5031_v60  ;;  %8219 = vmatprep.mubr.bf16.mxu0 %v5831_v43  ;;  %v5034_v0 = vshrl.u32 %v4776_v20, 16  ;;  %v5037_v6 = vshll.u32 %v4776_v20, 16  ;;  %v5255_v21 = vld [vmem:[#allocation3 + $0xe8] sm:$0x1f]  ;;  %v5503_v41 = vor.u32 %v5502_v54, %v5499_v36  ;;  %v496_v51 = vld [vmem:[#allocation3 + $0xf8] sm:$0x10] }
 0x32e   : > { %8067 = vmatmul.mubr.bf16.gmra.mrb[184].mxu1 %v5032_v18  ;;  %v5494_v40 = vor.u32 %v5493_v14, %v5490_v5  ;;  %v5505_v37 = vshrl.u32 %v5255_v21, 16  ;;  %v5508_v7 = vshll.u32 %v5255_v21, 16  ;;  %v5835_v22 = vrot.slane %v5833_v58, 3  ;;  %v5256_v59 = vld [vmem:[#allocation3 + $0xf0] sm:$0xf0] }
 0x32f   : > { %8074 = vmatprep.mubr.bf16.mxu1 %v5193_v13  ;;  %v5838_v32 = vrot.slane %v5836_v35, 4  ;;  %v5036_v46 = vrot.slane %v5034_v0, 3  ;;  %v5039_v38 = vrot.slane %v5037_v6, 4  ;;  %v6075_v55 = vshrl.u32 %v6042_v26, 16  ;;  %v6044_v24 = vld [vmem:[#allocation3 + $0x20] sm:$0xf0] }
 0x330   : > { %v5495_v61 = vsel %vm1147_vm7, %v5486_v31, %v5494_v40  ;;  %v5507_v60 = vrot.slane %v5505_v37, 4  ;;  %v5510_v12 = vrot.slane %v5508_v7, 5  ;;  %v6078_v47 = vshll.u32 %v6042_v26, 16  ;;  %v6045_v57 = vld [vmem:[#allocation3 + $0x28] sm:$0x1f] }
 0x331   : > { %8220 = vmatmul.mubr.bf16.gmra.mrb[212].mxu0 %v5495_v61  ;;  %v5839_v62 = vor.u32 %v5838_v32, %v5835_v22  ;;  %v5040_v30 = vor.u32 %v5039_v38, %v5036_v46  ;;  %v6083_v15 = vshrl.u32 %v6043_v28, 16  ;;  %v6077_v48 = vrot.slane %v6075_v55, 4  ;;  %v6715_v16 = vld [vmem:[#allocation3 + $0x20] sm:$0xf0]  ;;  %v6716_v20 = vld [vmem:[#allocation3 + $0x28] sm:$0xf] }
 0x332   : > { %v5511_v34 = vor.u32 %v5510_v12, %v5507_v60  ;;  %v6086_v11 = vshll.u32 %v6043_v28, 16  ;;  %v446_v19 = vsel %vm10744_vm2, 0, %v445_v39  ;;  %v6080_v52 = vrot.slane %v6078_v47, 5  ;;  %v5900_v18 = vld [vmem:[#allocation3 + $0x20] sm:$0xf0]  ;;  %v10314_v12 = vld [vmem:[#allocation10 + $0x208] sm:$0xff]  }
 0x333   : > { %v5848_v17 = vsel %vm336_vm3, %v5839_v62, %v5847_v63  ;;  %v5049_v42 = vsel %vm336_vm3, %v5040_v30, %v5048_v33  ;;  %v6085_v9 = vrot.slane %v6083_v15, 4  ;;  %447 = vst [vmem:[#allocation3 + $0x100] sm:$0x8] %v446_v19  ;;  %v5858_v25 = vshrl.u32 %v5593_v49, 16  ;;  %v5901_v35 = vld [vmem:[#allocation3 + $0x28] sm:$0xf] }
 0x334   : > { %8227 = vmatprep.mubr.bf16.mxu0 %v5848_v17  ;;  %v5512_v2 = vsel %vm1147_vm7, %v5503_v41, %v5511_v34  ;;  %v6088_v56 = vrot.slane %v6086_v11, 5  ;;  %v5861_v13 = vshll.u32 %v5593_v49, 16  ;;  %v6081_v31 = vor.u32 %v6080_v52, %v6077_v48  ;;  %v6046_v0 = vld [vmem:[#allocation3 + $0x30] sm:$0xf0]  ;;  %v6047_v37 = vld [vmem:[#allocation3 + $0x38] sm:$0x1f] }
 0x335   : > { %v5962_v23 = vrot.slane %v5898_v29, 4  ;;  %v5963_v10 = vrot.slane %v5899_v53, 4  ;;  %v497_v8 = vsel %vm10754_vm6, 0, %v496_v51  ;;  %v11807_v1 = vrot.slane %v5858_v25, 3  ;;  %v10322_v51 = vld [vmem:[#allocation10 + $0x200] sm:$0xff]   ;;  %v10315_v25 = vld [vmem:[#allocation10 + $0x210] sm:$0xff]  }
 0x336   : > { %8075 = vmatmul.mubr.bf16.gmra.mrb[188].mxu1 %v5049_v42  ;;  %v6089_v4 = vor.u32 %v6088_v56, %v6085_v9  ;;  %v11809_v44 = vrot.slane %v5861_v13, 4  ;;  %498 = vst [vmem:[#allocation3 + $0xf8] sm:$0x10] %v497_v8  ;;  %v5514_v63 = vshrl.u32 %v5256_v59, 16  ;;  %v5517_v36 = vshll.u32 %v5256_v59, 16 }
 0x337   : > { %v5964_v33 = vsel %vm1034_vm4, %v5962_v23, %v5963_v10  ;;  %v6092_v54 = vshrl.u32 %v6044_v24, 16  ;;  %v6095_v43 = vshll.u32 %v6044_v24, 16  ;;  %v6100_v58 = vshrl.u32 %v6045_v57, 16  ;;  %v6379_v42 = vld [vmem:[#allocation3 + $0x20] sm:$0xf8] }
 0x338   : > { %v6090_v5 = vsel %vm1147_vm7, %v6081_v31, %v6089_v4  ;;  %v5864_v14 = vor.u32 %v11809_v44, %v11807_v1  ;;  %v11815_v26 = vrot.slane %v5514_v63, 4  ;;  %v11817_v6 = vrot.slane %v5517_v36, 5  ;;  %v6380_v52 = vld [vmem:[#allocation3 + $0x28] sm:$0xf]  ;;  %v6717_v56 = vld [vmem:[#allocation3 + $0x30] sm:$0xf0] }
 0x339   : > { %8228 = vmatmul.mubr.bf16.gmra.mrb[216].mxu0 %v5512_v2  ;;  %8276 = vmatprep.mubr.bf16.mxu1 %v6090_v5  ;;  %v6094_v21 = vrot.slane %v6092_v54, 4  ;;  %v6097_v40 = vrot.slane %v6095_v43, 5  ;;  %v6103_v41 = vshll.u32 %v6045_v57, 16  ;;  %v6102_v28 = vrot.slane %v6100_v58, 4  ;;  %v6718_v10 = vld [vmem:[#allocation3 + $0x38] sm:$0xf] }
 0x33a   : > { %v5592_v7 = vld [vmem:[#allocation3 + $0x100] sm:$0xf8]  ;;  %v6779_v22 = vrot.slane %v6715_v16, 4  ;;  %v6780_v32 = vrot.slane %v6716_v20, 4  ;;  %v5965_v46 = vrot.slane %v5900_v18, 4  ;;  %v5520_v61 = vor.u32 %v11817_v6, %v11815_v26  ;;  %v10316_v43 = vld [vmem:[#allocation10 + $0x218] sm:$0xff]  }
 0x33b   : > { %v5850_v38 = vshrl.u32 %v5592_v7, 16  ;;  %v5853_v39 = vshll.u32 %v5592_v7, 16  ;;  %v6098_v60 = vor.u32 %v6097_v40, %v6094_v21  ;;  %v6105_v55 = vrot.slane %v6103_v41, 5  ;;  %v5902_v44 = vld [vmem:[#allocation3 + $0x30] sm:$0xf0] }
 0x33c   : > { %v6781_v49 = vsel %vm1034_vm4, %v6779_v22, %v6780_v32  ;;  %v5966_v62 = vrot.slane %v5901_v35, 4  ;;  %v6109_v30 = vshrl.u32 %v6046_v0, 16  ;;  %v6112_v53 = vshll.u32 %v6046_v0, 16  ;;  %v5903_v54 = vld [vmem:[#allocation3 + $0x38] sm:$0xf] }
 0x33d   : > { %v5852_v47 = vrot.slane %v5850_v38, 3  ;;  %v5855_v15 = vrot.slane %v5853_v39, 4  ;;  %v5257_v29 = vld [vmem:[#allocation3 + $0xf8] sm:$0x1f]  ;;  %v6117_v34 = vshrl.u32 %v6047_v37, 16  ;;  %v6106_v19 = vor.u32 %v6105_v55, %v6102_v28 }
 0x33e   : > { %8277 = vmatmul.mubr.bf16.vlgmr.msra.gmra.mrb[192].mxu1 %v5964_v33  ;;  %v5522_v48 = vshrl.u32 %v5257_v29, 16  ;;  %v5525_v11 = vshll.u32 %v5257_v29, 16  ;;  %v5967_v17 = vsel %vm1034_vm4, %v5965_v46, %v5966_v62  ;;  %v6111_v59 = vrot.slane %v6109_v30, 4  ;;  %v6048_v35 = vld [vmem:[#allocation3 + $0x40] sm:$0xf0] }
 0x33f   : > { %10056 = vmatpush3.bf16.msra.mxu1 %v10322_v51  ;;  %v5856_v9 = vor.u32 %v5855_v15, %v5852_v47  ;;  %v6114_v24 = vrot.slane %v6112_v53, 5  ;;  %v6119_v2 = vrot.slane %v6117_v34, 4  ;;  %v6107_v31 = vsel %vm1147_vm7, %v6098_v60, %v6106_v19  ;;  %v6049_v40 = vld [vmem:[#allocation3 + $0x48] sm:$0x1f]  ;;  %v6381_v41 = vld [vmem:[#allocation3 + $0x30] sm:$0xf8] }
 0x340   : > { %10057 = vmatprep.subr.bf16.mxu1 %v10314_v12  ;;  %v5524_v13 = vrot.slane %v5522_v48, 4  ;;  %v5527_v57 = vrot.slane %v5525_v11, 5  ;;  %v6120_v23 = vshll.u32 %v6047_v37, 16  ;;  %8284 = vmatprep.mubr.bf16.mxu1 %v6107_v31  ;;  %v6412_v4 = vshrl.u32 %v6379_v42, 16  ;;  %v6382_v32 = vld [vmem:[#allocation3 + $0x38] sm:$0xf] }
 0x341   : > { %v5865_v8 = vsel %vm336_vm3, %v5856_v9, %v5864_v14  ;;  %v6115_v16 = vor.u32 %v6114_v24, %v6111_v59  ;;  %v6415_v1 = vshll.u32 %v6379_v42, 16  ;;  %v6420_v33 = vshrl.u32 %v6380_v52, 16  ;;  %v5904_v15 = vld [vmem:[#allocation3 + $0x40] sm:$0xf0]  ;;  %v5905_v11 = vld [vmem:[#allocation3 + $0x48] sm:$0xf] }
 0x342   : > { %8235 = vmatprep.mubr.bf16.mxu0 %v5865_v8  ;;  %v5528_v63 = vor.u32 %v5527_v57, %v5524_v13  ;;  %v6122_v20 = vrot.slane %v6120_v23, 5  ;;  %v6423_v36 = vshll.u32 %v6380_v52, 16  ;;  %v6414_v18 = vrot.slane %v6412_v4, 3  ;;  %v10317_v29 = vld [vmem:[#allocation10 + $0x220] sm:$0xff]   ;;  %v6050_v52 = vld [vmem:[#allocation3 + $0x50] sm:$0xf0] }
 0x343   : > { %10058 = vmatpush3.bf16.msra.mxu1 %v10314_v12  ;;  %v6417_v5 = vrot.slane %v6415_v1, 4  ;;  %v6782_v26 = vrot.slane %v6717_v56, 4  ;;  %v6783_v58 = vrot.slane %v6718_v10, 4  ;;  %v6422_v6 = vrot.slane %v6420_v33, 3  ;;  %v6720_v12 = vld [vmem:[#allocation3 + $0x48] sm:$0xf] }
 0x344   : > { %10059 = vmatprep.subr.bf16.mxu1 %v10315_v25  ;;  %v5529_v14 = vsel %vm1147_vm7, %v5520_v61, %v5528_v63  ;;  %v6123_v0 = vor.u32 %v6122_v20, %v6119_v2  ;;  %v6425_v21 = vrot.slane %v6423_v36, 4  ;;  %v5968_v28 = vrot.slane %v5902_v44, 4  ;;  %v6719_v61 = vld [vmem:[#allocation3 + $0x40] sm:$0xf0]  ;;  %v6051_v56 = vld [vmem:[#allocation3 + $0x58] sm:$0x1f] }
 0x345   : > { %8236 = vmatmul.mubr.bf16.gmra.mrb[220].mxu0 %v5529_v14  ;;  %v6418_v37 = vor.u32 %v6417_v5, %v6414_v18  ;;  %v6784_v7 = vsel %vm1034_vm4, %v6782_v26, %v6783_v58  ;;  %v5969_v22 = vrot.slane %v5903_v54, 4  ;;  %v6126_v39 = vshrl.u32 %v6048_v35, 16  ;;  %v6383_v4 = vld [vmem:[#allocation3 + $0x40] sm:$0xf8]  ;;  %v10318_v1 = vld [vmem:[#allocation10 + $0x228] sm:$0xff]  }
 0x346   : > { %8285 = vmatmul.mubr.bf16.gmra.mrb[196].mxu1 %v5967_v17  ;;  %8437 = vmatprep.mubr.bf16.mxu0 %v6781_v49  ;;  %v6124_v46 = vsel %vm1147_vm7, %v6115_v16, %v6123_v0  ;;  %v6426_v38 = vor.u32 %v6425_v21, %v6422_v6  ;;  %v6129_v60 = vshll.u32 %v6048_v35, 16  ;;  %v6134_v62 = vshrl.u32 %v6049_v40, 16  ;;  %v6384_v36 = vld [vmem:[#allocation3 + $0x48] sm:$0xf]  ;;  %v6721_v54 = vld [vmem:[#allocation3 + $0x50] sm:$0xf0] }
 0x347   : > { %10060 = vmatpush3.bf16.msra.mxu1 %v10315_v25  ;;  %8292 = vmatprep.mubr.bf16.mxu1 %v6124_v46  ;;  %v5970_v55 = vsel %vm1034_vm4, %v5968_v28, %v5969_v22  ;;  %v6137_v30 = vshll.u32 %v6049_v40, 16  ;;  %v6429_v47 = vshrl.u32 %v6381_v41, 16  ;;  %v6128_v49 = vrot.slane %v6126_v39, 4  ;;  %v6722_v58 = vld [vmem:[#allocation3 + $0x58] sm:$0xf] }
 0x348   : > { %10061 = vmatprep.subr.bf16.mxu1 %v10316_v43  ;;  %v6427_v53 = vsel %vm336_vm3, %v6418_v37, %v6426_v38  ;;  %v6131_v34 = vrot.slane %v6129_v60, 5  ;;  %v6432_v48 = vshll.u32 %v6381_v41, 16  ;;  %v6136_v19 = vrot.slane %v6134_v62, 4  ;;  %v5906_v35 = vld [vmem:[#allocation3 + $0x50] sm:$0xf0] }
 0x349   : > { %v6139_v51 = vrot.slane %v6137_v30, 5  ;;  %v6431_v17 = vrot.slane %v6429_v47, 3  ;;  %v6437_v42 = vshrl.u32 %v6382_v32, 16  ;;  %v6440_v24 = vshll.u32 %v6382_v32, 16  ;;  %v5907_v40 = vld [vmem:[#allocation3 + $0x58] sm:$0xf] }
 0x34a   : > { %v6132_v9 = vor.u32 %v6131_v34, %v6128_v49  ;;  %v6434_v59 = vrot.slane %v6432_v48, 4  ;;  %v6785_v2 = vrot.slane %v6719_v61, 4  ;;  %v6786_v57 = vrot.slane %v6720_v12, 4  ;;  %v10319_v32 = vld [vmem:[#allocation10 + $0x230] sm:$0xff]   ;;  %v6053_v61 = vld [vmem:[#allocation3 + $0x68] sm:$0x1f] }
 0x34b   : > { %10062 = vmatpush3.bf16.msra.mxu1 %v10316_v43  ;;  %v6140_v25 = vor.u32 %v6139_v51, %v6136_v19  ;;  %v6439_v13 = vrot.slane %v6437_v42, 3  ;;  %v5971_v31 = vrot.slane %v5904_v15, 4  ;;  %v6442_v10 = vrot.slane %v6440_v24, 4  ;;  %v6385_v47 = vld [vmem:[#allocation3 + $0x50] sm:$0xf8] }
 0x34c   : > { %10063 = vmatprep.subr.bf16.mxu1 %v10317_v29  ;;  %v6435_v23 = vor.u32 %v6434_v59, %v6431_v17  ;;  %v5972_v8 = vrot.slane %v5905_v11, 4  ;;  %v6143_v16 = vshrl.u32 %v6050_v52, 16  ;;  %v6787_v63 = vsel %vm1034_vm4, %v6785_v2, %v6786_v57  ;;  %v6386_v34 = vld [vmem:[#allocation3 + $0x58] sm:$0xf]  ;;  %v6723_v17 = vld [vmem:[#allocation3 + $0x60] sm:$0xf0] }
 0x34d   : > { %8438 = vmatmul.mubr.bf16.vlgmr.msra.gmra.mrb[224].mxu0 %v6427_v53  ;;  %v6141_v44 = vsel %vm1147_vm7, %v6132_v9, %v6140_v25  ;;  %v6146_v20 = vshll.u32 %v6050_v52, 16  ;;  %v6151_v33 = vshrl.u32 %v6051_v56, 16  ;;  %v6443_v43 = vor.u32 %v6442_v10, %v6439_v13  ;;  %v6724_v42 = vld [vmem:[#allocation3 + $0x68] sm:$0xf]  ;;  %v10320_v52 = vld [vmem:[#allocation10 + $0x238] sm:$0xff]  }
 0x34e   : > { %8293 = vmatmul.mubr.bf16.gmra.mrb[200].mxu1 %v5970_v55  ;;  %8445 = vmatprep.mubr.bf16.mxu0 %v6784_v7  ;;  %v5973_v18 = vsel %vm1034_vm4, %v5971_v31, %v5972_v8  ;;  %v6145_v5 = vrot.slane %v6143_v16, 4  ;;  %v6154_v26 = vshll.u32 %v6051_v56, 16  ;;  %v6446_v6 = vshrl.u32 %v6383_v4, 16  ;;  %v6052_v7 = vld [vmem:[#allocation3 + $0x60] sm:$0xf0] }
 0x34f   : > { %8300 = vmatprep.mubr.bf16.mxu1 %v6141_v44  ;;  %v6148_v14 = vrot.slane %v6146_v20, 5  ;;  %v6153_v0 = vrot.slane %v6151_v33, 4  ;;  %v6449_v21 = vshll.u32 %v6383_v4, 16  ;;  %10064 = vmatpush3.bf16.msra.mxu1 %v10317_v29  ;;  %v6444_v41 = vsel %vm336_vm3, %v6435_v23, %v6443_v43  ;;  %v5908_v56 = vld [vmem:[#allocation3 + $0x60] sm:$0xf0] }
 0x350   : > { %v6156_v37 = vrot.slane %v6154_v26, 5  ;;  %v6454_v28 = vshrl.u32 %v6384_v36, 16  ;;  %v6457_v22 = vshll.u32 %v6384_v36, 16  ;;  %10065 = vmatprep.subr.bf16.mxu1 %v10318_v1  ;;  %v6448_v38 = vrot.slane %v6446_v6, 3  ;;  %v5909_v23 = vld [vmem:[#allocation3 + $0x68] sm:$0xf] }
 0x351   : > { %v6149_v46 = vor.u32 %v6148_v14, %v6145_v5  ;;  %v6451_v39 = vrot.slane %v6449_v21, 4  ;;  %v6788_v60 = vrot.slane %v6721_v54, 4  ;;  %v6789_v30 = vrot.slane %v6722_v58, 4  ;;  %v6055_v54 = vld [vmem:[#allocation3 + $0x78] sm:$0x1f] }
 0x352   : > { %v6157_v12 = vor.u32 %v6156_v37, %v6153_v0  ;;  %v6456_v55 = vrot.slane %v6454_v28, 3  ;;  %v6459_v62 = vrot.slane %v6457_v22, 4  ;;  %v5974_v29 = vrot.slane %v5906_v35, 4  ;;  %v6387_v26 = vld [vmem:[#allocation3 + $0x60] sm:$0xf8] }
 0x353   : > { %v6452_v15 = vor.u32 %v6451_v39, %v6448_v38  ;;  %v5975_v53 = vrot.slane %v5907_v40, 4  ;;  %v6160_v49 = vshrl.u32 %v6052_v7, 16  ;;  %10066 = vmatpush3.bf16.msra.mxu1 %v10318_v1  ;;  %v6790_v19 = vsel %vm1034_vm4, %v6788_v60, %v6789_v30  ;;  %v6054_v1 = vld [vmem:[#allocation3 + $0x70] sm:$0xf0]  ;;  %v6388_v6 = vld [vmem:[#allocation3 + $0x68] sm:$0xf] }
 0x354   : > { %v6158_v48 = vsel %vm1147_vm7, %v6149_v46, %v6157_v12  ;;  %v6460_v11 = vor.u32 %v6459_v62, %v6456_v55  ;;  %v6163_v51 = vshll.u32 %v6052_v7, 16  ;;  %10067 = vmatprep.subr.bf16.mxu1 %v10319_v32  ;;  %v6168_v24 = vshrl.u32 %v6053_v61, 16  ;;  %v6725_v28 = vld [vmem:[#allocation3 + $0x70] sm:$0xf0]  ;;  %v6726_v22 = vld [vmem:[#allocation3 + $0x78] sm:$0xf] }
 0x355   : > { %8446 = vmatmul.mubr.bf16.gmra.mrb[228].mxu0 %v6444_v41  ;;  %v5976_v9 = vsel %vm1034_vm4, %v5974_v29, %v5975_v53  ;;  %v6162_v59 = vrot.slane %v6160_v49, 4  ;;  %v6171_v2 = vshll.u32 %v6053_v61, 16  ;;  %v6463_v57 = vshrl.u32 %v6385_v47, 16  ;;  %v5910_v39 = vld [vmem:[#allocation3 + $0x70] sm:$0xf0] }
 0x356   : > { %8301 = vmatmul.mubr.bf16.gmra.mrb[204].mxu1 %v5973_v18  ;;  %8453 = vmatprep.mubr.bf16.mxu0 %v6787_v63  ;;  %v6461_v25 = vsel %vm336_vm3, %v6452_v15, %v6460_v11  ;;  %v6165_v13 = vrot.slane %v6163_v51, 5  ;;  %v6466_v31 = vshll.u32 %v6385_v47, 16  ;;  %v6170_v10 = vrot.slane %v6168_v24, 4  ;;  %v5911_v62 = vld [vmem:[#allocation3 + $0x78] sm:$0xf] }
 0x357   : > { %8308 = vmatprep.mubr.bf16.mxu1 %v6158_v48  ;;  %v6173_v8 = vrot.slane %v6171_v2, 5  ;;  %v6471_v16 = vshrl.u32 %v6386_v34, 16  ;;  %v6474_v4 = vshll.u32 %v6386_v34, 16  ;;  %10068 = vmatpush3.bf16.msra.mxu1 %v10319_v32  ;;  %v6465_v20 = vrot.slane %v6463_v57, 3  ;;  %v6056_v53 = vld [vmem:[#allocation3 + $0x80] sm:$0xf0] }
 0x358   : > { %v6166_v44 = vor.u32 %v6165_v13, %v6162_v59  ;;  %v6468_v33 = vrot.slane %v6466_v31, 4  ;;  %v6791_v36 = vrot.slane %v6723_v17, 4  ;;  %10069 = vmatprep.subr.bf16.mxu1 %v10320_v52  ;;  %v6792_v5 = vrot.slane %v6724_v42, 4  ;;  %v6057_v51 = vld [vmem:[#allocation3 + $0x88] sm:$0x1f] }
 0x359   : > { %v6174_v63 = vor.u32 %v6173_v8, %v6170_v10  ;;  %v6473_v43 = vrot.slane %v6471_v16, 3  ;;  %v6476_v18 = vrot.slane %v6474_v4, 4  ;;  %v5977_v35 = vrot.slane %v5908_v56, 4  ;;  %v6389_v59 = vld [vmem:[#allocation3 + $0x70] sm:$0xf8] }
 0x35a   : > { %v6469_v58 = vor.u32 %v6468_v33, %v6465_v20  ;;  %v5978_v14 = vrot.slane %v5909_v23, 4  ;;  %v6177_v0 = vshrl.u32 %v6054_v1, 16  ;;  %v6793_v41 = vsel %vm1034_vm4, %v6791_v36, %v6792_v5  ;;  %v6727_v10 = vld [vmem:[#allocation3 + $0x80] sm:$0xf0]  ;;  %v6728_v8 = vld [vmem:[#allocation3 + $0x88] sm:$0xf] }
 0x35b   : > { %v6175_v21 = vsel %vm1147_vm7, %v6166_v44, %v6174_v63  ;;  %v6477_v40 = vor.u32 %v6476_v18, %v6473_v43  ;;  %v6180_v37 = vshll.u32 %v6054_v1, 16  ;;  %10070 = vmatpush3.bf16.msra.mxu1 %v10320_v52  ;;  %v6185_v46 = vshrl.u32 %v6055_v54, 16  ;;  %v5912_v20 = vld [vmem:[#allocation3 + $0x80] sm:$0xf0]  ;;  %v5913_v43 = vld [vmem:[#allocation3 + $0x88] sm:$0xf] }
 0x35c   : > { %v5979_v7 = vsel %vm1034_vm4, %v5977_v35, %v5978_v14  ;;  %v6179_v32 = vrot.slane %v6177_v0, 4  ;;  %v6188_v38 = vshll.u32 %v6055_v54, 16  ;;  %v6480_v12 = vshrl.u32 %v6387_v26, 16  ;;  %v6058_v35 = vld [vmem:[#allocation3 + $0x90] sm:$0xf0] }
 0x35d   : > { %8454 = vmatmul.mubr.bf16.gmra.mrb[232].mxu0 %v6461_v25  ;;  %v6478_v60 = vsel %vm336_vm3, %v6469_v58, %v6477_v40  ;;  %v6182_v61 = vrot.slane %v6180_v37, 5  ;;  %v6483_v55 = vshll.u32 %v6387_v26, 16  ;;  %v6187_v30 = vrot.slane %v6185_v46, 4  ;;  %v6390_v25 = vld [vmem:[#allocation3 + $0x78] sm:$0xf] }
 0x35e   : > { %8309 = vmatmul.mubr.bf16.gmra.mrb[208].mxu1 %v5976_v9  ;;  %8461 = vmatprep.mubr.bf16.mxu0 %v6790_v19  ;;  %v6190_v47 = vrot.slane %v6188_v38, 5  ;;  %v6488_v15 = vshrl.u32 %v6388_v6, 16  ;;  %v6491_v29 = vshll.u32 %v6388_v6, 16  ;;  %v6482_v34 = vrot.slane %v6480_v12, 3  ;;  %v6059_v40 = vld [vmem:[#allocation3 + $0x98] sm:$0x1f] }
 0x35f   : > { %8316 = vmatprep.mubr.bf16.mxu1 %v6175_v21  ;;  %v6183_v49 = vor.u32 %v6182_v61, %v6179_v32  ;;  %v6485_v48 = vrot.slane %v6483_v55, 4  ;;  %v6794_v11 = vrot.slane %v6725_v28, 4  ;;  %v6795_v9 = vrot.slane %v6726_v22, 4  ;;  %v6391_v46 = vld [vmem:[#allocation3 + $0x80] sm:$0xf8] }
 0x360   : > { %v6191_v17 = vor.u32 %v6190_v47, %v6187_v30  ;;  %v6490_v42 = vrot.slane %v6488_v15, 3  ;;  %v6493_v52 = vrot.slane %v6491_v29, 4  ;;  %v5980_v2 = vrot.slane %v5910_v39, 4  ;;  %v6392_v61 = vld [vmem:[#allocation3 + $0x88] sm:$0xf] }
 0x361   : > { %v6486_v24 = vor.u32 %v6485_v48, %v6482_v34  ;;  %v5981_v56 = vrot.slane %v5911_v62, 4  ;;  %v6194_v19 = vshrl.u32 %v6056_v53, 16  ;;  %v11844_v31 = vsel %vm1034_vm4, %v6794_v11, %v6795_v9  ;;  %v6729_v30 = vld [vmem:[#allocation3 + $0x90] sm:$0xf0]  ;;  %v6730_v47 = vld [vmem:[#allocation3 + $0x98] sm:$0xf] }
 0x362   : > { %v6192_v13 = vsel %vm1147_vm7, %v6183_v49, %v6191_v17  ;;  %v6494_v57 = vor.u32 %v6493_v52, %v6490_v42  ;;  %v6197_v23 = vshll.u32 %v6056_v53, 16  ;;  %v6202_v1 = vshrl.u32 %v6057_v51, 16  ;;  %v5914_v34 = vld [vmem:[#allocation3 + $0x90] sm:$0xf0]  ;;  %v5915_v42 = vld [vmem:[#allocation3 + $0x98] sm:$0xf] }
 0x363   : > { %v5982_v16 = vsel %vm1034_vm4, %v5980_v2, %v5981_v56  ;;  %v6196_v4 = vrot.slane %v6194_v19, 4  ;;  %v6205_v44 = vshll.u32 %v6057_v51, 16  ;;  %v6497_v54 = vshrl.u32 %v6389_v59, 16  ;;  %v6060_v2 = vld [vmem:[#allocation3 + $0xa0] sm:$0xf0] }
 0x364   : > { %v6495_v33 = vsel %vm336_vm3, %v6486_v24, %v6494_v57  ;;  %v6199_v36 = vrot.slane %v6197_v23, 5  ;;  %v6500_v63 = vshll.u32 %v6389_v59, 16  ;;  %v6204_v18 = vrot.slane %v6202_v1, 4  ;;  %v6061_v57 = vld [vmem:[#allocation3 + $0xa8] sm:$0x1f] }
 0x365   : > { %8462 = vmatmul.mubr.bf16.gmra.mrb[236].mxu0 %v6478_v60  ;;  %v6207_v5 = vrot.slane %v6205_v44, 5  ;;  %v6505_v26 = vshrl.u32 %v6390_v25, 16  ;;  %v6508_v58 = vshll.u32 %v6390_v25, 16  ;;  %v6499_v0 = vrot.slane %v6497_v54, 3  ;;  %v6393_v1 = vld [vmem:[#allocation3 + $0x90] sm:$0xf8] }
 0x366   : > { %8317 = vmatmul.mubr.bf16.gmra.mrb[212].mxu1 %v5979_v7  ;;  %8469 = vmatprep.mubr.bf16.mxu0 %v6793_v41  ;;  %v6200_v14 = vor.u32 %v6199_v36, %v6196_v4  ;;  %v6502_v6 = vrot.slane %v6500_v63, 4  ;;  %v6797_v21 = vrot.slane %v6727_v10, 4  ;;  %v6798_v32 = vrot.slane %v6728_v8, 4  ;;  %v6394_v63 = vld [vmem:[#allocation3 + $0x98] sm:$0xf] }
 0x367   : > { %8324 = vmatprep.mubr.bf16.mxu1 %v6192_v13  ;;  %v6208_v37 = vor.u32 %v6207_v5, %v6204_v18  ;;  %v6507_v28 = vrot.slane %v6505_v26, 3  ;;  %v6510_v22 = vrot.slane %v6508_v58, 4  ;;  %v5983_v39 = vrot.slane %v5912_v20, 4  ;;  %v6731_v5 = vld [vmem:[#allocation3 + $0xa0] sm:$0xf0] }
 0x368   : > { %v6503_v38 = vor.u32 %v6502_v6, %v6499_v0  ;;  %v5984_v7 = vrot.slane %v5913_v43, 4  ;;  %v6211_v60 = vshrl.u32 %v6058_v35, 16  ;;  %v11850_v41 = vsel %vm1034_vm4, %v6797_v21, %v6798_v32  ;;  %v5916_v0 = vld [vmem:[#allocation3 + $0xa0] sm:$0xf0] }
 0x369   : > { %v6209_v12 = vsel %vm1147_vm7, %v6200_v14, %v6208_v37  ;;  %v6511_v55 = vor.u32 %v6510_v22, %v6507_v28  ;;  %v6214_v62 = vshll.u32 %v6058_v35, 16  ;;  %v6219_v53 = vshrl.u32 %v6059_v40, 16  ;;  %v5917_v28 = vld [vmem:[#allocation3 + $0xa8] sm:$0xf] }
 0x36a   : > { %v5985_v15 = vsel %vm1034_vm4, %v5983_v39, %v5984_v7  ;;  %v6213_v29 = vrot.slane %v6211_v60, 4  ;;  %v6222_v49 = vshll.u32 %v6059_v40, 16  ;;  %v6514_v51 = vshrl.u32 %v6391_v46, 16  ;;  %v6062_v39 = vld [vmem:[#allocation3 + $0xb0] sm:$0xf0] }
 0x36b   : > { %v6512_v48 = vsel %vm336_vm3, %v6503_v38, %v6511_v55  ;;  %v6216_v11 = vrot.slane %v6214_v62, 5  ;;  %v6517_v17 = vshll.u32 %v6391_v46, 16  ;;  %v6221_v52 = vrot.slane %v6219_v53, 4  ;;  %v6063_v55 = vld [vmem:[#allocation3 + $0xb8] sm:$0x1f] }
 0x36c   : > { %v6224_v9 = vrot.slane %v6222_v49, 5  ;;  %v6522_v59 = vshrl.u32 %v6392_v61, 16  ;;  %v6525_v24 = vshll.u32 %v6392_v61, 16  ;;  %v6516_v19 = vrot.slane %v6514_v51, 3  ;;  %v6395_v53 = vld [vmem:[#allocation3 + $0xa0] sm:$0xf8] }
 0x36d   : > { %8470 = vmatmul.mubr.bf16.gmra.mrb[240].mxu0 %v6495_v33  ;;  %v6217_v56 = vor.u32 %v6216_v11, %v6213_v29  ;;  %v6519_v25 = vrot.slane %v6517_v17, 4  ;;  %v6800_v13 = vrot.slane %v6729_v30, 4  ;;  %v6801_v4 = vrot.slane %v6730_v47, 4  ;;  %v6396_v17 = vld [vmem:[#allocation3 + $0xa8] sm:$0xf] }
 0x36e   : > { %8325 = vmatmul.mubr.bf16.gmra.mrb[216].mxu1 %v5982_v16  ;;  %8477 = vmatprep.mubr.bf16.mxu0 %v11844_v31  ;;  %v6225_v23 = vor.u32 %v6224_v9, %v6221_v52  ;;  %v6524_v10 = vrot.slane %v6522_v59, 3  ;;  %v6527_v8 = vrot.slane %v6525_v24, 4  ;;  %v5986_v20 = vrot.slane %v5914_v34, 4  ;;  %v6732_v31 = vld [vmem:[#allocation3 + $0xa8] sm:$0xf] }
 0x36f   : > { %8332 = vmatprep.mubr.bf16.mxu1 %v6209_v12  ;;  %v6520_v44 = vor.u32 %v6519_v25, %v6516_v19  ;;  %v5987_v36 = vrot.slane %v5915_v42, 4  ;;  %v6228_v54 = vshrl.u32 %v6060_v2, 16  ;;  %v11857_v43 = vsel %vm1034_vm4, %v6800_v13, %v6801_v4  ;;  %v6734_v59 = vld [vmem:[#allocation3 + $0xb8] sm:$0xf]  ;;  %v5918_v25 = vld [vmem:[#allocation3 + $0xb0] sm:$0xf0] }
 0x370   : > { %v6226_v16 = vsel %vm1147_vm7, %v6217_v56, %v6225_v23  ;;  %v6528_v33 = vor.u32 %v6527_v8, %v6524_v10  ;;  %v6231_v18 = vshll.u32 %v6060_v2, 16  ;;  %v6236_v35 = vshrl.u32 %v6061_v57, 16  ;;  %v5919_v13 = vld [vmem:[#allocation3 + $0xb8] sm:$0xf] }
 0x371   : > { %v11860_v26 = vsel %vm1034_vm4, %v5986_v20, %v5987_v36  ;;  %v6230_v58 = vrot.slane %v6228_v54, 4  ;;  %v6239_v14 = vshll.u32 %v6061_v57, 16  ;;  %v6531_v40 = vshrl.u32 %v6393_v1, 16 }
 0x372   : > { %v6529_v6 = vsel %vm336_vm3, %v6520_v44, %v6528_v33  ;;  %v6233_v21 = vrot.slane %v6231_v18, 5  ;;  %v6534_v37 = vshll.u32 %v6393_v1, 16  ;;  %v6238_v22 = vrot.slane %v6236_v35, 4  ;;  %v6064_v1 = vld [vmem:[#allocation3 + $0xc0] sm:$0xf0] }
 0x373   : > { %v6241_v32 = vrot.slane %v6239_v14, 5  ;;  %v6539_v46 = vshrl.u32 %v6394_v63, 16  ;;  %v6542_v38 = vshll.u32 %v6394_v63, 16  ;;  %v6533_v60 = vrot.slane %v6531_v40, 3 }
 0x374   : > { %v6234_v7 = vor.u32 %v6233_v21, %v6230_v58  ;;  %v6536_v61 = vrot.slane %v6534_v37, 4  ;;  %v6803_v12 = vrot.slane %v6731_v5, 4  ;;  %v6804_v29 = vrot.slane %v6732_v31, 4  ;;  %v6065_v21 = vld [vmem:[#allocation3 + $0xc8] sm:$0x1f] }
 0x375   : > { %8478 = vmatmul.mubr.bf16.gmra.mrb[244].mxu0 %v6512_v48  ;;  %v6242_v62 = vor.u32 %v6241_v32, %v6238_v22  ;;  %v6541_v30 = vrot.slane %v6539_v46, 3  ;;  %v6544_v47 = vrot.slane %v6542_v38, 4  ;;  %v5989_v34 = vrot.slane %v5916_v0, 4  ;;  %v6733_v48 = vld [vmem:[#allocation3 + $0xb0] sm:$0xf0] }
 0x376   : > { %8333 = vmatmul.mubr.bf16.gmra.mrb[220].mxu1 %v5985_v15  ;;  %8485 = vmatprep.mubr.bf16.mxu0 %v11850_v41  ;;  %v6537_v49 = vor.u32 %v6536_v61, %v6533_v60  ;;  %v5990_v11 = vrot.slane %v5917_v28, 4  ;;  %v6245_v51 = vshrl.u32 %v6062_v39, 16  ;;  %v11866_v9 = vsel %vm1034_vm4, %v6803_v12, %v6804_v29  ;;  %v6397_v32 = vld [vmem:[#allocation3 + $0xb0] sm:$0xf8] }
 0x377   : > { %8340 = vmatprep.mubr.bf16.mxu1 %v6226_v16  ;;  %v6243_v42 = vsel %vm1147_vm7, %v6234_v7, %v6242_v62  ;;  %v6545_v52 = vor.u32 %v6544_v47, %v6541_v30  ;;  %v6248_v15 = vshll.u32 %v6062_v39, 16  ;;  %v11868_v24 = vpop.f32.mrb[132].mxu1  ;;  %v6253_v56 = vshrl.u32 %v6063_v55, 16  ;;  %v6735_v30 = vld [vmem:[#allocation3 + $0xc0] sm:$0xf0] }
 0x378   : > { %v11871_v2 = vsel %vm1034_vm4, %v5989_v34, %v5990_v11  ;;  %v6247_v41 = vrot.slane %v6245_v51, 4  ;;  %v6256_v19 = vshll.u32 %v6063_v55, 16  ;;  %v11873_v57 = vpop.f32.mrb[133].mxu1  ;;  %v6548_v8 = vshrl.u32 %v6395_v53, 16  ;;  %v6736_v11 = vld [vmem:[#allocation3 + $0xc8] sm:$0xf] }
 0x379   : > { %v11876_v23 = vsel %vm336_vm3, %v6537_v49, %v6545_v52  ;;  %v6250_v10 = vrot.slane %v6248_v15, 5  ;;  %v6551_v4 = vshll.u32 %v6395_v53, 16  ;;  %v11878_v44 = vpop.f32.mrb[134].mxu1  ;;  %v6255_v20 = vrot.slane %v6253_v56, 4 }
 0x37a   : > { %v6258_v36 = vrot.slane %v6256_v19, 5  ;;  %v6556_v54 = vshrl.u32 %v6396_v17, 16  ;;  %v6559_v63 = vshll.u32 %v6396_v17, 16  ;;  %v11880_v16 = vpop.f32.mrb[135].mxu1  ;;  %v6550_v18 = vrot.slane %v6548_v8, 3 }
 0x37b   : > { %v6251_v33 = vor.u32 %v6250_v10, %v6247_v41  ;;  %v6553_v5 = vrot.slane %v6551_v4, 4  ;;  %v6806_v31 = vrot.slane %v6733_v48, 4  ;;  %v6807_v0 = vrot.slane %v6734_v59, 4  ;;  %v5920_v48 = vld [vmem:[#allocation3 + $0xc0] sm:$0xf0] }
 0x37c   : > { %v6259_v58 = vor.u32 %v6258_v36, %v6255_v20  ;;  %v6558_v35 = vrot.slane %v6556_v54, 3  ;;  %v6561_v14 = vrot.slane %v6559_v63, 4  ;;  %v5992_v37 = vrot.slane %v5918_v25, 4  ;;  %v5921_v25 = vld [vmem:[#allocation3 + $0xc8] sm:$0xf] }
 0x37d   : > { %8486 = vmatmul.mubr.bf16.gmra.mrb[248].mxu0 %v6529_v6  ;;  %v6554_v40 = vor.u32 %v6553_v5, %v6550_v18  ;;  %v5993_v28 = vrot.slane %v5919_v13, 4  ;;  %v6262_v22 = vshrl.u32 %v6064_v1, 16  ;;  %v11883_v46 = vpop.f32.mrb[160].mxu0  ;;  %v11888_v7 = vsel %vm1034_vm4, %v6806_v31, %v6807_v0  ;;  %v6398_v6 = vld [vmem:[#allocation3 + $0xb8] sm:$0xf] }
 0x37e   : > { %8341 = vmatmul.mubr.bf16.gmra.mrb[224].mxu1 %v11860_v26  ;;  %8493 = vmatprep.mubr.bf16.mxu0 %v11857_v43  ;;  %v6260_v38 = vsel %vm1147_vm7, %v6251_v33, %v6259_v58  ;;  %v6562_v39 = vor.u32 %v6561_v14, %v6558_v35  ;;  %v6265_v60 = vshll.u32 %v6064_v1, 16  ;;  %v11893_v26 = vld [vmem:[%s12428_s4] ss:$0 sm:$0xff]  ;;  %v11895_v61 = vpop.f32.mrb[161].mxu0  ;;  %v6270_v55 = vshrl.u32 %v6065_v21, 16 }
 0x37f   : > { %8348 = vmatprep.mubr.bf16.mxu1 %v6243_v42  ;;  %v11898_v12 = vsel %vm1034_vm4, %v5992_v37, %v5993_v28  ;;  %v6264_v43 = vrot.slane %v6262_v22, 4  ;;  %v6273_v62 = vshll.u32 %v6065_v21, 16  ;;  %v11900_v47 = vpop.f32.mrb[162].mxu0  ;;  %v6565_v49 = vshrl.u32 %v6397_v32, 16  ;;  %v6066_v13 = vld [vmem:[#allocation3 + $0xd0] sm:$0xf0] }
 0x380   : > { %v11903_v29 = vsel %vm336_vm3, %v6554_v40, %v6562_v39  ;;  %v6267_v53 = vrot.slane %v6265_v60, 5  ;;  %v6568_v34 = vshll.u32 %v6397_v32, 16  ;;  %v11905_v51 = vpop.f32.mrb[163].mxu0  ;;  %v6272_v17 = vrot.slane %v6270_v55, 4  ;;  %v6067_v20 = vld [vmem:[#allocation3 + $0xd8] sm:$0x1f] }
 0x381   : > { %v6275_v42 = vrot.slane %v6273_v62, 5  ;;  %v6573_v52 = vshrl.u32 %v6398_v6, 16  ;;  %v6576_v15 = vshll.u32 %v6398_v6, 16  ;;  %v6567_v41 = vrot.slane %v6565_v49, 3  ;;  %v6399_v18 = vld [vmem:[#allocation3 + $0xc0] sm:$0xf8] }
 0x382   : > { %v6268_v59 = vor.u32 %v6267_v53, %v6264_v43  ;;  %v6570_v56 = vrot.slane %v6568_v34, 4  ;;  %v11909_v19 = vadd.f32 %v11777_v50, %v11893_v26  ;;  %v6809_v1 = vrot.slane %v6735_v30, 4  ;;  %v6400_v35 = vld [vmem:[#allocation3 + $0xc8] sm:$0xf]  ;;  %v6737_v40 = vld [vmem:[#allocation3 + $0xd0] sm:$0xf0] }
 0x383   : > { %v6276_v10 = vor.u32 %v6275_v42, %v6272_v17  ;;  %v6575_v8 = vrot.slane %v6573_v52, 3  ;;  %v6578_v4 = vrot.slane %v6576_v15, 4  ;;  %v6810_v54 = vrot.slane %v6736_v11, 4  ;;  %v6738_v32 = vld [vmem:[#allocation3 + $0xd8] sm:$0xf] }
 0x384   : > { %v6571_v36 = vor.u32 %v6570_v56, %v6567_v41  ;;  %v11913_v63 = vadd.f32 %v11781_v3, %v11893_v26  ;;  %v5995_v33 = vrot.slane %v5920_v48, 4  ;;  %v5996_v31 = vrot.slane %v5921_v25, 4  ;;  %v5922_v43 = vld [vmem:[#allocation3 + $0xd0] sm:$0xf0]  ;;  %v5923_v15 = vld [vmem:[#allocation3 + $0xd8] sm:$0xf] }
 0x385   : > { %8494 = vmatmul.mubr.bf16.gmra.mrb[252].mxu0 %v11876_v23  ;;  %v6277_v50 = vsel %vm1147_vm7, %v6268_v59, %v6276_v10  ;;  %v6579_v5 = vor.u32 %v6578_v4, %v6575_v8  ;;  %v6279_v58 = vshrl.u32 %v6066_v13, 16  ;;  %v11920_v14 = vsel %vm1034_vm4, %v6809_v1, %v6810_v54 }
 0x386   : > { %8349 = vmatmul.mubr.bf16.gmra.mrb[228].mxu1 %v11871_v2  ;;  %8501 = vmatprep.mubr.bf16.mxu0 %v11866_v9  ;;  %v6282_v3 = vshll.u32 %v6066_v13, 16  ;;  %v6287_v0 = vshrl.u32 %v6067_v20, 16  ;;  %v6290_v21 = vshll.u32 %v6067_v20, 16  ;;  %v11922_v37 = vpop.f32.mrb[136].mxu1  ;;  %v11928_v23 = vsel %vm1034_vm4, %v5995_v33, %v5996_v31  ;;  %v6068_v13 = vld [vmem:[#allocation3 + $0xe0] sm:$0xf0] }
 0x387   : > { %8356 = vmatprep.mubr.bf16.mxu1 %v6260_v38  ;;  %v11925_v2 = vsel %vm336_vm3, %v6571_v36, %v6579_v5  ;;  %v6281_v28 = vrot.slane %v6279_v58, 4  ;;  %v6582_v22 = vshrl.u32 %v6399_v18, 16  ;;  %v11930_v9 = vpop.f32.mrb[137].mxu1  ;;  %v6585_v6 = vshll.u32 %v6399_v18, 16  ;;  %v6069_v36 = vld [vmem:[#allocation3 + $0xe8] sm:$0x1f] }
 0x388   : > { %v6284_v38 = vrot.slane %v6282_v3, 5  ;;  %v6289_v39 = vrot.slane %v6287_v0, 4  ;;  %v6292_v60 = vrot.slane %v6290_v21, 5  ;;  %v11932_v55 = vpop.f32.mrb[138].mxu1  ;;  %v6590_v30 = vshrl.u32 %v6400_v35, 16 }
 0x389   : > { %v6584_v62 = vrot.slane %v6582_v22, 3  ;;  %v6593_v53 = vshll.u32 %v6400_v35, 16  ;;  %v6812_v49 = vrot.slane %v6737_v40, 4  ;;  %v11934_v34 = vpop.f32.mrb[139].mxu1  ;;  %v6587_v42 = vrot.slane %v6585_v6, 4 }
 0x38a   : > { %v6285_v11 = vor.u32 %v6284_v38, %v6281_v28  ;;  %v6293_v17 = vor.u32 %v6292_v60, %v6289_v39  ;;  %v6813_v52 = vrot.slane %v6738_v32, 4  ;;  %v9669_v48 = vpop.f32.mrb[164].mxu0  ;;  %v6592_v59 = vrot.slane %v6590_v30, 3  ;;  %v6401_v33 = vld [vmem:[#allocation3 + $0xd0] sm:$0xf8] }
 0x38b   : > { %v6595_v41 = vrot.slane %v6593_v53, 4  ;;  %v9559_v56 = vadd.f32 %v11873_v57, %v11868_v24  ;;  %v9665_v25 = vadd.f32 %v11895_v61, %v11883_v46  ;;  %v9670_v10 = vpop.f32.mrb[165].mxu0  ;;  %v6588_v4 = vor.u32 %v6587_v42, %v6584_v62  ;;  %v6402_v5 = vld [vmem:[#allocation3 + $0xd8] sm:$0xf]  ;;  %v6739_v3 = vld [vmem:[#allocation3 + $0xe0] sm:$0xf0] }
 0x38c   : > { %v6294_v8 = vsel %vm1147_vm7, %v6285_v11, %v6293_v17  ;;  %v11942_v1 = vsel %vm1034_vm4, %v6812_v49, %v6813_v52  ;;  %v9562_v20 = vadd.f32 %v11880_v16, %v11878_v44  ;;  %v11946_v54 = vpop.f32.mrb[166].mxu0  ;;  %v5998_v61 = vrot.slane %v5922_v43, 4  ;;  %v6740_v40 = vld [vmem:[#allocation3 + $0xe8] sm:$0xf]  ;;  %v5924_v32 = vld [vmem:[#allocation3 + $0xe0] sm:$0xf0] }
 0x38d   : > { %8502 = vmatmul.mubr.bf16.gmra.mrb[0].mxu0 %v11903_v29  ;;  %v6596_v24 = vor.u32 %v6595_v41, %v6592_v59  ;;  %v7965_v57 = vadd.f32 %v9559_v56, %v11893_v26  ;;  %v11952_v46 = vadd.f32 %v9665_v25, %v11909_v19  ;;  %v9673_v18 = vpop.f32.mrb[167].mxu0  ;;  %v9668_v16 = vadd.f32 %v11905_v51, %v11900_v47  ;;  %v5925_v49 = vld [vmem:[#allocation3 + $0xe8] sm:$0xf]  ;;  %v6070_v59 = vld [vmem:[#allocation3 + $0xf0] sm:$0xf0] }
 0x38e   : > { %8357 = vmatmul.mubr.bf16.gmra.mrb[232].mxu1 %v11898_v12  ;;  %8509 = vmatprep.mubr.bf16.mxu0 %v11888_v7  ;;  %v11956_v44 = vadd.f32 %v9562_v20, %v11893_v26  ;;  %v5999_v29 = vrot.slane %v5923_v15, 4  ;;  %v6296_v12 = vshrl.u32 %v6068_v13, 16  ;;  %v6299_v19 = vshll.u32 %v6068_v13, 16  ;;  %v6071_v20 = vld [vmem:[#allocation3 + $0xf8] sm:$0x1f] }
 0x38f   : > { %8364 = vmatprep.mubr.bf16.mxu1 %v6277_v50  ;;  %v11961_v31 = vsel %vm336_vm3, %v6588_v4, %v6596_v24  ;;  %v6304_v58 = vshrl.u32 %v6069_v36, 16  ;;  %v6307_v35 = vshll.u32 %v6069_v36, 16  ;;  %v11964_v0 = vadd.f32 %v9668_v16, %v11913_v63  ;;  %v6404_v16 = vld [vmem:[#allocation3 + $0xe8] sm:$0xf] }
 0x390   : > { %v11967_v7 = vsel %vm1034_vm4, %v5998_v61, %v5999_v29  ;;  %v6298_v50 = vrot.slane %v6296_v12, 4  ;;  %v6599_v21 = vshrl.u32 %v6401_v33, 16  ;;  %v6301_v47 = vrot.slane %v6299_v19, 5 }
 0x391   : > { %v6306_v51 = vrot.slane %v6304_v58, 4  ;;  %v6309_v28 = vrot.slane %v6307_v35, 5  ;;  %v6602_v22 = vshll.u32 %v6401_v33, 16  ;;  %v6607_v39 = vshrl.u32 %v6402_v5, 16 }
 0x392   : > { %v6601_v38 = vrot.slane %v6599_v21, 3  ;;  %v6610_v60 = vshll.u32 %v6402_v5, 16  ;;  %v6815_v6 = vrot.slane %v6739_v3, 4  ;;  %v11969_v43 = vpop.f32.mrb[140].mxu1  ;;  %v6302_v62 = vor.u32 %v6301_v47, %v6298_v50  ;;  %v6741_v5 = vld [vmem:[#allocation3 + $0xf0] sm:$0xf0] }
 0x393   : > { %v6310_v63 = vor.u32 %v6309_v28, %v6306_v51  ;;  %v6604_v30 = vrot.slane %v6602_v22, 4  ;;  %v6816_v53 = vrot.slane %v6740_v40, 4  ;;  %v9570_v11 = vpop.f32.mrb[141].mxu1  ;;  %v6609_v17 = vrot.slane %v6607_v39, 3 }
 0x394   : > { %v6612_v42 = vrot.slane %v6610_v60, 4  ;;  %v9565_v52 = vadd.f32 %v11930_v9, %v11922_v37  ;;  %v9671_v15 = vadd.f32 %v9670_v10, %v9669_v48  ;;  %v11973_v41 = vpop.f32.mrb[142].mxu1  ;;  %v6001_v4 = vrot.slane %v5924_v32, 4  ;;  %v6403_v10 = vld [vmem:[#allocation3 + $0xe0] sm:$0xf8] }
 0x395   : > { %8510 = vmatmul.mubr.bf16.gmra.mrb[4].mxu0 %v11925_v2  ;;  %v6311_v56 = vsel %vm1147_vm7, %v6302_v62, %v6310_v63  ;;  %v6605_v25 = vor.u32 %v6604_v30, %v6601_v38  ;;  %v11979_v13 = vsel %vm1034_vm4, %v6815_v6, %v6816_v53  ;;  %v9573_v36 = vpop.f32.mrb[143].mxu1  ;;  %v6002_v2 = vrot.slane %v5925_v49, 4  ;;  %v5926_v38 = vld [vmem:[#allocation3 + $0xf0] sm:$0xf0] }
 0x396   : > { %8365 = vmatmul.mubr.bf16.gmra.mrb[236].mxu1 %v11928_v23  ;;  %8517 = vmatprep.mubr.bf16.mxu0 %v11920_v14  ;;  %v6613_v37 = vor.u32 %v6612_v42, %v6609_v17  ;;  %v7973_v9 = vadd.f32 %v9565_v52, %v11893_v26  ;;  %v11983_v48 = vadd.f32 %v9671_v15, %v7965_v57  ;;  %v6313_v61 = vshrl.u32 %v6070_v59, 16  ;;  %v499_v17 = vld [vmem:[#allocation3 + $0x108] sm:$0x10]  ;;  %v6072_v42 = vld [vmem:[#allocation3 + $0x100] sm:$0xf0] }
 0x397   : > { %8372 = vmatprep.mubr.bf16.mxu1 %v6294_v8  ;;  %v9568_v23 = vadd.f32 %v11934_v34, %v11932_v55  ;;  %v9674_v24 = vadd.f32 %v9673_v18, %v11946_v54  ;;  %v6316_v33 = vshll.u32 %v6070_v59, 16  ;;  %v9675_v29 = vpop.f32.mrb[168].mxu0  ;;  %v11992_v14 = vsel %vm1034_vm4, %v6001_v4, %v6002_v2  ;;  %v6742_v18 = vld [vmem:[#allocation3 + $0xf8] sm:$0xf] }
 0x398   : > { %v11989_v12 = vsel %vm336_vm3, %v6605_v25, %v6613_v37  ;;  %v6321_v8 = vshrl.u32 %v6071_v20, 16  ;;  %v6324_v57 = vshll.u32 %v6071_v20, 16  ;;  %v9676_v19 = vpop.f32.mrb[169].mxu0  ;;  %v6315_v34 = vrot.slane %v6313_v61, 4 }
 0x399   : > { %v7976_v58 = vadd.f32 %v9568_v23, %v11893_v26  ;;  %v11996_v55 = vadd.f32 %v9674_v24, %v11956_v44  ;;  %v6318_v54 = vrot.slane %v6316_v33, 5  ;;  %v9678_v35 = vpop.f32.mrb[170].mxu0  ;;  %v6616_v21 = vshrl.u32 %v6403_v10, 16  ;;  %v5927_v44 = vld [vmem:[#allocation3 + $0xf8] sm:$0xf] }
 0x39a   : > { %v6323_v3 = vrot.slane %v6321_v8, 4  ;;  %v6326_v50 = vrot.slane %v6324_v57, 5  ;;  %v6619_v40 = vshll.u32 %v6403_v10, 16  ;;  %v9679_v47 = vpop.f32.mrb[171].mxu0  ;;  %v6624_v28 = vshrl.u32 %v6404_v16, 16 }
 0x39b   : > { %v6319_v51 = vor.u32 %v6318_v54, %v6315_v34  ;;  %v6627_v22 = vshll.u32 %v6404_v16, 16  ;;  %v6818_v32 = vrot.slane %v6741_v5, 4  ;;  %v6618_v60 = vrot.slane %v6616_v21, 3  ;;  %v6743_v24 = vld [vmem:[#allocation3 + $0x100] sm:$0xf0] }
 0x39c   : > { %v6327_v39 = vor.u32 %v6326_v50, %v6323_v3  ;;  %v6621_v6 = vrot.slane %v6619_v40, 4  ;;  %v6819_v62 = vrot.slane %v6742_v18, 4  ;;  %v6626_v63 = vrot.slane %v6624_v28, 3  ;;  %v6744_v8 = vld [vmem:[#allocation3 + $0x108] sm:$0xf] }
 0x39d   : > { %8518 = vmatmul.mubr.bf16.gmra.mrb[8].mxu0 %v11961_v31  ;;  %v6629_v30 = vrot.slane %v6627_v22, 4  ;;  %v9571_v53 = vadd.f32 %v9570_v11, %v11969_v43  ;;  %v9677_v49 = vadd.f32 %v9676_v19, %v9675_v29  ;;  %v6004_v25 = vrot.slane %v5926_v38, 4  ;;  %v6405_v31 = vld [vmem:[#allocation3 + $0xf0] sm:$0xf8]  ;;  %v6406_v11 = vld [vmem:[#allocation3 + $0xf8] sm:$0xf] }
 0x39e   : > { %8373 = vmatmul.mubr.bf16.gmra.mrb[240].mxu1 %v11967_v7  ;;  %8525 = vmatprep.mubr.bf16.mxu0 %v11942_v1  ;;  %v6328_v52 = vsel %vm1147_vm7, %v6319_v51, %v6327_v39  ;;  %v6622_v15 = vor.u32 %v6621_v6, %v6618_v60  ;;  %v12004_v59 = vsel %vm1034_vm4, %v6818_v32, %v6819_v62  ;;  %v9575_v4 = vpop.f32.mrb[144].mxu1  ;;  %v500_v10 = vsel %vm10754_vm6, 0, %v499_v17  ;;  %v12023_v50 = vld [vmem:[#allocation3 + $0x100] sm:$0xf0]  ;;  %v6408_v6 = vld [vmem:[#allocation3 + $0x108] sm:$0xf] }
 0x39f   : > { %8380 = vmatprep.mubr.bf16.mxu1 %v6311_v56  ;;  %v6630_v7 = vor.u32 %v6629_v30, %v6626_v63  ;;  %v7981_v20 = vadd.f32 %v9571_v53, %v11893_v26  ;;  %v12007_v37 = vadd.f32 %v9677_v49, %v7973_v9  ;;  %v9574_v43 = vadd.f32 %v9573_v36, %v11973_v41  ;;  %v9576_v2 = vpop.f32.mrb[145].mxu1 }
 0x3a0   : > { %v9680_v1 = vadd.f32 %v9679_v47, %v9678_v35  ;;  %v6005_v56 = vrot.slane %v5927_v44, 4  ;;  %v6330_v23 = vshrl.u32 %v6072_v42, 16  ;;  %v9578_v61 = vpop.f32.mrb[146].mxu1  ;;  %501 = vst [vmem:[#allocation3 + $0x108] sm:$0x10] %v500_v10  ;;  %v6333_v9 = vshll.u32 %v6072_v42, 16 }
 0x3a1   : > { %v12013_v33 = vsel %vm336_vm3, %v6622_v15, %v6630_v7  ;;  %v7984_v16 = vadd.f32 %v9574_v43, %v11893_v26  ;;  %v6633_v29 = vshrl.u32 %v6405_v31, 16  ;;  %v9579_v41 = vpop.f32.mrb[147].mxu1  ;;  %v6636_v19 = vshll.u32 %v6405_v31, 16  ;;  %v6859_v42 = vld [vmem:[#allocation3 + $0x20] sm:$0xf0] }
 0x3a2   : > { %v12016_v36 = vadd.f32 %v9680_v1, %v7976_v58  ;;  %v6006_v57 = vsel %vm1034_vm4, %v6004_v25, %v6005_v56  ;;  %v12019_v5 = vrot.slane %v6330_v23, 4  ;;  %v12021_v34 = vrot.slane %v6333_v9, 5  ;;  %v9681_v3 = vpop.f32.mrb[172].mxu0  ;;  %v6407_v58 = vld [vmem:[#allocation3 + $0x100] sm:$0xf8] }
 0x3a3   : > { %v6635_v54 = vrot.slane %v6633_v29, 3  ;;  %v6641_v18 = vshrl.u32 %v6406_v11, 16  ;;  %v6644_v35 = vshll.u32 %v6406_v11, 16  ;;  %v6638_v21 = vrot.slane %v6636_v19, 4  ;;  %v9682_v28 = vpop.f32.mrb[173].mxu0 }
 0x3a4   : > { %v6821_v40 = vrot.slane %v6743_v24, 4  ;;  %v6822_v47 = vrot.slane %v6744_v8, 4  ;;  %v9577_v51 = vadd.f32 %v9576_v2, %v9575_v4  ;;  %v6336_v22 = vor.u32 %v12021_v34, %v12019_v5  ;;  %v9684_v60 = vpop.f32.mrb[174].mxu0  ;;  %v6860_v2 = vld [vmem:[#allocation3 + $0x28] sm:$0x1f] }
 0x3a5   : > { %8526 = vmatmul.mubr.bf16.gmra.mrb[12].mxu0 %v11989_v12  ;;  %v6643_v32 = vrot.slane %v6641_v18, 3  ;;  %v6646_v38 = vrot.slane %v6644_v35, 4  ;;  %v9683_v39 = vadd.f32 %v9682_v28, %v9681_v3  ;;  %v6639_v62 = vor.u32 %v6638_v21, %v6635_v54  ;;  %v9685_v12 = vpop.f32.mrb[175].mxu0  ;;  %v448_v18 = vld [vmem:[#allocation3 + $0x110] sm:$0x8] }
 0x3a6   : > { %8381 = vmatmul.mubr.bf16.gmra.mrb[244].mxu1 %v11992_v14  ;;  %8533 = vmatprep.mubr.bf16.mxu0 %v11979_v13  ;;  %v12031_v44 = vsel %vm1034_vm4, %v6821_v40, %v6822_v47  ;;  %v12034_v63 = vadd.f32 %v9577_v51, %v11893_v26  ;;  %v5929_v14 = vld [vmem:[#allocation3 + $0x108] sm:$0xf]  ;;  %v9580_v49 = vadd.f32 %v9579_v41, %v9578_v61  ;;  %v6007_v25 = vrot.slane %v12023_v50, 4  ;;  %v502_v40 = vld [vmem:[#allocation3 + $0x118] sm:$0x10] }
 0x3a7   : > { %8388 = vmatprep.mubr.bf16.mxu1 %v6328_v52  ;;  %v6647_v30 = vor.u32 %v6646_v38, %v6643_v32  ;;  %v12036_v53 = vadd.f32 %v9683_v39, %v7981_v20  ;;  %v9686_v17 = vadd.f32 %v9685_v12, %v9684_v60  ;;  %v6073_v15 = vld [vmem:[#allocation3 + $0x108] sm:$0x1f]  ;;  %v6650_v13 = vshrl.u32 %v6407_v58, 16  ;;  %v12049_v32 = vld [vmem:[#allocation3 + $0x110] sm:$0xf0] }
 0x3a8   : > { %v6653_v52 = vshll.u32 %v6407_v58, 16  ;;  %v6658_v31 = vshrl.u32 %v6408_v6, 16  ;;  %v6338_v4 = vshrl.u32 %v6073_v15, 16  ;;  %v6341_v7 = vshll.u32 %v6073_v15, 16 }
 0x3a9   : > { %v12040_v43 = vsel %vm336_vm3, %v6639_v62, %v6647_v30  ;;  %v6008_v11 = vrot.slane %v5929_v14, 4  ;;  %v12043_v1 = vadd.f32 %v9580_v49, %v11893_v26  ;;  %v12045_v20 = vadd.f32 %v9686_v17, %v7984_v16  ;;  %v6862_v62 = vld [vmem:[#allocation3 + $0x38] sm:$0x1f] }
 0x3aa   : > { %v6652_v56 = vrot.slane %v6650_v13, 3  ;;  %v6655_v10 = vrot.slane %v6653_v52, 4  ;;  %v9581_v23 = vpop.f32.mrb[148].mxu1  ;;  %v6340_v24 = vrot.slane %v6338_v4, 4  ;;  %v6343_v61 = vrot.slane %v6341_v7, 5 }
 0x3ab   : > { %v6660_v9 = vrot.slane %v6658_v31, 3  ;;  %v6661_v29 = vshll.u32 %v6408_v6, 16  ;;  %v9582_v8 = vpop.f32.mrb[149].mxu1  ;;  %v6892_v5 = vshrl.u32 %v6859_v42, 16  ;;  %v6895_v19 = vshll.u32 %v6859_v42, 16 }
 0x3ac   : > { %v6656_v41 = vor.u32 %v6655_v10, %v6652_v56  ;;  %v6900_v34 = vshrl.u32 %v6860_v2, 16  ;;  %v9584_v54 = vpop.f32.mrb[150].mxu1  ;;  %v6344_v35 = vor.u32 %v6343_v61, %v6340_v24  ;;  %v6903_v3 = vshll.u32 %v6860_v2, 16  ;;  %v6861_v6 = vld [vmem:[#allocation3 + $0x30] sm:$0xf0] }
 0x3ad   : > { %8534 = vmatmul.mubr.bf16.gmra.mrb[16].mxu0 %v12013_v33  ;;  %v6663_v16 = vrot.slane %v6661_v29, 4  ;;  %v9583_v50 = vadd.f32 %v9582_v8, %v9581_v23  ;;  %v9585_v21 = vpop.f32.mrb[151].mxu1  ;;  %v6894_v47 = vrot.slane %v6892_v5, 4  ;;  %v6897_v51 = vrot.slane %v6895_v19, 5  ;;  %v6410_v52 = vld [vmem:[#allocation3 + $0x118] sm:$0xf] }
 0x3ae   : > { %8389 = vmatmul.mubr.bf16.gmra.mrb[248].mxu1 %v6006_v57  ;;  %8541 = vmatprep.mubr.bf16.mxu0 %v12004_v59  ;;  %v6902_v28 = vrot.slane %v6900_v34, 4  ;;  %v9586_v58 = vadd.f32 %v9585_v21, %v9584_v54  ;;  %v6345_v38 = vsel %vm1147_vm7, %v6336_v22, %v6344_v35  ;;  %v6009_v39 = vsel %vm1034_vm4, %v6007_v25, %v6008_v11  ;;  %v6746_v22 = vld [vmem:[#allocation3 + $0x118] sm:$0xf]  ;;  %v6863_v31 = vld [vmem:[#allocation3 + $0x40] sm:$0xf0] }
 0x3af   : > { %v6664_v33 = vor.u32 %v6663_v16, %v6660_v9  ;;  %v6905_v57 = vrot.slane %v6903_v3, 5  ;;  %v9687_v60 = vpop.f32.mrb[176].mxu0  ;;  %8396 = vmatprep.mubr.bf16.mxu1 %v6345_v38  ;;  %v6898_v12 = vor.u32 %v6897_v51, %v6894_v47  ;;  %v12054_v14 = vadd.f32 %v9583_v50, %v11893_v26  ;;  %v6864_v24 = vld [vmem:[#allocation3 + $0x48] sm:$0x1f] }
 0x3b0   : > { %v9688_v59 = vpop.f32.mrb[177].mxu0  ;;  %v449_v30 = vsel %vm10744_vm2, 0, %v448_v18  ;;  %v503_v49 = vsel %vm10754_vm6, 0, %v502_v40  ;;  %v12064_v25 = vadd.f32 %v9586_v58, %v11893_v26  ;;  %v6824_v27 = vrot.slane %v12049_v32, 4 }
 0x3b1   : > { %v12061_v17 = vsel %vm336_vm3, %v6656_v41, %v6664_v33  ;;  %v6906_v42 = vor.u32 %v6905_v57, %v6902_v28  ;;  %v9689_v15 = vadd.f32 %v9688_v59, %v9687_v60  ;;  %v9690_v13 = vpop.f32.mrb[178].mxu0  ;;  %450 = vst [vmem:[#allocation3 + $0x110] sm:$0x8] %v449_v30  ;;  %504 = vst [vmem:[#allocation3 + $0x118] sm:$0x10] %v503_v49  ;;  %v6909_v7 = vshrl.u32 %v6861_v6, 16 }
 0x3b2   : > { %v9691_v4 = vpop.f32.mrb[179].mxu0  ;;  %v6912_v45 = vshll.u32 %v6861_v6, 16  ;;  %v6917_v11 = vshrl.u32 %v6862_v62, 16  ;;  %v6825_v10 = vrot.slane %v6746_v22, 4  ;;  %v6920_v23 = vshll.u32 %v6862_v62, 16 }
 0x3b3   : > { %v12068_v2 = vadd.f32 %v9689_v15, %v12034_v63  ;;  %v9692_v56 = vadd.f32 %v9691_v4, %v9690_v13  ;;  %v9587_v61 = vpop.f32.mrb[152].mxu1  ;;  %v6907_v9 = vsel %vm1147_vm7, %v6898_v12, %v6906_v42  ;;  %v6911_v29 = vrot.slane %v6909_v7, 4  ;;  %v6865_v12 = vld [vmem:[#allocation3 + $0x50] sm:$0xf0]  ;;  %v6866_v15 = vld [vmem:[#allocation3 + $0x58] sm:$0x1f] }
 0x3b4   : > { %v6914_v8 = vrot.slane %v6912_v45, 5  ;;  %v6919_v41 = vrot.slane %v6917_v11, 4  ;;  %v9588_v5 = vpop.f32.mrb[153].mxu1  ;;  %v6922_v34 = vrot.slane %v6920_v23, 5  ;;  %v6675_v63 = vshrl.u32 %v6410_v52, 16 }
 0x3b5   : > { %8542 = vmatmul.mubr.bf16.gmra.mrb[20].mxu0 %v12040_v43  ;;  %v12073_v19 = vadd.f32 %v9692_v56, %v12043_v1  ;;  %v6678_v54 = vshll.u32 %v6410_v52, 16  ;;  %v9590_v18 = vpop.f32.mrb[154].mxu1  ;;  %v6926_v16 = vshrl.u32 %v6863_v31, 16  ;;  %v6929_v3 = vshll.u32 %v6863_v31, 16  ;;  %v6867_v56 = vld [vmem:[#allocation3 + $0x60] sm:$0xf0] }
 0x3b6   : > { %8397 = vmatmul.mubr.bf16.gmra.mrb[252].mxu1 %v6009_v39  ;;  %8549 = vmatprep.mubr.bf16.mxu0 %v12031_v44  ;;  %v6915_v35 = vor.u32 %v6914_v8, %v6911_v29  ;;  %v6934_v50 = vshrl.u32 %v6864_v24, 16  ;;  %v9591_v21 = vpop.f32.mrb[155].mxu1  ;;  %v6923_v40 = vor.u32 %v6922_v34, %v6919_v41  ;;  %v6677_v47 = vrot.slane %v6675_v63, 3  ;;  %v6868_v29 = vld [vmem:[#allocation3 + $0x68] sm:$0x1f] }
 0x3b7   : > { %10071 = vmatprep.mubr.bf16.mxu1 %v6907_v9  ;;  %v6680_v51 = vrot.slane %v6678_v54, 4  ;;  %v6937_v43 = vshll.u32 %v6864_v24, 16  ;;  %v9693_v28 = vpop.f32.mrb[180].mxu0  ;;  %v6928_v1 = vrot.slane %v6926_v16, 4  ;;  %v6931_v32 = vrot.slane %v6929_v3, 5 }
 0x3b8   : > { %v6409_v58 = vld [vmem:[#allocation3 + $0x110] sm:$0xf8]  ;;  %v6936_v38 = vrot.slane %v6934_v50, 4  ;;  %v9589_v39 = vadd.f32 %v9588_v5, %v9587_v61  ;;  %v9694_v33 = vpop.f32.mrb[181].mxu0  ;;  %v6826_v57 = vsel %vm1034_vm4, %v6824_v27, %v6825_v10  ;;  %v6924_v44 = vsel %vm1147_vm7, %v6915_v35, %v6923_v40 }
 0x3b9   : > { %v6667_v60 = vshrl.u32 %v6409_v58, 16  ;;  %v6670_v6 = vshll.u32 %v6409_v58, 16  ;;  %v9696_v62 = vpop.f32.mrb[182].mxu0  ;;  %v6681_v59 = vor.u32 %v6680_v51, %v6677_v47  ;;  %v6932_v30 = vor.u32 %v6931_v32, %v6928_v1  ;;  %v6869_v47 = vld [vmem:[#allocation3 + $0x70] sm:$0xf0] }
 0x3ba   : > { %v6939_v49 = vrot.slane %v6937_v43, 5  ;;  %v9695_v22 = vadd.f32 %v9694_v33, %v9693_v28  ;;  %v9697_v42 = vpop.f32.mrb[183].mxu0  ;;  %v9592_v31 = vadd.f32 %v9591_v21, %v9590_v18  ;;  %v6943_v27 = vshrl.u32 %v6865_v12, 16 }
 0x3bb   : > { %v6669_v13 = vrot.slane %v6667_v60, 3  ;;  %v6672_v52 = vrot.slane %v6670_v6, 4  ;;  %v9698_v4 = vadd.f32 %v9697_v42, %v9696_v62  ;;  %v6946_v11 = vshll.u32 %v6865_v12, 16 }
 0x3bc   : > { %v6940_v7 = vor.u32 %v6939_v49, %v6936_v38  ;;  %v12079_v45 = vadd.f32 %v9695_v22, %v12054_v14  ;;  %v9593_v10 = vpop.f32.mrb[156].mxu1  ;;  %v8005_v24 = vadd.f32 %v9589_v39, %v11893_v26  ;;  %v6951_v9 = vshrl.u32 %v6866_v15, 16 }
 0x3bd   : > { %8550 = vmatmul.mubr.bf16.gmra.mrb[24].mxu0 %v12061_v17  ;;  %v6673_v23 = vor.u32 %v6672_v52, %v6669_v13  ;;  %v12084_v61 = vadd.f32 %v9698_v4, %v12064_v25  ;;  %v9594_v8 = vpop.f32.mrb[157].mxu1  ;;  %v6945_v41 = vrot.slane %v6943_v27, 4  ;;  %v6948_v5 = vrot.slane %v6946_v11, 5 }
 0x3be   : > { %10072 = vmatmul.mubr.bf16.vlgmr.msra.gmra.mrb[0].mxu1 %v6924_v44  ;;  %8557 = vmatprep.mubr.bf16.mxu0 %v6826_v57  ;;  %v6941_v14 = vsel %vm1147_vm7, %v6932_v30, %v6940_v7  ;;  %v6954_v34 = vshll.u32 %v6866_v15, 16  ;;  %v9596_v63 = vpop.f32.mrb[158].mxu1  ;;  %v6953_v17 = vrot.slane %v6951_v9, 4  ;;  %v6960_v18 = vshrl.u32 %v6867_v56, 16  ;;  %v6870_v44 = vld [vmem:[#allocation3 + $0x78] sm:$0x1f] }
 0x3bf   : > { %v6682_v54 = vsel %vm336_vm3, %v6673_v23, %v6681_v59  ;;  %10075 = vmatprep.mubr.bf16.mxu1 %v6941_v14  ;;  %v6963_v35 = vshll.u32 %v6867_v56, 16  ;;  %v9597_v16 = vpop.f32.mrb[159].mxu1  ;;  %v6949_v3 = vor.u32 %v6948_v5, %v6945_v41  ;;  %v6968_v50 = vshrl.u32 %v6868_v29, 16  ;;  %v6871_v59 = vld [vmem:[#allocation3 + $0x80] sm:$0xf0] }
 0x3c0   : > { %v6956_v25 = vrot.slane %v6954_v34, 5  ;;  %v6971_v21 = vshll.u32 %v6868_v29, 16  ;;  %v9699_v40 = vpop.f32.mrb[184].mxu0  ;;  %v6962_v51 = vrot.slane %v6960_v18, 4  ;;  %v9595_v28 = vadd.f32 %v9594_v8, %v9593_v10  ;;  %v6872_v15 = vld [vmem:[#allocation3 + $0x88] sm:$0x1f] }
 0x3c1   : > { %v6965_v43 = vrot.slane %v6963_v35, 5  ;;  %v9700_v58 = vpop.f32.mrb[185].mxu0  ;;  %v9598_v1 = vadd.f32 %v9597_v16, %v9596_v63  ;;  %v6970_v38 = vrot.slane %v6968_v50, 4  ;;  %v8008_v60 = vadd.f32 %v9592_v31, %v11893_v26  ;;  %v6873_v9 = vld [vmem:[#allocation3 + $0x90] sm:$0xf0] }
 0x3c2   : > { %v6957_v32 = vor.u32 %v6956_v25, %v6953_v17  ;;  %v6973_v39 = vrot.slane %v6971_v21, 5  ;;  %v9701_v33 = vadd.f32 %v9700_v58, %v9699_v40  ;;  %v9702_v57 = vpop.f32.mrb[186].mxu0  ;;  %v6977_v12 = vshrl.u32 %v6869_v47, 16  ;;  %v6874_v50 = vld [vmem:[#allocation3 + $0x98] sm:$0x1f] }
 0x3c3   : > { %v6966_v6 = vor.u32 %v6965_v43, %v6962_v51  ;;  %v9703_v62 = vpop.f32.mrb[187].mxu0  ;;  %v6980_v52 = vshll.u32 %v6869_v47, 16  ;;  %v6985_v4 = vshrl.u32 %v6870_v44, 16  ;;  %v6988_v7 = vshll.u32 %v6870_v44, 16  ;;  %v6875_v58 = vld [vmem:[#allocation3 + $0xa0] sm:$0xf0] }
 0x3c4   : > { %v6958_v30 = vsel %vm1147_vm7, %v6949_v3, %v6957_v32  ;;  %v6974_v49 = vor.u32 %v6973_v39, %v6970_v38  ;;  %v12090_v22 = vadd.f32 %v9701_v33, %v8005_v24  ;;  %v9704_v42 = vadd.f32 %v9703_v62, %v9702_v57 }
 0x3c5   : > { %8558 = vmatmul.mubr.bf16.gmra.mrb[28].mxu0 %v6682_v54  ;;  %v6979_v13 = vrot.slane %v6977_v12, 4  ;;  %v9599_v27 = vpop.f32.mrb[160].mxu1  ;;  %v6994_v56 = vshrl.u32 %v6871_v59, 16  ;;  %v6997_v10 = vshll.u32 %v6871_v59, 16  ;;  %v6982_v24 = vrot.slane %v6980_v52, 5 }
 0x3c6   : > { %10076 = vmatmul.mubr.bf16.gmra.mrb[4].mxu1 %v6958_v30  ;;  %v6975_v31 = vsel %vm1147_vm7, %v6966_v6, %v6974_v49  ;;  %v12093_v11 = vadd.f32 %v9704_v42, %v8008_v60  ;;  %v9600_v23 = vpop.f32.mrb[161].mxu1  ;;  %v6987_v29 = vrot.slane %v6985_v4, 4  ;;  %v6990_v8 = vrot.slane %v6988_v7, 5  ;;  %v6876_v59 = vld [vmem:[#allocation3 + $0xa8] sm:$0x1f] }
 0x3c7   : > { %10079 = vmatprep.mubr.bf16.mxu1 %v6975_v31  ;;  %v7002_v14 = vshrl.u32 %v6872_v15, 16  ;;  %v9602_v41 = vpop.f32.mrb[162].mxu1  ;;  %v6996_v5 = vrot.slane %v6994_v56, 4  ;;  %v6999_v34 = vrot.slane %v6997_v10, 5  ;;  %v7005_v63 = vshll.u32 %v6872_v15, 16 }
 0x3c8   : > { %v9601_v54 = vadd.f32 %v9600_v23, %v9599_v27  ;;  %v9603_v17 = vpop.f32.mrb[163].mxu1  ;;  %v6983_v18 = vor.u32 %v6982_v24, %v6979_v13  ;;  %v6991_v35 = vor.u32 %v6990_v8, %v6987_v29  ;;  %v8013_v21 = vadd.f32 %v9595_v28, %v11893_v26  ;;  %v6877_v15 = vld [vmem:[#allocation3 + $0xb0] sm:$0xf0]  ;;  %v6878_v27 = vld [vmem:[#allocation3 + $0xb8] sm:$0x1f] }
 0x3c9   : > { %v7004_v16 = vrot.slane %v7002_v14, 4  ;;  %v9705_v3 = vpop.f32.mrb[188].mxu0  ;;  %v12095_v25 = vadd.f32 %v9603_v17, %v9602_v41  ;;  %v7000_v40 = vor.u32 %v6999_v34, %v6996_v5  ;;  %v7007_v47 = vrot.slane %v7005_v63, 5  ;;  %v6879_v5 = vld [vmem:[#allocation3 + $0xc0] sm:$0xf0] }
 0x3ca   : > { %v9706_v51 = vpop.f32.mrb[189].mxu0  ;;  %v7011_v43 = vshrl.u32 %v6873_v9, 16  ;;  %v8016_v32 = vadd.f32 %v9598_v1, %v11893_v26  ;;  %v6992_v38 = vsel %vm1147_vm7, %v6983_v18, %v6991_v35  ;;  %v7014_v57 = vshll.u32 %v6873_v9, 16 }
 0x3cb   : > { %v9707_v39 = vadd.f32 %v9706_v51, %v9705_v3  ;;  %v9708_v33 = vpop.f32.mrb[190].mxu0  ;;  %v7008_v44 = vor.u32 %v7007_v47, %v7004_v16  ;;  %v7019_v62 = vshrl.u32 %v6874_v50, 16  ;;  %v7022_v12 = vshll.u32 %v6874_v50, 16  ;;  %v6880_v47 = vld [vmem:[#allocation3 + $0xc8] sm:$0x1f] }
 0x3cc   : > { %v9709_v60 = vpop.f32.mrb[191].mxu0  ;;  %v7013_v6 = vrot.slane %v7011_v43, 4  ;;  %v7016_v49 = vrot.slane %v7014_v57, 5  ;;  %v7028_v42 = vshrl.u32 %v6875_v58, 16  ;;  %v7031_v4 = vshll.u32 %v6875_v58, 16 }
 0x3cd   : > { %v12100_v28 = vadd.f32 %v9707_v39, %v8013_v21  ;;  %v9710_v30 = vadd.f32 %v9709_v60, %v9708_v33  ;;  %v7009_v1 = vsel %vm1147_vm7, %v7000_v40, %v7008_v44  ;;  %v7021_v13 = vrot.slane %v7019_v62, 4 }
 0x3ce   : > { %10080 = vmatmul.mubr.bf16.gmra.mrb[8].mxu1 %v6992_v38  ;;  %v7024_v52 = vrot.slane %v7022_v12, 5  ;;  %v9605_v7 = vpop.f32.mrb[164].mxu1  ;;  %v7017_v56 = vor.u32 %v7016_v49, %v7013_v6  ;;  %v7030_v10 = vrot.slane %v7028_v42, 4  ;;  %v7036_v23 = vshrl.u32 %v6876_v59, 16 }
 0x3cf   : > { %10083 = vmatprep.mubr.bf16.mxu1 %v7009_v1  ;;  %v12103_v31 = vadd.f32 %v9710_v30, %v8016_v32  ;;  %v9606_v9 = vpop.f32.mrb[165].mxu1  ;;  %v7033_v29 = vrot.slane %v7031_v4, 5  ;;  %v7039_v8 = vshll.u32 %v6876_v59, 16  ;;  %v7045_v17 = vshrl.u32 %v6877_v15, 16  ;;  %v6881_v30 = vld [vmem:[#allocation3 + $0xd0] sm:$0xf0] }
 0x3d0   : > { %v7025_v24 = vor.u32 %v7024_v52, %v7021_v13  ;;  %v12105_v14 = vadd.f32 %v9606_v9, %v9605_v7  ;;  %v9608_v41 = vpop.f32.mrb[166].mxu1  ;;  %v7038_v34 = vrot.slane %v7036_v23, 4  ;;  %v7048_v18 = vshll.u32 %v6877_v15, 16  ;;  %v6882_v13 = vld [vmem:[#allocation3 + $0xd8] sm:$0x1f] }
 0x3d1   : > { %v9609_v63 = vpop.f32.mrb[167].mxu1  ;;  %v7053_v35 = vshrl.u32 %v6878_v27, 16  ;;  %v8021_v16 = vadd.f32 %v9601_v54, %v11893_v26  ;;  %v7034_v50 = vor.u32 %v7033_v29, %v7030_v10  ;;  %v7041_v21 = vrot.slane %v7039_v8, 5  ;;  %v12112_v26 = vld [vmem:[%s12428_s4] ss:$0 sm:$0xff] }
 0x3d2   : > { %v7026_v3 = vsel %vm1147_vm7, %v7017_v56, %v7025_v24  ;;  %v9711_v40 = vpop.f32.mrb[192].mxu0  ;;  %v9610_v43 = vadd.f32 %v9609_v63, %v9608_v41  ;;  %v7047_v58 = vrot.slane %v7045_v17, 4  ;;  %v7050_v32 = vrot.slane %v7048_v18, 5  ;;  %v6883_v63 = vld [vmem:[#allocation3 + $0xe0] sm:$0xf0] }
 0x3d3   : > { %v9712_v51 = vpop.f32.mrb[193].mxu0  ;;  %v7055_v38 = vrot.slane %v7053_v35, 4  ;;  %v7042_v39 = vor.u32 %v7041_v21, %v7038_v34  ;;  %v7056_v44 = vshll.u32 %v6878_v27, 16  ;;  %v7062_v60 = vshrl.u32 %v6879_v5, 16 }
 0x3d4   : > { %v9713_v33 = vadd.f32 %v9712_v51, %v9711_v40  ;;  %v9714_v57 = vpop.f32.mrb[194].mxu0  ;;  %v8024_v54 = vadd.f32 %v12112_v26, %v12095_v25  ;;  %v7051_v62 = vor.u32 %v7050_v32, %v7047_v58  ;;  %v7065_v12 = vshll.u32 %v6879_v5, 16  ;;  %v6885_v51 = vld [vmem:[#allocation3 + $0xf0] sm:$0xf0] }
 0x3d5   : > { %v9715_v6 = vpop.f32.mrb[195].mxu0  ;;  %v7070_v59 = vshrl.u32 %v6880_v47, 16  ;;  %v7043_v49 = vsel %vm1147_vm7, %v7034_v50, %v7042_v39  ;;  %v7058_v1 = vrot.slane %v7056_v44, 5  ;;  %v7064_v52 = vrot.slane %v7062_v60, 4 }
 0x3d6   : > { %10084 = vmatmul.mubr.bf16.gmra.mrb[12].mxu1 %v7026_v3  ;;  %v12117_v42 = vadd.f32 %v9713_v33, %v8021_v16  ;;  %v9716_v15 = vadd.f32 %v9715_v6, %v9714_v57  ;;  %v7067_v4 = vrot.slane %v7065_v12, 5  ;;  %v7073_v27 = vshll.u32 %v6880_v47, 16  ;;  %v6884_v16 = vld [vmem:[#allocation3 + $0xe8] sm:$0x1f] }
 0x3d7   : > { %10087 = vmatprep.mubr.bf16.mxu1 %v7043_v49  ;;  %v7072_v7 = vrot.slane %v7070_v59, 4  ;;  %v9611_v56 = vpop.f32.mrb[168].mxu1  ;;  %v7059_v10 = vor.u32 %v7058_v1, %v7055_v38  ;;  %v7079_v9 = vshrl.u32 %v6881_v30, 16  ;;  %v7082_v24 = vshll.u32 %v6881_v30, 16 }
 0x3d8   : > { %v12119_v25 = vadd.f32 %v9716_v15, %v8024_v54  ;;  %v9612_v23 = vpop.f32.mrb[169].mxu1  ;;  %v7068_v29 = vor.u32 %v7067_v4, %v7064_v52  ;;  %v7075_v8 = vrot.slane %v7073_v27, 5  ;;  %v7087_v34 = vshrl.u32 %v6882_v13, 16  ;;  %v6886_v15 = vld [vmem:[#allocation3 + $0xf8] sm:$0x1f] }
 0x3d9   : > { %v12121_v41 = vadd.f32 %v9612_v23, %v9611_v56  ;;  %v9614_v5 = vpop.f32.mrb[170].mxu1  ;;  %v7060_v17 = vsel %vm1147_vm7, %v7051_v62, %v7059_v10  ;;  %v7090_v35 = vshll.u32 %v6882_v13, 16  ;;  %v7081_v40 = vrot.slane %v7079_v9, 4  ;;  %v6888_v9 = vld [vmem:[#allocation3 + $0x108] sm:$0x1f] }
 0x3da   : > { %v9615_v18 = vpop.f32.mrb[171].mxu1  ;;  %v7076_v3 = vor.u32 %v7075_v8, %v7072_v7  ;;  %v7084_v47 = vrot.slane %v7082_v24, 5  ;;  %v7089_v32 = vrot.slane %v7087_v34, 4  ;;  %v7096_v39 = vshrl.u32 %v6883_v63, 16 }
 0x3db   : > { %v9717_v50 = vpop.f32.mrb[196].mxu0  ;;  %v12124_v21 = vadd.f32 %v9615_v18, %v9614_v5  ;;  %v7092_v38 = vrot.slane %v7090_v35, 5  ;;  %v7099_v33 = vshll.u32 %v6883_v63, 16  ;;  %v8029_v57 = vadd.f32 %v12112_v26, %v12105_v14  ;;  %v6887_v14 = vld [vmem:[#allocation3 + $0x100] sm:$0xf0] }
 0x3dc   : > { %v9718_v58 = vpop.f32.mrb[197].mxu0  ;;  %v7077_v44 = vsel %vm1147_vm7, %v7068_v29, %v7076_v3  ;;  %v7104_v6 = vshrl.u32 %v6884_v16, 16  ;;  %v8032_v62 = vadd.f32 %v12112_v26, %v9610_v43  ;;  %v7098_v59 = vrot.slane %v7096_v39, 4  ;;  %v6889_v35 = vld [vmem:[#allocation3 + $0x110] sm:$0xf0] }
 0x3dd   : > { %v9719_v60 = vadd.f32 %v9718_v58, %v9717_v50  ;;  %v9720_v54 = vpop.f32.mrb[198].mxu0  ;;  %v7101_v30 = vrot.slane %v7099_v33, 5  ;;  %v7107_v49 = vshll.u32 %v6884_v16, 16  ;;  %v7113_v4 = vshrl.u32 %v6885_v51, 16  ;;  %v6890_v33 = vld [vmem:[#allocation3 + $0x118] sm:$0x1f] }
 0x3de   : > { %10088 = vmatmul.mubr.bf16.gmra.mrb[16].mxu1 %v7060_v17  ;;  %v9721_v12 = vpop.f32.mrb[199].mxu0  ;;  %v7106_v52 = vrot.slane %v7104_v6, 4  ;;  %v7085_v7 = vor.u32 %v7084_v47, %v7081_v40  ;;  %v7093_v27 = vor.u32 %v7092_v38, %v7089_v32  ;;  %v7116_v23 = vshll.u32 %v6885_v51, 16 }
 0x3df   : > { %10091 = vmatprep.mubr.bf16.mxu1 %v7077_v44  ;;  %v12130_v1 = vadd.f32 %v9719_v60, %v8029_v57  ;;  %v9722_v13 = vadd.f32 %v9721_v12, %v9720_v54  ;;  %v7109_v56 = vrot.slane %v7107_v49, 5  ;;  %v7102_v43 = vor.u32 %v7101_v30, %v7098_v59 }
 0x3e0   : > { %v9617_v10 = vpop.f32.mrb[172].mxu1  ;;  %v7121_v8 = vshrl.u32 %v6886_v15, 16  ;;  %v7124_v5 = vshll.u32 %v6886_v15, 16  ;;  %v7130_v18 = vshrl.u32 %v6887_v14, 16  ;;  %v7115_v3 = vrot.slane %v7113_v4, 4 }
 0x3e1   : > { %v12132_v24 = vadd.f32 %v9722_v13, %v8032_v62  ;;  %v9618_v29 = vpop.f32.mrb[173].mxu1  ;;  %v7110_v34 = vor.u32 %v7109_v56, %v7106_v52  ;;  %v7118_v50 = vrot.slane %v7116_v23, 5  ;;  %v7133_v40 = vshll.u32 %v6887_v14, 16 }
 0x3e2   : > { %v9619_v63 = vadd.f32 %v9618_v29, %v9617_v10  ;;  %v9620_v17 = vpop.f32.mrb[174].mxu1  ;;  %v7138_v47 = vshrl.u32 %v6888_v9, 16  ;;  %v7094_v58 = vsel %vm1147_vm7, %v7085_v7, %v7093_v27  ;;  %v7123_v38 = vrot.slane %v7121_v8, 4 }
 0x3e3   : > { %v9621_v16 = vpop.f32.mrb[175].mxu1  ;;  %v7126_v39 = vrot.slane %v7124_v5, 5  ;;  %v8037_v57 = vadd.f32 %v12112_v26, %v12121_v41  ;;  %v7111_v44 = vsel %vm1147_vm7, %v7102_v43, %v7110_v34  ;;  %v7132_v54 = vrot.slane %v7130_v18, 4 }
 0x3e4   : > { %v9723_v51 = vpop.f32.mrb[200].mxu0  ;;  %v9622_v32 = vadd.f32 %v9621_v16, %v9620_v17  ;;  %v7135_v6 = vrot.slane %v7133_v40, 5  ;;  %v7140_v59 = vrot.slane %v7138_v47, 4  ;;  %v7141_v30 = vshll.u32 %v6888_v9, 16 }
 0x3e5   : > { %v9724_v60 = vpop.f32.mrb[201].mxu0  ;;  %v7147_v49 = vshrl.u32 %v6889_v35, 16  ;;  %v8040_v15 = vadd.f32 %v12112_v26, %v12124_v21  ;;  %v7119_v52 = vor.u32 %v7118_v50, %v7115_v3  ;;  %v7150_v4 = vshll.u32 %v6889_v35, 16 }
 0x3e6   : > { %10092 = vmatmul.mubr.bf16.gmra.mrb[20].mxu1 %v7094_v58  ;;  %v9725_v62 = vadd.f32 %v9724_v60, %v9723_v51  ;;  %v9726_v12 = vpop.f32.mrb[202].mxu0  ;;  %v7155_v14 = vshrl.u32 %v6890_v33, 16  ;;  %v7127_v27 = vor.u32 %v7126_v39, %v7123_v38  ;;  %v7143_v56 = vrot.slane %v7141_v30, 5 }
 0x3e7   : > { %10095 = vmatprep.mubr.bf16.mxu1 %v7111_v44  ;;  %v9727_v13 = vpop.f32.mrb[203].mxu0  ;;  %v7136_v10 = vor.u32 %v7135_v6, %v7132_v54  ;;  %v7149_v43 = vrot.slane %v7147_v49, 4  ;;  %v7158_v29 = vshll.u32 %v6890_v33, 16  ;;  %v7152_v34 = vrot.slane %v7150_v4, 5 }
 0x3e8   : > { %v12140_v41 = vadd.f32 %v9725_v62, %v8037_v57  ;;  %v9728_v7 = vadd.f32 %v9727_v13, %v9726_v12  ;;  %v7144_v9 = vor.u32 %v7143_v56, %v7140_v59  ;;  %v7157_v17 = vrot.slane %v7155_v14, 4 }
 0x3e9   : > { %v9623_v23 = vpop.f32.mrb[176].mxu1  ;;  %v7160_v16 = vrot.slane %v7158_v29, 5  ;;  %v7128_v35 = vsel %vm1147_vm7, %v7119_v52, %v7127_v27  ;;  %v7153_v51 = vor.u32 %v7152_v34, %v7149_v43  ;;  %v8045_v39 = vadd.f32 %v12112_v26, %v9619_v63 }
 0x3ea   : > { %v12142_v8 = vadd.f32 %v9728_v7, %v8040_v15  ;;  %v9624_v5 = vpop.f32.mrb[177].mxu1  ;;  %v7145_v50 = vsel %vm1147_vm7, %v7136_v10, %v7144_v9  ;;  %v8048_v60 = vadd.f32 %v12112_v26, %v9622_v32 }
 0x3eb   : > { %v9625_v21 = vadd.f32 %v9624_v5, %v9623_v23  ;;  %v9626_v18 = vpop.f32.mrb[178].mxu1  ;;  %v7161_v38 = vor.u32 %v7160_v16, %v7157_v17 }
 0x3ec   : > { %v9627_v3 = vpop.f32.mrb[179].mxu1 }
 0x3ed   : > { %v9729_v40 = vpop.f32.mrb[204].mxu0  ;;  %v9628_v47 = vadd.f32 %v9627_v3, %v9626_v18  ;;  %v7162_v62 = vsel %vm1147_vm7, %v7153_v51, %v7161_v38  ;;  %v8053_v14 = vadd.f32 %v12112_v26, %v9625_v21 }
 0x3ee   : > { %10096 = vmatmul.mubr.bf16.gmra.mrb[24].mxu1 %v7128_v35  ;;  %v9730_v58 = vpop.f32.mrb[205].mxu0 }
 0x3ef   : > { %10099 = vmatprep.mubr.bf16.mxu1 %v7145_v50  ;;  %v9731_v33 = vadd.f32 %v9730_v58, %v9729_v40  ;;  %v9732_v57 = vpop.f32.mrb[206].mxu0  ;;  %v8056_v56 = vadd.f32 %v12112_v26, %v9628_v47 }
 0x3f0   : > { %v9733_v44 = vpop.f32.mrb[207].mxu0 }
 0x3f1   : > { %v12148_v54 = vadd.f32 %v9731_v33, %v8045_v39  ;;  %v9734_v6 = vadd.f32 %v9733_v44, %v9732_v57 }
 0x3f2   : > { %v9629_v12 = vpop.f32.mrb[180].mxu1 }
 0x3f3   : > { %v12151_v59 = vadd.f32 %v9734_v6, %v8048_v60  ;;  %v9630_v30 = vpop.f32.mrb[181].mxu1 }
 0x3f4   : > { %v9631_v49 = vadd.f32 %v9630_v30, %v9629_v12  ;;  %v9632_v15 = vpop.f32.mrb[182].mxu1 }
 0x3f5   : > { %v9633_v13 = vpop.f32.mrb[183].mxu1 }
 0x3f6   : > { %10100 = vmatmul.mubr.bf16.gmra.mrb[28].mxu1 %v7162_v62  ;;  %v9735_v52 = vpop.f32.mrb[208].mxu0  ;;  %v9634_v63 = vadd.f32 %v9633_v13, %v9632_v15  ;;  %v8061_v21 = vadd.f32 %v12112_v26, %v9631_v49 }
 0x3f7   : > { %v9736_v4 = vpop.f32.mrb[209].mxu0 }
 0x3f8   : > { %v9737_v7 = vadd.f32 %v9736_v4, %v9735_v52  ;;  %v9738_v32 = vpop.f32.mrb[210].mxu0  ;;  %v8064_v47 = vadd.f32 %v12112_v26, %v9634_v63 }
 0x3f9   : > { %v9739_v27 = vpop.f32.mrb[211].mxu0 }
 0x3fa   : > { %v12155_v10 = vadd.f32 %v9737_v7, %v8053_v14  ;;  %v9740_v23 = vadd.f32 %v9739_v27, %v9738_v32 }
 0x3fc   : > { %v12157_v43 = vadd.f32 %v9740_v23, %v8056_v56 }
 0x401   : > { %v9635_v29 = vpop.f32.mrb[184].mxu1 }
 0x402   : > { %v9636_v9 = vpop.f32.mrb[185].mxu1 }
 0x403   : > { %v9637_v5 = vadd.f32 %v9636_v9, %v9635_v29  ;;  %v9638_v34 = vpop.f32.mrb[186].mxu1 }
 0x404   : > { %v9639_v17 = vpop.f32.mrb[187].mxu1  ;;  %v9741_v18 = vpop.f32.mrb[212].mxu0 }
 0x405   : > { %v9640_v16 = vadd.f32 %v9639_v17, %v9638_v34  ;;  %v9742_v35 = vpop.f32.mrb[213].mxu0  ;;  %v8069_v30 = vadd.f32 %v12112_v26, %v9637_v5 }
 0x406   : > { %v9743_v3 = vadd.f32 %v9742_v35, %v9741_v18  ;;  %v9744_v50 = vpop.f32.mrb[214].mxu0 }
 0x407   : > { %v9745_v40 = vpop.f32.mrb[215].mxu0  ;;  %v8072_v52 = vadd.f32 %v12112_v26, %v9640_v16 }
 0x408   : > { %v12161_v58 = vadd.f32 %v9743_v3, %v8061_v21  ;;  %v9746_v51 = vadd.f32 %v9745_v40, %v9744_v50 }
 0x409   : > { %v9641_v38 = vpop.f32.mrb[188].mxu1 }
 0x40a   : > { %v9642_v39 = vpop.f32.mrb[189].mxu1  ;;  %v12163_v33 = vadd.f32 %v9746_v51, %v8064_v47 }
 0x40b   : > { %v9643_v57 = vadd.f32 %v9642_v39, %v9641_v38  ;;  %v9644_v44 = vpop.f32.mrb[190].mxu1 }
 0x40c   : > { %v9645_v60 = vpop.f32.mrb[191].mxu1  ;;  %v9747_v6 = vpop.f32.mrb[216].mxu0 }
 0x40d   : > { %v9646_v62 = vadd.f32 %v9645_v60, %v9644_v44  ;;  %v9748_v12 = vpop.f32.mrb[217].mxu0  ;;  %v8077_v16 = vadd.f32 %v12112_v26, %v9643_v57 }
 0x40e   : > { %v9749_v49 = vadd.f32 %v9748_v12, %v9747_v6  ;;  %v9750_v15 = vpop.f32.mrb[218].mxu0 }
 0x40f   : > { %v9751_v13 = vpop.f32.mrb[219].mxu0  ;;  %v8080_v47 = vadd.f32 %v12112_v26, %v9646_v62 }
 0x410   : > { %v12167_v63 = vadd.f32 %v9749_v49, %v8069_v30  ;;  %v9752_v4 = vadd.f32 %v9751_v13, %v9750_v15 }
 0x411   : > { %v9775_v14 = vpop.f32.mrb[192].mxu1 }
 0x412   : > { %v9776_v7 = vpop.f32.mrb[193].mxu1  ;;  %v12169_v32 = vadd.f32 %v9752_v4, %v8072_v52 }
 0x413   : > { %v9777_v27 = vadd.f32 %v9776_v7, %v9775_v14  ;;  %v9778_v56 = vpop.f32.mrb[194].mxu1 }
 0x414   : > { %v9779_v23 = vpop.f32.mrb[195].mxu1 }
 0x415   : > { %v8279_v29 = vadd.f32 %v9777_v27, %v11952_v46  ;;  %v9780_v9 = vadd.f32 %v9779_v23, %v9778_v56 }
 0x417   : > { %v8282_v5 = vadd.f32 %v9780_v9, %v11964_v0 }
 0x418   : > { %v9753_v34 = vpop.f32.mrb[220].mxu0 }
 0x419   : > { %v9781_v17 = vpop.f32.mrb[196].mxu1  ;;  %v9754_v18 = vpop.f32.mrb[221].mxu0 }
 0x41a   : > { %v9782_v35 = vpop.f32.mrb[197].mxu1  ;;  %v9755_v21 = vadd.f32 %v9754_v18, %v9753_v34  ;;  %v9756_v3 = vpop.f32.mrb[222].mxu0 }
 0x41b   : > { %v9783_v50 = vadd.f32 %v9782_v35, %v9781_v17  ;;  %v9784_v40 = vpop.f32.mrb[198].mxu1  ;;  %v9757_v51 = vpop.f32.mrb[223].mxu0 }
 0x41c   : > { %v9785_v38 = vpop.f32.mrb[199].mxu1  ;;  %v12175_v39 = vadd.f32 %v9755_v21, %v8077_v16  ;;  %v9758_v46 = vadd.f32 %v9757_v51, %v9756_v3 }
 0x41d   : > { %v8287_v44 = vadd.f32 %v9783_v50, %v11983_v48  ;;  %v9786_v0 = vadd.f32 %v9785_v38, %v9784_v40 }
 0x41e   : > { %v12178_v60 = vadd.f32 %v9758_v46, %v8080_v47 }
 0x41f   : > { %v8290_v6 = vadd.f32 %v9786_v0, %v11996_v55 }
 0x420   : > { %v9887_v12 = vpop.f32.mrb[224].mxu0 }
 0x421   : > { %v9787_v57 = vpop.f32.mrb[200].mxu1  ;;  %v9888_v30 = vpop.f32.mrb[225].mxu0 }
 0x422   : > { %v9788_v49 = vpop.f32.mrb[201].mxu1  ;;  %v9889_v15 = vadd.f32 %v9888_v30, %v9887_v12  ;;  %v9890_v13 = vpop.f32.mrb[226].mxu0 }
 0x423   : > { %v9789_v52 = vadd.f32 %v9788_v49, %v9787_v57  ;;  %v9790_v26 = vpop.f32.mrb[202].mxu1  ;;  %v9891_v62 = vpop.f32.mrb[227].mxu0 }
 0x424   : > { %v9791_v4 = vpop.f32.mrb[203].mxu1  ;;  %v9892_v14 = vadd.f32 %v9891_v62, %v9890_v13  ;;  %v12182_v48 = vadd.f32 %v9889_v15, %v8279_v29 }
 0x425   : > { %v8295_v7 = vadd.f32 %v9789_v52, %v12007_v37  ;;  %v9792_v27 = vadd.f32 %v9791_v4, %v9790_v26 }
 0x426   : > { %v12185_v23 = vadd.f32 %v9892_v14, %v8282_v5 }
 0x427   : > { %v8298_v56 = vadd.f32 %v9792_v27, %v12016_v36 }
 0x428   : > { %v9893_v55 = vpop.f32.mrb[228].mxu0 }
 0x429   : > { %v9793_v9 = vpop.f32.mrb[204].mxu1  ;;  %v9894_v34 = vpop.f32.mrb[229].mxu0 }
 0x42a   : > { %v9794_v17 = vpop.f32.mrb[205].mxu1  ;;  %v9895_v18 = vadd.f32 %v9894_v34, %v9893_v55  ;;  %v9896_v35 = vpop.f32.mrb[230].mxu0 }
 0x42b   : > { %v9795_v16 = vadd.f32 %v9794_v17, %v9793_v9  ;;  %v9796_v21 = vpop.f32.mrb[206].mxu1  ;;  %v9897_v3 = vpop.f32.mrb[231].mxu0 }
 0x42c   : > { %v9797_v50 = vpop.f32.mrb[207].mxu1  ;;  %v9898_v40 = vadd.f32 %v9897_v3, %v9896_v35  ;;  %v12188_v29 = vadd.f32 %v9895_v18, %v8287_v44 }
 0x42d   : > { %v8303_v37 = vadd.f32 %v9795_v16, %v12036_v53  ;;  %v9798_v47 = vadd.f32 %v9797_v50, %v9796_v21 }
 0x42e   : > { %v12191_v5 = vadd.f32 %v9898_v40, %v8290_v6 }
 0x42f   : > { %v8306_v36 = vadd.f32 %v9798_v47, %v12045_v20 }
 0x430   : > { %v9899_v51 = vpop.f32.mrb[232].mxu0 }
 0x431   : > { %v9799_v38 = vpop.f32.mrb[208].mxu1  ;;  %v9900_v46 = vpop.f32.mrb[233].mxu0 }
 0x432   : > { %v9800_v0 = vpop.f32.mrb[209].mxu1  ;;  %v9901_v12 = vadd.f32 %v9900_v46, %v9899_v51  ;;  %v9902_v57 = vpop.f32.mrb[234].mxu0 }
 0x433   : > { %v9801_v30 = vadd.f32 %v9800_v0, %v9799_v38  ;;  %v9802_v49 = vpop.f32.mrb[210].mxu1  ;;  %v9903_v15 = vpop.f32.mrb[235].mxu0 }
 0x434   : > { %v9803_v13 = vpop.f32.mrb[211].mxu1  ;;  %v9904_v52 = vadd.f32 %v9903_v15, %v9902_v57  ;;  %v12194_v44 = vadd.f32 %v9901_v12, %v8295_v7 }
 0x435   : > { %v8311_v53 = vadd.f32 %v9801_v30, %v12068_v2  ;;  %v9804_v26 = vadd.f32 %v9803_v13, %v9802_v49 }
 0x436   : > { %v12197_v6 = vadd.f32 %v9904_v52, %v8298_v56 }
 0x437   : > { %v8314_v20 = vadd.f32 %v9804_v26, %v12073_v19 }
 0x438   : > { %v9905_v62 = vpop.f32.mrb[236].mxu0 }
 0x439   : > { %v9805_v4 = vpop.f32.mrb[212].mxu1  ;;  %v9906_v14 = vpop.f32.mrb[237].mxu0 }
 0x43a   : > { %v9806_v27 = vpop.f32.mrb[213].mxu1  ;;  %v9907_v55 = vadd.f32 %v9906_v14, %v9905_v62  ;;  %v9908_v9 = vpop.f32.mrb[238].mxu0 }
 0x43b   : > { %v9807_v34 = vadd.f32 %v9806_v27, %v9805_v4  ;;  %v9808_v17 = vpop.f32.mrb[214].mxu1  ;;  %v9909_v18 = vpop.f32.mrb[239].mxu0 }
 0x43c   : > { %v9809_v35 = vpop.f32.mrb[215].mxu1  ;;  %v9910_v16 = vadd.f32 %v9909_v18, %v9908_v9  ;;  %v12200_v7 = vadd.f32 %v9907_v55, %v8303_v37 }
 0x43d   : > { %v8319_v2 = vadd.f32 %v9807_v34, %v12079_v45  ;;  %v9810_v21 = vadd.f32 %v9809_v35, %v9808_v17 }
 0x43e   : > { %v12203_v56 = vadd.f32 %v9910_v16, %v8306_v36 }
 0x43f   : > { %v8322_v19 = vadd.f32 %v9810_v21, %v12084_v61 }
 0x440   : > { %v9911_v3 = vpop.f32.mrb[240].mxu0 }
 0x441   : > { %v9811_v50 = vpop.f32.mrb[216].mxu1  ;;  %v9912_v40 = vpop.f32.mrb[241].mxu0 }
 0x442   : > { %v9812_v47 = vpop.f32.mrb[217].mxu1  ;;  %v9913_v51 = vadd.f32 %v9912_v40, %v9911_v3  ;;  %v9914_v38 = vpop.f32.mrb[242].mxu0 }
 0x443   : > { %v9813_v46 = vadd.f32 %v9812_v47, %v9811_v50  ;;  %v9814_v0 = vpop.f32.mrb[218].mxu1  ;;  %v9915_v12 = vpop.f32.mrb[243].mxu0 }
 0x444   : > { %v9815_v57 = vpop.f32.mrb[219].mxu1  ;;  %v9916_v30 = vadd.f32 %v9915_v12, %v9914_v38  ;;  %v12206_v37 = vadd.f32 %v9913_v51, %v8311_v53 }
 0x445   : > { %v8327_v45 = vadd.f32 %v9813_v46, %v12090_v22  ;;  %v9816_v49 = vadd.f32 %v9815_v57, %v9814_v0 }
 0x446   : > { %v12209_v36 = vadd.f32 %v9916_v30, %v8314_v20 }
 0x447   : > { %v8330_v61 = vadd.f32 %v9816_v49, %v12093_v11 }
 0x448   : > { %v9917_v15 = vpop.f32.mrb[244].mxu0 }
 0x449   : > { %v9817_v13 = vpop.f32.mrb[220].mxu1  ;;  %v9918_v52 = vpop.f32.mrb[245].mxu0 }
 0x44a   : > { %v9818_v26 = vpop.f32.mrb[221].mxu1  ;;  %v9919_v62 = vadd.f32 %v9918_v52, %v9917_v15  ;;  %v9920_v4 = vpop.f32.mrb[246].mxu0 }
 0x44b   : > { %v9819_v14 = vadd.f32 %v9818_v26, %v9817_v13  ;;  %v9820_v27 = vpop.f32.mrb[222].mxu1  ;;  %v9921_v55 = vpop.f32.mrb[247].mxu0 }
 0x44c   : > { %v9821_v9 = vpop.f32.mrb[223].mxu1  ;;  %v9922_v34 = vadd.f32 %v9921_v55, %v9920_v4  ;;  %v12212_v53 = vadd.f32 %v9919_v62, %v8319_v2 }
 0x44d   : > { %v8335_v22 = vadd.f32 %v9819_v14, %v12100_v28  ;;  %v9822_v17 = vadd.f32 %v9821_v9, %v9820_v27 }
 0x44e   : > { %v12215_v20 = vadd.f32 %v9922_v34, %v8322_v19 }
 0x44f   : > { %v8338_v11 = vadd.f32 %v9822_v17, %v12103_v31 }
 0x450   : > { %v9923_v18 = vpop.f32.mrb[248].mxu0 }
 0x451   : > { %v9823_v35 = vpop.f32.mrb[224].mxu1  ;;  %v9924_v16 = vpop.f32.mrb[249].mxu0 }
 0x452   : > { %v9824_v21 = vpop.f32.mrb[225].mxu1  ;;  %v9925_v3 = vadd.f32 %v9924_v16, %v9923_v18  ;;  %v9926_v50 = vpop.f32.mrb[250].mxu0 }
 0x453   : > { %v9825_v40 = vadd.f32 %v9824_v21, %v9823_v35  ;;  %v9826_v47 = vpop.f32.mrb[226].mxu1  ;;  %v9927_v51 = vpop.f32.mrb[251].mxu0 }
 0x454   : > { %v9827_v38 = vpop.f32.mrb[227].mxu1  ;;  %v9928_v46 = vadd.f32 %v9927_v51, %v9926_v50  ;;  %v12218_v2 = vadd.f32 %v9925_v3, %v8327_v45 }
 0x455   : > { %v8343_v28 = vadd.f32 %v9825_v40, %v12117_v42  ;;  %v9828_v0 = vadd.f32 %v9827_v38, %v9826_v47 }
 0x456   : > { %v12221_v19 = vadd.f32 %v9928_v46, %v8330_v61 }
 0x457   : > { %v8346_v31 = vadd.f32 %v9828_v0, %v12119_v25 }
 0x458   : > { %v9929_v12 = vpop.f32.mrb[252].mxu0 }
 0x459   : > { %v9829_v57 = vpop.f32.mrb[228].mxu1  ;;  %v9930_v30 = vpop.f32.mrb[253].mxu0 }
 0x45a   : > { %v9830_v49 = vpop.f32.mrb[229].mxu1  ;;  %v9931_v15 = vadd.f32 %v9930_v30, %v9929_v12  ;;  %v9932_v13 = vpop.f32.mrb[254].mxu0 }
 0x45b   : > { %v9831_v52 = vadd.f32 %v9830_v49, %v9829_v57  ;;  %v9832_v26 = vpop.f32.mrb[230].mxu1  ;;  %v9933_v62 = vpop.f32.mrb[255].mxu0 }
 0x45c   : > { %v9833_v4 = vpop.f32.mrb[231].mxu1  ;;  %v9934_v14 = vadd.f32 %v9933_v62, %v9932_v13  ;;  %v12224_v45 = vadd.f32 %v9931_v15, %v8335_v22 }
 0x45d   : > { %v8351_v42 = vadd.f32 %v9831_v52, %v12130_v1  ;;  %v9834_v27 = vadd.f32 %v9833_v4, %v9832_v26 }
 0x45e   : > { %v12227_v61 = vadd.f32 %v9934_v14, %v8338_v11 }
 0x45f   : > { %v8354_v25 = vadd.f32 %v9834_v27, %v12132_v24 }
 0x460   : > { %v9935_v55 = vpop.f32.mrb[0].mxu0 }
 0x461   : > { %v9835_v9 = vpop.f32.mrb[232].mxu1  ;;  %v9936_v34 = vpop.f32.mrb[1].mxu0 }
 0x462   : > { %v9836_v17 = vpop.f32.mrb[233].mxu1  ;;  %v9937_v18 = vadd.f32 %v9936_v34, %v9935_v55  ;;  %v9938_v35 = vpop.f32.mrb[2].mxu0 }
 0x463   : > { %v9837_v16 = vadd.f32 %v9836_v17, %v9835_v9  ;;  %v9838_v21 = vpop.f32.mrb[234].mxu1  ;;  %v9939_v3 = vpop.f32.mrb[3].mxu0 }
 0x464   : > { %v9839_v50 = vpop.f32.mrb[235].mxu1  ;;  %v9940_v40 = vadd.f32 %v9939_v3, %v9938_v35  ;;  %v12230_v22 = vadd.f32 %v9937_v18, %v8343_v28 }
 0x465   : > { %v8359_v1 = vadd.f32 %v9837_v16, %v12140_v41  ;;  %v9840_v47 = vadd.f32 %v9839_v50, %v9838_v21 }
 0x466   : > { %v12233_v11 = vadd.f32 %v9940_v40, %v8346_v31 }
 0x467   : > { %v8362_v24 = vadd.f32 %v9840_v47, %v12142_v8 }
 0x468   : > { %v9941_v51 = vpop.f32.mrb[4].mxu0 }
 0x469   : > { %v9841_v38 = vpop.f32.mrb[236].mxu1  ;;  %v9942_v46 = vpop.f32.mrb[5].mxu0 }
 0x46a   : > { %v9842_v0 = vpop.f32.mrb[237].mxu1  ;;  %v9943_v12 = vadd.f32 %v9942_v46, %v9941_v51  ;;  %v9944_v57 = vpop.f32.mrb[6].mxu0 }
 0x46b   : > { %v9843_v30 = vadd.f32 %v9842_v0, %v9841_v38  ;;  %v9844_v49 = vpop.f32.mrb[238].mxu1  ;;  %v9945_v15 = vpop.f32.mrb[7].mxu0 }
 0x46c   : > { %v9845_v13 = vpop.f32.mrb[239].mxu1  ;;  %v9946_v52 = vadd.f32 %v9945_v15, %v9944_v57  ;;  %v12236_v28 = vadd.f32 %v9943_v12, %v8351_v42 }
 0x46d   : > { %v8367_v41 = vadd.f32 %v9843_v30, %v12148_v54  ;;  %v9846_v26 = vadd.f32 %v9845_v13, %v9844_v49 }
 0x46e   : > { %v12239_v31 = vadd.f32 %v9946_v52, %v8354_v25 }
 0x46f   : > { %v8370_v8 = vadd.f32 %v9846_v26, %v12151_v59 }
 0x470   : > { %v9947_v62 = vpop.f32.mrb[8].mxu0 }
 0x471   : > { %v9847_v4 = vpop.f32.mrb[240].mxu1  ;;  %v9948_v14 = vpop.f32.mrb[9].mxu0 }
 0x472   : > { %v9848_v27 = vpop.f32.mrb[241].mxu1  ;;  %v9949_v55 = vadd.f32 %v9948_v14, %v9947_v62  ;;  %v9950_v9 = vpop.f32.mrb[10].mxu0 }
 0x473   : > { %v9849_v34 = vadd.f32 %v9848_v27, %v9847_v4  ;;  %v9850_v17 = vpop.f32.mrb[242].mxu1  ;;  %v9951_v18 = vpop.f32.mrb[11].mxu0 }
 0x474   : > { %v9851_v35 = vpop.f32.mrb[243].mxu1  ;;  %v9952_v16 = vadd.f32 %v9951_v18, %v9950_v9  ;;  %v12242_v42 = vadd.f32 %v9949_v55, %v8359_v1 }
 0x475   : > { %v8375_v54 = vadd.f32 %v9849_v34, %v12155_v10  ;;  %v9852_v21 = vadd.f32 %v9851_v35, %v9850_v17 }
 0x476   : > { %v12245_v25 = vadd.f32 %v9952_v16, %v8362_v24 }
 0x477   : > { %v8378_v59 = vadd.f32 %v9852_v21, %v12157_v43 }
 0x478   : > { %v9953_v3 = vpop.f32.mrb[12].mxu0 }
 0x479   : > { %v9853_v50 = vpop.f32.mrb[244].mxu1  ;;  %v9954_v40 = vpop.f32.mrb[13].mxu0 }
 0x47a   : > { %v9854_v47 = vpop.f32.mrb[245].mxu1  ;;  %v9955_v51 = vadd.f32 %v9954_v40, %v9953_v3  ;;  %v9956_v38 = vpop.f32.mrb[14].mxu0 }
 0x47b   : > { %v9855_v46 = vadd.f32 %v9854_v47, %v9853_v50  ;;  %v9856_v0 = vpop.f32.mrb[246].mxu1  ;;  %v9957_v12 = vpop.f32.mrb[15].mxu0 }
 0x47c   : > { %v9857_v57 = vpop.f32.mrb[247].mxu1  ;;  %v9958_v30 = vadd.f32 %v9957_v12, %v9956_v38  ;;  %v12248_v1 = vadd.f32 %v9955_v51, %v8367_v41 }
 0x47d   : > { %v8383_v10 = vadd.f32 %v9855_v46, %v12161_v58  ;;  %v9858_v49 = vadd.f32 %v9857_v57, %v9856_v0 }
 0x47e   : > { %v12251_v24 = vadd.f32 %v9958_v30, %v8370_v8 }
 0x47f   : > { %v8386_v43 = vadd.f32 %v9858_v49, %v12163_v33 }
 0x480   : > { %v9959_v15 = vpop.f32.mrb[16].mxu0 }
 0x481   : > { %v9859_v13 = vpop.f32.mrb[248].mxu1  ;;  %v9960_v52 = vpop.f32.mrb[17].mxu0 }
 0x482   : > { %v9860_v26 = vpop.f32.mrb[249].mxu1  ;;  %v9961_v62 = vadd.f32 %v9960_v52, %v9959_v15  ;;  %v9962_v4 = vpop.f32.mrb[18].mxu0 }
 0x483   : > { %v9861_v14 = vadd.f32 %v9860_v26, %v9859_v13  ;;  %v9862_v27 = vpop.f32.mrb[250].mxu1  ;;  %v9963_v55 = vpop.f32.mrb[19].mxu0 }
 0x484   : > { %v9863_v9 = vpop.f32.mrb[251].mxu1  ;;  %v9964_v34 = vadd.f32 %v9963_v55, %v9962_v4  ;;  %v12254_v41 = vadd.f32 %v9961_v62, %v8375_v54  ;;  %v10324_v62 = vld [vmem:[%s10733_s6 + $0x10] sm:$0xff] }
 0x485   : > { %v8391_v58 = vadd.f32 %v9861_v14, %v12167_v63  ;;  %v9864_v17 = vadd.f32 %v9863_v9, %v9862_v27  ;;  %v10325_v27 = vld [vmem:[%s10733_s6] sm:$0xff] }
 0x486   : > { %v12257_v8 = vadd.f32 %v9964_v34, %v8378_v59 }
 0x487   : > { %v8394_v33 = vadd.f32 %v9864_v17, %v12169_v32 }
 0x488   : > { %v9965_v18 = vpop.f32.mrb[20].mxu0 }
 0x489   : > { %v9865_v35 = vpop.f32.mrb[252].mxu1  ;;  %v9966_v16 = vpop.f32.mrb[21].mxu0 }
 0x48a   : > { %v9866_v21 = vpop.f32.mrb[253].mxu1  ;;  %v9967_v3 = vadd.f32 %v9966_v16, %v9965_v18  ;;  %v9968_v50 = vpop.f32.mrb[22].mxu0 }
 0x48b   : > { %v9867_v40 = vadd.f32 %v9866_v21, %v9865_v35  ;;  %v9868_v47 = vpop.f32.mrb[254].mxu1  ;;  %v9969_v51 = vpop.f32.mrb[23].mxu0 }
 0x48c   : > { %v9869_v38 = vpop.f32.mrb[255].mxu1  ;;  %v9970_v46 = vadd.f32 %v9969_v51, %v9968_v50  ;;  %v12260_v0 = vadd.f32 %v9967_v3, %v8383_v10  ;;  %v10328_v51 = vld [vmem:[%s10733_s6 + $0x30] sm:$0xff] }
 0x48d   : > { %v8399_v63 = vadd.f32 %v9867_v40, %v12175_v39  ;;  %v9870_v54 = vadd.f32 %v9869_v38, %v9868_v47 }
 0x48e   : > { %v12263_v59 = vadd.f32 %v9970_v46, %v8386_v43 }
 0x48f   : > { %v8402_v32 = vadd.f32 %v9870_v54, %v12178_v60 }
 0x490   : > { %v9971_v12 = vpop.f32.mrb[24].mxu0 }
 0x491   : > { %v10073_v57 = vpop.f32.mrb[0].mxu1  ;;  %v9972_v30 = vpop.f32.mrb[25].mxu0 }
 0x492   : > { %v8609_v49 = vadd.f32 %v10073_v57, %v12188_v29  ;;  %v8600_v15 = vpop.f32.mrb[1].mxu1  ;;  %v9973_v13 = vadd.f32 %v9972_v30, %v9971_v12  ;;  %v9974_v52 = vpop.f32.mrb[26].mxu0 }
 0x493   : > { %v8601_v39 = vadd.f32 %v8600_v15, %v12182_v48  ;;  %v10074_v26 = vpop.f32.mrb[2].mxu1  ;;  %v9975_v10 = vpop.f32.mrb[27].mxu0  ;;  %v10326_v48 = vld [vmem:[%s10733_s6 + $0x18] sm:$0xff] }
 0x494   : > { %v8729_v60 = vadd.f32 %v10324_v62, %v8609_v49  ;;  %v8612_v43 = vadd.f32 %v10074_v26, %v12191_v5  ;;  %v8603_v4 = vpop.f32.mrb[3].mxu1  ;;  %v9976_v14 = vadd.f32 %v9975_v10, %v9974_v52  ;;  %v12271_v9 = vadd.f32 %v9973_v13, %v8391_v58  ;;  %v10327_v5 = vld [vmem:[%s10733_s6 + $0x8] sm:$0xff]  ;;  %v10332_v62 = vld [vmem:[%s10733_s6 + $0x50] sm:$0xff] }
 0x495   : > { %v8727_v55 = vadd.f32 %v10325_v27, %v8601_v39  ;;  %v8604_v29 = vadd.f32 %v8603_v4, %v12185_v23  ;;  %v10331_v13 = vld [vmem:[%s10733_s6 + $0x28] sm:$0xff]  ;;  %v10333_v4 = vld [vmem:[%s10733_s6 + $0x40] sm:$0xff] }
 0x496   : > { %8761 = vst [vmem:[%s12275_s16 + $0x10] sm:$0xff] %v8729_v60  ;;  %v8730_v34 = vadd.f32 %v10326_v48, %v8612_v43  ;;  %v12281_v18 = vadd.f32 %v9976_v14, %v8394_v33 }
 0x497   : > { %8759 = vst [vmem:[%s12275_s16] sm:$0xff] %v8727_v55  ;;  %v8728_v17 = vadd.f32 %v10327_v5, %v8604_v29  ;;  %v10334_v55 = vld [vmem:[%s10733_s6 + $0x58] sm:$0xff]  ;;  %v10335_v29 = vld [vmem:[%s10733_s6 + $0x48] sm:$0xff] }
 0x498   : > { %8762 = vst [vmem:[%s12275_s16 + $0x18] sm:$0xff] %v8730_v34  ;;  %v9977_v23 = vpop.f32.mrb[28].mxu0 }
 0x499   : > { %8760 = vst [vmem:[%s12275_s16 + $0x8] sm:$0xff] %v8728_v17  ;;  %v10077_v58 = vpop.f32.mrb[4].mxu1  ;;  %v9978_v35 = vpop.f32.mrb[29].mxu0  ;;  %v10336_v17 = vld [vmem:[%s10733_s6 + $0x70] sm:$0xff] }
 0x49a   : > { %v8625_v16 = vadd.f32 %v10077_v58, %v12200_v7  ;;  %v8616_v21 = vpop.f32.mrb[5].mxu1  ;;  %v9979_v3 = vadd.f32 %v9978_v35, %v9977_v23  ;;  %v9980_v50 = vpop.f32.mrb[30].mxu0  ;;  %v10329_v7 = vld [vmem:[%s10733_s6 + $0x20] sm:$0xff] }
 0x49b   : > { %v8617_v40 = vadd.f32 %v8616_v21, %v12194_v44  ;;  %v10078_v47 = vpop.f32.mrb[6].mxu1  ;;  %v9981_v33 = vpop.f32.mrb[31].mxu0  ;;  %v10330_v44 = vld [vmem:[%s10733_s6 + $0x38] sm:$0xff] }
 0x49c   : > { %v8733_v38 = vadd.f32 %v10328_v51, %v8625_v16  ;;  %v8628_v46 = vadd.f32 %v10078_v47, %v12203_v56  ;;  %v8619_v54 = vpop.f32.mrb[7].mxu1  ;;  %v9982_v12 = vadd.f32 %v9981_v33, %v9980_v50  ;;  %v12291_v49 = vadd.f32 %v9979_v3, %v8399_v63  ;;  %v10337_v16 = vld [vmem:[%s10733_s6 + $0x60] sm:$0xff]  ;;  %v10338_v50 = vld [vmem:[%s10733_s6 + $0x78] sm:$0xff] }
 0x49d   : > { %v8731_v57 = vadd.f32 %v10329_v7, %v8617_v40  ;;  %v8620_v30 = vadd.f32 %v8619_v54, %v12197_v6  ;;  %v10339_v40 = vld [vmem:[%s10733_s6 + $0x68] sm:$0xff]  ;;  %v10341_v7 = vld [vmem:[%s10733_s6 + $0x80] sm:$0xff] }
 0x49e   : > { %8765 = vst [vmem:[%s12275_s16 + $0x30] sm:$0xff] %v8733_v38  ;;  %v8734_v15 = vadd.f32 %v10330_v44, %v8628_v46  ;;  %v12297_v39 = vadd.f32 %v9982_v12, %v8402_v32  ;;  %v10340_v38 = vld [vmem:[%s10733_s6 + $0x90] sm:$0xff]  ;;  %v10342_v44 = vld [vmem:[%s10733_s6 + $0x98] sm:$0xff] }
 0x49f   : > { %8763 = vst [vmem:[%s12275_s16 + $0x20] sm:$0xff] %v8731_v57  ;;  %v8732_v52 = vadd.f32 %v10331_v13, %v8620_v30 }
 0x4a0   : > { %8766 = vst [vmem:[%s12275_s16 + $0x38] sm:$0xff] %v8734_v15  ;;  %v10343_v15 = vld [vmem:[%s10733_s6 + $0x88] sm:$0xff] }
 0x4a1   : > { %8764 = vst [vmem:[%s12275_s16 + $0x28] sm:$0xff] %v8732_v52  ;;  %v10081_v56 = vpop.f32.mrb[8].mxu1 }
 0x4a2   : > { %v8641_v6 = vadd.f32 %v10081_v56, %v12212_v53  ;;  %v8632_v63 = vpop.f32.mrb[9].mxu1 }
 0x4a3   : > { %v8633_v26 = vadd.f32 %v8632_v63, %v12206_v37  ;;  %v10082_v10 = vpop.f32.mrb[10].mxu1 }
 0x4a4   : > { %v8737_v60 = vadd.f32 %v10332_v62, %v8641_v6  ;;  %v8644_v43 = vadd.f32 %v10082_v10, %v12215_v20  ;;  %v8635_v32 = vpop.f32.mrb[11].mxu1  ;;  %v10344_v6 = vld [vmem:[%s10733_s6 + $0xb0] sm:$0xff]  ;;  %v10345_v62 = vld [vmem:[%s10733_s6 + $0xa0] sm:$0xff] }
 0x4a5   : > { %v8735_v14 = vadd.f32 %v10333_v4, %v8633_v26  ;;  %v8636_v27 = vadd.f32 %v8635_v32, %v12209_v36  ;;  %v10346_v32 = vld [vmem:[%s10733_s6 + $0xb8] sm:$0xff]  ;;  %v10347_v4 = vld [vmem:[%s10733_s6 + $0xa8] sm:$0xff] }
 0x4a6   : > { %8769 = vst [vmem:[%s12275_s16 + $0x50] sm:$0xff] %v8737_v60  ;;  %v8738_v53 = vadd.f32 %v10334_v55, %v8644_v43 }
 0x4a7   : > { %8767 = vst [vmem:[%s12275_s16 + $0x40] sm:$0xff] %v8735_v14  ;;  %v8736_v37 = vadd.f32 %v10335_v29, %v8636_v27 }
 0x4a8   : > { %8770 = vst [vmem:[%s12275_s16 + $0x58] sm:$0xff] %v8738_v53  ;;  %v10348_v53 = vld [vmem:[%s10733_s6 + $0xd0] sm:$0xff] }
 0x4a9   : > { %8768 = vst [vmem:[%s12275_s16 + $0x48] sm:$0xff] %v8736_v37  ;;  %v10085_v48 = vpop.f32.mrb[12].mxu1 }
 0x4aa   : > { %v8657_v20 = vadd.f32 %v10085_v48, %v12224_v45  ;;  %v8648_v34 = vpop.f32.mrb[13].mxu1 }
 0x4ab   : > { %v8649_v36 = vadd.f32 %v8648_v34, %v12218_v2  ;;  %v10086_v5 = vpop.f32.mrb[14].mxu1 }
 0x4ac   : > { %v8741_v23 = vadd.f32 %v10336_v17, %v8657_v20  ;;  %v8660_v58 = vadd.f32 %v10086_v5, %v12227_v61  ;;  %v8651_v35 = vpop.f32.mrb[15].mxu1  ;;  %v10349_v20 = vld [vmem:[%s10733_s6 + $0xc0] sm:$0xff] }
 0x4ad   : > { %v8739_v21 = vadd.f32 %v10337_v16, %v8649_v36  ;;  %v8652_v3 = vadd.f32 %v8651_v35, %v12221_v19  ;;  %v10352_v16 = vld [vmem:[%s10733_s6 + $0xf0] sm:$0xff] }
 0x4ae   : > { %8773 = vst [vmem:[%s12275_s16 + $0x70] sm:$0xff] %v8741_v23  ;;  %v8742_v45 = vadd.f32 %v10338_v50, %v8660_v58 }
 0x4af   : > { %8771 = vst [vmem:[%s12275_s16 + $0x60] sm:$0xff] %v8739_v21  ;;  %v8740_v2 = vadd.f32 %v10339_v40, %v8652_v3 }
 0x4b0   : > { %8774 = vst [vmem:[%s12275_s16 + $0x78] sm:$0xff] %v8742_v45  ;;  %v10353_v45 = vld [vmem:[%s10733_s6 + $0xe0] sm:$0xff] }
 0x4b1   : > { %8772 = vst [vmem:[%s12275_s16 + $0x68] sm:$0xff] %v8740_v2  ;;  %v10089_v47 = vpop.f32.mrb[16].mxu1 }
 0x4b2   : > { %v8673_v61 = vadd.f32 %v10089_v47, %v12236_v28  ;;  %v8664_v33 = vpop.f32.mrb[17].mxu1 }
 0x4b3   : > { %v8665_v19 = vadd.f32 %v8664_v33, %v12230_v22  ;;  %v10090_v51 = vpop.f32.mrb[18].mxu1 }
 0x4b4   : > { %v8745_v46 = vadd.f32 %v10340_v38, %v8673_v61  ;;  %v8676_v54 = vadd.f32 %v10090_v51, %v12239_v31  ;;  %v8667_v12 = vpop.f32.mrb[19].mxu1 }
 0x4b5   : > { %v8743_v57 = vadd.f32 %v10341_v7, %v8665_v19  ;;  %v8668_v30 = vadd.f32 %v8667_v12, %v12233_v11 }
 0x4b6   : > { %8777 = vst [vmem:[%s12275_s16 + $0x90] sm:$0xff] %v8745_v46  ;;  %v8746_v28 = vadd.f32 %v10342_v44, %v8676_v54 }
 0x4b7   : > { %8775 = vst [vmem:[%s12275_s16 + $0x80] sm:$0xff] %v8743_v57  ;;  %v8744_v22 = vadd.f32 %v10343_v15, %v8668_v30 }
 0x4b8   : > { %8778 = vst [vmem:[%s12275_s16 + $0x98] sm:$0xff] %v8746_v28 }
 0x4b9   : > { %8776 = vst [vmem:[%s12275_s16 + $0x88] sm:$0xff] %v8744_v22  ;;  %v10093_v13 = vpop.f32.mrb[20].mxu1 }
 0x4ba   : > { %v8689_v31 = vadd.f32 %v10093_v13, %v12248_v1  ;;  %v8680_v52 = vpop.f32.mrb[21].mxu1 }
 0x4bb   : > { %v8681_v11 = vadd.f32 %v8680_v52, %v12242_v42  ;;  %v10094_v56 = vpop.f32.mrb[22].mxu1 }
 0x4bc   : > { %v8749_v63 = vadd.f32 %v10344_v6, %v8689_v31  ;;  %v8692_v26 = vadd.f32 %v10094_v56, %v12251_v24  ;;  %v8683_v10 = vpop.f32.mrb[23].mxu1 }
 0x4bd   : > { %v8747_v60 = vadd.f32 %v10345_v62, %v8681_v11  ;;  %v8684_v43 = vadd.f32 %v8683_v10, %v12245_v25 }
 0x4be   : > { %8781 = vst [vmem:[%s12275_s16 + $0xb0] sm:$0xff] %v8749_v63  ;;  %v8750_v1 = vadd.f32 %v10346_v32, %v8692_v26 }
 0x4bf   : > { %8779 = vst [vmem:[%s12275_s16 + $0xa0] sm:$0xff] %v8747_v60  ;;  %v8748_v42 = vadd.f32 %v10347_v4, %v8684_v43 }
 0x4c0   : > { %8782 = vst [vmem:[%s12275_s16 + $0xb8] sm:$0xff] %v8750_v1 }
 0x4c1   : > { %8780 = vst [vmem:[%s12275_s16 + $0xa8] sm:$0xff] %v8748_v42  ;;  %v10097_v14 = vpop.f32.mrb[24].mxu1 }
 0x4c2   : > { %v8705_v24 = vadd.f32 %v10097_v14, %v12260_v0  ;;  %v8696_v27 = vpop.f32.mrb[25].mxu1  ;;  %v10350_v0 = vld [vmem:[%s10733_s6 + $0xd8] sm:$0xff] }
 0x4c3   : > { %v8697_v25 = vadd.f32 %v8696_v27, %v12254_v41  ;;  %v10098_v55 = vpop.f32.mrb[26].mxu1  ;;  %v10351_v41 = vld [vmem:[%s10733_s6 + $0xc8] sm:$0xff] }
 0x4c4   : > { %v8753_v29 = vadd.f32 %v10348_v53, %v8705_v24  ;;  %v8708_v37 = vadd.f32 %v10098_v55, %v12263_v59  ;;  %v8699_v48 = vpop.f32.mrb[27].mxu1 }
 0x4c5   : > { %v8751_v34 = vadd.f32 %v10349_v20, %v8697_v25  ;;  %v8700_v36 = vadd.f32 %v8699_v48, %v12257_v8 }
 0x4c6   : > { %8785 = vst [vmem:[%s12275_s16 + $0xd0] sm:$0xff] %v8753_v29  ;;  %v8754_v5 = vadd.f32 %v10350_v0, %v8708_v37 }
 0x4c7   : > { %8783 = vst [vmem:[%s12275_s16 + $0xc0] sm:$0xff] %v8751_v34  ;;  %v8752_v17 = vadd.f32 %v10351_v41, %v8700_v36 }
 0x4c8   : > { %8786 = vst [vmem:[%s12275_s16 + $0xd8] sm:$0xff] %v8754_v5 }
 0x4c9   : > { %8784 = vst [vmem:[%s12275_s16 + $0xc8] sm:$0xff] %v8752_v17  ;;  %v10101_v59 = vpop.f32.mrb[28].mxu1 }
 0x4ca   : > { %v8721_v23 = vadd.f32 %v10101_v59, %v12291_v49  ;;  %v8712_v58 = vpop.f32.mrb[29].mxu1 }
 0x4cb   : > { %v8713_v35 = vadd.f32 %v8712_v58, %v12271_v9  ;;  %v10102_v8 = vpop.f32.mrb[30].mxu1  ;;  %v10354_v9 = vld [vmem:[%s10733_s6 + $0xf8] sm:$0xff] }
 0x4cc   : > { %v8757_v21 = vadd.f32 %v10352_v16, %v8721_v23  ;;  %v8724_v3 = vadd.f32 %v10102_v8, %v12297_v39  ;;  %v8715_v50 = vpop.f32.mrb[31].mxu1  ;;  %v10355_v39 = vld [vmem:[%s10733_s6 + $0xe8] sm:$0xff] }
 0x4cd   : > { %v8755_v40 = vadd.f32 %v10353_v45, %v8713_v35  ;;  %v8716_v49 = vadd.f32 %v8715_v50, %v12281_v18 }
 0x4ce   : > { %8789 = vst [vmem:[%s12275_s16 + $0xf0] sm:$0xff] %v8757_v21  ;;  %v8758_v2 = vadd.f32 %v10354_v9, %v8724_v3 }
 0x4cf   : > { %8787 = vst [vmem:[%s12275_s16 + $0xe0] sm:$0xff] %v8755_v40  ;;  %v8756_v47 = vadd.f32 %v10355_v39, %v8716_v49 }
 0x4d0   : > { %8790 = vst [vmem:[%s12275_s16 + $0xf8] sm:$0xff] %v8758_v2 }
 0x4d1   : > { %8788 = vst [vmem:[%s12275_s16 + $0xe8] sm:$0xff] %v8756_v47 }
 0x4d2   : > { %10455 = shalt.err (!%p10452_p2)
}
 0x4d3   : > { %s10456_s6 = scalar_lea.hbm %s12374_s22, 4096  ;;  %s10460_s30 = scalar_lea.hbm %s12429_s5, 8192 }
 0x4d4   : > { %p10457_p13 = scmp.ne.s32.totalorder %s12374_s22, %s10456_s6  ;;  %p10461_p4 = scmp.lt.u32.totalorder %s12374_s22, %s12429_s5 }
 0x4d5   : > { %p10462_p5 = scmp.lt.u32.totalorder %s10460_s30, %s10456_s6  ;;  %p10464_p11 = scmp.lt.u32.totalorder %s10456_s6, %s12374_s22 }
 0x4d6   : > { %p10458_p6 = pnand %p10457_p13, %p12468_p0 }
 0x4d7   : > { %p10463_p8 = por %p10462_p5, %p10461_p4 }
 0x4d8   : > { %p10459_p10 = pneg %p10458_p6 }
 0x4d9   : > { %p10465_p1 = por %p10464_p11, %p10463_p8 }
 0x4db   : > { %p10466_p3 = pnand %p10465_p1, %p10459_p10 }
 0x4dd   : > { %10469 = shalt.err (!%p10466_p3)
}
 0x4de   : > { %s10523_s9 = smov 128   ;;  %s10524_s13 = smov 8  }
 0x4df   : > { %10113 = dma.vmem_to_hbm [thread:$0]  (%p12468_p0), %s12376_s12, 4096, %s12374_s22, %s8792_s7, %s10523_s9, %s10523_s9, %s10524_s13  }
 0x4e0 PF: > { %s8820_s17 = sand.u32 1, %s10500_s18   ;;  %p12469_p7 = scmp.ne.s32.totalorder %s12436_s25, 0 }
 0x4e1   : > { %p12470_p9 = scmp.ge.s32.totalorder %s10512_s21, 2  ;;  %s8821_s24 = scalar_lea.sflag [#allocation7], %s8820_s17 }
 0x4e3   : > { %p10127_p12 = pnand %p12470_p9, %p12469_p7 }
 0x4e5   : > { %10495 = dma.done.wait (!%p10127_p12), %s8821_s24, 4096  }
 0x4e6   : > { %10497 = vsyncadd (!%p10127_p12), %s8821_s24, 4294963200  ;;  %p19_p2 = scmp.ge.s32.totalorder %s10665_s14, 4   ;;  %s12471_s18 = smov %s10504_s19 }
 0x4e7   : > { %s12472_s19 = smov %s10508_s20  ;;  %s12473_s20 = smov %s10681_s27 }
 0x4e8   : > { %s12474_s21 = smov %s10665_s14  ;;  %21 = sbr.rel (!%p19_p2) target bundleno = 6 (0x6), region = 99 }
 0x4ef   :  { %8826 = vsyncpa [#allocation6], 1 }
 0x4f0   :  { %8828 = vsyncpa [#allocation6 + $0x1], 1 }
 0x4f1   :  { %8829 = vsyncpa [#allocation9], 1 }
 0x4f2   :  { %8830 = vsyncpa [#allocation7], 1 }
 0x4f3   :  { %8832 = vsyncpa [#allocation7 + $0x1], 1 }

</bundles_post_ra>
